<compile_context>
chip_gen: v7x
topology: tpu7x:2x2x1
jax: 0.10.0
libtpu: 0.0.40
codegen_flags: <defaults>
</compile_context>

<pallas_src>
import jax
import jax.numpy as jnp
from jax.experimental import pallas as pl
from jax.experimental.pallas import tpu as pltpu

DIMIN = 28 * 28          # 784
NUM_FEATURES = 10        # latent size ("num_features" in AE.__init__)

LANE = 128
SUBLANE_BF16 = 16        # bf16 packs 16 rows per sublane group


def _round_up(x, m):
    return (x + m - 1) // m * m


DIN_P = _round_up(DIMIN, LANE)         # 896
LAT_P = _round_up(NUM_FEATURES, LANE)  # 128


def _ae_kernel(x_ref,
               w1, b1, w2, b2, w3, b3, w4, b4,
               wd4, bd4, wd3, bd3, wd2, bd2, wd1, bd1,
               ae_ref, de_ref):
    """Fused AE.forward (pretrainMode=True): 4 encoder + 4 decoder linears.

    Weights are bf16, activations cast to bf16 at each matmul, accumulation in
    f32 on the MXU; bias-add and ReLU are done in f32.
    """
    def lin(h, w_ref, b_ref, relu):
        y = jnp.dot(h.astype(jnp.bfloat16), w_ref[...],
                    preferred_element_type=jnp.float32) + b_ref[...]
        return jnp.maximum(y, 0.0) if relu else y

    x = x_ref[...]                      # (TB, 896) bf16, cast in wrapper
    # encoder
    h = lin(x, w1, b1, relu=True)       # (TB, 512)  f32
    h = lin(h, w2, b2, relu=True)       # (TB, 512)
    h = lin(h, w3, b3, relu=True)       # (TB, 2048)
    z = lin(h, w4, b4, relu=False)      # (TB, 128)  -> x_ae (padded)
    ae_ref[...] = z
    # decoder
    d = lin(z, wd4, bd4, relu=True)     # (TB, 2048)
    d = lin(d, wd3, bd3, relu=True)     # (TB, 512)
    d = lin(d, wd2, bd2, relu=True)     # (TB, 512)
    de_ref[...] = lin(d, wd1, bd1, relu=False)   # (TB, 896) -> x_de (padded)


def _pad2(a, rows, cols):
    return jnp.pad(a, ((0, rows - a.shape[0]), (0, cols - a.shape[1])))


def _pick_tb(B):
    """Batch tile: bf16-packed, MXU friendly, >=2 grid steps when worthwhile."""
    if B <= 32:
        return _round_up(B, SUBLANE_BF16)        # single step, no tiling waste
    if B >= 1024:
        return 512                                # amortize per-step overhead
    # medium batches: split into (at least) two balanced steps so both v7x
    # TensorCores participate via dimension_semantics=("parallel",)
    return min(512, _round_up(pl.cdiv(B, 2), SUBLANE_BF16))


def ae_forward(x_nchw, params):
    """AE.forward(x) with pretrainMode=True. Returns (x_ae, x_de)."""
    B = x_nchw.shape[0]
    x = x_nchw.reshape(B, DIMIN).astype(jnp.bfloat16)

    TB = _pick_tb(B)
    B_pad = _round_up(B, TB)
    x_p = jnp.pad(x, ((0, B_pad - B), (0, DIN_P - DIMIN)))

    # Zero-pad every weight/bias to lane multiples (exactness preserved);
    # weights go to bf16, biases stay f32.
    flat_params = []
    for (w, b) in params:
        rp = _round_up(w.shape[0], LANE)
        cp = _round_up(w.shape[1], LANE)
        flat_params.append(_pad2(w, rp, cp).astype(jnp.bfloat16))
        flat_params.append(_pad2(b, 1, cp).astype(jnp.float32))

    grid = (B_pad // TB,)

    def tile_spec(feat):
        return pl.BlockSpec((TB, feat), lambda i: (i, 0))

    def resident_spec(shape):
        # Same block every grid step -> fetched once, stays VMEM-resident.
        return pl.BlockSpec(shape, lambda i: tuple(0 for _ in shape))

    in_specs = [tile_spec(DIN_P)] + [resident_spec(p.shape) for p in flat_params]
    out_shapes = (
        jax.ShapeDtypeStruct((B_pad, LAT_P), jnp.float32),
        jax.ShapeDtypeStruct((B_pad, DIN_P), jnp.float32),
    )
    out_specs = (
        tile_spec(LAT_P),
        tile_spec(DIN_P),
    )

    # Advisory cost estimate so XLA schedules the wrapper ops around the call.
    weights = flat_params[0::2]
    flops = 2 * B_pad * sum(w.shape[0] * w.shape[1] for w in weights)
    bytes_accessed = (
        x_p.size * x_p.dtype.itemsize
        + sum(p.size * p.dtype.itemsize for p in flat_params)
        + B_pad * (LAT_P + DIN_P) * 4
    )
    cost = pl.CostEstimate(flops=flops, transcendentals=0,
                           bytes_accessed=bytes_accessed)

    ae_p, de_p = pl.pallas_call(
        _ae_kernel,
        grid=grid,
        out_shape=out_shapes,
        in_specs=in_specs,
        out_specs=out_specs,
        compiler_params=pltpu.CompilerParams(
            dimension_semantics=("parallel",),        # megacore / 2-TC sharding
            vmem_limit_bytes=56 * 1024 * 1024,        # below v7x 64 MiB physical
        ),
        cost_estimate=cost,
    )(x_p, *flat_params)

    x_ae = ae_p[:B, :NUM_FEATURES]
    x_de = de_p[:B, :DIMIN].reshape(B, 1, 28, 28)
    return x_ae, x_de


def init_params(key, num_features=NUM_FEATURES, dimin=DIMIN):
    """Deterministic xavier-uniform weights (PyTorch (out,in) -> stored (in,out))."""
    layer_dims = [
        (dimin, 500),           # fc1
        (500, 500),             # fc2
        (500, 2000),            # fc3
        (2000, num_features),   # fc4
        (num_features, 2000),   # fc_d4
        (2000, 500),            # fc_d3
        (500, 500),             # fc_d2
        (500, dimin),           # fc_d1
    ]
    params = []
    for (fan_in, fan_out) in layer_dims:
        key, kw, kb = jax.random.split(key, 3)
        bound_w = (6.0 / (fan_in + fan_out)) ** 0.5           # xavier_uniform
        w_pt = jax.random.uniform(kw, (fan_out, fan_in), jnp.float32,
                                  minval=-bound_w, maxval=bound_w)
        w = jnp.transpose(w_pt)                               # (in, out)
        bound_b = 1.0 / (fan_in ** 0.5)                       # torch Linear bias init
        b = jax.random.uniform(kb, (1, fan_out), jnp.float32,
                               minval=-bound_b, maxval=bound_b)
        params.append((w, b))
    return params


def ae_forward_ref(x_nchw, params):
    """Pure-JAX f32 reference of AE.forward for correctness check."""
    B = x_nchw.shape[0]
    h = x_nchw.reshape(B, DIMIN).astype(jnp.float32)
    (w1, b1), (w2, b2), (w3, b3), (w4, b4), \
        (wd4, bd4), (wd3, bd3), (wd2, bd2), (wd1, bd1) = params
    h = jnp.maximum(h @ w1 + b1, 0.0)
    h = jnp.maximum(h @ w2 + b2, 0.0)
    h = jnp.maximum(h @ w3 + b3, 0.0)
    z = h @ w4 + b4
    d = jnp.maximum(z @ wd4 + bd4, 0.0)
    d = jnp.maximum(d @ wd3 + bd3, 0.0)
    d = jnp.maximum(d @ wd2 + bd2, 0.0)
    d = d @ wd1 + bd1
    return z, d.reshape(B, 1, 28, 28)


if __name__ == "__main__":
    key = jax.random.PRNGKey(0)
    key, kx = jax.random.split(key)
    B = 2
    x = jax.random.normal(kx, (B, 1, 28, 28), dtype=jnp.float32)

    params = init_params(key)

    x_ae, x_de = ae_forward(x, params)
    jax.block_until_ready((x_ae, x_de))

    # sanity check vs pure-JAX f32 reference (kernel uses bf16 MXU inputs with
    # f32 accumulation -> expect ~1% drift through 8 chained layers)
    ref_ae, ref_de = ae_forward_ref(x, params)
    assert x_ae.shape == (B, NUM_FEATURES)
    assert x_de.shape == (B, 1, 28, 28)
    assert jnp.allclose(x_ae, ref_ae, atol=5e-2, rtol=5e-2)
    assert jnp.allclose(x_de, ref_de, atol=5e-2, rtol=5e-2)

    print("KERNEL_OK")
</pallas_src>

<mosaic_0001>
module attributes {stable_mosaic.version = 11 : i64} {
  func.func @_ae_kernel(%arg0: i32, %arg1: memref<16x896xbf16, #tpu.memory_space<vmem>>, %arg2: memref<896x512xbf16, #tpu.memory_space<vmem>>, %arg3: memref<1x512xf32, #tpu.memory_space<vmem>>, %arg4: memref<512x512xbf16, #tpu.memory_space<vmem>>, %arg5: memref<1x512xf32, #tpu.memory_space<vmem>>, %arg6: memref<512x2048xbf16, #tpu.memory_space<vmem>>, %arg7: memref<1x2048xf32, #tpu.memory_space<vmem>>, %arg8: memref<2048x128xbf16, #tpu.memory_space<vmem>>, %arg9: memref<1x128xf32, #tpu.memory_space<vmem>>, %arg10: memref<128x2048xbf16, #tpu.memory_space<vmem>>, %arg11: memref<1x2048xf32, #tpu.memory_space<vmem>>, %arg12: memref<2048x512xbf16, #tpu.memory_space<vmem>>, %arg13: memref<1x512xf32, #tpu.memory_space<vmem>>, %arg14: memref<512x512xbf16, #tpu.memory_space<vmem>>, %arg15: memref<1x512xf32, #tpu.memory_space<vmem>>, %arg16: memref<512x896xbf16, #tpu.memory_space<vmem>>, %arg17: memref<1x896xf32, #tpu.memory_space<vmem>>, %arg18: memref<16x128xf32, #tpu.memory_space<vmem>>, %arg19: memref<16x896xf32, #tpu.memory_space<vmem>>) attributes {dimension_semantics = [#tpu.dimension_semantics<parallel>], iteration_bounds = array<i64: 1>, scalar_prefetch = 0 : i64, scratch_operands = 0 : i64, tpu.core_type = #tpu.core_type<tc>, window_params = [{transform_indices = @transform_0, window_bounds = array<i64: 16, 896>}, {pipeline_mode = #tpu.pipeline_mode<synchronous>, transform_indices = @transform_1, window_bounds = array<i64: 896, 512>}, {pipeline_mode = #tpu.pipeline_mode<synchronous>, transform_indices = @transform_2, window_bounds = array<i64: 1, 512>}, {pipeline_mode = #tpu.pipeline_mode<synchronous>, transform_indices = @transform_3, window_bounds = array<i64: 512, 512>}, {pipeline_mode = #tpu.pipeline_mode<synchronous>, transform_indices = @transform_4, window_bounds = array<i64: 1, 512>}, {pipeline_mode = #tpu.pipeline_mode<synchronous>, transform_indices = @transform_5, window_bounds = array<i64: 512, 2048>}, {pipeline_mode = #tpu.pipeline_mode<synchronous>, transform_indices = @transform_6, window_bounds = array<i64: 1, 2048>}, {pipeline_mode = #tpu.pipeline_mode<synchronous>, transform_indices = @transform_7, window_bounds = array<i64: 2048, 128>}, {pipeline_mode = #tpu.pipeline_mode<synchronous>, transform_indices = @transform_8, window_bounds = array<i64: 1, 128>}, {pipeline_mode = #tpu.pipeline_mode<synchronous>, transform_indices = @transform_9, window_bounds = array<i64: 128, 2048>}, {pipeline_mode = #tpu.pipeline_mode<synchronous>, transform_indices = @transform_10, window_bounds = array<i64: 1, 2048>}, {pipeline_mode = #tpu.pipeline_mode<synchronous>, transform_indices = @transform_11, window_bounds = array<i64: 2048, 512>}, {pipeline_mode = #tpu.pipeline_mode<synchronous>, transform_indices = @transform_12, window_bounds = array<i64: 1, 512>}, {pipeline_mode = #tpu.pipeline_mode<synchronous>, transform_indices = @transform_13, window_bounds = array<i64: 512, 512>}, {pipeline_mode = #tpu.pipeline_mode<synchronous>, transform_indices = @transform_14, window_bounds = array<i64: 1, 512>}, {pipeline_mode = #tpu.pipeline_mode<synchronous>, transform_indices = @transform_15, window_bounds = array<i64: 512, 896>}, {pipeline_mode = #tpu.pipeline_mode<synchronous>, transform_indices = @transform_16, window_bounds = array<i64: 1, 896>}, {transform_indices = @transform_17, window_bounds = array<i64: 16, 128>}, {transform_indices = @transform_18, window_bounds = array<i64: 16, 896>}]} {
    %c0 = arith.constant 0 : index
    %c0_0 = arith.constant 0 : index
    %0 = vector.load %arg1[%c0, %c0_0] : memref<16x896xbf16, #tpu.memory_space<vmem>>, vector<16x896xbf16>
    %c0_1 = arith.constant 0 : index
    %c0_2 = arith.constant 0 : index
    %1 = vector.load %arg2[%c0_1, %c0_2] : memref<896x512xbf16, #tpu.memory_space<vmem>>, vector<896x512xbf16>
    %cst = arith.constant dense<0.000000e+00> : vector<16x512xf32>
    %2 = tpu.matmul %0, %1, %cst {dimension_numbers = #tpu.dot_dimension_numbers<[1], [0], [0], [1], [0, 0, 1, 1], [], []>} : vector<16x896xbf16>, vector<896x512xbf16>, vector<16x512xf32> -> vector<16x512xf32>
    %c0_3 = arith.constant 0 : index
    %c0_4 = arith.constant 0 : index
    %3 = vector.load %arg3[%c0_3, %c0_4] : memref<1x512xf32, #tpu.memory_space<vmem>>, vector<1x512xf32>
    %4 = vector.broadcast %3 : vector<1x512xf32> to vector<16x512xf32>
    %5 = arith.addf %2, %4 : vector<16x512xf32>
    %cst_5 = arith.constant 0.000000e+00 : f32
    %6 = vector.broadcast %cst_5 : f32 to vector<16x512xf32>
    %7 = arith.maximumf %5, %6 : vector<16x512xf32>
    %8 = arith.truncf %7 : vector<16x512xf32> to vector<16x512xbf16>
    %c0_6 = arith.constant 0 : index
    %c0_7 = arith.constant 0 : index
    %9 = vector.load %arg4[%c0_6, %c0_7] : memref<512x512xbf16, #tpu.memory_space<vmem>>, vector<512x512xbf16>
    %cst_8 = arith.constant dense<0.000000e+00> : vector<16x512xf32>
    %10 = tpu.matmul %8, %9, %cst_8 {dimension_numbers = #tpu.dot_dimension_numbers<[1], [0], [0], [1], [0, 0, 1, 1], [], []>} : vector<16x512xbf16>, vector<512x512xbf16>, vector<16x512xf32> -> vector<16x512xf32>
    %c0_9 = arith.constant 0 : index
    %c0_10 = arith.constant 0 : index
    %11 = vector.load %arg5[%c0_9, %c0_10] : memref<1x512xf32, #tpu.memory_space<vmem>>, vector<1x512xf32>
    %12 = vector.broadcast %11 : vector<1x512xf32> to vector<16x512xf32>
    %13 = arith.addf %10, %12 : vector<16x512xf32>
    %cst_11 = arith.constant 0.000000e+00 : f32
    %14 = vector.broadcast %cst_11 : f32 to vector<16x512xf32>
    %15 = arith.maximumf %13, %14 : vector<16x512xf32>
    %16 = arith.truncf %15 : vector<16x512xf32> to vector<16x512xbf16>
    %c0_12 = arith.constant 0 : index
    %c0_13 = arith.constant 0 : index
    %17 = vector.load %arg6[%c0_12, %c0_13] : memref<512x2048xbf16, #tpu.memory_space<vmem>>, vector<512x2048xbf16>
    %cst_14 = arith.constant dense<0.000000e+00> : vector<16x2048xf32>
    %18 = tpu.matmul %16, %17, %cst_14 {dimension_numbers = #tpu.dot_dimension_numbers<[1], [0], [0], [1], [0, 0, 1, 1], [], []>} : vector<16x512xbf16>, vector<512x2048xbf16>, vector<16x2048xf32> -> vector<16x2048xf32>
    %c0_15 = arith.constant 0 : index
    %c0_16 = arith.constant 0 : index
    %19 = vector.load %arg7[%c0_15, %c0_16] : memref<1x2048xf32, #tpu.memory_space<vmem>>, vector<1x2048xf32>
    %20 = vector.broadcast %19 : vector<1x2048xf32> to vector<16x2048xf32>
    %21 = arith.addf %18, %20 : vector<16x2048xf32>
    %cst_17 = arith.constant 0.000000e+00 : f32
    %22 = vector.broadcast %cst_17 : f32 to vector<16x2048xf32>
    %23 = arith.maximumf %21, %22 : vector<16x2048xf32>
    %24 = arith.truncf %23 : vector<16x2048xf32> to vector<16x2048xbf16>
    %c0_18 = arith.constant 0 : index
    %c0_19 = arith.constant 0 : index
    %25 = vector.load %arg8[%c0_18, %c0_19] : memref<2048x128xbf16, #tpu.memory_space<vmem>>, vector<2048x128xbf16>
    %cst_20 = arith.constant dense<0.000000e+00> : vector<16x128xf32>
    %26 = tpu.matmul %24, %25, %cst_20 {dimension_numbers = #tpu.dot_dimension_numbers<[1], [0], [0], [1], [0, 0, 1, 1], [], []>} : vector<16x2048xbf16>, vector<2048x128xbf16>, vector<16x128xf32> -> vector<16x128xf32>
    %c0_21 = arith.constant 0 : index
    %c0_22 = arith.constant 0 : index
    %27 = vector.load %arg9[%c0_21, %c0_22] : memref<1x128xf32, #tpu.memory_space<vmem>>, vector<1x128xf32>
    %28 = vector.broadcast %27 : vector<1x128xf32> to vector<16x128xf32>
    %29 = arith.addf %26, %28 : vector<16x128xf32>
    %c0_23 = arith.constant 0 : index
    %c0_24 = arith.constant 0 : index
    %30 = vector.load %arg18[%c0_23, %c0_24] : memref<16x128xf32, #tpu.memory_space<vmem>>, vector<16x128xf32>
    tpu.vector_store %arg18[%c0_23, %c0_24], %29 {strides = array<i32>} : memref<16x128xf32, #tpu.memory_space<vmem>>, vector<16x128xf32>,
    %31 = arith.truncf %29 : vector<16x128xf32> to vector<16x128xbf16>
    %c0_25 = arith.constant 0 : index
    %c0_26 = arith.constant 0 : index
    %32 = vector.load %arg10[%c0_25, %c0_26] : memref<128x2048xbf16, #tpu.memory_space<vmem>>, vector<128x2048xbf16>
    %cst_27 = arith.constant dense<0.000000e+00> : vector<16x2048xf32>
    %33 = tpu.matmul %31, %32, %cst_27 {dimension_numbers = #tpu.dot_dimension_numbers<[1], [0], [0], [1], [0, 0, 1, 1], [], []>} : vector<16x128xbf16>, vector<128x2048xbf16>, vector<16x2048xf32> -> vector<16x2048xf32>
    %c0_28 = arith.constant 0 : index
    %c0_29 = arith.constant 0 : index
    %34 = vector.load %arg11[%c0_28, %c0_29] : memref<1x2048xf32, #tpu.memory_space<vmem>>, vector<1x2048xf32>
    %35 = vector.broadcast %34 : vector<1x2048xf32> to vector<16x2048xf32>
    %36 = arith.addf %33, %35 : vector<16x2048xf32>
    %cst_30 = arith.constant 0.000000e+00 : f32
    %37 = vector.broadcast %cst_30 : f32 to vector<16x2048xf32>
    %38 = arith.maximumf %36, %37 : vector<16x2048xf32>
    %39 = arith.truncf %38 : vector<16x2048xf32> to vector<16x2048xbf16>
    %c0_31 = arith.constant 0 : index
    %c0_32 = arith.constant 0 : index
    %40 = vector.load %arg12[%c0_31, %c0_32] : memref<2048x512xbf16, #tpu.memory_space<vmem>>, vector<2048x512xbf16>
    %cst_33 = arith.constant dense<0.000000e+00> : vector<16x512xf32>
    %41 = tpu.matmul %39, %40, %cst_33 {dimension_numbers = #tpu.dot_dimension_numbers<[1], [0], [0], [1], [0, 0, 1, 1], [], []>} : vector<16x2048xbf16>, vector<2048x512xbf16>, vector<16x512xf32> -> vector<16x512xf32>
    %c0_34 = arith.constant 0 : index
    %c0_35 = arith.constant 0 : index
    %42 = vector.load %arg13[%c0_34, %c0_35] : memref<1x512xf32, #tpu.memory_space<vmem>>, vector<1x512xf32>
    %43 = vector.broadcast %42 : vector<1x512xf32> to vector<16x512xf32>
    %44 = arith.addf %41, %43 : vector<16x512xf32>
    %cst_36 = arith.constant 0.000000e+00 : f32
    %45 = vector.broadcast %cst_36 : f32 to vector<16x512xf32>
    %46 = arith.maximumf %44, %45 : vector<16x512xf32>
    %47 = arith.truncf %46 : vector<16x512xf32> to vector<16x512xbf16>
    %c0_37 = arith.constant 0 : index
    %c0_38 = arith.constant 0 : index
    %48 = vector.load %arg14[%c0_37, %c0_38] : memref<512x512xbf16, #tpu.memory_space<vmem>>, vector<512x512xbf16>
    %cst_39 = arith.constant dense<0.000000e+00> : vector<16x512xf32>
    %49 = tpu.matmul %47, %48, %cst_39 {dimension_numbers = #tpu.dot_dimension_numbers<[1], [0], [0], [1], [0, 0, 1, 1], [], []>} : vector<16x512xbf16>, vector<512x512xbf16>, vector<16x512xf32> -> vector<16x512xf32>
    %c0_40 = arith.constant 0 : index
    %c0_41 = arith.constant 0 : index
    %50 = vector.load %arg15[%c0_40, %c0_41] : memref<1x512xf32, #tpu.memory_space<vmem>>, vector<1x512xf32>
    %51 = vector.broadcast %50 : vector<1x512xf32> to vector<16x512xf32>
    %52 = arith.addf %49, %51 : vector<16x512xf32>
    %cst_42 = arith.constant 0.000000e+00 : f32
    %53 = vector.broadcast %cst_42 : f32 to vector<16x512xf32>
    %54 = arith.maximumf %52, %53 : vector<16x512xf32>
    %55 = arith.truncf %54 : vector<16x512xf32> to vector<16x512xbf16>
    %c0_43 = arith.constant 0 : index
    %c0_44 = arith.constant 0 : index
    %56 = vector.load %arg16[%c0_43, %c0_44] : memref<512x896xbf16, #tpu.memory_space<vmem>>, vector<512x896xbf16>
    %cst_45 = arith.constant dense<0.000000e+00> : vector<16x896xf32>
    %57 = tpu.matmul %55, %56, %cst_45 {dimension_numbers = #tpu.dot_dimension_numbers<[1], [0], [0], [1], [0, 0, 1, 1], [], []>} : vector<16x512xbf16>, vector<512x896xbf16>, vector<16x896xf32> -> vector<16x896xf32>
    %c0_46 = arith.constant 0 : index
    %c0_47 = arith.constant 0 : index
    %58 = vector.load %arg17[%c0_46, %c0_47] : memref<1x896xf32, #tpu.memory_space<vmem>>, vector<1x896xf32>
    %59 = vector.broadcast %58 : vector<1x896xf32> to vector<16x896xf32>
    %60 = arith.addf %57, %59 : vector<16x896xf32>
    %c0_48 = arith.constant 0 : index
    %c0_49 = arith.constant 0 : index
    %61 = vector.load %arg19[%c0_48, %c0_49] : memref<16x896xf32, #tpu.memory_space<vmem>>, vector<16x896xf32>
    tpu.vector_store %arg19[%c0_48, %c0_49], %60 {strides = array<i32>} : memref<16x896xf32, #tpu.memory_space<vmem>>, vector<16x896xf32>,
    return
  }
  func.func @transform_0(%arg0: i32) -> (i32, i32) {
    %c0_i32 = arith.constant 0 : i32
    %c0_i32_0 = arith.constant 0 : i32
    return %arg0, %c0_i32 : i32, i32
  }
  func.func @transform_1(%arg0: i32) -> (i32, i32) {
    %c0_i32 = arith.constant 0 : i32
    %c0_i32_0 = arith.constant 0 : i32
    %c0_i32_1 = arith.constant 0 : i32
    return %c0_i32, %c0_i32_0 : i32, i32
  }
  func.func @transform_2(%arg0: i32) -> (i32, i32) {
    %c0_i32 = arith.constant 0 : i32
    %c0_i32_0 = arith.constant 0 : i32
    %c0_i32_1 = arith.constant 0 : i32
    return %c0_i32, %c0_i32_0 : i32, i32
  }
  func.func @transform_3(%arg0: i32) -> (i32, i32) {
    %c0_i32 = arith.constant 0 : i32
    %c0_i32_0 = arith.constant 0 : i32
    %c0_i32_1 = arith.constant 0 : i32
    return %c0_i32, %c0_i32_0 : i32, i32
  }
  func.func @transform_4(%arg0: i32) -> (i32, i32) {
    %c0_i32 = arith.constant 0 : i32
    %c0_i32_0 = arith.constant 0 : i32
    %c0_i32_1 = arith.constant 0 : i32
    return %c0_i32, %c0_i32_0 : i32, i32
  }
  func.func @transform_5(%arg0: i32) -> (i32, i32) {
    %c0_i32 = arith.constant 0 : i32
    %c0_i32_0 = arith.constant 0 : i32
    %c0_i32_1 = arith.constant 0 : i32
    return %c0_i32, %c0_i32_0 : i32, i32
  }
  func.func @transform_6(%arg0: i32) -> (i32, i32) {
    %c0_i32 = arith.constant 0 : i32
    %c0_i32_0 = arith.constant 0 : i32
    %c0_i32_1 = arith.constant 0 : i32
    return %c0_i32, %c0_i32_0 : i32, i32
  }
  func.func @transform_7(%arg0: i32) -> (i32, i32) {
    %c0_i32 = arith.constant 0 : i32
    %c0_i32_0 = arith.constant 0 : i32
    %c0_i32_1 = arith.constant 0 : i32
    return %c0_i32, %c0_i32_0 : i32, i32
  }
  func.func @transform_8(%arg0: i32) -> (i32, i32) {
    %c0_i32 = arith.constant 0 : i32
    %c0_i32_0 = arith.constant 0 : i32
    %c0_i32_1 = arith.constant 0 : i32
    return %c0_i32, %c0_i32_0 : i32, i32
  }
  func.func @transform_9(%arg0: i32) -> (i32, i32) {
    %c0_i32 = arith.constant 0 : i32
    %c0_i32_0 = arith.constant 0 : i32
    %c0_i32_1 = arith.constant 0 : i32
    return %c0_i32, %c0_i32_0 : i32, i32
  }
  func.func @transform_10(%arg0: i32) -> (i32, i32) {
    %c0_i32 = arith.constant 0 : i32
    %c0_i32_0 = arith.constant 0 : i32
    %c0_i32_1 = arith.constant 0 : i32
    return %c0_i32, %c0_i32_0 : i32, i32
  }
  func.func @transform_11(%arg0: i32) -> (i32, i32) {
    %c0_i32 = arith.constant 0 : i32
    %c0_i32_0 = arith.constant 0 : i32
    %c0_i32_1 = arith.constant 0 : i32
    return %c0_i32, %c0_i32_0 : i32, i32
  }
  func.func @transform_12(%arg0: i32) -> (i32, i32) {
    %c0_i32 = arith.constant 0 : i32
    %c0_i32_0 = arith.constant 0 : i32
    %c0_i32_1 = arith.constant 0 : i32
    return %c0_i32, %c0_i32_0 : i32, i32
  }
  func.func @transform_13(%arg0: i32) -> (i32, i32) {
    %c0_i32 = arith.constant 0 : i32
    %c0_i32_0 = arith.constant 0 : i32
    %c0_i32_1 = arith.constant 0 : i32
    return %c0_i32, %c0_i32_0 : i32, i32
  }
  func.func @transform_14(%arg0: i32) -> (i32, i32) {
    %c0_i32 = arith.constant 0 : i32
    %c0_i32_0 = arith.constant 0 : i32
    %c0_i32_1 = arith.constant 0 : i32
    return %c0_i32, %c0_i32_0 : i32, i32
  }
  func.func @transform_15(%arg0: i32) -> (i32, i32) {
    %c0_i32 = arith.constant 0 : i32
    %c0_i32_0 = arith.constant 0 : i32
    %c0_i32_1 = arith.constant 0 : i32
    return %c0_i32, %c0_i32_0 : i32, i32
  }
  func.func @transform_16(%arg0: i32) -> (i32, i32) {
    %c0_i32 = arith.constant 0 : i32
    %c0_i32_0 = arith.constant 0 : i32
    %c0_i32_1 = arith.constant 0 : i32
    return %c0_i32, %c0_i32_0 : i32, i32
  }
  func.func @transform_17(%arg0: i32) -> (i32, i32) {
    %c0_i32 = arith.constant 0 : i32
    %c0_i32_0 = arith.constant 0 : i32
    return %arg0, %c0_i32 : i32, i32
  }
  func.func @transform_18(%arg0: i32) -> (i32, i32) {
    %c0_i32 = arith.constant 0 : i32
    %c0_i32_0 = arith.constant 0 : i32
    return %arg0, %c0_i32 : i32, i32
  }
}

</mosaic_0001>

<bundles_post_ra>
// kernel: tpu_custom_call.1
= control target key start
LH: loop header
LB: loop body
LE: loop exit
PB: predicated region body
PF: predicated region fallthrough
CT: control target
= control target key end

     0   :  { %s21676_s0 = inlined_call_operand.hbm [shape: bf16[16,896], index: 0, kind: input, shape index: {}]   ;;  %s21677_s1 = inlined_call_operand.hbm [shape: bf16[896,512], index: 1, kind: input, shape index: {}]   ;;  %s21678_s2 = inlined_call_operand.hbm [shape: f32[1,512], index: 2, kind: input, shape index: {}]   ;;  %s21679_s3 = inlined_call_operand.hbm [shape: bf16[512,512], index: 3, kind: input, shape index: {}]   ;;  %s21680_s4 = inlined_call_operand.hbm [shape: f32[1,512], index: 4, kind: input, shape index: {}]   ;;  %s21681_s5 = inlined_call_operand.hbm [shape: bf16[512,2048], index: 5, kind: input, shape index: {}]   ;;  %s21682_s6 = inlined_call_operand.hbm [shape: f32[1,2048], index: 6, kind: input, shape index: {}]   ;;  %s21683_s7 = inlined_call_operand.hbm [shape: bf16[2048,128], index: 7, kind: input, shape index: {}]   ;;  %s21684_s8 = inlined_call_operand.hbm [shape: f32[1,128], index: 8, kind: input, shape index: {}]   ;;  %s21685_s9 = inlined_call_operand.hbm [shape: bf16[128,2048], index: 9, kind: input, shape index: {}]   ;;  %s21686_s10 = inlined_call_operand.hbm [shape: f32[1,2048], index: 10, kind: input, shape index: {}]   ;;  %s21687_s11 = inlined_call_operand.hbm [shape: bf16[2048,512], index: 11, kind: input, shape index: {}]   ;;  %s21688_s12 = inlined_call_operand.hbm [shape: f32[1,512], index: 12, kind: input, shape index: {}]   ;;  %s21689_s13 = inlined_call_operand.hbm [shape: bf16[512,512], index: 13, kind: input, shape index: {}]   ;;  %s21690_s14 = inlined_call_operand.hbm [shape: f32[1,512], index: 14, kind: input, shape index: {}]   ;;  %s21691_s15 = inlined_call_operand.hbm [shape: bf16[512,896], index: 15, kind: input, shape index: {}]   ;;  %s21692_s16 = inlined_call_operand.hbm [shape: f32[1,896], index: 16, kind: input, shape index: {}]   ;;  %s21693_s17 = inlined_call_operand.hbm [shape: f32[16,128], index: 17, kind: output, shape index: {0}]   ;;  %s21694_s18 = inlined_call_operand.hbm [shape: f32[16,896], index: 18, kind: output, shape index: {1}]  }
   0x1   :  { %21700 = sst [smem:[#allocation43_spill]] %s21676_s0 }
   0x2   :  { %21701 = sst [smem:[#allocation44_spill]] %s21677_s1 }
   0x3   :  { %21702 = sst [smem:[#allocation45_spill]] %s21678_s2 }
   0x4   :  { %21703 = sst [smem:[#allocation46_spill]] %s21693_s17 }
   0x5   :  { %21704 = sst [smem:[#allocation47_spill]] %s21694_s18 }
   0x6   :  { %24 = vsyncpa [#allocation3], 0 }
   0x7   :  { %25 = vsyncpa [#allocation6], 0 }
   0x8   :  { %26 = vsyncpa [#allocation9], 0 }
   0x9   :  { %27 = vsyncpa [#allocation12], 0 }
   0xa   :  { %28 = vsyncpa [#allocation15], 0 }
   0xb   :  { %29 = vsyncpa [#allocation18], 0 }
   0xc   :  { %30 = vsyncpa [#allocation21], 0 }
   0xd   :  { %31 = vsyncpa [#allocation24], 0 }
   0xe   :  { %32 = vsyncpa [#allocation27], 0 }
   0xf   :  { %33 = vsyncpa [#allocation4], 0 }
  0x10   :  { %34 = vsyncpa [#allocation31], 0  ;;  %s20967_s27 = smov [#allocation5]   ;;  %s21705_s0 = sld [smem:[#allocation44_spill]] }
  0x11   :  { %s52_s28 = sshll.u32 %s20967_s27, 4  ;;  %s53_s28 = int_to_ptr.vmem [resolvable:$true] %s52_s28 }
  0x16   :  { %s20527_s19 = scalar_lea.hbm %s21705_s0, 28672 }
  0x17   :  { %p20528_p0 = scmp.ne.s32.totalorder %s21705_s0, %s20527_s19  ;;  %p20531_p1 = scmp.lt.u32.totalorder %s20527_s19, %s21705_s0 }
  0x19   :  { %p20533_p2 = pnand %p20531_p1, %p20528_p0 }
  0x1b   :  { %20536 = shalt.err (!%p20533_p2)
}
  0x1c   :  { %s20537_s2 = scalar_lea.vmem %s53_s28, 28672  ;;  %p20542_p4 = scmp.lt.s32.totalorder %s53_s28, %s53_s28 }
  0x1d   :  { %p20538_p3 = scmp.ne.s32.totalorder %s53_s28, %s20537_s2  ;;  %p20543_p5 = scmp.lt.s32.totalorder %s20537_s2, %s20537_s2 }
  0x1f   :  { %p20544_p6 = por %p20543_p5, %p20542_p4 }
  0x21   :  { %p20545_p7 = pnand %p20544_p6, %p20538_p3 }
  0x23   :  { %20548 = shalt.err (!%p20545_p7)
}
  0x24   :  { %s20968_s23 = smov 256   ;;  %s20969_s24 = smov 16  }
  0x25   :  { %58 = dma.hbm_to_vmem [thread:$0]  %s21705_s0, 28672, %s53_s28, [#allocation6], %s20968_s23, %s20968_s23, %s20969_s24  }
  0x26   :  { %s20970_s27 = smov [#allocation8]   ;;  %s20971_s30 = smov [#allocation11]  }
  0x27   :  { %s74_s29 = sshll.u32 %s20970_s27, 4  ;;  %s96_s19 = sshll.u32 %s20971_s30, 4  ;;  %s75_s29 = int_to_ptr.vmem [resolvable:$true] %s74_s29  ;;  %s97_s19 = int_to_ptr.vmem [resolvable:$true] %s96_s19 }
  0x28   :  { %s20549_s21 = scalar_lea.hbm %s21679_s3, 16384 }
  0x29   :  { %p20550_p8 = scmp.ne.s32.totalorder %s21679_s3, %s20549_s21  ;;  %p20553_p9 = scmp.lt.u32.totalorder %s20549_s21, %s21679_s3 }
  0x2b   :  { %p20555_p10 = pnand %p20553_p9, %p20550_p8 }
  0x2d   :  { %20558 = shalt.err (!%p20555_p10)
}
  0x2e   :  { %s20559_s28 = scalar_lea.vmem %s75_s29, 16384  ;;  %p20564_p12 = scmp.lt.s32.totalorder %s75_s29, %s75_s29 }
  0x2f   :  { %p20560_p11 = scmp.ne.s32.totalorder %s75_s29, %s20559_s28  ;;  %p20565_p13 = scmp.lt.s32.totalorder %s20559_s28, %s20559_s28 }
  0x31   :  { %p20566_p0 = por %p20565_p13, %p20564_p12 }
  0x33   :  { %p20567_p1 = pnand %p20566_p0, %p20560_p11 }
  0x35   :  { %20570 = shalt.err (!%p20567_p1)
}
  0x36   :  { %80 = dma.hbm_to_vmem [thread:$0]  %s21679_s3, 16384, %s75_s29, [#allocation9], %s20968_s23, %s20968_s23, %s20969_s24  }
  0x37   :  { %s20571_s18 = scalar_lea.hbm %s21681_s5, 65536 }
  0x38   :  { %p20572_p2 = scmp.ne.s32.totalorder %s21681_s5, %s20571_s18  ;;  %p20575_p3 = scmp.lt.u32.totalorder %s20571_s18, %s21681_s5 }
  0x3a   :  { %p20577_p4 = pnand %p20575_p3, %p20572_p2 }
  0x3c   :  { %20580 = shalt.err (!%p20577_p4)
}
  0x3d   :  { %s20581_s21 = scalar_lea.vmem %s97_s19, 65536  ;;  %p20586_p6 = scmp.lt.s32.totalorder %s97_s19, %s97_s19 }
  0x3e   :  { %p20582_p5 = scmp.ne.s32.totalorder %s97_s19, %s20581_s21  ;;  %p20587_p7 = scmp.lt.s32.totalorder %s20581_s21, %s20581_s21 }
  0x40   :  { %p20588_p8 = por %p20587_p7, %p20586_p6 }
  0x42   :  { %p20589_p9 = pnand %p20588_p8, %p20582_p5 }
  0x44   :  { %20592 = shalt.err (!%p20589_p9)
}
  0x45   :  { %s20972_s3 = smov 1024   ;;  %s20973_s29 = smov 64  }
  0x46   :  { %102 = dma.hbm_to_vmem [thread:$0]  %s21681_s5, 65536, %s97_s19, [#allocation12], %s20972_s3, %s20972_s3, %s20973_s29  }
  0x47   :  { %s20974_s28 = smov [#allocation14]   ;;  %s20593_s17 = scalar_lea.hbm %s21683_s7, 16384 }
  0x48   :  { %s118_s0 = sshll.u32 %s20974_s28, 4  ;;  %p20594_p10 = scmp.ne.s32.totalorder %s21683_s7, %s20593_s17  ;;  %s119_s0 = int_to_ptr.vmem [resolvable:$true] %s118_s0 }
  0x49   :  { %p20597_p11 = scmp.lt.u32.totalorder %s20593_s17, %s21683_s7 }
  0x4b   :  { %p20599_p12 = pnand %p20597_p11, %p20594_p10 }
  0x4d   :  { %20602 = shalt.err (!%p20599_p12)
}
  0x4e   :  { %s20603_s20 = scalar_lea.vmem %s119_s0, 16384  ;;  %p20608_p0 = scmp.lt.s32.totalorder %s119_s0, %s119_s0 }
  0x4f   :  { %p20604_p13 = scmp.ne.s32.totalorder %s119_s0, %s20603_s20  ;;  %p20609_p1 = scmp.lt.s32.totalorder %s20603_s20, %s20603_s20 }
  0x51   :  { %p20610_p2 = por %p20609_p1, %p20608_p0 }
  0x53   :  { %p20611_p3 = pnand %p20610_p2, %p20604_p13 }
  0x55   :  { %20614 = shalt.err (!%p20611_p3)
}
  0x56   :  { %s20975_s5 = smov 4   ;;  %s20976_s22 = smov [#allocation17]  }
  0x57   :  { %124 = dma.hbm_to_vmem [thread:$0]  %s21683_s7, 16384, %s119_s0, [#allocation15], %s20973_s29, %s20973_s29, %s20975_s5  }
  0x58   :  { %s140_s2 = sshll.u32 %s20976_s22, 4  ;;  %s20977_s28 = smov [#allocation20]   ;;  %s141_s2 = int_to_ptr.vmem [resolvable:$true] %s140_s2 }
  0x59   :  { %s162_s25 = sshll.u32 %s20977_s28, 4  ;;  %s20615_s18 = scalar_lea.hbm %s21685_s9, 16384  ;;  %s163_s25 = int_to_ptr.vmem [resolvable:$true] %s162_s25 }
  0x5a   :  { %p20616_p4 = scmp.ne.s32.totalorder %s21685_s9, %s20615_s18  ;;  %p20619_p5 = scmp.lt.u32.totalorder %s20615_s18, %s21685_s9 }
  0x5c   :  { %p20621_p6 = pnand %p20619_p5, %p20616_p4 }
  0x5e   :  { %20624 = shalt.err (!%p20621_p6)
}
  0x5f   :  { %s20625_s7 = scalar_lea.vmem %s141_s2, 16384  ;;  %p20630_p8 = scmp.lt.s32.totalorder %s141_s2, %s141_s2 }
  0x60   :  { %p20626_p7 = scmp.ne.s32.totalorder %s141_s2, %s20625_s7  ;;  %p20631_p9 = scmp.lt.s32.totalorder %s20625_s7, %s20625_s7 }
  0x62   :  { %p20632_p10 = por %p20631_p9, %p20630_p8 }
  0x64   :  { %p20633_p11 = pnand %p20632_p10, %p20626_p7 }
  0x66   :  { %20636 = shalt.err (!%p20633_p11)
}
  0x67   :  { %146 = dma.hbm_to_vmem [thread:$0]  %s21685_s9, 16384, %s141_s2, [#allocation18], %s20972_s3, %s20972_s3, %s20973_s29  }
  0x68   :  { %s20637_s22 = scalar_lea.hbm %s21687_s11, 65536 }
  0x69   :  { %p20638_p12 = scmp.ne.s32.totalorder %s21687_s11, %s20637_s22  ;;  %p20641_p13 = scmp.lt.u32.totalorder %s20637_s22, %s21687_s11 }
  0x6b   :  { %p20643_p0 = pnand %p20641_p13, %p20638_p12 }
  0x6d   :  { %20646 = shalt.err (!%p20643_p0)
}
  0x6e   :  { %s20647_s27 = scalar_lea.vmem %s163_s25, 65536  ;;  %p20652_p2 = scmp.lt.s32.totalorder %s163_s25, %s163_s25 }
  0x6f   :  { %p20648_p1 = scmp.ne.s32.totalorder %s163_s25, %s20647_s27  ;;  %p20653_p3 = scmp.lt.s32.totalorder %s20647_s27, %s20647_s27 }
  0x71   :  { %p20654_p4 = por %p20653_p3, %p20652_p2 }
  0x73   :  { %p20655_p5 = pnand %p20654_p4, %p20648_p1 }
  0x75   :  { %20658 = shalt.err (!%p20655_p5)
}
  0x76   :  { %168 = dma.hbm_to_vmem [thread:$0]  %s21687_s11, 65536, %s163_s25, [#allocation21], %s20968_s23, %s20968_s23, %s20969_s24  }
  0x77   :  { %s20978_s29 = smov [#allocation23]   ;;  %s20659_s20 = scalar_lea.hbm %s21689_s13, 16384 }
  0x78   :  { %s184_s2 = sshll.u32 %s20978_s29, 4  ;;  %p20660_p6 = scmp.ne.s32.totalorder %s21689_s13, %s20659_s20  ;;  %s185_s2 = int_to_ptr.vmem [resolvable:$true] %s184_s2 }
  0x79   :  { %p20663_p7 = scmp.lt.u32.totalorder %s20659_s20, %s21689_s13 }
  0x7b   :  { %p20665_p8 = pnand %p20663_p7, %p20660_p6 }
  0x7d   :  { %20668 = shalt.err (!%p20665_p8)
}
  0x7e   :  { %s20669_s21 = scalar_lea.vmem %s185_s2, 16384  ;;  %p20674_p10 = scmp.lt.s32.totalorder %s185_s2, %s185_s2 }
  0x7f   :  { %p20670_p9 = scmp.ne.s32.totalorder %s185_s2, %s20669_s21  ;;  %p20675_p11 = scmp.lt.s32.totalorder %s20669_s21, %s20669_s21 }
  0x81   :  { %p20676_p12 = por %p20675_p11, %p20674_p10 }
  0x83   :  { %p20677_p13 = pnand %p20676_p12, %p20670_p9 }
  0x85   :  { %20680 = shalt.err (!%p20677_p13)
}
  0x86   :  { %190 = dma.hbm_to_vmem [thread:$0]  %s21689_s13, 16384, %s185_s2, [#allocation24], %s20968_s23, %s20968_s23, %s20969_s24  }
  0x87   :  { %s20979_s22 = smov [#allocation26]   ;;  %s20980_s26 = smov [#allocation2]  }
  0x88   :  { %s206_s28 = sshll.u32 %s20979_s22, 4  ;;  %s40_s17 = sshll.u32 %s20980_s26, 4  ;;  %s207_s28 = int_to_ptr.vmem [resolvable:$true] %s206_s28  ;;  %s21197_s17 = int_to_ptr.vmem [resolvable:$true] %s40_s17 }
  0x89   :  { %s20681_s9 = scalar_lea.hbm %s21691_s15, 28672 }
  0x8a   :  { %p20682_p0 = scmp.ne.s32.totalorder %s21691_s15, %s20681_s9  ;;  %p20685_p1 = scmp.lt.u32.totalorder %s20681_s9, %s21691_s15 }
  0x8c   :  { %p20687_p2 = pnand %p20685_p1, %p20682_p0 }
  0x8e   :  { %20690 = shalt.err (!%p20687_p2)
}
  0x8f   :  { %s20691_s13 = scalar_lea.vmem %s207_s28, 28672  ;;  %p20696_p4 = scmp.lt.s32.totalorder %s207_s28, %s207_s28 }
  0x90   :  { %p20692_p3 = scmp.ne.s32.totalorder %s207_s28, %s20691_s13  ;;  %p20697_p5 = scmp.lt.s32.totalorder %s20691_s13, %s20691_s13 }
  0x92   :  { %p20698_p6 = por %p20697_p5, %p20696_p4 }
  0x94   :  { %p20699_p7 = pnand %p20698_p6, %p20692_p3 }
  0x96   :  { %20702 = shalt.err (!%p20699_p7)
}
  0x97   :  { %s20981_s23 = smov 448   ;;  %s20982_s24 = smov 28  }
  0x98   :  { %212 = dma.hbm_to_vmem [thread:$0]  %s21691_s15, 28672, %s207_s28, [#allocation27], %s20981_s23, %s20981_s23, %s20982_s24  }
  0x99   :  { %s21706_s5 = sld [smem:[#allocation43_spill]] }
  0x9f   :  { %s20703_s19 = scalar_lea.hbm %s21706_s5, 896 }
  0xa0   :  { %p20704_p8 = scmp.ne.s32.totalorder %s21706_s5, %s20703_s19  ;;  %p20707_p9 = scmp.lt.u32.totalorder %s20703_s19, %s21706_s5 }
  0xa2   :  { %p20709_p10 = pnand %p20707_p9, %p20704_p8 }
  0xa4   :  { %20712 = shalt.err (!%p20709_p10)
}
  0xa5   :  { %s20713_s26 = scalar_lea.vmem %s21197_s17, 896  ;;  %p20718_p12 = scmp.lt.s32.totalorder %s21197_s17, %s21197_s17 }
  0xa6   :  { %p20714_p11 = scmp.ne.s32.totalorder %s21197_s17, %s20713_s26  ;;  %p20719_p13 = scmp.lt.s32.totalorder %s20713_s26, %s20713_s26 }
  0xa8   :  { %p20720_p0 = por %p20719_p13, %p20718_p12 }
  0xaa   :  { %p20721_p1 = pnand %p20720_p0, %p20714_p11 }
  0xac   :  { %20724 = shalt.err (!%p20721_p1)
}
  0xad   :  { %46 = dma.hbm_to_vmem [thread:$0]  %s21706_s5, 896, %s21197_s17, [#allocation3], %s20981_s23, %s20981_s23, %s20982_s24  }
  0xae   :  { %s20983_s18 = smov [#allocation7]   ;;  %s20984_s9 = smov [#allocation10]  }
  0xaf   :  { %s65_s27 = sshll.u32 %s20983_s18, 4  ;;  %s87_s3 = sshll.u32 %s20984_s9, 4  ;;  %s66_s27 = int_to_ptr.vmem [resolvable:$true] %s65_s27  ;;  %s88_s3 = int_to_ptr.vmem [resolvable:$true] %s87_s3 }
  0xb0   :  { %s21707_s1 = sld [smem:[#allocation45_spill]] }
  0xb6   :  { %s20725_s13 = scalar_lea.hbm %s21707_s1, 64 }
  0xb7   :  { %p20726_p2 = scmp.ne.s32.totalorder %s21707_s1, %s20725_s13  ;;  %p20729_p3 = scmp.lt.u32.totalorder %s20725_s13, %s21707_s1 }
  0xb9   :  { %p20731_p4 = pnand %p20729_p3, %p20726_p2 }
  0xbb   :  { %20734 = shalt.err (!%p20731_p4)
}
  0xbc   :  { %s20735_s17 = scalar_lea.vmem %s66_s27, 64  ;;  %p20740_p6 = scmp.lt.s32.totalorder %s66_s27, %s66_s27 }
  0xbd   :  { %p20736_p5 = scmp.ne.s32.totalorder %s66_s27, %s20735_s17  ;;  %p20741_p7 = scmp.lt.s32.totalorder %s20735_s17, %s20735_s17 }
  0xbf   :  { %p20742_p8 = por %p20741_p7, %p20740_p6 }
  0xc1   :  { %p20743_p9 = pnand %p20742_p8, %p20736_p5 }
  0xc3   :  { %20746 = shalt.err (!%p20743_p9)
}
  0xc4   :  { %68 = dma.hbm_to_vmem [thread:$0]  %s21707_s1, 64, %s66_s27, [#allocation6]  }
  0xc5   :  { %s20747_s21 = scalar_lea.hbm %s21680_s4, 64 }
  0xc6   :  { %p20748_p10 = scmp.ne.s32.totalorder %s21680_s4, %s20747_s21  ;;  %p20751_p11 = scmp.lt.u32.totalorder %s20747_s21, %s21680_s4 }
  0xc8   :  { %p20753_p12 = pnand %p20751_p11, %p20748_p10 }
  0xca   :  { %20756 = shalt.err (!%p20753_p12)
}
  0xcb   :  { %s20757_s15 = scalar_lea.vmem %s88_s3, 64  ;;  %p20762_p0 = scmp.lt.s32.totalorder %s88_s3, %s88_s3 }
  0xcc   :  { %p20758_p13 = scmp.ne.s32.totalorder %s88_s3, %s20757_s15  ;;  %p20763_p1 = scmp.lt.s32.totalorder %s20757_s15, %s20757_s15 }
  0xce   :  { %p20764_p2 = por %p20763_p1, %p20762_p0 }
  0xd0   :  { %p20765_p3 = pnand %p20764_p2, %p20758_p13 }
  0xd2   :  { %20768 = shalt.err (!%p20765_p3)
}
  0xd3   :  { %90 = dma.hbm_to_vmem [thread:$0]  %s21680_s4, 64, %s88_s3, [#allocation9]  }
  0xd4   :  { %s20985_s27 = smov [#allocation13]   ;;  %s20986_s29 = smov [#allocation16]  }
  0xd5   :  { %s109_s9 = sshll.u32 %s20985_s27, 4  ;;  %s131_s30 = sshll.u32 %s20986_s29, 4  ;;  %s110_s9 = int_to_ptr.vmem [resolvable:$true] %s109_s9  ;;  %s132_s30 = int_to_ptr.vmem [resolvable:$true] %s131_s30 }
  0xd6   :  { %s20769_s2 = scalar_lea.hbm %s21682_s6, 256 }
  0xd7   :  { %p20770_p4 = scmp.ne.s32.totalorder %s21682_s6, %s20769_s2  ;;  %p20773_p5 = scmp.lt.u32.totalorder %s20769_s2, %s21682_s6 }
  0xd9   :  { %p20775_p6 = pnand %p20773_p5, %p20770_p4 }
  0xdb   :  { %20778 = shalt.err (!%p20775_p6)
}
  0xdc   :  { %s20779_s4 = scalar_lea.vmem %s110_s9, 256  ;;  %p20784_p8 = scmp.lt.s32.totalorder %s110_s9, %s110_s9 }
  0xdd   :  { %p20780_p7 = scmp.ne.s32.totalorder %s110_s9, %s20779_s4  ;;  %p20785_p9 = scmp.lt.s32.totalorder %s20779_s4, %s20779_s4 }
  0xdf   :  { %p20786_p10 = por %p20785_p9, %p20784_p8 }
  0xe1   :  { %p20787_p11 = pnand %p20786_p10, %p20780_p7 }
  0xe3   :  { %20790 = shalt.err (!%p20787_p11)
}
  0xe4   :  { %112 = dma.hbm_to_vmem [thread:$0]  %s21682_s6, 256, %s110_s9, [#allocation12]  }
  0xe5   :  { %s20791_s19 = scalar_lea.hbm %s21684_s8, 16 }
  0xe6   :  { %p20792_p12 = scmp.ne.s32.totalorder %s21684_s8, %s20791_s19  ;;  %p20795_p13 = scmp.lt.u32.totalorder %s20791_s19, %s21684_s8 }
  0xe8   :  { %p20797_p0 = pnand %p20795_p13, %p20792_p12 }
  0xea   :  { %20800 = shalt.err (!%p20797_p0)
}
  0xeb   :  { %s20801_s26 = scalar_lea.vmem %s132_s30, 16  ;;  %s20805_s15 = scalar_lea.vmem %s132_s30, 32 }
  0xec   :  { %p20802_p1 = scmp.ne.s32.totalorder %s132_s30, %s20801_s26  ;;  %p20806_p2 = scmp.lt.s32.totalorder %s132_s30, %s132_s30 }
  0xed   :  { %p20807_p3 = scmp.lt.s32.totalorder %s20805_s15, %s20801_s26 }
  0xef   :  { %p20808_p4 = por %p20807_p3, %p20806_p2 }
  0xf1   :  { %p20809_p5 = pnand %p20808_p4, %p20802_p1 }
  0xf3   :  { %20812 = shalt.err (!%p20809_p5)
}
  0xf4   :  { %134 = dma.hbm_to_vmem [thread:$0]  %s21684_s8, 16, %s132_s30, [#allocation15]  }
  0xf5   :  { %s20987_s18 = smov [#allocation19]   ;;  %s20988_s9 = smov [#allocation22]  }
  0xf6   :  { %s153_s27 = sshll.u32 %s20987_s18, 4  ;;  %s175_s29 = sshll.u32 %s20988_s9, 4  ;;  %s154_s27 = int_to_ptr.vmem [resolvable:$true] %s153_s27  ;;  %s176_s29 = int_to_ptr.vmem [resolvable:$true] %s175_s29 }
  0xf7   :  { %s20813_s2 = scalar_lea.hbm %s21686_s10, 256 }
  0xf8   :  { %p20814_p6 = scmp.ne.s32.totalorder %s21686_s10, %s20813_s2  ;;  %p20817_p7 = scmp.lt.u32.totalorder %s20813_s2, %s21686_s10 }
  0xfa   :  { %p20819_p8 = pnand %p20817_p7, %p20814_p6 }
  0xfc   :  { %20822 = shalt.err (!%p20819_p8)
}
  0xfd   :  { %s20823_s8 = scalar_lea.vmem %s154_s27, 256  ;;  %p20828_p10 = scmp.lt.s32.totalorder %s154_s27, %s154_s27 }
  0xfe   :  { %p20824_p9 = scmp.ne.s32.totalorder %s154_s27, %s20823_s8  ;;  %p20829_p11 = scmp.lt.s32.totalorder %s20823_s8, %s20823_s8 }
 0x100   :  { %p20830_p12 = por %p20829_p11, %p20828_p10 }
 0x102   :  { %p20831_p13 = pnand %p20830_p12, %p20824_p9 }
 0x104   :  { %20834 = shalt.err (!%p20831_p13)
}
 0x105   :  { %156 = dma.hbm_to_vmem [thread:$0]  %s21686_s10, 256, %s154_s27, [#allocation18]  }
 0x106   :  { %s20835_s24 = scalar_lea.hbm %s21688_s12, 64 }
 0x107   :  { %p20836_p0 = scmp.ne.s32.totalorder %s21688_s12, %s20835_s24  ;;  %p20839_p1 = scmp.lt.u32.totalorder %s20835_s24, %s21688_s12 }
 0x109   :  { %p20841_p2 = pnand %p20839_p1, %p20836_p0 }
 0x10b   :  { %20844 = shalt.err (!%p20841_p2)
}
 0x10c   :  { %s20845_s25 = scalar_lea.vmem %s176_s29, 64  ;;  %p20850_p4 = scmp.lt.s32.totalorder %s176_s29, %s176_s29 }
 0x10d   :  { %p20846_p3 = scmp.ne.s32.totalorder %s176_s29, %s20845_s25  ;;  %p20851_p5 = scmp.lt.s32.totalorder %s20845_s25, %s20845_s25 }
 0x10f   :  { %p20852_p6 = por %p20851_p5, %p20850_p4 }
 0x111   :  { %p20853_p7 = pnand %p20852_p6, %p20846_p3 }
 0x113   :  { %20856 = shalt.err (!%p20853_p7)
}
 0x114   :  { %178 = dma.hbm_to_vmem [thread:$0]  %s21688_s12, 64, %s176_s29, [#allocation21]  }
 0x115   :  { %s20989_s26 = smov [#allocation25]   ;;  %s20990_s6 = smov [#allocation28]  }
 0x116   :  { %s197_s15 = sshll.u32 %s20989_s26, 4  ;;  %s219_s28 = sshll.u32 %s20990_s6, 4  ;;  %s198_s15 = int_to_ptr.vmem [resolvable:$true] %s197_s15  ;;  %s220_s28 = int_to_ptr.vmem [resolvable:$true] %s219_s28 }
 0x117   :  { %s20857_s9 = scalar_lea.hbm %s21690_s14, 64 }
 0x118   :  { %p20858_p8 = scmp.ne.s32.totalorder %s21690_s14, %s20857_s9  ;;  %p20861_p9 = scmp.lt.u32.totalorder %s20857_s9, %s21690_s14 }
 0x11a   :  { %p20863_p10 = pnand %p20861_p9, %p20858_p8 }
 0x11c   :  { %20866 = shalt.err (!%p20863_p10)
}
 0x11d   :  { %s20867_s12 = scalar_lea.vmem %s198_s15, 64  ;;  %p20872_p12 = scmp.lt.s32.totalorder %s198_s15, %s198_s15 }
 0x11e   :  { %p20868_p11 = scmp.ne.s32.totalorder %s198_s15, %s20867_s12  ;;  %p20873_p13 = scmp.lt.s32.totalorder %s20867_s12, %s20867_s12 }
 0x120   :  { %p20874_p0 = por %p20873_p13, %p20872_p12 }
 0x122   :  { %p20875_p1 = pnand %p20874_p0, %p20868_p11 }
 0x124   :  { %20878 = shalt.err (!%p20875_p1)
}
 0x125   :  { %200 = dma.hbm_to_vmem [thread:$0]  %s21690_s14, 64, %s198_s15, [#allocation24]  }
 0x126   :  { %s20879_s8 = scalar_lea.hbm %s21692_s16, 112 }
 0x127   :  { %p20880_p2 = scmp.ne.s32.totalorder %s21692_s16, %s20879_s8  ;;  %p20883_p3 = scmp.lt.u32.totalorder %s20879_s8, %s21692_s16 }
 0x129   :  { %p20885_p4 = pnand %p20883_p3, %p20880_p2 }
 0x12b   :  { %20888 = shalt.err (!%p20885_p4)
}
 0x12c   :  { %s20889_s24 = scalar_lea.vmem %s220_s28, 112  ;;  %s20893_s5 = scalar_lea.vmem %s220_s28, 128 }
 0x12d   :  { %p20890_p5 = scmp.ne.s32.totalorder %s220_s28, %s20889_s24  ;;  %p20894_p6 = scmp.lt.s32.totalorder %s220_s28, %s220_s28 }
 0x12e   :  { %p20895_p7 = scmp.lt.s32.totalorder %s20893_s5, %s20889_s24 }
 0x130   :  { %p20896_p8 = por %p20895_p7, %p20894_p6 }
 0x132   :  { %p20897_p9 = pnand %p20896_p8, %p20890_p5 }
 0x134   :  { %20900 = shalt.err (!%p20897_p9)
}
 0x135   :  { %222 = dma.hbm_to_vmem [thread:$0]  %s21692_s16, 112, %s220_s28, [#allocation27]  }
 0x136   :  { %20945 = dma.done.wait [#allocation3], 896  }
 0x137   :  { %20946 = vsyncadd [#allocation3], 4294966400 }
 0x138   :  { %20947 = dma.done.wait [#allocation6], 28736  }
 0x139   :  { %20948 = vsyncadd [#allocation6], 4294938560 }
 0x13a   :  { %20949 = dma.done.wait [#allocation9], 16448  }
 0x13b   :  { %20950 = vsyncadd [#allocation9], 4294950848 }
 0x13c   :  { %20951 = dma.done.wait [#allocation12], 65792  }
 0x13d   :  { %20952 = vsyncadd [#allocation12], 4294901504 }
 0x13e   :  { %20953 = dma.done.wait [#allocation15], 16400  }
 0x13f   :  { %20954 = vsyncadd [#allocation15], 4294950896 }
 0x140   :  { %20955 = dma.done.wait [#allocation18], 16640  }
 0x141   :  { %20956 = vsyncadd [#allocation18], 4294950656 }
 0x142   :  { %20957 = dma.done.wait [#allocation21], 65600  }
 0x143   :  { %20958 = vsyncadd [#allocation21], 4294901696 }
 0x144   :  { %20959 = dma.done.wait [#allocation24], 16448  }
 0x145   :  { %20960 = vsyncadd [#allocation24], 4294950848 }
 0x146   :  { %20961 = dma.done.wait [#allocation27], 28784  }
 0x147   :  { %20962 = vsyncadd [#allocation27], 4294938512  ;;  %v20991_v0 = vmov 0   ;;  %v18580_v1 = vld [vmem:[#allocation5 + $0x4] ss:$16 sps:$4 sm:$0xff]   ;;  %s20992_s16 = smov [#allocation29]  }
 0x148   :  { %1846 = vmatprep.mubr.bf16.mxu1 %v20991_v0  ;;  %v18582_v2 = vld [vmem:[#allocation5 + $0x604] ss:$16 sps:$4 sm:$0xff]   ;;  %1685 = vmatprep.subr.bf16.mxu0 %v18580_v1  ;;  %v18584_v3 = vld [vmem:[#allocation5] ss:$16 sps:$4 sm:$0xff]   ;;  %v18633_v34 = vld [vmem:[#allocation5 + $0xc] ss:$16 sps:$4 sm:$0xff]  }
 0x149   :  { %v18585_v4 = vld [vmem:[#allocation5 + $0x600] ss:$16 sps:$4 sm:$0xff]   ;;  %1814 = vmatprep.subr.bf16.mxu1 %v18582_v2  ;;  %v18586_v5 = vld [vmem:[#allocation5 + $0x24] ss:$16 sps:$4 sm:$0xff]   ;;  %1686 = vmatpush1.bf16.msra.mxu0 %v18584_v3  ;;  %v18631_v36 = vld [vmem:[#allocation5 + $0x8] ss:$16 sps:$4 sm:$0xff]  }
 0x14a   :  { %1815 = vmatpush1.bf16.msra.mxu1 %v18585_v4  ;;  %v18588_v6 = vld [vmem:[#allocation5 + $0x624] ss:$16 sps:$4 sm:$0xff]   ;;  %v18590_v7 = vld [vmem:[#allocation5 + $0x20] ss:$16 sps:$4 sm:$0xff]   ;;  %1687 = vmatprep.subr.bf16.mxu0 %v18586_v5  ;;  %v18639_v39 = vld [vmem:[#allocation5 + $0x2c] ss:$16 sps:$4 sm:$0xff]  }
 0x14b   :  { %v18591_v8 = vld [vmem:[#allocation5 + $0x620] ss:$16 sps:$4 sm:$0xff]   ;;  %1816 = vmatprep.subr.bf16.mxu1 %v18588_v6  ;;  %v18592_v9 = vld [vmem:[#allocation5 + $0x44] ss:$16 sps:$4 sm:$0xff]   ;;  %v18637_v40 = vld [vmem:[#allocation5 + $0x28] ss:$16 sps:$4 sm:$0xff]  }
 0x14c   :  { %v18594_v10 = vld [vmem:[#allocation5 + $0x644] ss:$16 sps:$4 sm:$0xff]   ;;  %v18596_v11 = vld [vmem:[#allocation5 + $0x40] ss:$16 sps:$4 sm:$0xff]   ;;  %v18645_v43 = vld [vmem:[#allocation5 + $0x4c] ss:$16 sps:$4 sm:$0xff]  }
 0x14d   :  { %v18597_v12 = vld [vmem:[#allocation5 + $0x640] ss:$16 sps:$4 sm:$0xff]   ;;  %1688 = vmatpush1.bf16.msra.mxu0 %v18590_v7  ;;  %v18598_v13 = vld [vmem:[#allocation5 + $0x64] ss:$16 sps:$4 sm:$0xff]   ;;  %v18643_v44 = vld [vmem:[#allocation5 + $0x48] ss:$16 sps:$4 sm:$0xff]  }
 0x14e   :  { %1817 = vmatpush1.bf16.msra.mxu1 %v18591_v8  ;;  %1689 = vmatprep.subr.bf16.mxu0 %v18592_v9  ;;  %v18600_v14 = vld [vmem:[#allocation5 + $0x664] ss:$16 sps:$4 sm:$0xff]   ;;  %v18602_v15 = vld [vmem:[#allocation5 + $0x60] ss:$16 sps:$4 sm:$0xff]   ;;  %v18651_v47 = vld [vmem:[#allocation5 + $0x6c] ss:$16 sps:$4 sm:$0xff]  }
 0x14f   :  { %1818 = vmatprep.subr.bf16.mxu1 %v18594_v10  ;;  %v18603_v16 = vld [vmem:[#allocation5 + $0x660] ss:$16 sps:$4 sm:$0xff]   ;;  %v18604_v17 = vld [vmem:[#allocation5 + $0x84] ss:$16 sps:$4 sm:$0xff]   ;;  %v18649_v48 = vld [vmem:[#allocation5 + $0x68] ss:$16 sps:$4 sm:$0xff]  }
 0x150   :  { %v18606_v18 = vld [vmem:[#allocation5 + $0x684] ss:$16 sps:$4 sm:$0xff]   ;;  %v18608_v19 = vld [vmem:[#allocation5 + $0x80] ss:$16 sps:$4 sm:$0xff]   ;;  %v18679_v51 = vld [vmem:[#allocation2 + $0x4] ss:$28 sps:$4 sm:$0xff]  }
 0x151   :  { %1690 = vmatpush1.bf16.msra.mxu0 %v18596_v11  ;;  %v18609_v20 = vld [vmem:[#allocation5 + $0x680] ss:$16 sps:$4 sm:$0xff]   ;;  %v18610_v21 = vld [vmem:[#allocation5 + $0xa4] ss:$16 sps:$4 sm:$0xff]   ;;  %v18657_v52 = vld [vmem:[#allocation5 + $0x8c] ss:$16 sps:$4 sm:$0xff]   ;;  %1717 = vmatprep.mubr.bf16.mxu0 %v18679_v51 }
 0x152   :  { %1819 = vmatpush1.bf16.msra.mxu1 %v18597_v12  ;;  %1691 = vmatprep.subr.bf16.mxu0 %v18598_v13  ;;  %v18612_v22 = vld [vmem:[#allocation5 + $0x6a4] ss:$16 sps:$4 sm:$0xff]   ;;  %v18614_v23 = vld [vmem:[#allocation5 + $0xa0] ss:$16 sps:$4 sm:$0xff]   ;;  %v18655_v53 = vld [vmem:[#allocation5 + $0x88] ss:$16 sps:$4 sm:$0xff]  }
 0x153   :  { %1820 = vmatprep.subr.bf16.mxu1 %v18600_v14  ;;  %v18615_v24 = vld [vmem:[#allocation5 + $0x6a0] ss:$16 sps:$4 sm:$0xff]   ;;  %v18616_v25 = vld [vmem:[#allocation5 + $0xc4] ss:$16 sps:$4 sm:$0xff]   ;;  %v18663_v56 = vld [vmem:[#allocation5 + $0xac] ss:$16 sps:$4 sm:$0xff]  }
 0x154   :  { %v18618_v26 = vld [vmem:[#allocation5 + $0x6c4] ss:$16 sps:$4 sm:$0xff]   ;;  %v18620_v27 = vld [vmem:[#allocation5 + $0xc0] ss:$16 sps:$4 sm:$0xff]   ;;  %v18661_v57 = vld [vmem:[#allocation5 + $0xa8] ss:$16 sps:$4 sm:$0xff]  }
 0x155   :  { %1692 = vmatpush1.bf16.msra.mxu0 %v18602_v15  ;;  %v18621_v28 = vld [vmem:[#allocation5 + $0x6c0] ss:$16 sps:$4 sm:$0xff]   ;;  %v18622_v29 = vld [vmem:[#allocation5 + $0xe4] ss:$16 sps:$4 sm:$0xff]   ;;  %v18669_v60 = vld [vmem:[#allocation5 + $0xcc] ss:$16 sps:$4 sm:$0xff]  }
 0x156   :  { %1821 = vmatpush1.bf16.msra.mxu1 %v18603_v16  ;;  %1693 = vmatprep.subr.bf16.mxu0 %v18604_v17  ;;  %v18624_v30 = vld [vmem:[#allocation5 + $0x6e4] ss:$16 sps:$4 sm:$0xff]   ;;  %v18626_v31 = vld [vmem:[#allocation5 + $0xe0] ss:$16 sps:$4 sm:$0xff]   ;;  %v18667_v61 = vld [vmem:[#allocation5 + $0xc8] ss:$16 sps:$4 sm:$0xff]  }
 0x157   :  { %1822 = vmatprep.subr.bf16.mxu1 %v18606_v18  ;;  %v18627_v32 = vld [vmem:[#allocation5 + $0x6e0] ss:$16 sps:$4 sm:$0xff]   ;;  %v18628_v33 = vld [vmem:[#allocation5 + $0x104] ss:$16 sps:$4 sm:$0xff]   ;;  %v18675_v1 = vld [vmem:[#allocation5 + $0xec] ss:$16 sps:$4 sm:$0xff]  }
 0x158   :  { %v18630_v35 = vld [vmem:[#allocation2 + $0x18] ss:$28 sps:$4 sm:$0xff]   ;;  %v18635_v38 = vld [vmem:[#allocation5 + $0x124] ss:$16 sps:$4 sm:$0xff]   ;;  %v18673_v2 = vld [vmem:[#allocation5 + $0xe8] ss:$16 sps:$4 sm:$0xff]  }
 0x159   :  { %1694 = vmatpush1.bf16.msra.mxu0 %v18608_v19  ;;  %v18634_v37 = vld [vmem:[#allocation5 + $0x100] ss:$16 sps:$4 sm:$0xff]   ;;  %v18641_v42 = vld [vmem:[#allocation5 + $0x144] ss:$16 sps:$4 sm:$0xff]   ;;  %v18685_v5 = vld [vmem:[#allocation5 + $0x10c] ss:$16 sps:$4 sm:$0xff]  }
 0x15a   :  { %1823 = vmatpush1.bf16.msra.mxu1 %v18609_v20  ;;  %1695 = vmatprep.subr.bf16.mxu0 %v18610_v21  ;;  %v18640_v41 = vld [vmem:[#allocation5 + $0x120] ss:$16 sps:$4 sm:$0xff]   ;;  %v18647_v46 = vld [vmem:[#allocation5 + $0x164] ss:$16 sps:$4 sm:$0xff]   ;;  %v18683_v8 = vld [vmem:[#allocation5 + $0x108] ss:$16 sps:$4 sm:$0xff]  }
 0x15b   :  { %1824 = vmatprep.subr.bf16.mxu1 %v18612_v22  ;;  %v18646_v45 = vld [vmem:[#allocation5 + $0x140] ss:$16 sps:$4 sm:$0xff]   ;;  %v18653_v50 = vld [vmem:[#allocation5 + $0x184] ss:$16 sps:$4 sm:$0xff]   ;;  %v18691_v10 = vld [vmem:[#allocation5 + $0x12c] ss:$16 sps:$4 sm:$0xff]  }
 0x15c   :  { %v18652_v49 = vld [vmem:[#allocation5 + $0x160] ss:$16 sps:$4 sm:$0xff]   ;;  %v18659_v55 = vld [vmem:[#allocation5 + $0x1a4] ss:$16 sps:$4 sm:$0xff]   ;;  %v18689_v12 = vld [vmem:[#allocation5 + $0x128] ss:$16 sps:$4 sm:$0xff]  }
 0x15d   :  { %1696 = vmatpush1.bf16.msra.mxu0 %v18614_v23  ;;  %v18658_v54 = vld [vmem:[#allocation5 + $0x180] ss:$16 sps:$4 sm:$0xff]   ;;  %v18665_v59 = vld [vmem:[#allocation5 + $0x1c4] ss:$16 sps:$4 sm:$0xff]   ;;  %v18697_v14 = vld [vmem:[#allocation5 + $0x14c] ss:$16 sps:$4 sm:$0xff]  }
 0x15e   :  { %1825 = vmatpush1.bf16.msra.mxu1 %v18615_v24  ;;  %1697 = vmatprep.subr.bf16.mxu0 %v18616_v25  ;;  %v18664_v58 = vld [vmem:[#allocation5 + $0x1a0] ss:$16 sps:$4 sm:$0xff]   ;;  %v18671_v63 = vld [vmem:[#allocation5 + $0x1e4] ss:$16 sps:$4 sm:$0xff]   ;;  %v18695_v16 = vld [vmem:[#allocation5 + $0x148] ss:$16 sps:$4 sm:$0xff]  }
 0x15f   :  { %1826 = vmatprep.subr.bf16.mxu1 %v18618_v26  ;;  %v18670_v62 = vld [vmem:[#allocation5 + $0x1c0] ss:$16 sps:$4 sm:$0xff]   ;;  %v18682_v4 = vld [vmem:[#allocation5 + $0x204] ss:$16 sps:$4 sm:$0xff]   ;;  %v18703_v18 = vld [vmem:[#allocation5 + $0x16c] ss:$16 sps:$4 sm:$0xff]  }
 0x160   :  { %v18676_v3 = vld [vmem:[#allocation5 + $0x1e0] ss:$16 sps:$4 sm:$0xff]   ;;  %v21325_v6 = vld [vmem:[#allocation2] ss:$28 sps:$4 sm:$0xff]   ;;  %v18709_v22 = vld [vmem:[#allocation5 + $0x18c] ss:$16 sps:$4 sm:$0xff]  }
 0x161   :  { %1698 = vmatpush1.bf16.msra.mxu0 %v18620_v27  ;;  %v18680_v7 = vld [vmem:[#allocation5 + $0x200] ss:$16 sps:$4 sm:$0xff]   ;;  %v18688_v9 = vld [vmem:[#allocation5 + $0x224] ss:$16 sps:$4 sm:$0xff]   ;;  %v18701_v20 = vld [vmem:[#allocation5 + $0x168] ss:$16 sps:$4 sm:$0xff]  }
 0x162   :  { %1827 = vmatpush1.bf16.msra.mxu1 %v18621_v28  ;;  %1699 = vmatprep.subr.bf16.mxu0 %v18622_v29  ;;  %v18686_v11 = vld [vmem:[#allocation5 + $0x220] ss:$16 sps:$4 sm:$0xff]   ;;  %v18694_v13 = vld [vmem:[#allocation5 + $0x244] ss:$16 sps:$4 sm:$0xff]   ;;  %v18707_v24 = vld [vmem:[#allocation5 + $0x188] ss:$16 sps:$4 sm:$0xff]  }
 0x163   :  { %1828 = vmatprep.subr.bf16.mxu1 %v18624_v30  ;;  %v18692_v15 = vld [vmem:[#allocation5 + $0x240] ss:$16 sps:$4 sm:$0xff]   ;;  %v18700_v17 = vld [vmem:[#allocation5 + $0x264] ss:$16 sps:$4 sm:$0xff]   ;;  %v18715_v26 = vld [vmem:[#allocation5 + $0x1ac] ss:$16 sps:$4 sm:$0xff]  }
 0x164   :  { %v18698_v19 = vld [vmem:[#allocation5 + $0x260] ss:$16 sps:$4 sm:$0xff]   ;;  %v18706_v21 = vld [vmem:[#allocation5 + $0x284] ss:$16 sps:$4 sm:$0xff]   ;;  %v18713_v28 = vld [vmem:[#allocation5 + $0x1a8] ss:$16 sps:$4 sm:$0xff]  }
 0x165   :  { %1700 = vmatpush1.bf16.msra.mxu0 %v18626_v31  ;;  %v18704_v23 = vld [vmem:[#allocation5 + $0x280] ss:$16 sps:$4 sm:$0xff]   ;;  %v18712_v25 = vld [vmem:[#allocation5 + $0x2a4] ss:$16 sps:$4 sm:$0xff]   ;;  %v18721_v30 = vld [vmem:[#allocation5 + $0x1cc] ss:$16 sps:$4 sm:$0xff]  }
 0x166   :  { %1829 = vmatpush1.bf16.msra.mxu1 %v18627_v32  ;;  %1701 = vmatprep.subr.bf16.mxu0 %v18628_v33  ;;  %v18710_v27 = vld [vmem:[#allocation5 + $0x2a0] ss:$16 sps:$4 sm:$0xff]   ;;  %v18718_v29 = vld [vmem:[#allocation5 + $0x2c4] ss:$16 sps:$4 sm:$0xff]   ;;  %v18719_v32 = vld [vmem:[#allocation5 + $0x1c8] ss:$16 sps:$4 sm:$0xff]  }
 0x167   :  { %1857 = vmatprep.subr.bf16.mxu1 %v18633_v34  ;;  %v18716_v31 = vld [vmem:[#allocation5 + $0x2c0] ss:$16 sps:$4 sm:$0xff]   ;;  %v18724_v33 = vld [vmem:[#allocation5 + $0x2e4] ss:$16 sps:$4 sm:$0xff]   ;;  %s16085_s21 = sshll.u32 %s20992_s16, 4  ;;  %s16086_s21 = int_to_ptr.vmem [resolvable:$true] %s16085_s21 }
 0x168   :  { %v18778_v34 = vld [vmem:[#allocation2 + $0xc] ss:$28 sps:$4 sm:$0xff]   ;;  %s20901_s11 = scalar_lea.vmem %s16086_s21, 256  ;;  %p20906_p11 = scmp.lt.s32.totalorder %s16086_s21, %s16086_s21 }
 0x169   :  { %1847 = vmatmul.mubr.bf16.vlgmr.msra.gmra.mrb[0].mxu1 %v18630_v35  ;;  %1702 = vmatpush1.bf16.msra.mxu0 %v18634_v37  ;;  %v18727_v35 = vld [vmem:[#allocation5 + $0x1ec] ss:$16 sps:$4 sm:$0xff]   ;;  %v18725_v37 = vld [vmem:[#allocation5 + $0x1e8] ss:$16 sps:$4 sm:$0xff]   ;;  %p20902_p10 = scmp.ne.s32.totalorder %s16086_s21, %s20901_s11  ;;  %p20907_p12 = scmp.lt.s32.totalorder %s20901_s11, %s20901_s11 }
 0x16a   :  { %1858 = vmatpush1.bf16.msra.mxu1 %v18631_v36  ;;  %1703 = vmatprep.subr.bf16.mxu0 %v18635_v38  ;;  %v18722_v36 = vld [vmem:[#allocation5 + $0x2e0] ss:$16 sps:$4 sm:$0xff]   ;;  %v18730_v38 = vld [vmem:[#allocation5 + $0x304] ss:$16 sps:$4 sm:$0xff]  }
 0x16b   :  { %1859 = vmatprep.subr.bf16.mxu1 %v18639_v39  ;;  %1889 = vmatprep.mubr.bf16.mxu1 %v18679_v51  ;;  %v18733_v39 = vld [vmem:[#allocation5 + $0x20c] ss:$16 sps:$4 sm:$0xff]   ;;  %p20908_p13 = por %p20907_p12, %p20906_p11 }
 0x16c   :  { %v18751_v51 = vld [vmem:[#allocation5 + $0x26c] ss:$16 sps:$4 sm:$0xff]  }
 0x16d   :  { %1704 = vmatpush1.bf16.msra.mxu0 %v18640_v41  ;;  %v18731_v41 = vld [vmem:[#allocation5 + $0x208] ss:$16 sps:$4 sm:$0xff]   ;;  %p20909_p0 = pnand %p20908_p13, %p20902_p10 }
 0x16e   :  { %1860 = vmatpush1.bf16.msra.mxu1 %v18637_v40  ;;  %1705 = vmatprep.subr.bf16.mxu0 %v18641_v42  ;;  %v18728_v40 = vld [vmem:[#allocation5 + $0x300] ss:$16 sps:$4 sm:$0xff]   ;;  %v18736_v42 = vld [vmem:[#allocation5 + $0x324] ss:$16 sps:$4 sm:$0xff]  }
 0x16f   :  { %1861 = vmatprep.subr.bf16.mxu1 %v18645_v43  ;;  %v18739_v43 = vld [vmem:[#allocation5 + $0x22c] ss:$16 sps:$4 sm:$0xff]  }
 0x171   :  { %1706 = vmatpush1.bf16.msra.mxu0 %v18646_v45  ;;  %v18737_v45 = vld [vmem:[#allocation5 + $0x228] ss:$16 sps:$4 sm:$0xff]  }
 0x172   :  { %1862 = vmatpush1.bf16.msra.mxu1 %v18643_v44  ;;  %1707 = vmatprep.subr.bf16.mxu0 %v18647_v46  ;;  %v18734_v44 = vld [vmem:[#allocation5 + $0x320] ss:$16 sps:$4 sm:$0xff]   ;;  %v18742_v46 = vld [vmem:[#allocation5 + $0x344] ss:$16 sps:$4 sm:$0xff]  }
 0x173   :  { %1863 = vmatprep.subr.bf16.mxu1 %v18651_v47  ;;  %v18745_v47 = vld [vmem:[#allocation5 + $0x24c] ss:$16 sps:$4 sm:$0xff]  }
 0x175   :  { %1708 = vmatpush1.bf16.msra.mxu0 %v18652_v49  ;;  %v18743_v49 = vld [vmem:[#allocation5 + $0x248] ss:$16 sps:$4 sm:$0xff]  }
 0x176   :  { %1864 = vmatpush1.bf16.msra.mxu1 %v18649_v48  ;;  %1709 = vmatprep.subr.bf16.mxu0 %v18653_v50  ;;  %v18740_v48 = vld [vmem:[#allocation5 + $0x340] ss:$16 sps:$4 sm:$0xff]   ;;  %v18748_v50 = vld [vmem:[#allocation5 + $0x364] ss:$16 sps:$4 sm:$0xff]  }
 0x177   :  { %1865 = vmatprep.subr.bf16.mxu1 %v18657_v52  ;;  %v18746_v52 = vld [vmem:[#allocation5 + $0x360] ss:$16 sps:$4 sm:$0xff]  }
 0x179   :  { %1710 = vmatpush1.bf16.msra.mxu0 %v18658_v54  ;;  %v18754_v54 = vld [vmem:[#allocation5 + $0x384] ss:$16 sps:$4 sm:$0xff]  }
 0x17a   :  { %1866 = vmatpush1.bf16.msra.mxu1 %v18655_v53  ;;  %1711 = vmatprep.subr.bf16.mxu0 %v18659_v55  ;;  %v18749_v53 = vld [vmem:[#allocation5 + $0x268] ss:$16 sps:$4 sm:$0xff]   ;;  %v18757_v55 = vld [vmem:[#allocation5 + $0x28c] ss:$16 sps:$4 sm:$0xff]  }
 0x17b   :  { %1867 = vmatprep.subr.bf16.mxu1 %v18663_v56  ;;  %v18752_v56 = vld [vmem:[#allocation5 + $0x380] ss:$16 sps:$4 sm:$0xff]  }
 0x17d   :  { %1712 = vmatpush1.bf16.msra.mxu0 %v18664_v58  ;;  %v18760_v58 = vld [vmem:[#allocation5 + $0x3a4] ss:$16 sps:$4 sm:$0xff]  }
 0x17e   :  { %1868 = vmatpush1.bf16.msra.mxu1 %v18661_v57  ;;  %1713 = vmatprep.subr.bf16.mxu0 %v18665_v59  ;;  %v18755_v57 = vld [vmem:[#allocation5 + $0x288] ss:$16 sps:$4 sm:$0xff]   ;;  %v18763_v59 = vld [vmem:[#allocation5 + $0x2ac] ss:$16 sps:$4 sm:$0xff]  }
 0x17f   :  { %1869 = vmatprep.subr.bf16.mxu1 %v18669_v60  ;;  %v18758_v60 = vld [vmem:[#allocation5 + $0x3a0] ss:$16 sps:$4 sm:$0xff]  }
 0x181   :  { %1714 = vmatpush1.bf16.msra.mxu0 %v18670_v62  ;;  %v18766_v62 = vld [vmem:[#allocation5 + $0x3c4] ss:$16 sps:$4 sm:$0xff]  }
 0x182   :  { %1870 = vmatpush1.bf16.msra.mxu1 %v18667_v61  ;;  %1715 = vmatprep.subr.bf16.mxu0 %v18671_v63  ;;  %v18761_v61 = vld [vmem:[#allocation5 + $0x2a8] ss:$16 sps:$4 sm:$0xff]   ;;  %v18769_v63 = vld [vmem:[#allocation5 + $0x2cc] ss:$16 sps:$4 sm:$0xff]  }
 0x183   :  { %1871 = vmatprep.subr.bf16.mxu1 %v18675_v1  ;;  %v18764_v1 = vld [vmem:[#allocation5 + $0x3c0] ss:$16 sps:$4 sm:$0xff]  }
 0x185   :  { %1716 = vmatpush1.bf16.msra.mxu0 %v18676_v3  ;;  %v18772_v3 = vld [vmem:[#allocation5 + $0x3e4] ss:$16 sps:$4 sm:$0xff]  }
 0x186   :  { %1872 = vmatpush1.bf16.msra.mxu1 %v18673_v2  ;;  %1728 = vmatprep.subr.bf16.mxu0 %v18682_v4  ;;  %v18767_v2 = vld [vmem:[#allocation5 + $0x2c8] ss:$16 sps:$4 sm:$0xff]   ;;  %v18775_v4 = vld [vmem:[#allocation5 + $0x2ec] ss:$16 sps:$4 sm:$0xff]  }
 0x187   :  { %1873 = vmatprep.subr.bf16.mxu1 %v18685_v5  ;;  %v18770_v5 = vld [vmem:[#allocation5 + $0x3e0] ss:$16 sps:$4 sm:$0xff]  }
 0x188   :  { %1718 = vmatmul.mubr.bf16.vlgmr.msra.gmra.mrb[0].mxu0 %v21325_v6 }
 0x189   :  { %1729 = vmatpush1.bf16.msra.mxu0 %v18680_v7  ;;  %1760 = vmatprep.mubr.bf16.mxu0 %v18778_v34  ;;  %v18781_v7 = vld [vmem:[#allocation5 + $0x404] ss:$16 sps:$4 sm:$0xff]  }
 0x18a   :  { %1874 = vmatpush1.bf16.msra.mxu1 %v18683_v8  ;;  %1730 = vmatprep.subr.bf16.mxu0 %v18688_v9  ;;  %v18784_v8 = vld [vmem:[#allocation5 + $0x30c] ss:$16 sps:$4 sm:$0xff]  }
 0x18b   :  { %1875 = vmatprep.subr.bf16.mxu1 %v18691_v10  ;;  %v21329_v9 = vld [vmem:[#allocation2 + $0x8] ss:$28 sps:$4 sm:$0xff]  }
 0x18c   :  { %v18779_v10 = vld [vmem:[#allocation5 + $0x400] ss:$16 sps:$4 sm:$0xff]  }
 0x18d   :  { %1731 = vmatpush1.bf16.msra.mxu0 %v18686_v11  ;;  %v18782_v11 = vld [vmem:[#allocation5 + $0x308] ss:$16 sps:$4 sm:$0xff]  }
 0x18e   :  { %1876 = vmatpush1.bf16.msra.mxu1 %v18689_v12  ;;  %1732 = vmatprep.subr.bf16.mxu0 %v18694_v13  ;;  %v18787_v12 = vld [vmem:[#allocation5 + $0x424] ss:$16 sps:$4 sm:$0xff]   ;;  %v18790_v13 = vld [vmem:[#allocation5 + $0x32c] ss:$16 sps:$4 sm:$0xff]  }
 0x18f   :  { %1877 = vmatprep.subr.bf16.mxu1 %v18697_v14  ;;  %v18785_v14 = vld [vmem:[#allocation5 + $0x420] ss:$16 sps:$4 sm:$0xff]  }
 0x191   :  { %1733 = vmatpush1.bf16.msra.mxu0 %v18692_v15  ;;  %v18788_v15 = vld [vmem:[#allocation5 + $0x328] ss:$16 sps:$4 sm:$0xff]  }
 0x192   :  { %1878 = vmatpush1.bf16.msra.mxu1 %v18695_v16  ;;  %1734 = vmatprep.subr.bf16.mxu0 %v18700_v17  ;;  %v18793_v16 = vld [vmem:[#allocation5 + $0x444] ss:$16 sps:$4 sm:$0xff]   ;;  %v21332_v17 = vld [vmem:[#allocation2 + $0x14] ss:$28 sps:$4 sm:$0xff]  }
 0x193   :  { %1879 = vmatprep.subr.bf16.mxu1 %v18703_v18  ;;  %v18796_v18 = vld [vmem:[#allocation5 + $0x34c] ss:$16 sps:$4 sm:$0xff]  }
 0x195   :  { %1735 = vmatpush1.bf16.msra.mxu0 %v18698_v19  ;;  %v18791_v19 = vld [vmem:[#allocation5 + $0x440] ss:$16 sps:$4 sm:$0xff]  }
 0x196   :  { %1880 = vmatpush1.bf16.msra.mxu1 %v18701_v20  ;;  %1736 = vmatprep.subr.bf16.mxu0 %v18706_v21  ;;  %v18794_v20 = vld [vmem:[#allocation5 + $0x348] ss:$16 sps:$4 sm:$0xff]   ;;  %v18799_v21 = vld [vmem:[#allocation5 + $0x464] ss:$16 sps:$4 sm:$0xff]  }
 0x197   :  { %1881 = vmatprep.subr.bf16.mxu1 %v18709_v22  ;;  %v18802_v22 = vld [vmem:[#allocation5 + $0x36c] ss:$16 sps:$4 sm:$0xff]  }
 0x199   :  { %1737 = vmatpush1.bf16.msra.mxu0 %v18704_v23  ;;  %v18797_v23 = vld [vmem:[#allocation5 + $0x460] ss:$16 sps:$4 sm:$0xff]  }
 0x19a   :  { %1882 = vmatpush1.bf16.msra.mxu1 %v18707_v24  ;;  %1738 = vmatprep.subr.bf16.mxu0 %v18712_v25  ;;  %v18800_v24 = vld [vmem:[#allocation5 + $0x368] ss:$16 sps:$4 sm:$0xff]   ;;  %v18805_v25 = vld [vmem:[#allocation5 + $0x484] ss:$16 sps:$4 sm:$0xff]  }
 0x19b   :  { %1883 = vmatprep.subr.bf16.mxu1 %v18715_v26  ;;  %v18808_v26 = vld [vmem:[#allocation5 + $0x38c] ss:$16 sps:$4 sm:$0xff]  }
 0x19d   :  { %1739 = vmatpush1.bf16.msra.mxu0 %v18710_v27  ;;  %v18803_v27 = vld [vmem:[#allocation5 + $0x480] ss:$16 sps:$4 sm:$0xff]  }
 0x19e   :  { %1884 = vmatpush1.bf16.msra.mxu1 %v18713_v28  ;;  %1740 = vmatprep.subr.bf16.mxu0 %v18718_v29  ;;  %v18806_v28 = vld [vmem:[#allocation5 + $0x388] ss:$16 sps:$4 sm:$0xff]   ;;  %v18811_v29 = vld [vmem:[#allocation5 + $0x4a4] ss:$16 sps:$4 sm:$0xff]  }
 0x19f   :  { %1885 = vmatprep.subr.bf16.mxu1 %v18721_v30  ;;  %v18814_v30 = vld [vmem:[#allocation5 + $0x3ac] ss:$16 sps:$4 sm:$0xff]  }
 0x1a1   :  { %1741 = vmatpush1.bf16.msra.mxu0 %v18716_v31  ;;  %v18809_v31 = vld [vmem:[#allocation5 + $0x4a0] ss:$16 sps:$4 sm:$0xff]  }
 0x1a2   :  { %1886 = vmatpush1.bf16.msra.mxu1 %v18719_v32  ;;  %1742 = vmatprep.subr.bf16.mxu0 %v18724_v33  ;;  %v18812_v32 = vld [vmem:[#allocation5 + $0x3a8] ss:$16 sps:$4 sm:$0xff]   ;;  %v18817_v33 = vld [vmem:[#allocation5 + $0x4c4] ss:$16 sps:$4 sm:$0xff]  }
 0x1a3   :  { %1887 = vmatprep.subr.bf16.mxu1 %v18727_v35  ;;  %v18815_v35 = vld [vmem:[#allocation5 + $0x4c0] ss:$16 sps:$4 sm:$0xff]  }
 0x1a5   :  { %1743 = vmatpush1.bf16.msra.mxu0 %v18722_v36  ;;  %v18818_v36 = vld [vmem:[#allocation5 + $0x3c8] ss:$16 sps:$4 sm:$0xff]  }
 0x1a6   :  { %1888 = vmatpush1.bf16.msra.mxu1 %v18725_v37  ;;  %1744 = vmatprep.subr.bf16.mxu0 %v18730_v38  ;;  %v18823_v37 = vld [vmem:[#allocation5 + $0x4e4] ss:$16 sps:$4 sm:$0xff]   ;;  %v18826_v38 = vld [vmem:[#allocation5 + $0x3ec] ss:$16 sps:$4 sm:$0xff]  }
 0x1a7   :  { %1900 = vmatprep.subr.bf16.mxu1 %v18733_v39  ;;  %v18821_v39 = vld [vmem:[#allocation5 + $0x4e0] ss:$16 sps:$4 sm:$0xff]  }
 0x1a9   :  { %1890 = vmatmul.mubr.bf16.vlgmr.msra.gmra.mrb[4].mxu1 %v21325_v6  ;;  %1745 = vmatpush1.bf16.msra.mxu0 %v18728_v40  ;;  %v18773_v6 = vld [vmem:[#allocation5 + $0x2e8] ss:$16 sps:$4 sm:$0xff]  }
 0x1aa   :  { %1901 = vmatpush1.bf16.msra.mxu1 %v18731_v41  ;;  %1746 = vmatprep.subr.bf16.mxu0 %v18736_v42  ;;  %v18824_v40 = vld [vmem:[#allocation5 + $0x3e8] ss:$16 sps:$4 sm:$0xff]   ;;  %v18829_v41 = vld [vmem:[#allocation5 + $0x504] ss:$16 sps:$4 sm:$0xff]   ;;  %v18832_v42 = vld [vmem:[#allocation5 + $0x40c] ss:$16 sps:$4 sm:$0xff]  }
 0x1ab   :  { %1902 = vmatprep.subr.bf16.mxu1 %v18739_v43  ;;  %1932 = vmatprep.mubr.bf16.mxu1 %v18778_v34  ;;  %v18820_v34 = vld [vmem:[#allocation5 + $0x3cc] ss:$16 sps:$4 sm:$0xff]   ;;  %v18827_v43 = vld [vmem:[#allocation5 + $0x500] ss:$16 sps:$4 sm:$0xff]  }
 0x1ad   :  { %1747 = vmatpush1.bf16.msra.mxu0 %v18734_v44  ;;  %v18830_v44 = vld [vmem:[#allocation5 + $0x408] ss:$16 sps:$4 sm:$0xff]  }
 0x1ae   :  { %1903 = vmatpush1.bf16.msra.mxu1 %v18737_v45  ;;  %1748 = vmatprep.subr.bf16.mxu0 %v18742_v46  ;;  %v18835_v45 = vld [vmem:[#allocation5 + $0x524] ss:$16 sps:$4 sm:$0xff]   ;;  %v18838_v46 = vld [vmem:[#allocation5 + $0x42c] ss:$16 sps:$4 sm:$0xff]  }
 0x1af   :  { %1904 = vmatprep.subr.bf16.mxu1 %v18745_v47  ;;  %v18833_v47 = vld [vmem:[#allocation5 + $0x520] ss:$16 sps:$4 sm:$0xff]  }
 0x1b1   :  { %1749 = vmatpush1.bf16.msra.mxu0 %v18740_v48  ;;  %v18836_v48 = vld [vmem:[#allocation5 + $0x428] ss:$16 sps:$4 sm:$0xff]  }
 0x1b2   :  { %1905 = vmatpush1.bf16.msra.mxu1 %v18743_v49  ;;  %1750 = vmatprep.subr.bf16.mxu0 %v18748_v50  ;;  %v18841_v49 = vld [vmem:[#allocation5 + $0x544] ss:$16 sps:$4 sm:$0xff]   ;;  %v18844_v50 = vld [vmem:[#allocation5 + $0x44c] ss:$16 sps:$4 sm:$0xff]  }
 0x1b3   :  { %1906 = vmatprep.subr.bf16.mxu1 %v18751_v51  ;;  %v18839_v51 = vld [vmem:[#allocation5 + $0x540] ss:$16 sps:$4 sm:$0xff]  }
 0x1b5   :  { %1751 = vmatpush1.bf16.msra.mxu0 %v18746_v52  ;;  %v18842_v52 = vld [vmem:[#allocation5 + $0x448] ss:$16 sps:$4 sm:$0xff]  }
 0x1b6   :  { %1907 = vmatpush1.bf16.msra.mxu1 %v18749_v53  ;;  %1752 = vmatprep.subr.bf16.mxu0 %v18754_v54  ;;  %v18847_v53 = vld [vmem:[#allocation5 + $0x564] ss:$16 sps:$4 sm:$0xff]   ;;  %v18850_v54 = vld [vmem:[#allocation5 + $0x46c] ss:$16 sps:$4 sm:$0xff]  }
 0x1b7   :  { %1908 = vmatprep.subr.bf16.mxu1 %v18757_v55  ;;  %v18845_v55 = vld [vmem:[#allocation5 + $0x560] ss:$16 sps:$4 sm:$0xff]  }
 0x1b9   :  { %1753 = vmatpush1.bf16.msra.mxu0 %v18752_v56  ;;  %v18848_v56 = vld [vmem:[#allocation5 + $0x468] ss:$16 sps:$4 sm:$0xff]  }
 0x1ba   :  { %1909 = vmatpush1.bf16.msra.mxu1 %v18755_v57  ;;  %1754 = vmatprep.subr.bf16.mxu0 %v18760_v58  ;;  %v18853_v57 = vld [vmem:[#allocation5 + $0x584] ss:$16 sps:$4 sm:$0xff]   ;;  %v18856_v58 = vld [vmem:[#allocation5 + $0x48c] ss:$16 sps:$4 sm:$0xff]  }
 0x1bb   :  { %1910 = vmatprep.subr.bf16.mxu1 %v18763_v59  ;;  %v18851_v59 = vld [vmem:[#allocation5 + $0x580] ss:$16 sps:$4 sm:$0xff]  }
 0x1bd   :  { %1755 = vmatpush1.bf16.msra.mxu0 %v18758_v60  ;;  %v18854_v60 = vld [vmem:[#allocation5 + $0x488] ss:$16 sps:$4 sm:$0xff]  }
 0x1be   :  { %1911 = vmatpush1.bf16.msra.mxu1 %v18761_v61  ;;  %1756 = vmatprep.subr.bf16.mxu0 %v18766_v62  ;;  %v18859_v61 = vld [vmem:[#allocation5 + $0x5a4] ss:$16 sps:$4 sm:$0xff]   ;;  %v18862_v62 = vld [vmem:[#allocation5 + $0x4ac] ss:$16 sps:$4 sm:$0xff]  }
 0x1bf   :  { %1912 = vmatprep.subr.bf16.mxu1 %v18769_v63  ;;  %v18857_v63 = vld [vmem:[#allocation5 + $0x5a0] ss:$16 sps:$4 sm:$0xff]  }
 0x1c1   :  { %1757 = vmatpush1.bf16.msra.mxu0 %v18764_v1  ;;  %v18860_v1 = vld [vmem:[#allocation5 + $0x4a8] ss:$16 sps:$4 sm:$0xff]  }
 0x1c2   :  { %1913 = vmatpush1.bf16.msra.mxu1 %v18767_v2  ;;  %1758 = vmatprep.subr.bf16.mxu0 %v18772_v3  ;;  %v18865_v2 = vld [vmem:[#allocation5 + $0x5c4] ss:$16 sps:$4 sm:$0xff]   ;;  %v18868_v3 = vld [vmem:[#allocation5 + $0x4cc] ss:$16 sps:$4 sm:$0xff]  }
 0x1c3   :  { %1914 = vmatprep.subr.bf16.mxu1 %v18775_v4  ;;  %v18863_v4 = vld [vmem:[#allocation5 + $0x5c0] ss:$16 sps:$4 sm:$0xff]  }
 0x1c5   :  { %1759 = vmatpush1.bf16.msra.mxu0 %v18770_v5  ;;  %v18866_v5 = vld [vmem:[#allocation5 + $0x4c8] ss:$16 sps:$4 sm:$0xff]  }
 0x1c6   :  { %1915 = vmatpush1.bf16.msra.mxu1 %v18773_v6  ;;  %1771 = vmatprep.subr.bf16.mxu0 %v18781_v7  ;;  %v18871_v6 = vld [vmem:[#allocation5 + $0x5e4] ss:$16 sps:$4 sm:$0xff]   ;;  %v18874_v7 = vld [vmem:[#allocation5 + $0x4ec] ss:$16 sps:$4 sm:$0xff]  }
 0x1c7   :  { %1916 = vmatprep.subr.bf16.mxu1 %v18784_v8  ;;  %v18869_v8 = vld [vmem:[#allocation5 + $0x5e0] ss:$16 sps:$4 sm:$0xff]  }
 0x1c8   :  { %1761 = vmatmul.mubr.bf16.vlgmr.msra.gmra.mrb[0].mxu0 %v21329_v9 }
 0x1c9   :  { %1772 = vmatpush1.bf16.msra.mxu0 %v18779_v10  ;;  %1803 = vmatprep.mubr.bf16.mxu0 %v21332_v17  ;;  %v18880_v10 = vld [vmem:[#allocation5 + $0x50c] ss:$16 sps:$4 sm:$0xff]  }
 0x1ca   :  { %1917 = vmatpush1.bf16.msra.mxu1 %v18782_v11  ;;  %1773 = vmatprep.subr.bf16.mxu0 %v18787_v12  ;;  %v21337_v11 = vld [vmem:[#allocation2 + $0x10] ss:$28 sps:$4 sm:$0xff]  }
 0x1cb   :  { %1918 = vmatprep.subr.bf16.mxu1 %v18790_v13  ;;  %v18928_v12 = vld [vmem:[#allocation8 + $0x4] ss:$16 sps:$4 sm:$0xff]  }
 0x1cc   :  { %v18878_v13 = vld [vmem:[#allocation5 + $0x508] ss:$16 sps:$4 sm:$0xff]  }
 0x1cd   :  { %1774 = vmatpush1.bf16.msra.mxu0 %v18785_v14  ;;  %v18926_v14 = vld [vmem:[#allocation8] ss:$16 sps:$4 sm:$0xff]  }
 0x1ce   :  { %1919 = vmatpush1.bf16.msra.mxu1 %v18788_v15  ;;  %1775 = vmatprep.subr.bf16.mxu0 %v18793_v16  ;;  %v18883_v15 = vld [vmem:[#allocation5 + $0x52c] ss:$16 sps:$4 sm:$0xff]   ;;  %v18934_v16 = vld [vmem:[#allocation8 + $0x24] ss:$16 sps:$4 sm:$0xff]  }
 0x1cf   :  { %1920 = vmatprep.subr.bf16.mxu1 %v18796_v18  ;;  %v18932_v18 = vld [vmem:[#allocation8 + $0x20] ss:$16 sps:$4 sm:$0xff]  }
 0x1d1   :  { %1776 = vmatpush1.bf16.msra.mxu0 %v18791_v19  ;;  %v18886_v19 = vld [vmem:[#allocation5 + $0x54c] ss:$16 sps:$4 sm:$0xff]  }
 0x1d2   :  { %1921 = vmatpush1.bf16.msra.mxu1 %v18794_v20  ;;  %1777 = vmatprep.subr.bf16.mxu0 %v18799_v21  ;;  %v18940_v20 = vld [vmem:[#allocation8 + $0x44] ss:$16 sps:$4 sm:$0xff]  }
 0x1d3   :  { %1922 = vmatprep.subr.bf16.mxu1 %v18802_v22  ;;  %v18884_v21 = vld [vmem:[#allocation5 + $0x548] ss:$16 sps:$4 sm:$0xff]   ;;  %v18938_v22 = vld [vmem:[#allocation8 + $0x40] ss:$16 sps:$4 sm:$0xff]  }
 0x1d5   :  { %1778 = vmatpush1.bf16.msra.mxu0 %v18797_v23  ;;  %v18889_v23 = vld [vmem:[#allocation5 + $0x56c] ss:$16 sps:$4 sm:$0xff]  }
 0x1d6   :  { %1923 = vmatpush1.bf16.msra.mxu1 %v18800_v24  ;;  %1779 = vmatprep.subr.bf16.mxu0 %v18805_v25  ;;  %v18946_v24 = vld [vmem:[#allocation8 + $0x64] ss:$16 sps:$4 sm:$0xff]  }
 0x1d7   :  { %1924 = vmatprep.subr.bf16.mxu1 %v18808_v26  ;;  %v18887_v25 = vld [vmem:[#allocation5 + $0x568] ss:$16 sps:$4 sm:$0xff]   ;;  %v18944_v26 = vld [vmem:[#allocation8 + $0x60] ss:$16 sps:$4 sm:$0xff]  }
 0x1d9   :  { %1780 = vmatpush1.bf16.msra.mxu0 %v18803_v27  ;;  %v18892_v27 = vld [vmem:[#allocation5 + $0x58c] ss:$16 sps:$4 sm:$0xff]  }
 0x1da   :  { %1925 = vmatpush1.bf16.msra.mxu1 %v18806_v28  ;;  %1781 = vmatprep.subr.bf16.mxu0 %v18811_v29  ;;  %v18952_v28 = vld [vmem:[#allocation8 + $0x84] ss:$16 sps:$4 sm:$0xff]  }
 0x1db   :  { %1926 = vmatprep.subr.bf16.mxu1 %v18814_v30  ;;  %v18890_v29 = vld [vmem:[#allocation5 + $0x588] ss:$16 sps:$4 sm:$0xff]   ;;  %v18950_v30 = vld [vmem:[#allocation8 + $0x80] ss:$16 sps:$4 sm:$0xff]  }
 0x1dd   :  { %1782 = vmatpush1.bf16.msra.mxu0 %v18809_v31  ;;  %v18895_v31 = vld [vmem:[#allocation5 + $0x5ac] ss:$16 sps:$4 sm:$0xff]  }
 0x1de   :  { %1927 = vmatpush1.bf16.msra.mxu1 %v18812_v32  ;;  %1783 = vmatprep.subr.bf16.mxu0 %v18817_v33  ;;  %v18958_v32 = vld [vmem:[#allocation8 + $0xa4] ss:$16 sps:$4 sm:$0xff]  }
 0x1df   :  { %1928 = vmatprep.subr.bf16.mxu1 %v18820_v34  ;;  %v18893_v33 = vld [vmem:[#allocation5 + $0x5a8] ss:$16 sps:$4 sm:$0xff]   ;;  %v18956_v34 = vld [vmem:[#allocation8 + $0xa0] ss:$16 sps:$4 sm:$0xff]  }
 0x1e1   :  { %1784 = vmatpush1.bf16.msra.mxu0 %v18815_v35  ;;  %v18898_v35 = vld [vmem:[#allocation5 + $0x5cc] ss:$16 sps:$4 sm:$0xff]  }
 0x1e2   :  { %1929 = vmatpush1.bf16.msra.mxu1 %v18818_v36  ;;  %1785 = vmatprep.subr.bf16.mxu0 %v18823_v37  ;;  %v18964_v36 = vld [vmem:[#allocation8 + $0xc4] ss:$16 sps:$4 sm:$0xff]  }
 0x1e3   :  { %1930 = vmatprep.subr.bf16.mxu1 %v18826_v38  ;;  %v18896_v37 = vld [vmem:[#allocation5 + $0x5c8] ss:$16 sps:$4 sm:$0xff]   ;;  %v18962_v38 = vld [vmem:[#allocation8 + $0xc0] ss:$16 sps:$4 sm:$0xff]  }
 0x1e5   :  { %1786 = vmatpush1.bf16.msra.mxu0 %v18821_v39  ;;  %v18901_v39 = vld [vmem:[#allocation5 + $0x5ec] ss:$16 sps:$4 sm:$0xff]  }
 0x1e6   :  { %1931 = vmatpush1.bf16.msra.mxu1 %v18824_v40  ;;  %1787 = vmatprep.subr.bf16.mxu0 %v18829_v41  ;;  %v18970_v40 = vld [vmem:[#allocation8 + $0xe4] ss:$16 sps:$4 sm:$0xff]  }
 0x1e7   :  { %1943 = vmatprep.subr.bf16.mxu1 %v18832_v42  ;;  %v18899_v41 = vld [vmem:[#allocation5 + $0x5e8] ss:$16 sps:$4 sm:$0xff]   ;;  %v18968_v42 = vld [vmem:[#allocation8 + $0xe0] ss:$16 sps:$4 sm:$0xff]  }
 0x1e9   :  { %1933 = vmatmul.mubr.bf16.vlgmr.msra.gmra.mrb[4].mxu1 %v21329_v9  ;;  %1788 = vmatpush1.bf16.msra.mxu0 %v18827_v43  ;;  %v18872_v9 = vld [vmem:[#allocation5 + $0x4e8] ss:$16 sps:$4 sm:$0xff]   ;;  %v18904_v43 = vld [vmem:[#allocation5 + $0x60c] ss:$16 sps:$4 sm:$0xff]  }
 0x1ea   :  { %1944 = vmatpush1.bf16.msra.mxu1 %v18830_v44  ;;  %1789 = vmatprep.subr.bf16.mxu0 %v18835_v45  ;;  %v18976_v44 = vld [vmem:[#allocation8 + $0x104] ss:$16 sps:$4 sm:$0xff]  }
 0x1eb   :  { %1945 = vmatprep.subr.bf16.mxu1 %v18838_v46  ;;  %1975 = vmatprep.mubr.bf16.mxu1 %v21332_v17  ;;  %v18881_v17 = vld [vmem:[#allocation5 + $0x528] ss:$16 sps:$4 sm:$0xff]   ;;  %v18907_v46 = vld [vmem:[#allocation5 + $0x62c] ss:$16 sps:$4 sm:$0xff]  }
 0x1ec   :  { %v18902_v45 = vld [vmem:[#allocation5 + $0x608] ss:$16 sps:$4 sm:$0xff]  }
 0x1ed   :  { %1790 = vmatpush1.bf16.msra.mxu0 %v18833_v47  ;;  %v18974_v47 = vld [vmem:[#allocation8 + $0x100] ss:$16 sps:$4 sm:$0xff]  }
 0x1ee   :  { %1946 = vmatpush1.bf16.msra.mxu1 %v18836_v48  ;;  %1791 = vmatprep.subr.bf16.mxu0 %v18841_v49  ;;  %v18982_v48 = vld [vmem:[#allocation8 + $0x124] ss:$16 sps:$4 sm:$0xff]  }
 0x1ef   :  { %1947 = vmatprep.subr.bf16.mxu1 %v18844_v50  ;;  %v18905_v49 = vld [vmem:[#allocation5 + $0x628] ss:$16 sps:$4 sm:$0xff]   ;;  %v18910_v50 = vld [vmem:[#allocation5 + $0x64c] ss:$16 sps:$4 sm:$0xff]  }
 0x1f1   :  { %1792 = vmatpush1.bf16.msra.mxu0 %v18839_v51  ;;  %v18980_v51 = vld [vmem:[#allocation8 + $0x120] ss:$16 sps:$4 sm:$0xff]  }
 0x1f2   :  { %1948 = vmatpush1.bf16.msra.mxu1 %v18842_v52  ;;  %1793 = vmatprep.subr.bf16.mxu0 %v18847_v53  ;;  %v18988_v52 = vld [vmem:[#allocation8 + $0x144] ss:$16 sps:$4 sm:$0xff]  }
 0x1f3   :  { %1949 = vmatprep.subr.bf16.mxu1 %v18850_v54  ;;  %v18908_v53 = vld [vmem:[#allocation5 + $0x648] ss:$16 sps:$4 sm:$0xff]   ;;  %v18913_v54 = vld [vmem:[#allocation5 + $0x66c] ss:$16 sps:$4 sm:$0xff]  }
 0x1f5   :  { %1794 = vmatpush1.bf16.msra.mxu0 %v18845_v55  ;;  %v18986_v55 = vld [vmem:[#allocation8 + $0x140] ss:$16 sps:$4 sm:$0xff]  }
 0x1f6   :  { %1950 = vmatpush1.bf16.msra.mxu1 %v18848_v56  ;;  %1795 = vmatprep.subr.bf16.mxu0 %v18853_v57  ;;  %v18994_v56 = vld [vmem:[#allocation8 + $0x164] ss:$16 sps:$4 sm:$0xff]  }
 0x1f7   :  { %1951 = vmatprep.subr.bf16.mxu1 %v18856_v58  ;;  %v18911_v57 = vld [vmem:[#allocation5 + $0x668] ss:$16 sps:$4 sm:$0xff]   ;;  %v18916_v58 = vld [vmem:[#allocation5 + $0x68c] ss:$16 sps:$4 sm:$0xff]  }
 0x1f9   :  { %1796 = vmatpush1.bf16.msra.mxu0 %v18851_v59  ;;  %v18992_v59 = vld [vmem:[#allocation8 + $0x160] ss:$16 sps:$4 sm:$0xff]  }
 0x1fa   :  { %1952 = vmatpush1.bf16.msra.mxu1 %v18854_v60  ;;  %1797 = vmatprep.subr.bf16.mxu0 %v18859_v61  ;;  %v19000_v60 = vld [vmem:[#allocation8 + $0x184] ss:$16 sps:$4 sm:$0xff]  }
 0x1fb   :  { %1953 = vmatprep.subr.bf16.mxu1 %v18862_v62  ;;  %v18914_v61 = vld [vmem:[#allocation5 + $0x688] ss:$16 sps:$4 sm:$0xff]   ;;  %v18919_v62 = vld [vmem:[#allocation5 + $0x6ac] ss:$16 sps:$4 sm:$0xff]  }
 0x1fd   :  { %1798 = vmatpush1.bf16.msra.mxu0 %v18857_v63  ;;  %v18998_v63 = vld [vmem:[#allocation8 + $0x180] ss:$16 sps:$4 sm:$0xff]  }
 0x1fe   :  { %1954 = vmatpush1.bf16.msra.mxu1 %v18860_v1  ;;  %1799 = vmatprep.subr.bf16.mxu0 %v18865_v2  ;;  %v18917_v1 = vld [vmem:[#allocation5 + $0x6a8] ss:$16 sps:$4 sm:$0xff]   ;;  %v18922_v2 = vld [vmem:[#allocation5 + $0x6cc] ss:$16 sps:$4 sm:$0xff]  }
 0x1ff   :  { %1955 = vmatprep.subr.bf16.mxu1 %v18868_v3 }
 0x201   :  { %1800 = vmatpush1.bf16.msra.mxu0 %v18863_v4  ;;  %v18920_v4 = vld [vmem:[#allocation5 + $0x6c8] ss:$16 sps:$4 sm:$0xff]  }
 0x202   :  { %1956 = vmatpush1.bf16.msra.mxu1 %v18866_v5  ;;  %1801 = vmatprep.subr.bf16.mxu0 %v18871_v6  ;;  %v18925_v6 = vld [vmem:[#allocation5 + $0x6ec] ss:$16 sps:$4 sm:$0xff]  }
 0x203   :  { %1957 = vmatprep.subr.bf16.mxu1 %v18874_v7 }
 0x205   :  { %1802 = vmatpush1.bf16.msra.mxu0 %v18869_v8 }
 0x206   :  { %1958 = vmatpush1.bf16.msra.mxu1 %v18872_v9  ;;  %2831 = vmatprep.subr.bf16.mxu0 %v18928_v12  ;;  %v18923_v9 = vld [vmem:[#allocation5 + $0x6e8] ss:$16 sps:$4 sm:$0xff]   ;;  %v18937_v12 = vld [vmem:[#allocation8 + $0x2c] ss:$16 sps:$4 sm:$0xff]  }
 0x207   :  { %1959 = vmatprep.subr.bf16.mxu1 %v18880_v10  ;;  %v18931_v10 = vld [vmem:[#allocation8 + $0xc] ss:$16 sps:$4 sm:$0xff]  }
 0x208   :  { %1804 = vmatmul.mubr.bf16.vlgmr.msra.gmra.mrb[0].mxu0 %v21337_v11 }
 0x209   :  { %2832 = vmatpush1.bf16.msra.mxu0 %v18926_v14  ;;  %v20526_v14 = vld [vmem:[#allocation2 + $0x18] ss:$28 sps:$4 sm:$0xff]  }
 0x20a   :  { %1960 = vmatpush1.bf16.msra.mxu1 %v18878_v13  ;;  %2833 = vmatprep.subr.bf16.mxu0 %v18934_v16  ;;  %v18935_v13 = vld [vmem:[#allocation8 + $0x28] ss:$16 sps:$4 sm:$0xff]  }
 0x20b   :  { %1961 = vmatprep.subr.bf16.mxu1 %v18883_v15  ;;  %v18943_v15 = vld [vmem:[#allocation8 + $0x4c] ss:$16 sps:$4 sm:$0xff]   ;;  %v18941_v16 = vld [vmem:[#allocation8 + $0x48] ss:$16 sps:$4 sm:$0xff]  }
 0x20d   :  { %2834 = vmatpush1.bf16.msra.mxu0 %v18932_v18  ;;  %v18947_v18 = vld [vmem:[#allocation8 + $0x68] ss:$16 sps:$4 sm:$0xff]  }
 0x20e   :  { %1962 = vmatpush1.bf16.msra.mxu1 %v18881_v17  ;;  %2835 = vmatprep.subr.bf16.mxu0 %v18940_v20  ;;  %v18949_v17 = vld [vmem:[#allocation8 + $0x6c] ss:$16 sps:$4 sm:$0xff]   ;;  %v18953_v20 = vld [vmem:[#allocation8 + $0x88] ss:$16 sps:$4 sm:$0xff]  }
 0x20f   :  { %1963 = vmatprep.subr.bf16.mxu1 %v18886_v19  ;;  %v18955_v19 = vld [vmem:[#allocation8 + $0x8c] ss:$16 sps:$4 sm:$0xff]  }
 0x211   :  { %2836 = vmatpush1.bf16.msra.mxu0 %v18938_v22  ;;  %v18959_v22 = vld [vmem:[#allocation8 + $0xa8] ss:$16 sps:$4 sm:$0xff]  }
 0x212   :  { %1964 = vmatpush1.bf16.msra.mxu1 %v18884_v21  ;;  %2837 = vmatprep.subr.bf16.mxu0 %v18946_v24  ;;  %v18961_v21 = vld [vmem:[#allocation8 + $0xac] ss:$16 sps:$4 sm:$0xff]  }
 0x213   :  { %1965 = vmatprep.subr.bf16.mxu1 %v18889_v23  ;;  %v19006_v23 = vld [vmem:[#allocation8 + $0x1a4] ss:$16 sps:$4 sm:$0xff]   ;;  %v18967_v24 = vld [vmem:[#allocation8 + $0xcc] ss:$16 sps:$4 sm:$0xff]  }
 0x215   :  { %2838 = vmatpush1.bf16.msra.mxu0 %v18944_v26  ;;  %v18965_v26 = vld [vmem:[#allocation8 + $0xc8] ss:$16 sps:$4 sm:$0xff]  }
 0x216   :  { %1966 = vmatpush1.bf16.msra.mxu1 %v18887_v25  ;;  %2839 = vmatprep.subr.bf16.mxu0 %v18952_v28  ;;  %v19004_v25 = vld [vmem:[#allocation8 + $0x1a0] ss:$16 sps:$4 sm:$0xff]   ;;  %v18973_v28 = vld [vmem:[#allocation8 + $0xec] ss:$16 sps:$4 sm:$0xff]  }
 0x217   :  { %1967 = vmatprep.subr.bf16.mxu1 %v18892_v27  ;;  %v19012_v27 = vld [vmem:[#allocation8 + $0x1c4] ss:$16 sps:$4 sm:$0xff]  }
 0x219   :  { %2840 = vmatpush1.bf16.msra.mxu0 %v18950_v30  ;;  %v18971_v30 = vld [vmem:[#allocation8 + $0xe8] ss:$16 sps:$4 sm:$0xff]  }
 0x21a   :  { %1968 = vmatpush1.bf16.msra.mxu1 %v18890_v29  ;;  %2841 = vmatprep.subr.bf16.mxu0 %v18958_v32  ;;  %v19010_v29 = vld [vmem:[#allocation8 + $0x1c0] ss:$16 sps:$4 sm:$0xff]   ;;  %v18979_v32 = vld [vmem:[#allocation8 + $0x10c] ss:$16 sps:$4 sm:$0xff]  }
 0x21b   :  { %1969 = vmatprep.subr.bf16.mxu1 %v18895_v31  ;;  %v19018_v31 = vld [vmem:[#allocation8 + $0x1e4] ss:$16 sps:$4 sm:$0xff]  }
 0x21d   :  { %2842 = vmatpush1.bf16.msra.mxu0 %v18956_v34  ;;  %v18977_v34 = vld [vmem:[#allocation8 + $0x108] ss:$16 sps:$4 sm:$0xff]  }
 0x21e   :  { %1970 = vmatpush1.bf16.msra.mxu1 %v18893_v33  ;;  %2843 = vmatprep.subr.bf16.mxu0 %v18964_v36  ;;  %v19016_v33 = vld [vmem:[#allocation8 + $0x1e0] ss:$16 sps:$4 sm:$0xff]   ;;  %v18985_v36 = vld [vmem:[#allocation8 + $0x12c] ss:$16 sps:$4 sm:$0xff]  }
 0x21f   :  { %1971 = vmatprep.subr.bf16.mxu1 %v18898_v35  ;;  %v19024_v35 = vld [vmem:[#allocation8 + $0x204] ss:$16 sps:$4 sm:$0xff]  }
 0x221   :  { %2844 = vmatpush1.bf16.msra.mxu0 %v18962_v38  ;;  %v18991_v38 = vld [vmem:[#allocation8 + $0x14c] ss:$16 sps:$4 sm:$0xff]  }
 0x222   :  { %1972 = vmatpush1.bf16.msra.mxu1 %v18896_v37  ;;  %2845 = vmatprep.subr.bf16.mxu0 %v18970_v40  ;;  %v18983_v37 = vld [vmem:[#allocation8 + $0x128] ss:$16 sps:$4 sm:$0xff]   ;;  %v18997_v40 = vld [vmem:[#allocation8 + $0x16c] ss:$16 sps:$4 sm:$0xff]  }
 0x223   :  { %1973 = vmatprep.subr.bf16.mxu1 %v18901_v39  ;;  %v18989_v39 = vld [vmem:[#allocation8 + $0x148] ss:$16 sps:$4 sm:$0xff]  }
 0x225   :  { %2846 = vmatpush1.bf16.msra.mxu0 %v18968_v42  ;;  %v19003_v42 = vld [vmem:[#allocation8 + $0x18c] ss:$16 sps:$4 sm:$0xff]  }
 0x226   :  { %1974 = vmatpush1.bf16.msra.mxu1 %v18899_v41  ;;  %2847 = vmatprep.subr.bf16.mxu0 %v18976_v44  ;;  %v18995_v41 = vld [vmem:[#allocation8 + $0x168] ss:$16 sps:$4 sm:$0xff]   ;;  %v19009_v44 = vld [vmem:[#allocation8 + $0x1ac] ss:$16 sps:$4 sm:$0xff]  }
 0x227   :  { %1986 = vmatprep.subr.bf16.mxu1 %v18904_v43  ;;  %v19001_v43 = vld [vmem:[#allocation8 + $0x188] ss:$16 sps:$4 sm:$0xff]  }
 0x229   :  { %1976 = vmatmul.mubr.bf16.vlgmr.msra.gmra.mrb[4].mxu1 %v21337_v11  ;;  %2848 = vmatpush1.bf16.msra.mxu0 %v18974_v47  ;;  %v18929_v11 = vld [vmem:[#allocation8 + $0x8] ss:$16 sps:$4 sm:$0xff]  }
 0x22a   :  { %1987 = vmatpush1.bf16.msra.mxu1 %v18902_v45  ;;  %2018 = vmatprep.mubr.bf16.mxu1 %v20991_v0  ;;  %v19007_v45 = vld [vmem:[#allocation8 + $0x1a8] ss:$16 sps:$4 sm:$0xff]  }
 0x22b   :  { %1988 = vmatprep.subr.bf16.mxu1 %v18907_v46  ;;  %2849 = vmatprep.subr.bf16.mxu0 %v18982_v48  ;;  %v19015_v46 = vld [vmem:[#allocation8 + $0x1cc] ss:$16 sps:$4 sm:$0xff]   ;;  %v19013_v47 = vld [vmem:[#allocation8 + $0x1c8] ss:$16 sps:$4 sm:$0xff]  }
 0x22c   :  { %v19021_v48 = vld [vmem:[#allocation8 + $0x1ec] ss:$16 sps:$4 sm:$0xff]  }
 0x22d   :  { %2850 = vmatpush1.bf16.msra.mxu0 %v18980_v51  ;;  %v509_v51 = vlaneseq }
 0x22e   :  { %1989 = vmatpush1.bf16.msra.mxu1 %v18905_v49  ;;  %2851 = vmatprep.subr.bf16.mxu0 %v18988_v52  ;;  %v19019_v49 = vld [vmem:[#allocation8 + $0x1e8] ss:$16 sps:$4 sm:$0xff]  }
 0x22f   :  { %1990 = vmatprep.subr.bf16.mxu1 %v18910_v50  ;;  %v19027_v50 = vld [vmem:[#allocation8 + $0x20c] ss:$16 sps:$4 sm:$0xff]   ;;  %v21350_v52 = vshrl.u32 %v509_v51, 7  ;;  %v19084_v51 = vld [vmem:[#allocation8 + $0x344] ss:$16 sps:$4 sm:$0xff]  }
 0x231   :  { %2852 = vmatpush1.bf16.msra.mxu0 %v18986_v55  ;;  %v21358_v55 = vsub.s32 1, %v21350_v52 }
 0x232   :  { %1991 = vmatpush1.bf16.msra.mxu1 %v18908_v53  ;;  %2853 = vmatprep.subr.bf16.mxu0 %v18994_v56  ;;  %v21353_v53 = vsub.s32 0, %v21350_v52 }
 0x233   :  { %1992 = vmatprep.subr.bf16.mxu1 %v18913_v54  ;;  %v21355_v54 = vld [vmem:[#allocation7] sm:$0xf] }
 0x234   :  { %v512_v56 = vrot.slane %v21355_v54, %v21353_v53 }
 0x235   :  { %2854 = vmatpush1.bf16.msra.mxu0 %v18992_v59 }
 0x236   :  { %1993 = vmatpush1.bf16.msra.mxu1 %v18911_v57  ;;  %2855 = vmatprep.subr.bf16.mxu0 %v19000_v60  ;;  %v516_v57 = vrot.slane %v21355_v54, %v21358_v55 }
 0x237   :  { %1994 = vmatprep.subr.bf16.mxu1 %v18916_v58 }
 0x239   :  { %2856 = vmatpush1.bf16.msra.mxu0 %v18998_v63 }
 0x23a   :  { %1995 = vmatpush1.bf16.msra.mxu1 %v18914_v61  ;;  %2857 = vmatprep.subr.bf16.mxu0 %v19006_v23  ;;  %v19042_v23 = vld [vmem:[#allocation8 + $0x264] ss:$16 sps:$4 sm:$0xff]  }
 0x23b   :  { %1996 = vmatprep.subr.bf16.mxu1 %v18919_v62 }
 0x23c   :  { %v21342_v3 = vpop.f32.mrb[0].mxu1 }
 0x23d   :  { %v21344_v5 = vpop.f32.mrb[1].mxu1  ;;  %2858 = vmatpush1.bf16.msra.mxu0 %v19004_v25  ;;  %v19040_v25 = vld [vmem:[#allocation8 + $0x260] ss:$16 sps:$4 sm:$0xff]  }
 0x23e   :  { %v21346_v7 = vpop.f32.mrb[2].mxu1  ;;  %1997 = vmatpush1.bf16.msra.mxu1 %v18917_v1  ;;  %2859 = vmatprep.subr.bf16.mxu0 %v19012_v27  ;;  %v19048_v27 = vld [vmem:[#allocation8 + $0x284] ss:$16 sps:$4 sm:$0xff]  }
 0x23f   :  { %v21348_v8 = vpop.f32.mrb[3].mxu1  ;;  %1998 = vmatprep.subr.bf16.mxu1 %v18922_v2 }
 0x241   :  { %2860 = vmatpush1.bf16.msra.mxu0 %v19010_v29  ;;  %v19046_v29 = vld [vmem:[#allocation8 + $0x280] ss:$16 sps:$4 sm:$0xff]  }
 0x242   :  { %1999 = vmatpush1.bf16.msra.mxu1 %v18920_v4  ;;  %2861 = vmatprep.subr.bf16.mxu0 %v19018_v31  ;;  %v19054_v31 = vld [vmem:[#allocation8 + $0x2a4] ss:$16 sps:$4 sm:$0xff]  }
 0x243   :  { %2000 = vmatprep.subr.bf16.mxu1 %v18925_v6 }
 0x245   :  { %2862 = vmatpush1.bf16.msra.mxu0 %v19016_v33  ;;  %v19052_v33 = vld [vmem:[#allocation8 + $0x2a0] ss:$16 sps:$4 sm:$0xff]  }
 0x246   :  { %2001 = vmatpush1.bf16.msra.mxu1 %v18923_v9  ;;  %2874 = vmatprep.subr.bf16.mxu0 %v19024_v35  ;;  %v19060_v35 = vld [vmem:[#allocation8 + $0x2c4] ss:$16 sps:$4 sm:$0xff]  }
 0x247   :  { %2917 = vmatprep.subr.bf16.mxu1 %v18931_v10 }
 0x249   :  { %2019 = vmatmul.mubr.bf16.vlgmr.msra.gmra.mrb[4].mxu1 %v20526_v14 }
 0x24a   :  { %2918 = vmatpush1.bf16.msra.mxu1 %v18929_v11 }
 0x24b   :  { %2919 = vmatprep.subr.bf16.mxu1 %v18937_v12 }
 0x24e   :  { %2920 = vmatpush1.bf16.msra.mxu1 %v18935_v13 }
 0x24f   :  { %2921 = vmatprep.subr.bf16.mxu1 %v18943_v15  ;;  %v19022_v15 = vld [vmem:[#allocation8 + $0x200] ss:$16 sps:$4 sm:$0xff]  }
 0x252   :  { %2922 = vmatpush1.bf16.msra.mxu1 %v18941_v16  ;;  %v19025_v16 = vld [vmem:[#allocation8 + $0x208] ss:$16 sps:$4 sm:$0xff]  }
 0x253   :  { %2923 = vmatprep.subr.bf16.mxu1 %v18949_v17 }
 0x256   :  { %2924 = vmatpush1.bf16.msra.mxu1 %v18947_v18  ;;  %v19030_v18 = vld [vmem:[#allocation8 + $0x224] ss:$16 sps:$4 sm:$0xff]  }
 0x257   :  { %2925 = vmatprep.subr.bf16.mxu1 %v18955_v19  ;;  %v19033_v19 = vld [vmem:[#allocation8 + $0x22c] ss:$16 sps:$4 sm:$0xff]  }
 0x25a   :  { %2926 = vmatpush1.bf16.msra.mxu1 %v18953_v20 }
 0x25b   :  { %2927 = vmatprep.subr.bf16.mxu1 %v18961_v21  ;;  %v19031_v21 = vld [vmem:[#allocation8 + $0x228] ss:$16 sps:$4 sm:$0xff]  }
 0x25e   :  { %2928 = vmatpush1.bf16.msra.mxu1 %v18959_v22  ;;  %v19037_v22 = vld [vmem:[#allocation8 + $0x248] ss:$16 sps:$4 sm:$0xff]  }
 0x25f   :  { %2929 = vmatprep.subr.bf16.mxu1 %v18967_v24  ;;  %v19045_v24 = vld [vmem:[#allocation8 + $0x26c] ss:$16 sps:$4 sm:$0xff]  }
 0x262   :  { %2930 = vmatpush1.bf16.msra.mxu1 %v18965_v26  ;;  %v19043_v26 = vld [vmem:[#allocation8 + $0x268] ss:$16 sps:$4 sm:$0xff]  }
 0x263   :  { %2931 = vmatprep.subr.bf16.mxu1 %v18973_v28  ;;  %v19051_v28 = vld [vmem:[#allocation8 + $0x28c] ss:$16 sps:$4 sm:$0xff]  }
 0x266   :  { %2932 = vmatpush1.bf16.msra.mxu1 %v18971_v30  ;;  %v19049_v30 = vld [vmem:[#allocation8 + $0x288] ss:$16 sps:$4 sm:$0xff]  }
 0x267   :  { %2933 = vmatprep.subr.bf16.mxu1 %v18979_v32  ;;  %v19057_v32 = vld [vmem:[#allocation8 + $0x2ac] ss:$16 sps:$4 sm:$0xff]  }
 0x26a   :  { %2934 = vmatpush1.bf16.msra.mxu1 %v18977_v34  ;;  %v19055_v34 = vld [vmem:[#allocation8 + $0x2a8] ss:$16 sps:$4 sm:$0xff]  }
 0x26b   :  { %2935 = vmatprep.subr.bf16.mxu1 %v18985_v36  ;;  %v19063_v36 = vld [vmem:[#allocation8 + $0x2cc] ss:$16 sps:$4 sm:$0xff]  }
 0x26e   :  { %2936 = vmatpush1.bf16.msra.mxu1 %v18983_v37  ;;  %v19058_v37 = vld [vmem:[#allocation8 + $0x2c0] ss:$16 sps:$4 sm:$0xff]  }
 0x26f   :  { %2937 = vmatprep.subr.bf16.mxu1 %v18991_v38  ;;  %v19061_v38 = vld [vmem:[#allocation8 + $0x2c8] ss:$16 sps:$4 sm:$0xff]  }
 0x272   :  { %2938 = vmatpush1.bf16.msra.mxu1 %v18989_v39  ;;  %v19066_v39 = vld [vmem:[#allocation8 + $0x2e4] ss:$16 sps:$4 sm:$0xff]  }
 0x273   :  { %2939 = vmatprep.subr.bf16.mxu1 %v18997_v40  ;;  %v19069_v40 = vld [vmem:[#allocation8 + $0x2ec] ss:$16 sps:$4 sm:$0xff]  }
 0x276   :  { %2940 = vmatpush1.bf16.msra.mxu1 %v18995_v41  ;;  %v19064_v41 = vld [vmem:[#allocation8 + $0x2e0] ss:$16 sps:$4 sm:$0xff]  }
 0x277   :  { %2941 = vmatprep.subr.bf16.mxu1 %v19003_v42  ;;  %v19067_v42 = vld [vmem:[#allocation8 + $0x2e8] ss:$16 sps:$4 sm:$0xff]  }
 0x27a   :  { %2942 = vmatpush1.bf16.msra.mxu1 %v19001_v43  ;;  %v19072_v43 = vld [vmem:[#allocation8 + $0x304] ss:$16 sps:$4 sm:$0xff]  }
 0x27b   :  { %2943 = vmatprep.subr.bf16.mxu1 %v19009_v44  ;;  %v19075_v44 = vld [vmem:[#allocation8 + $0x30c] ss:$16 sps:$4 sm:$0xff]  }
 0x27e   :  { %2944 = vmatpush1.bf16.msra.mxu1 %v19007_v45  ;;  %v19070_v45 = vld [vmem:[#allocation8 + $0x300] ss:$16 sps:$4 sm:$0xff]  }
 0x27f   :  { %2945 = vmatprep.subr.bf16.mxu1 %v19015_v46  ;;  %v19073_v46 = vld [vmem:[#allocation8 + $0x308] ss:$16 sps:$4 sm:$0xff]  }
 0x282   :  { %2946 = vmatpush1.bf16.msra.mxu1 %v19013_v47  ;;  %v19078_v47 = vld [vmem:[#allocation8 + $0x324] ss:$16 sps:$4 sm:$0xff]  }
 0x283   :  { %2947 = vmatprep.subr.bf16.mxu1 %v19021_v48  ;;  %v19081_v48 = vld [vmem:[#allocation8 + $0x32c] ss:$16 sps:$4 sm:$0xff]  }
 0x286   :  { %2948 = vmatpush1.bf16.msra.mxu1 %v19019_v49  ;;  %v19076_v49 = vld [vmem:[#allocation8 + $0x320] ss:$16 sps:$4 sm:$0xff]  }
 0x287   :  { %2960 = vmatprep.subr.bf16.mxu1 %v19027_v50  ;;  %v19079_v50 = vld [vmem:[#allocation8 + $0x328] ss:$16 sps:$4 sm:$0xff]  }
 0x2db   :  { %v1805_v58 = vpop.f32.mrb[0].mxu0 }
 0x2dc   :  { %v18333_v59 = vadd.f32 %v1805_v58, %v512_v56  ;;  %v1807_v60 = vpop.f32.mrb[1].mxu0  ;;  %v19085_v58 = vld [vmem:[#allocation8 + $0x348] ss:$16 sps:$4 sm:$0xff]  }
 0x2dd   :  { %v18335_v61 = vadd.f32 %v1807_v60, %v516_v57  ;;  %v1809_v62 = vpop.f32.mrb[2].mxu0  ;;  %v19093_v60 = vld [vmem:[#allocation8 + $0x36c] ss:$16 sps:$4 sm:$0xff]  }
 0x2de   :  { %v18334_v63 = vadd.f32 %v18333_v59, %v21342_v3  ;;  %v18337_v1 = vadd.f32 %v1809_v62, %v512_v56  ;;  %v1811_v2 = vpop.f32.mrb[3].mxu0  ;;  %v19028_v3 = vld [vmem:[#allocation8 + $0x220] ss:$16 sps:$4 sm:$0xff]   ;;  %v19087_v56 = vld [vmem:[#allocation8 + $0x34c] ss:$16 sps:$4 sm:$0xff]  }
 0x2df   :  { %v18336_v4 = vadd.f32 %v18335_v61, %v21344_v5  ;;  %v18339_v6 = vadd.f32 %v1811_v2, %v516_v57  ;;  %v19036_v5 = vld [vmem:[#allocation8 + $0x244] ss:$16 sps:$4 sm:$0xff]   ;;  %v19082_v57 = vld [vmem:[#allocation8 + $0x340] ss:$16 sps:$4 sm:$0xff]   ;;  %v19091_v62 = vld [vmem:[#allocation8 + $0x368] ss:$16 sps:$4 sm:$0xff]  }
 0x2e0   :  { %v18338_v9 = vadd.f32 %v18337_v1, %v21346_v7  ;;  %v2029_v11 = vmax.f32 %v18334_v63, 0.0  ;;  %v19039_v7 = vld [vmem:[#allocation8 + $0x24c] ss:$16 sps:$4 sm:$0xff]   ;;  %v19090_v59 = vld [vmem:[#allocation8 + $0x364] ss:$16 sps:$4 sm:$0xff]  }
 0x2e1   :  { %v18340_v10 = vadd.f32 %v18339_v6, %v21348_v8  ;;  %v2030_v13 = vmax.f32 %v18336_v4, 0.0  ;;  %v19034_v8 = vld [vmem:[#allocation8 + $0x240] ss:$16 sps:$4 sm:$0xff]   ;;  %v19096_v63 = vld [vmem:[#allocation8 + $0x384] ss:$16 sps:$4 sm:$0xff]   ;;  %v21369_v6 = vsub.s32 2, %v21350_v52 }
 0x2e2   :  { %v2033_v12 = vmax.f32 %v18338_v9, 0.0  ;;  %v19088_v61 = vld [vmem:[#allocation8 + $0x360] ss:$16 sps:$4 sm:$0xff]   ;;  %v19099_v1 = vld [vmem:[#allocation8 + $0x38c] ss:$16 sps:$4 sm:$0xff]  }
 0x2e3   :  { %v2034_v14 = vmax.f32 %v18340_v10, 0.0  ;;  %v19094_v2 = vld [vmem:[#allocation8 + $0x380] ss:$16 sps:$4 sm:$0xff]   ;;  %v19097_v4 = vld [vmem:[#allocation8 + $0x388] ss:$16 sps:$4 sm:$0xff]  }
 0x2e4   :  { %v2037_v17 = vpack.c.bf16 %v2033_v12, %v2029_v11  ;;  %v19102_v9 = vld [vmem:[#allocation8 + $0x3a4] ss:$16 sps:$4 sm:$0xff]   ;;  %v19105_v10 = vld [vmem:[#allocation8 + $0x3ac] ss:$16 sps:$4 sm:$0xff]   ;;  %v21372_v11 = vsub.s32 3, %v21350_v52 }
 0x2e5   :  { %v2038_v20 = vpack.c.bf16 %v2034_v14, %v2030_v13  ;;  %v19100_v12 = vld [vmem:[#allocation8 + $0x3a0] ss:$16 sps:$4 sm:$0xff]   ;;  %v19103_v13 = vld [vmem:[#allocation8 + $0x3a8] ss:$16 sps:$4 sm:$0xff]   ;;  %v520_v14 = vrot.slane %v21355_v54, %v21369_v6 }
 0x2e7   :  { %2863 = vmatprep.mubr.bf16.mxu0 %v2038_v20  ;;  %2949 = vmatprep.mubr.bf16.mxu1 %v2038_v20  ;;  %v19109_v20 = vld [vmem:[#allocation8 + $0x3c8] ss:$16 sps:$4 sm:$0xff]  }
 0x2e8   :  { %2864 = vmatmul.mubr.bf16.vlgmr.msra.gmra.mrb[4].mxu0 %v2037_v17  ;;  %2950 = vmatmul.mubr.bf16.vlgmr.msra.gmra.mrb[8].mxu1 %v2037_v17  ;;  %v524_v17 = vrot.slane %v21355_v54, %v21372_v11  ;;  %v3016_v54 = vld [vmem:[#allocation11 + $0x8] sm:$0xff] }
 0x2e9   :  { %2875 = vmatpush1.bf16.msra.mxu0 %v19022_v15  ;;  %2961 = vmatpush1.bf16.msra.mxu1 %v19025_v16  ;;  %v19108_v15 = vld [vmem:[#allocation8 + $0x3c4] ss:$16 sps:$4 sm:$0xff]   ;;  %v19111_v16 = vld [vmem:[#allocation8 + $0x3cc] ss:$16 sps:$4 sm:$0xff]  }
 0x2ea   :  { %2876 = vmatprep.subr.bf16.mxu0 %v19030_v18  ;;  %2962 = vmatprep.subr.bf16.mxu1 %v19033_v19  ;;  %v19106_v19 = vld [vmem:[#allocation8 + $0x3c0] ss:$16 sps:$4 sm:$0xff]  }
 0x2ed   :  { %2877 = vmatpush1.bf16.msra.mxu0 %v19028_v3  ;;  %2963 = vmatpush1.bf16.msra.mxu1 %v19031_v21 }
 0x2ee   :  { %2878 = vmatprep.subr.bf16.mxu0 %v19036_v5  ;;  %2964 = vmatprep.subr.bf16.mxu1 %v19039_v7  ;;  %v19114_v5 = vld [vmem:[#allocation8 + $0x3e4] ss:$16 sps:$4 sm:$0xff]   ;;  %v19117_v7 = vld [vmem:[#allocation8 + $0x3ec] ss:$16 sps:$4 sm:$0xff]  }
 0x2f1   :  { %2879 = vmatpush1.bf16.msra.mxu0 %v19034_v8  ;;  %2965 = vmatpush1.bf16.msra.mxu1 %v19037_v22 }
 0x2f2   :  { %2880 = vmatprep.subr.bf16.mxu0 %v19042_v23  ;;  %2966 = vmatprep.subr.bf16.mxu1 %v19045_v24 }
 0x2f5   :  { %2881 = vmatpush1.bf16.msra.mxu0 %v19040_v25  ;;  %2967 = vmatpush1.bf16.msra.mxu1 %v19043_v26  ;;  %v3015_v25 = vld [vmem:[#allocation11] sm:$0xff] }
 0x2f6   :  { %2882 = vmatprep.subr.bf16.mxu0 %v19048_v27  ;;  %2968 = vmatprep.subr.bf16.mxu1 %v19051_v28  ;;  %v3023_v26 = vld [vmem:[#allocation11 + $0x40] sm:$0xff]  ;;  %v3024_v27 = vld [vmem:[#allocation11 + $0x48] sm:$0xff] }
 0x2f9   :  { %2883 = vmatpush1.bf16.msra.mxu0 %v19046_v29  ;;  %2969 = vmatpush1.bf16.msra.mxu1 %v19049_v30  ;;  %v19112_v29 = vld [vmem:[#allocation8 + $0x3e0] ss:$16 sps:$4 sm:$0xff]   ;;  %v19115_v30 = vld [vmem:[#allocation8 + $0x3e8] ss:$16 sps:$4 sm:$0xff]  }
 0x2fa   :  { %2884 = vmatprep.subr.bf16.mxu0 %v19054_v31  ;;  %2970 = vmatprep.subr.bf16.mxu1 %v19057_v32 }
 0x2fd   :  { %2885 = vmatpush1.bf16.msra.mxu0 %v19052_v33  ;;  %2971 = vmatpush1.bf16.msra.mxu1 %v19055_v34 }
 0x2fe   :  { %2886 = vmatprep.subr.bf16.mxu0 %v19060_v35  ;;  %2972 = vmatprep.subr.bf16.mxu1 %v19063_v36  ;;  %v3031_v35 = vld [vmem:[#allocation11 + $0x80] sm:$0xff] }
 0x2ff   :  { %v3039_v36 = vld [vmem:[#allocation11 + $0xc0] sm:$0xff] }
 0x301   :  { %2887 = vmatpush1.bf16.msra.mxu0 %v19058_v37  ;;  %2973 = vmatpush1.bf16.msra.mxu1 %v19061_v38  ;;  %v3032_v37 = vld [vmem:[#allocation11 + $0x88] sm:$0xff] }
 0x302   :  { %2888 = vmatprep.subr.bf16.mxu0 %v19066_v39  ;;  %2974 = vmatprep.subr.bf16.mxu1 %v19069_v40  ;;  %v3040_v38 = vld [vmem:[#allocation11 + $0xc8] sm:$0xff] }
 0x305   :  { %2889 = vmatpush1.bf16.msra.mxu0 %v19064_v41  ;;  %2975 = vmatpush1.bf16.msra.mxu1 %v19067_v42  ;;  %v16481_v41 = vcombine.high %v3015_v25, %v3023_v26  ;;  %v16483_v42 = vcombine.high %v3016_v54, %v3024_v27 }
 0x306   :  { %2890 = vmatprep.subr.bf16.mxu0 %v19072_v43  ;;  %2976 = vmatprep.subr.bf16.mxu1 %v19075_v44  ;;  %v16480_v43 = vcombine.low %v3015_v25, %v3023_v26  ;;  %v16482_v44 = vcombine.low %v3016_v54, %v3024_v27  ;;  %v3127_v27 = vld [vmem:[#allocation11 + $0x380] sm:$0xff] }
 0x309   :  { %2891 = vmatpush1.bf16.msra.mxu0 %v19070_v45  ;;  %2977 = vmatpush1.bf16.msra.mxu1 %v19073_v46  ;;  %v3047_v45 = vld [vmem:[#allocation11 + $0x100] sm:$0xff] }
 0x30a   :  { %2892 = vmatprep.subr.bf16.mxu0 %v19078_v47  ;;  %2978 = vmatprep.subr.bf16.mxu1 %v19081_v48  ;;  %v3055_v46 = vld [vmem:[#allocation11 + $0x140] sm:$0xff]  ;;  %v3048_v47 = vld [vmem:[#allocation11 + $0x108] sm:$0xff] }
 0x30b   :  { %v3056_v48 = vld [vmem:[#allocation11 + $0x148] sm:$0xff] }
 0x30d   :  { %2893 = vmatpush1.bf16.msra.mxu0 %v19076_v49  ;;  %2979 = vmatpush1.bf16.msra.mxu1 %v19079_v50  ;;  %v16497_v49 = vcombine.high %v3031_v35, %v3039_v36  ;;  %v16499_v50 = vcombine.high %v3032_v37, %v3040_v38 }
 0x30e   :  { %2894 = vmatprep.subr.bf16.mxu0 %v19084_v51  ;;  %2980 = vmatprep.subr.bf16.mxu1 %v19087_v56  ;;  %v16496_v51 = vcombine.low %v3031_v35, %v3039_v36  ;;  %v16498_v56 = vcombine.low %v3032_v37, %v3040_v38  ;;  %v3143_v35 = vld [vmem:[#allocation11 + $0x400] sm:$0xff]  ;;  %v3144_v37 = vld [vmem:[#allocation11 + $0x408] sm:$0xff] }
 0x30f   :  { %v3151_v36 = vld [vmem:[#allocation11 + $0x440] sm:$0xff]  ;;  %v3152_v38 = vld [vmem:[#allocation11 + $0x448] sm:$0xff] }
 0x311   :  { %2895 = vmatpush1.bf16.msra.mxu0 %v19082_v57  ;;  %2981 = vmatpush1.bf16.msra.mxu1 %v19085_v58  ;;  %v3063_v57 = vld [vmem:[#allocation11 + $0x180] sm:$0xff] }
 0x312   :  { %2896 = vmatprep.subr.bf16.mxu0 %v19090_v59  ;;  %2982 = vmatprep.subr.bf16.mxu1 %v19093_v60  ;;  %v3071_v58 = vld [vmem:[#allocation11 + $0x1c0] sm:$0xff]  ;;  %v3064_v59 = vld [vmem:[#allocation11 + $0x188] sm:$0xff] }
 0x313   :  { %v3072_v60 = vld [vmem:[#allocation11 + $0x1c8] sm:$0xff] }
 0x315   :  { %2897 = vmatpush1.bf16.msra.mxu0 %v19088_v61  ;;  %2983 = vmatpush1.bf16.msra.mxu1 %v19091_v62  ;;  %v16513_v61 = vcombine.high %v3047_v45, %v3055_v46  ;;  %v16515_v62 = vcombine.high %v3048_v47, %v3056_v48 }
 0x316   :  { %2898 = vmatprep.subr.bf16.mxu0 %v19096_v63  ;;  %2984 = vmatprep.subr.bf16.mxu1 %v19099_v1  ;;  %v16512_v63 = vcombine.low %v3047_v45, %v3055_v46  ;;  %v16514_v1 = vcombine.low %v3048_v47, %v3056_v48  ;;  %v3160_v45 = vld [vmem:[#allocation11 + $0x488] sm:$0xff]  ;;  %v16609_v47 = vcombine.high %v3143_v35, %v3151_v36 }
 0x317   :  { %v3168_v46 = vld [vmem:[#allocation11 + $0x4c8] sm:$0xff]  ;;  %v16611_v48 = vcombine.high %v3144_v37, %v3152_v38 }
 0x319   :  { %2899 = vmatpush1.bf16.msra.mxu0 %v19094_v2  ;;  %2985 = vmatpush1.bf16.msra.mxu1 %v19097_v4  ;;  %v3079_v2 = vld [vmem:[#allocation11 + $0x200] sm:$0xff] }
 0x31a   :  { %2900 = vmatprep.subr.bf16.mxu0 %v19102_v9  ;;  %2986 = vmatprep.subr.bf16.mxu1 %v19105_v10  ;;  %v3087_v4 = vld [vmem:[#allocation11 + $0x240] sm:$0xff]  ;;  %v3080_v9 = vld [vmem:[#allocation11 + $0x208] sm:$0xff] }
 0x31b   :  { %v3088_v10 = vld [vmem:[#allocation11 + $0x248] sm:$0xff] }
 0x31c   :  { %v2020_v18 = vpop.f32.mrb[4].mxu1 }
 0x31d   :  { %v18341_v3 = vadd.f32 %v2020_v18, %v520_v14  ;;  %v2022_v21 = vpop.f32.mrb[5].mxu1  ;;  %2901 = vmatpush1.bf16.msra.mxu0 %v19100_v12  ;;  %2987 = vmatpush1.bf16.msra.mxu1 %v19103_v13  ;;  %v16529_v12 = vcombine.high %v3063_v57, %v3071_v58  ;;  %v16531_v13 = vcombine.high %v3064_v59, %v3072_v60  ;;  %v3096_v18 = vld [vmem:[#allocation11 + $0x288] sm:$0xff] }
 0x31e   :  { %v18342_v8 = vadd.f32 %v2022_v21, %v524_v17  ;;  %v2024_v22 = vpop.f32.mrb[6].mxu1  ;;  %2902 = vmatprep.subr.bf16.mxu0 %v19108_v15  ;;  %2988 = vmatprep.subr.bf16.mxu1 %v19111_v16  ;;  %v16530_v15 = vcombine.low %v3064_v59, %v3072_v60  ;;  %v3095_v16 = vld [vmem:[#allocation11 + $0x280] sm:$0xff]  ;;  %v16544_v21 = vcombine.low %v3079_v2, %v3087_v4 }
 0x31f   :  { %v18343_v23 = vadd.f32 %v2024_v22, %v520_v14  ;;  %v2026_v24 = vpop.f32.mrb[7].mxu1  ;;  %v2031_v31 = vmax.f32 %v18341_v3, 0.0  ;;  %v16528_v14 = vcombine.low %v3063_v57, %v3071_v58  ;;  %v16547_v3 = vcombine.high %v3080_v9, %v3088_v10  ;;  %v3112_v22 = vld [vmem:[#allocation11 + $0x308] sm:$0xff] }
 0x320   :  { %v18344_v28 = vadd.f32 %v2026_v24, %v524_v17  ;;  %v2032_v33 = vmax.f32 %v18342_v8, 0.0  ;;  %v3103_v17 = vld [vmem:[#allocation11 + $0x2c0] sm:$0xff]  ;;  %v3176_v57 = vld [vmem:[#allocation11 + $0x508] sm:$0xff]  ;;  %v16627_v60 = vcombine.high %v3160_v45, %v3168_v46 }
 0x321   :  { %v2035_v32 = vmax.f32 %v18343_v23, 0.0  ;;  %2903 = vmatpush1.bf16.msra.mxu0 %v19106_v19  ;;  %2989 = vmatpush1.bf16.msra.mxu1 %v19109_v20  ;;  %v3104_v19 = vld [vmem:[#allocation11 + $0x2c8] sm:$0xff]  ;;  %v16545_v20 = vcombine.high %v3079_v2, %v3087_v4  ;;  %v3119_v8 = vld [vmem:[#allocation11 + $0x340] sm:$0xff]  ;;  %v16561_v24 = vcombine.high %v3095_v16, %v3103_v17  ;;  %v16560_v26 = vcombine.low %v3095_v16, %v3103_v17 }
 0x322   :  { %v2036_v34 = vmax.f32 %v18344_v28, 0.0  ;;  %2904 = vmatprep.subr.bf16.mxu0 %v19114_v5  ;;  %2990 = vmatprep.subr.bf16.mxu1 %v19117_v7  ;;  %v16546_v5 = vcombine.low %v3080_v9, %v3088_v10  ;;  %v3111_v7 = vld [vmem:[#allocation11 + $0x300] sm:$0xff]  ;;  %v3120_v23 = vld [vmem:[#allocation11 + $0x348] sm:$0xff]  ;;  %v16563_v25 = vcombine.high %v3096_v18, %v3104_v19  ;;  %v16562_v54 = vcombine.low %v3096_v18, %v3104_v19 }
 0x323   :  { %v2039_v39 = vpack.c.bf16 %v2035_v32, %v2031_v31  ;;  %v3135_v28 = vld [vmem:[#allocation11 + $0x3c0] sm:$0xff]  ;;  %v16577_v31 = vcombine.high %v3111_v7, %v3119_v8  ;;  %v16579_v32 = vcombine.high %v3112_v22, %v3120_v23  ;;  %v3184_v58 = vld [vmem:[#allocation11 + $0x548] sm:$0xff] }
 0x324   :  { %v2040_v40 = vpack.c.bf16 %v2036_v34, %v2032_v33  ;;  %v16576_v33 = vcombine.low %v3111_v7, %v3119_v8  ;;  %v16578_v34 = vcombine.low %v3112_v22, %v3120_v23  ;;  %v3192_v2 = vld [vmem:[#allocation11 + $0x588] sm:$0xff]  ;;  %v16643_v10 = vcombine.high %v3176_v57, %v3184_v58 }
 0x325   :  { %2905 = vmatpush1.bf16.msra.mxu0 %v19112_v29  ;;  %2991 = vmatpush1.bf16.msra.mxu1 %v19115_v30  ;;  %v3128_v29 = vld [vmem:[#allocation11 + $0x388] sm:$0xff] }
 0x326   :  { %2906 = vmatprep.mubr.bf16.mxu0 %v2040_v40  ;;  %2992 = vmatprep.mubr.bf16.mxu1 %v2040_v40  ;;  %v3136_v30 = vld [vmem:[#allocation11 + $0x3c8] sm:$0xff] }
 0x327   :  { %6171 = vmatprep.subr.bf16.mxu0 %v16481_v41  ;;  %6257 = vmatprep.subr.bf16.mxu1 %v16483_v42  ;;  %v16595_v40 = vcombine.high %v3128_v29, %v3136_v30  ;;  %v16592_v41 = vcombine.low %v3127_v27, %v3135_v28  ;;  %v16594_v42 = vcombine.low %v3128_v29, %v3136_v30  ;;  %v3200_v4 = vld [vmem:[#allocation11 + $0x5c8] sm:$0xff]  ;;  %v3239_v29 = vld [vmem:[#allocation11 + $0x700] sm:$0xff] }
 0x328   :  { %2907 = vmatmul.mubr.bf16.vlgmr.msra.gmra.mrb[4].mxu0 %v2039_v39  ;;  %2993 = vmatmul.mubr.bf16.vlgmr.msra.gmra.mrb[8].mxu1 %v2039_v39  ;;  %v16593_v39 = vcombine.high %v3127_v27, %v3135_v28  ;;  %v3208_v16 = vld [vmem:[#allocation11 + $0x608] sm:$0xff]  ;;  %v16659_v19 = vcombine.high %v3192_v2, %v3200_v4  ;;  %v3247_v30 = vld [vmem:[#allocation11 + $0x740] sm:$0xff] }
 0x329   :  { %6172 = vmatpush1.bf16.msra.mxu0 %v16480_v43  ;;  %6258 = vmatpush1.bf16.msra.mxu1 %v16482_v44  ;;  %v3159_v43 = vld [vmem:[#allocation11 + $0x480] sm:$0xff]  ;;  %v3216_v17 = vld [vmem:[#allocation11 + $0x648] sm:$0xff] }
 0x32a   :  { %6173 = vmatprep.subr.bf16.mxu0 %v16497_v49  ;;  %6259 = vmatprep.subr.bf16.mxu1 %v16499_v50  ;;  %v3167_v44 = vld [vmem:[#allocation11 + $0x4c0] sm:$0xff]  ;;  %v16608_v49 = vcombine.low %v3143_v35, %v3151_v36  ;;  %v16610_v50 = vcombine.low %v3144_v37, %v3152_v38  ;;  %v3224_v7 = vld [vmem:[#allocation11 + $0x688] sm:$0xff]  ;;  %v16675_v23 = vcombine.high %v3208_v16, %v3216_v17 }
 0x32b   :  { %v16625_v59 = vcombine.high %v3159_v43, %v3167_v44  ;;  %v3232_v8 = vld [vmem:[#allocation11 + $0x6c8] sm:$0xff]  ;;  %v3255_v37 = vld [vmem:[#allocation11 + $0x780] sm:$0xff] }
 0x32c   :  { %v16690_v28 = vcombine.low %v3224_v7, %v3232_v8  ;;  %v3263_v38 = vld [vmem:[#allocation11 + $0x7c0] sm:$0xff] }
 0x32d   :  { %6174 = vmatpush1.bf16.msra.mxu0 %v16496_v51  ;;  %6260 = vmatpush1.bf16.msra.mxu1 %v16498_v56  ;;  %v3175_v51 = vld [vmem:[#allocation11 + $0x500] sm:$0xff] }
 0x32e   :  { %6175 = vmatprep.subr.bf16.mxu0 %v16513_v61  ;;  %6261 = vmatprep.subr.bf16.mxu1 %v16515_v62  ;;  %v3183_v56 = vld [vmem:[#allocation11 + $0x540] sm:$0xff]  ;;  %v16624_v61 = vcombine.low %v3159_v43, %v3167_v44  ;;  %v16626_v62 = vcombine.low %v3160_v45, %v3168_v46 }
 0x32f   :  { %v16641_v9 = vcombine.high %v3175_v51, %v3183_v56  ;;  %v3271_v45 = vld [vmem:[#allocation11 + $0x800] sm:$0xff] }
 0x330   :  { %v3279_v46 = vld [vmem:[#allocation11 + $0x840] sm:$0xff] }
 0x331   :  { %6176 = vmatpush1.bf16.msra.mxu0 %v16512_v63  ;;  %6262 = vmatpush1.bf16.msra.mxu1 %v16514_v1  ;;  %v3191_v63 = vld [vmem:[#allocation11 + $0x580] sm:$0xff] }
 0x332   :  { %6177 = vmatprep.subr.bf16.mxu0 %v16529_v12  ;;  %6263 = vmatprep.subr.bf16.mxu1 %v16531_v13  ;;  %v3199_v1 = vld [vmem:[#allocation11 + $0x5c0] sm:$0xff]  ;;  %v16640_v12 = vcombine.low %v3175_v51, %v3183_v56  ;;  %v16642_v13 = vcombine.low %v3176_v57, %v3184_v58  ;;  %v2169_v57 = vld [vmem:[#allocation10] sm:$0xf] }
 0x333   :  { %v16657_v18 = vcombine.high %v3191_v63, %v3199_v1  ;;  %v2174_v58 = vrot.slane %v2169_v57, %v21353_v53 }
 0x335   :  { %6178 = vmatpush1.bf16.msra.mxu0 %v16528_v14  ;;  %6264 = vmatpush1.bf16.msra.mxu1 %v16530_v15  ;;  %v3207_v14 = vld [vmem:[#allocation11 + $0x600] sm:$0xff] }
 0x336   :  { %6179 = vmatprep.subr.bf16.mxu0 %v16545_v20  ;;  %6265 = vmatprep.subr.bf16.mxu1 %v16547_v3  ;;  %v3215_v15 = vld [vmem:[#allocation11 + $0x640] sm:$0xff]  ;;  %v16656_v20 = vcombine.low %v3191_v63, %v3199_v1  ;;  %v16658_v3 = vcombine.low %v3192_v2, %v3200_v4 }
 0x337   :  { %v16673_v22 = vcombine.high %v3207_v14, %v3215_v15 }
 0x339   :  { %6180 = vmatpush1.bf16.msra.mxu0 %v16544_v21  ;;  %6266 = vmatpush1.bf16.msra.mxu1 %v16546_v5  ;;  %v3223_v21 = vld [vmem:[#allocation11 + $0x680] sm:$0xff] }
 0x33a   :  { %6181 = vmatprep.subr.bf16.mxu0 %v16561_v24  ;;  %6267 = vmatprep.subr.bf16.mxu1 %v16563_v25  ;;  %v3231_v5 = vld [vmem:[#allocation11 + $0x6c0] sm:$0xff]  ;;  %v16672_v24 = vcombine.low %v3207_v14, %v3215_v15  ;;  %v16674_v25 = vcombine.low %v3208_v16, %v3216_v17 }
 0x33b   :  { %v16688_v27 = vcombine.low %v3223_v21, %v3231_v5 }
 0x33d   :  { %6182 = vmatpush1.bf16.msra.mxu0 %v16560_v26  ;;  %6268 = vmatpush1.bf16.msra.mxu1 %v16562_v54  ;;  %v16689_v26 = vcombine.high %v3223_v21, %v3231_v5  ;;  %v16691_v54 = vcombine.high %v3224_v7, %v3232_v8 }
 0x33e   :  { %6183 = vmatprep.subr.bf16.mxu0 %v16577_v31  ;;  %6269 = vmatprep.subr.bf16.mxu1 %v16579_v32  ;;  %v3240_v31 = vld [vmem:[#allocation11 + $0x708] sm:$0xff]  ;;  %v16705_v32 = vcombine.high %v3239_v29, %v3247_v30 }
 0x341   :  { %6184 = vmatpush1.bf16.msra.mxu0 %v16576_v33  ;;  %6270 = vmatpush1.bf16.msra.mxu1 %v16578_v34  ;;  %v3248_v33 = vld [vmem:[#allocation11 + $0x748] sm:$0xff]  ;;  %v16704_v34 = vcombine.low %v3239_v29, %v3247_v30 }
 0x342   :  { %6185 = vmatprep.subr.bf16.mxu0 %v16593_v39  ;;  %6271 = vmatprep.subr.bf16.mxu1 %v16595_v40  ;;  %v16706_v35 = vcombine.low %v3240_v31, %v3248_v33  ;;  %v16707_v36 = vcombine.high %v3240_v31, %v3248_v33  ;;  %v3256_v39 = vld [vmem:[#allocation11 + $0x788] sm:$0xff]  ;;  %v16721_v40 = vcombine.high %v3255_v37, %v3263_v38 }
 0x343   :  { %v3296_v29 = vld [vmem:[#allocation11 + $0x8c8] sm:$0xff] }
 0x345   :  { %6186 = vmatpush1.bf16.msra.mxu0 %v16592_v41  ;;  %6272 = vmatpush1.bf16.msra.mxu1 %v16594_v42  ;;  %v3264_v41 = vld [vmem:[#allocation11 + $0x7c8] sm:$0xff]  ;;  %v16720_v42 = vcombine.low %v3255_v37, %v3263_v38 }
 0x346   :  { %6187 = vmatprep.subr.bf16.mxu0 %v16609_v47  ;;  %6273 = vmatprep.subr.bf16.mxu1 %v16611_v48  ;;  %v16722_v43 = vcombine.low %v3256_v39, %v3264_v41  ;;  %v16723_v44 = vcombine.high %v3256_v39, %v3264_v41  ;;  %v3272_v47 = vld [vmem:[#allocation11 + $0x808] sm:$0xff]  ;;  %v16737_v48 = vcombine.high %v3271_v45, %v3279_v46 }
 0x347   :  { %v3312_v37 = vld [vmem:[#allocation11 + $0x948] sm:$0xff] }
 0x349   :  { %6188 = vmatpush1.bf16.msra.mxu0 %v16608_v49  ;;  %6274 = vmatpush1.bf16.msra.mxu1 %v16610_v50  ;;  %v3280_v49 = vld [vmem:[#allocation11 + $0x848] sm:$0xff]  ;;  %v16736_v50 = vcombine.low %v3271_v45, %v3279_v46 }
 0x34a   :  { %6189 = vmatprep.subr.bf16.mxu0 %v16625_v59  ;;  %6275 = vmatprep.subr.bf16.mxu1 %v16627_v60  ;;  %v16738_v51 = vcombine.low %v3272_v47, %v3280_v49  ;;  %v16739_v56 = vcombine.high %v3272_v47, %v3280_v49  ;;  %v2182_v59 = vrot.slane %v2169_v57, %v21369_v6  ;;  %v3328_v45 = vld [vmem:[#allocation11 + $0x9c8] sm:$0xff] }
 0x34b   :  { %v2178_v60 = vrot.slane %v2169_v57, %v21358_v55 }
 0x34d   :  { %6190 = vmatpush1.bf16.msra.mxu0 %v16624_v61  ;;  %6276 = vmatpush1.bf16.msra.mxu1 %v16626_v62  ;;  %v2186_v61 = vrot.slane %v2169_v57, %v21372_v11  ;;  %v3344_v57 = vld [vmem:[#allocation11 + $0xa48] sm:$0xff] }
 0x34e   :  { %6191 = vmatprep.subr.bf16.mxu0 %v16641_v9  ;;  %6277 = vmatprep.subr.bf16.mxu1 %v16643_v10 }
 0x351   :  { %6192 = vmatpush1.bf16.msra.mxu0 %v16640_v12  ;;  %6278 = vmatpush1.bf16.msra.mxu1 %v16642_v13 }
 0x352   :  { %6193 = vmatprep.subr.bf16.mxu0 %v16657_v18  ;;  %6279 = vmatprep.subr.bf16.mxu1 %v16659_v19 }
 0x355   :  { %6194 = vmatpush1.bf16.msra.mxu0 %v16656_v20  ;;  %6280 = vmatpush1.bf16.msra.mxu1 %v16658_v3 }
 0x356   :  { %6195 = vmatprep.subr.bf16.mxu0 %v16673_v22  ;;  %6281 = vmatprep.subr.bf16.mxu1 %v16675_v23 }
 0x359   :  { %6196 = vmatpush1.bf16.msra.mxu0 %v16672_v24  ;;  %6282 = vmatpush1.bf16.msra.mxu1 %v16674_v25  ;;  %v3287_v25 = vld [vmem:[#allocation11 + $0x880] sm:$0xff] }
 0x35a   :  { %6197 = vmatprep.subr.bf16.mxu0 %v16689_v26  ;;  %6283 = vmatprep.subr.bf16.mxu1 %v16691_v54 }
 0x35d   :  { %6198 = vmatpush1.bf16.msra.mxu0 %v16688_v27  ;;  %6284 = vmatpush1.bf16.msra.mxu1 %v16690_v28  ;;  %v3295_v27 = vld [vmem:[#allocation11 + $0x8c0] sm:$0xff]  ;;  %v3288_v28 = vld [vmem:[#allocation11 + $0x888] sm:$0xff] }
 0x35e   :  { %6199 = vmatprep.subr.bf16.mxu0 %v16705_v32  ;;  %6285 = vmatprep.subr.bf16.mxu1 %v16707_v36  ;;  %v3303_v32 = vld [vmem:[#allocation11 + $0x900] sm:$0xff]  ;;  %v16753_v33 = vcombine.high %v3287_v25, %v3295_v27  ;;  %v3304_v36 = vld [vmem:[#allocation11 + $0x908] sm:$0xff]  ;;  %v16752_v38 = vcombine.low %v3287_v25, %v3295_v27  ;;  %v16754_v39 = vcombine.low %v3288_v28, %v3296_v29 }
 0x35f   :  { %v16771_v41 = vcombine.high %v3304_v36, %v3312_v37  ;;  %v16770_v47 = vcombine.low %v3304_v36, %v3312_v37  ;;  %v3399_v25 = vld [vmem:[#allocation11 + $0xc00] sm:$0xff] }
 0x360   :  { %v3407_v27 = vld [vmem:[#allocation11 + $0xc40] sm:$0xff] }
 0x361   :  { %6200 = vmatpush1.bf16.msra.mxu0 %v16704_v34  ;;  %6286 = vmatpush1.bf16.msra.mxu1 %v16706_v35  ;;  %v16755_v34 = vcombine.high %v3288_v28, %v3296_v29  ;;  %v3311_v35 = vld [vmem:[#allocation11 + $0x940] sm:$0xff]  ;;  %v3400_v28 = vld [vmem:[#allocation11 + $0xc08] sm:$0xff] }
 0x362   :  { %6201 = vmatprep.subr.bf16.mxu0 %v16721_v40  ;;  %6287 = vmatprep.subr.bf16.mxu1 %v16723_v44  ;;  %v16769_v40 = vcombine.high %v3303_v32, %v3311_v35  ;;  %v3320_v44 = vld [vmem:[#allocation11 + $0x988] sm:$0xff]  ;;  %v16768_v46 = vcombine.low %v3303_v32, %v3311_v35  ;;  %v3415_v36 = vld [vmem:[#allocation11 + $0xc80] sm:$0xff] }
 0x363   :  { %v16787_v49 = vcombine.high %v3320_v44, %v3328_v45  ;;  %v3408_v29 = vld [vmem:[#allocation11 + $0xc48] sm:$0xff]  ;;  %v3423_v37 = vld [vmem:[#allocation11 + $0xcc0] sm:$0xff] }
 0x364   :  { %v16867_v35 = vcombine.high %v3400_v28, %v3408_v29 }
 0x365   :  { %6202 = vmatpush1.bf16.msra.mxu0 %v16720_v42  ;;  %6288 = vmatpush1.bf16.msra.mxu1 %v16722_v43  ;;  %v3319_v42 = vld [vmem:[#allocation11 + $0x980] sm:$0xff] }
 0x366   :  { %6214 = vmatprep.subr.bf16.mxu0 %v16737_v48  ;;  %6300 = vmatprep.subr.bf16.mxu1 %v16739_v56  ;;  %v3327_v43 = vld [vmem:[#allocation11 + $0x9c0] sm:$0xff]  ;;  %v3336_v56 = vld [vmem:[#allocation11 + $0xa08] sm:$0xff] }
 0x367   :  { %v16785_v48 = vcombine.high %v3319_v42, %v3327_v43 }
 0x3fb   :  { %v2908_v62 = vpop.f32.mrb[4].mxu0  ;;  %v2994_v63 = vpop.f32.mrb[8].mxu1 }
 0x3fc   :  { %v18345_v1 = vadd.f32 %v2908_v62, %v2174_v58  ;;  %v18349_v2 = vadd.f32 %v2994_v63, %v2182_v59  ;;  %v2910_v4 = vpop.f32.mrb[5].mxu0  ;;  %v2996_v9 = vpop.f32.mrb[9].mxu1  ;;  %v3351_v62 = vld [vmem:[#allocation11 + $0xa80] sm:$0xff] }
 0x3fd   :  { %v18346_v10 = vadd.f32 %v2910_v4, %v2178_v60  ;;  %v18350_v12 = vadd.f32 %v2996_v9, %v2186_v61  ;;  %v2912_v13 = vpop.f32.mrb[6].mxu0  ;;  %v2998_v14 = vpop.f32.mrb[10].mxu1  ;;  %v3359_v63 = vld [vmem:[#allocation11 + $0xac0] sm:$0xff]  ;;  %v16802_v9 = vcombine.low %v3336_v56, %v3344_v57 }
 0x3fe   :  { %v18347_v15 = vadd.f32 %v2912_v13, %v2174_v58  ;;  %v18351_v16 = vadd.f32 %v2998_v14, %v2182_v59  ;;  %v2914_v17 = vpop.f32.mrb[7].mxu0  ;;  %v3000_v18 = vpop.f32.mrb[11].mxu1  ;;  %v3003_v3 = vmax.f32 %v18345_v1, 0.0  ;;  %v3005_v21 = vmax.f32 %v18349_v2, 0.0  ;;  %v3352_v1 = vld [vmem:[#allocation11 + $0xa88] sm:$0xff]  ;;  %v3367_v13 = vld [vmem:[#allocation11 + $0xb00] sm:$0xff] }
 0x3ff   :  { %v18348_v19 = vadd.f32 %v2914_v17, %v2178_v60  ;;  %v18352_v20 = vadd.f32 %v3000_v18, %v2186_v61  ;;  %v3004_v8 = vmax.f32 %v18346_v10, 0.0  ;;  %v3006_v22 = vmax.f32 %v18350_v12, 0.0  ;;  %v3360_v2 = vld [vmem:[#allocation11 + $0xac8] sm:$0xff]  ;;  %v3375_v14 = vld [vmem:[#allocation11 + $0xb40] sm:$0xff] }
 0x400   :  { %v3007_v5 = vmax.f32 %v18347_v15, 0.0  ;;  %v3009_v7 = vmax.f32 %v18351_v16, 0.0  ;;  %v16784_v58 = vcombine.low %v3319_v42, %v3327_v43  ;;  %v16786_v59 = vcombine.low %v3320_v44, %v3328_v45  ;;  %v3368_v15 = vld [vmem:[#allocation11 + $0xb08] sm:$0xff]  ;;  %v3431_v44 = vld [vmem:[#allocation11 + $0xd00] sm:$0xff] }
 0x401   :  { %v3008_v23 = vmax.f32 %v18348_v19, 0.0  ;;  %v3010_v24 = vmax.f32 %v18352_v20, 0.0  ;;  %v16803_v61 = vcombine.high %v3336_v56, %v3344_v57  ;;  %v16817_v10 = vcombine.high %v3351_v62, %v3359_v63  ;;  %v3376_v16 = vld [vmem:[#allocation11 + $0xb48] sm:$0xff]  ;;  %v3439_v45 = vld [vmem:[#allocation11 + $0xd40] sm:$0xff] }
 0x402   :  { %v21382_v26 = vpack.c.bf16 %v3007_v5, %v3003_v3  ;;  %v21384_v54 = vpack.c.bf16 %v3009_v7, %v3005_v21  ;;  %v16819_v12 = vcombine.high %v3352_v1, %v3360_v2  ;;  %v16816_v17 = vcombine.low %v3351_v62, %v3359_v63  ;;  %v3383_v3 = vld [vmem:[#allocation11 + $0xb80] sm:$0xff]  ;;  %v3384_v5 = vld [vmem:[#allocation11 + $0xb88] sm:$0xff] }
 0x403   :  { %v21386_v30 = vpack.c.bf16 %v3008_v23, %v3004_v8  ;;  %v21388_v31 = vpack.c.bf16 %v3010_v24, %v3006_v22  ;;  %v16818_v18 = vcombine.low %v3352_v1, %v3360_v2  ;;  %v16833_v19 = vcombine.high %v3367_v13, %v3375_v14  ;;  %v3391_v21 = vld [vmem:[#allocation11 + $0xbc0] sm:$0xff]  ;;  %v3392_v7 = vld [vmem:[#allocation11 + $0xbc8] sm:$0xff] }
 0x404   :  { %v16835_v20 = vcombine.high %v3368_v15, %v3376_v16  ;;  %v16832_v8 = vcombine.low %v3367_v13, %v3375_v14  ;;  %v16834_v22 = vcombine.low %v3368_v15, %v3376_v16  ;;  %v16849_v23 = vcombine.high %v3383_v3, %v3391_v21  ;;  %v3447_v56 = vld [vmem:[#allocation11 + $0xd80] sm:$0xff] }
 0x405   :  { %6203 = vmatprep.mubr.bf16.mxu0 %v21386_v30  ;;  %6289 = vmatprep.mubr.bf16.mxu1 %v21386_v30  ;;  %v16851_v24 = vcombine.high %v3384_v5, %v3392_v7  ;;  %v16848_v32 = vcombine.low %v3383_v3, %v3391_v21  ;;  %v16881_v42 = vcombine.high %v3415_v36, %v3423_v37  ;;  %v3455_v57 = vld [vmem:[#allocation11 + $0xdc0] sm:$0xff] }
 0x406   :  { %6204 = vmatmul.mubr.bf16.vlgmr.msra.gmra.mrb[8].mxu0 %v21382_v26  ;;  %6290 = vmatmul.mubr.bf16.vlgmr.msra.gmra.mrb[12].mxu1 %v21382_v26  ;;  %v16913_v62 = vcombine.high %v3447_v56, %v3455_v57  ;;  %v3463_v1 = vld [vmem:[#allocation11 + $0xe00] sm:$0xff] }
 0x407   :  { %6215 = vmatpush1.bf16.msra.mxu0 %v16736_v50  ;;  %6301 = vmatpush1.bf16.msra.mxu1 %v16738_v51  ;;  %v3335_v50 = vld [vmem:[#allocation11 + $0xa00] sm:$0xff] }
 0x408   :  { %6246 = vmatprep.mubr.bf16.mxu0 %v21388_v31  ;;  %6332 = vmatprep.mubr.bf16.mxu1 %v21388_v31  ;;  %v3343_v51 = vld [vmem:[#allocation11 + $0xa40] sm:$0xff] }
 0x409   :  { %6216 = vmatprep.subr.bf16.mxu0 %v16753_v33  ;;  %6302 = vmatprep.subr.bf16.mxu1 %v16755_v34  ;;  %v16801_v60 = vcombine.high %v3335_v50, %v3343_v51  ;;  %v16800_v4 = vcombine.low %v3335_v50, %v3343_v51  ;;  %v16850_v33 = vcombine.low %v3384_v5, %v3392_v7  ;;  %v3471_v2 = vld [vmem:[#allocation11 + $0xe40] sm:$0xff] }
 0x40a   :  { %v16865_v34 = vcombine.high %v3399_v25, %v3407_v27  ;;  %v16897_v50 = vcombine.high %v3431_v44, %v3439_v45  ;;  %v16929_v13 = vcombine.high %v3463_v1, %v3471_v2  ;;  %v3479_v15 = vld [vmem:[#allocation11 + $0xe80] sm:$0xff] }
 0x40b   :  { %6217 = vmatpush1.bf16.msra.mxu0 %v16752_v38  ;;  %6303 = vmatpush1.bf16.msra.mxu1 %v16754_v39  ;;  %v3416_v38 = vld [vmem:[#allocation11 + $0xc88] sm:$0xff]  ;;  %v3487_v16 = vld [vmem:[#allocation11 + $0xec0] sm:$0xff] }
 0x40c   :  { %6218 = vmatprep.subr.bf16.mxu0 %v16769_v40  ;;  %6304 = vmatprep.subr.bf16.mxu1 %v16771_v41  ;;  %v3424_v39 = vld [vmem:[#allocation11 + $0xcc8] sm:$0xff]  ;;  %v16864_v40 = vcombine.low %v3399_v25, %v3407_v27  ;;  %v16866_v41 = vcombine.low %v3400_v28, %v3408_v29  ;;  %v16945_v3 = vcombine.high %v3479_v15, %v3487_v16  ;;  %v3495_v5 = vld [vmem:[#allocation11 + $0xf00] sm:$0xff] }
 0x40d   :  { %v16883_v43 = vcombine.high %v3416_v38, %v3424_v39  ;;  %v3503_v7 = vld [vmem:[#allocation11 + $0xf40] sm:$0xff] }
 0x40e   :  { %v16961_v25 = vcombine.high %v3495_v5, %v3503_v7  ;;  %v3511_v28 = vld [vmem:[#allocation11 + $0xf80] sm:$0xff] }
 0x40f   :  { %6219 = vmatpush1.bf16.msra.mxu0 %v16768_v46  ;;  %6305 = vmatpush1.bf16.msra.mxu1 %v16770_v47  ;;  %v3432_v46 = vld [vmem:[#allocation11 + $0xd08] sm:$0xff]  ;;  %v3519_v29 = vld [vmem:[#allocation11 + $0xfc0] sm:$0xff] }
 0x410   :  { %6220 = vmatprep.subr.bf16.mxu0 %v16785_v48  ;;  %6306 = vmatprep.subr.bf16.mxu1 %v16787_v49  ;;  %v3440_v47 = vld [vmem:[#allocation11 + $0xd48] sm:$0xff]  ;;  %v16880_v48 = vcombine.low %v3415_v36, %v3423_v37  ;;  %v16882_v49 = vcombine.low %v3416_v38, %v3424_v39  ;;  %v16977_v36 = vcombine.high %v3511_v28, %v3519_v29  ;;  %v3017_v38 = vld [vmem:[#allocation11 + $0x10] sm:$0xff] }
 0x411   :  { %v16899_v51 = vcombine.high %v3432_v46, %v3440_v47  ;;  %v3025_v39 = vld [vmem:[#allocation11 + $0x50] sm:$0xff] }
 0x413   :  { %6221 = vmatpush1.bf16.msra.mxu0 %v16784_v58  ;;  %6307 = vmatpush1.bf16.msra.mxu1 %v16786_v59  ;;  %v3448_v58 = vld [vmem:[#allocation11 + $0xd88] sm:$0xff] }
 0x414   :  { %6222 = vmatprep.subr.bf16.mxu0 %v16801_v60  ;;  %6308 = vmatprep.subr.bf16.mxu1 %v16803_v61  ;;  %v3456_v59 = vld [vmem:[#allocation11 + $0xdc8] sm:$0xff]  ;;  %v16896_v60 = vcombine.low %v3431_v44, %v3439_v45  ;;  %v16898_v61 = vcombine.low %v3432_v46, %v3440_v47  ;;  %v16485_v44 = vcombine.high %v3017_v38, %v3025_v39  ;;  %v3033_v46 = vld [vmem:[#allocation11 + $0x90] sm:$0xff] }
 0x415   :  { %v16915_v63 = vcombine.high %v3448_v58, %v3456_v59  ;;  %v3041_v47 = vld [vmem:[#allocation11 + $0xd0] sm:$0xff] }
 0x417   :  { %6223 = vmatpush1.bf16.msra.mxu0 %v16800_v4  ;;  %6309 = vmatpush1.bf16.msra.mxu1 %v16802_v9  ;;  %v3464_v4 = vld [vmem:[#allocation11 + $0xe08] sm:$0xff] }
 0x418   :  { %6224 = vmatprep.subr.bf16.mxu0 %v16817_v10  ;;  %6310 = vmatprep.subr.bf16.mxu1 %v16819_v12  ;;  %v3472_v9 = vld [vmem:[#allocation11 + $0xe48] sm:$0xff]  ;;  %v16912_v10 = vcombine.low %v3447_v56, %v3455_v57  ;;  %v16914_v12 = vcombine.low %v3448_v58, %v3456_v59  ;;  %v16501_v56 = vcombine.high %v3033_v46, %v3041_v47  ;;  %v3049_v58 = vld [vmem:[#allocation11 + $0x110] sm:$0xff] }
 0x419   :  { %v16931_v14 = vcombine.high %v3464_v4, %v3472_v9  ;;  %v3057_v59 = vld [vmem:[#allocation11 + $0x150] sm:$0xff] }
 0x41b   :  { %6225 = vmatpush1.bf16.msra.mxu0 %v16816_v17  ;;  %6311 = vmatpush1.bf16.msra.mxu1 %v16818_v18  ;;  %v3480_v17 = vld [vmem:[#allocation11 + $0xe88] sm:$0xff] }
 0x41c   :  { %6226 = vmatprep.subr.bf16.mxu0 %v16833_v19  ;;  %6312 = vmatprep.subr.bf16.mxu1 %v16835_v20  ;;  %v3488_v18 = vld [vmem:[#allocation11 + $0xec8] sm:$0xff]  ;;  %v16928_v19 = vcombine.low %v3463_v1, %v3471_v2  ;;  %v16930_v20 = vcombine.low %v3464_v4, %v3472_v9  ;;  %v16517_v1 = vcombine.high %v3049_v58, %v3057_v59  ;;  %v3065_v4 = vld [vmem:[#allocation11 + $0x190] sm:$0xff] }
 0x41d   :  { %v16947_v21 = vcombine.high %v3480_v17, %v3488_v18  ;;  %v3073_v9 = vld [vmem:[#allocation11 + $0x1d0] sm:$0xff] }
 0x41f   :  { %6227 = vmatpush1.bf16.msra.mxu0 %v16832_v8  ;;  %6313 = vmatpush1.bf16.msra.mxu1 %v16834_v22  ;;  %v3496_v8 = vld [vmem:[#allocation11 + $0xf08] sm:$0xff] }
 0x420   :  { %6228 = vmatprep.subr.bf16.mxu0 %v16849_v23  ;;  %6314 = vmatprep.subr.bf16.mxu1 %v16851_v24  ;;  %v3504_v22 = vld [vmem:[#allocation11 + $0xf48] sm:$0xff]  ;;  %v16944_v23 = vcombine.low %v3479_v15, %v3487_v16  ;;  %v16946_v24 = vcombine.low %v3480_v17, %v3488_v18  ;;  %v16533_v15 = vcombine.high %v3065_v4, %v3073_v9  ;;  %v3081_v17 = vld [vmem:[#allocation11 + $0x210] sm:$0xff] }
 0x421   :  { %v16963_v27 = vcombine.high %v3496_v8, %v3504_v22  ;;  %v3089_v18 = vld [vmem:[#allocation11 + $0x250] sm:$0xff] }
 0x423   :  { %6229 = vmatpush1.bf16.msra.mxu0 %v16848_v32  ;;  %6315 = vmatpush1.bf16.msra.mxu1 %v16850_v33  ;;  %v3512_v32 = vld [vmem:[#allocation11 + $0xf88] sm:$0xff] }
 0x424   :  { %6230 = vmatprep.subr.bf16.mxu0 %v16865_v34  ;;  %6316 = vmatprep.subr.bf16.mxu1 %v16867_v35  ;;  %v3520_v33 = vld [vmem:[#allocation11 + $0xfc8] sm:$0xff]  ;;  %v16960_v34 = vcombine.low %v3495_v5, %v3503_v7  ;;  %v16962_v35 = vcombine.low %v3496_v8, %v3504_v22  ;;  %v16549_v5 = vcombine.high %v3081_v17, %v3089_v18  ;;  %v3097_v8 = vld [vmem:[#allocation11 + $0x290] sm:$0xff] }
 0x425   :  { %v16979_v37 = vcombine.high %v3512_v32, %v3520_v33  ;;  %v3105_v22 = vld [vmem:[#allocation11 + $0x2d0] sm:$0xff] }
 0x427   :  { %6231 = vmatpush1.bf16.msra.mxu0 %v16864_v40  ;;  %6317 = vmatpush1.bf16.msra.mxu1 %v16866_v41  ;;  %v3018_v40 = vld [vmem:[#allocation11 + $0x18] sm:$0xff] }
 0x428   :  { %6232 = vmatprep.subr.bf16.mxu0 %v16881_v42  ;;  %6318 = vmatprep.subr.bf16.mxu1 %v16883_v43  ;;  %v3026_v41 = vld [vmem:[#allocation11 + $0x58] sm:$0xff]  ;;  %v16976_v42 = vcombine.low %v3511_v28, %v3519_v29  ;;  %v16978_v43 = vcombine.low %v3512_v32, %v3520_v33  ;;  %v16565_v28 = vcombine.high %v3097_v8, %v3105_v22  ;;  %v3113_v32 = vld [vmem:[#allocation11 + $0x310] sm:$0xff] }
 0x429   :  { %v16487_v45 = vcombine.high %v3018_v40, %v3026_v41  ;;  %v3121_v33 = vld [vmem:[#allocation11 + $0x350] sm:$0xff] }
 0x42b   :  { %6233 = vmatpush1.bf16.msra.mxu0 %v16880_v48  ;;  %6319 = vmatpush1.bf16.msra.mxu1 %v16882_v49  ;;  %v3034_v48 = vld [vmem:[#allocation11 + $0x98] sm:$0xff] }
 0x42c   :  { %6234 = vmatprep.subr.bf16.mxu0 %v16897_v50  ;;  %6320 = vmatprep.subr.bf16.mxu1 %v16899_v51  ;;  %v3042_v49 = vld [vmem:[#allocation11 + $0xd8] sm:$0xff]  ;;  %v16484_v50 = vcombine.low %v3017_v38, %v3025_v39  ;;  %v16486_v51 = vcombine.low %v3018_v40, %v3026_v41  ;;  %v16581_v38 = vcombine.high %v3113_v32, %v3121_v33  ;;  %v3129_v40 = vld [vmem:[#allocation11 + $0x390] sm:$0xff] }
 0x42d   :  { %v16503_v57 = vcombine.high %v3034_v48, %v3042_v49  ;;  %v3137_v41 = vld [vmem:[#allocation11 + $0x3d0] sm:$0xff] }
 0x42f   :  { %6235 = vmatpush1.bf16.msra.mxu0 %v16896_v60  ;;  %6321 = vmatpush1.bf16.msra.mxu1 %v16898_v61  ;;  %v3050_v60 = vld [vmem:[#allocation11 + $0x118] sm:$0xff] }
 0x430   :  { %6236 = vmatprep.subr.bf16.mxu0 %v16913_v62  ;;  %6322 = vmatprep.subr.bf16.mxu1 %v16915_v63  ;;  %v3058_v61 = vld [vmem:[#allocation11 + $0x158] sm:$0xff]  ;;  %v16500_v62 = vcombine.low %v3033_v46, %v3041_v47  ;;  %v16502_v63 = vcombine.low %v3034_v48, %v3042_v49  ;;  %v16597_v46 = vcombine.high %v3129_v40, %v3137_v41  ;;  %v3145_v48 = vld [vmem:[#allocation11 + $0x410] sm:$0xff] }
 0x431   :  { %v16519_v2 = vcombine.high %v3050_v60, %v3058_v61  ;;  %v3153_v49 = vld [vmem:[#allocation11 + $0x450] sm:$0xff] }
 0x433   :  { %6237 = vmatpush1.bf16.msra.mxu0 %v16912_v10  ;;  %6323 = vmatpush1.bf16.msra.mxu1 %v16914_v12  ;;  %v3066_v10 = vld [vmem:[#allocation11 + $0x198] sm:$0xff] }
 0x434   :  { %6238 = vmatprep.subr.bf16.mxu0 %v16929_v13  ;;  %6324 = vmatprep.subr.bf16.mxu1 %v16931_v14  ;;  %v3074_v12 = vld [vmem:[#allocation11 + $0x1d8] sm:$0xff]  ;;  %v16516_v13 = vcombine.low %v3049_v58, %v3057_v59  ;;  %v16518_v14 = vcombine.low %v3050_v60, %v3058_v61  ;;  %v16613_v58 = vcombine.high %v3145_v48, %v3153_v49  ;;  %v3161_v60 = vld [vmem:[#allocation11 + $0x490] sm:$0xff] }
 0x435   :  { %v16535_v16 = vcombine.high %v3066_v10, %v3074_v12  ;;  %v3169_v61 = vld [vmem:[#allocation11 + $0x4d0] sm:$0xff] }
 0x437   :  { %6239 = vmatpush1.bf16.msra.mxu0 %v16928_v19  ;;  %6325 = vmatpush1.bf16.msra.mxu1 %v16930_v20  ;;  %v3082_v19 = vld [vmem:[#allocation11 + $0x218] sm:$0xff] }
 0x438   :  { %6240 = vmatprep.subr.bf16.mxu0 %v16945_v3  ;;  %6326 = vmatprep.subr.bf16.mxu1 %v16947_v21  ;;  %v3090_v20 = vld [vmem:[#allocation11 + $0x258] sm:$0xff]  ;;  %v16532_v3 = vcombine.low %v3065_v4, %v3073_v9  ;;  %v16534_v21 = vcombine.low %v3066_v10, %v3074_v12  ;;  %v16629_v4 = vcombine.high %v3161_v60, %v3169_v61  ;;  %v3177_v10 = vld [vmem:[#allocation11 + $0x510] sm:$0xff] }
 0x439   :  { %v16551_v7 = vcombine.high %v3082_v19, %v3090_v20  ;;  %v3185_v12 = vld [vmem:[#allocation11 + $0x550] sm:$0xff] }
 0x43b   :  { %6241 = vmatpush1.bf16.msra.mxu0 %v16944_v23  ;;  %6327 = vmatpush1.bf16.msra.mxu1 %v16946_v24  ;;  %v3098_v23 = vld [vmem:[#allocation11 + $0x298] sm:$0xff] }
 0x43c   :  { %6242 = vmatprep.subr.bf16.mxu0 %v16961_v25  ;;  %6328 = vmatprep.subr.bf16.mxu1 %v16963_v27  ;;  %v3106_v24 = vld [vmem:[#allocation11 + $0x2d8] sm:$0xff]  ;;  %v16548_v25 = vcombine.low %v3081_v17, %v3089_v18  ;;  %v16550_v27 = vcombine.low %v3082_v19, %v3090_v20  ;;  %v16645_v17 = vcombine.high %v3177_v10, %v3185_v12  ;;  %v3193_v19 = vld [vmem:[#allocation11 + $0x590] sm:$0xff] }
 0x43d   :  { %v16567_v29 = vcombine.high %v3098_v23, %v3106_v24  ;;  %v3201_v20 = vld [vmem:[#allocation11 + $0x5d0] sm:$0xff] }
 0x43f   :  { %6243 = vmatpush1.bf16.msra.mxu0 %v16960_v34  ;;  %6329 = vmatpush1.bf16.msra.mxu1 %v16962_v35  ;;  %v3114_v34 = vld [vmem:[#allocation11 + $0x318] sm:$0xff] }
 0x440   :  { %6244 = vmatprep.subr.bf16.mxu0 %v16977_v36  ;;  %6330 = vmatprep.subr.bf16.mxu1 %v16979_v37  ;;  %v3122_v35 = vld [vmem:[#allocation11 + $0x358] sm:$0xff]  ;;  %v16564_v36 = vcombine.low %v3097_v8, %v3105_v22  ;;  %v16566_v37 = vcombine.low %v3098_v23, %v3106_v24  ;;  %v16661_v8 = vcombine.high %v3193_v19, %v3201_v20  ;;  %v3209_v23 = vld [vmem:[#allocation11 + $0x610] sm:$0xff] }
 0x441   :  { %v16583_v39 = vcombine.high %v3114_v34, %v3122_v35  ;;  %v3217_v24 = vld [vmem:[#allocation11 + $0x650] sm:$0xff] }
 0x443   :  { %6245 = vmatpush1.bf16.msra.mxu0 %v16976_v42  ;;  %6331 = vmatpush1.bf16.msra.mxu1 %v16978_v43  ;;  %v3130_v42 = vld [vmem:[#allocation11 + $0x398] sm:$0xff] }
 0x444   :  { %6343 = vmatprep.subr.bf16.mxu0 %v16485_v44  ;;  %6429 = vmatprep.subr.bf16.mxu1 %v16487_v45  ;;  %v3138_v43 = vld [vmem:[#allocation11 + $0x3d8] sm:$0xff]  ;;  %v16580_v44 = vcombine.low %v3113_v32, %v3121_v33  ;;  %v16582_v45 = vcombine.low %v3114_v34, %v3122_v35  ;;  %v16677_v32 = vcombine.high %v3209_v23, %v3217_v24  ;;  %v3225_v34 = vld [vmem:[#allocation11 + $0x690] sm:$0xff] }
 0x445   :  { %v16599_v47 = vcombine.high %v3130_v42, %v3138_v43  ;;  %v3233_v35 = vld [vmem:[#allocation11 + $0x6d0] sm:$0xff] }
 0x446   :  { %6247 = vmatmul.mubr.bf16.vlgmr.msra.gmra.mrb[8].mxu0 %v21384_v54  ;;  %6333 = vmatmul.mubr.bf16.vlgmr.msra.gmra.mrb[12].mxu1 %v21384_v54 }
 0x447   :  { %6344 = vmatpush1.bf16.msra.mxu0 %v16484_v50  ;;  %6375 = vmatprep.mubr.bf16.mxu0 %v21386_v30  ;;  %v3146_v50 = vld [vmem:[#allocation11 + $0x418] sm:$0xff] }
 0x448   :  { %6430 = vmatpush1.bf16.msra.mxu1 %v16486_v51  ;;  %6461 = vmatprep.mubr.bf16.mxu1 %v21386_v30  ;;  %v3154_v51 = vld [vmem:[#allocation11 + $0x458] sm:$0xff] }
 0x449   :  { %6345 = vmatprep.subr.bf16.mxu0 %v16501_v56  ;;  %6431 = vmatprep.subr.bf16.mxu1 %v16503_v57  ;;  %v16596_v56 = vcombine.low %v3129_v40, %v3137_v41  ;;  %v16598_v57 = vcombine.low %v3130_v42, %v3138_v43  ;;  %v16615_v59 = vcombine.high %v3146_v50, %v3154_v51  ;;  %v3241_v42 = vld [vmem:[#allocation11 + $0x710] sm:$0xff] }
 0x44a   :  { %v16693_v40 = vcombine.high %v3225_v34, %v3233_v35  ;;  %v3249_v43 = vld [vmem:[#allocation11 + $0x750] sm:$0xff] }
 0x44b   :  { %6346 = vmatpush1.bf16.msra.mxu0 %v16500_v62  ;;  %v3162_v62 = vld [vmem:[#allocation11 + $0x498] sm:$0xff] }
 0x44c   :  { %6432 = vmatpush1.bf16.msra.mxu1 %v16502_v63  ;;  %6347 = vmatprep.subr.bf16.mxu0 %v16517_v1  ;;  %v3170_v63 = vld [vmem:[#allocation11 + $0x4d8] sm:$0xff]  ;;  %v16612_v1 = vcombine.low %v3145_v48, %v3153_v49  ;;  %v16709_v48 = vcombine.high %v3241_v42, %v3249_v43 }
 0x44d   :  { %6433 = vmatprep.subr.bf16.mxu1 %v16519_v2  ;;  %v16614_v2 = vcombine.low %v3146_v50, %v3154_v51  ;;  %v16631_v9 = vcombine.high %v3162_v62, %v3170_v63  ;;  %v3257_v50 = vld [vmem:[#allocation11 + $0x790] sm:$0xff] }
 0x44e   :  { %v3265_v51 = vld [vmem:[#allocation11 + $0x7d0] sm:$0xff] }
 0x44f   :  { %6348 = vmatpush1.bf16.msra.mxu0 %v16516_v13  ;;  %v3178_v13 = vld [vmem:[#allocation11 + $0x518] sm:$0xff] }
 0x450   :  { %6434 = vmatpush1.bf16.msra.mxu1 %v16518_v14  ;;  %6349 = vmatprep.subr.bf16.mxu0 %v16533_v15  ;;  %v3186_v14 = vld [vmem:[#allocation11 + $0x558] sm:$0xff]  ;;  %v16628_v15 = vcombine.low %v3161_v60, %v3169_v61  ;;  %v16725_v60 = vcombine.high %v3257_v50, %v3265_v51 }
 0x451   :  { %6435 = vmatprep.subr.bf16.mxu1 %v16535_v16  ;;  %v16630_v16 = vcombine.low %v3162_v62, %v3170_v63  ;;  %v16647_v18 = vcombine.high %v3178_v13, %v3186_v14  ;;  %v3273_v62 = vld [vmem:[#allocation11 + $0x810] sm:$0xff] }
 0x452   :  { %v3281_v63 = vld [vmem:[#allocation11 + $0x850] sm:$0xff] }
 0x453   :  { %6350 = vmatpush1.bf16.msra.mxu0 %v16532_v3  ;;  %v3194_v3 = vld [vmem:[#allocation11 + $0x598] sm:$0xff] }
 0x454   :  { %6436 = vmatpush1.bf16.msra.mxu1 %v16534_v21  ;;  %6351 = vmatprep.subr.bf16.mxu0 %v16549_v5  ;;  %v3202_v21 = vld [vmem:[#allocation11 + $0x5d8] sm:$0xff]  ;;  %v16644_v5 = vcombine.low %v3177_v10, %v3185_v12  ;;  %v16741_v10 = vcombine.high %v3273_v62, %v3281_v63 }
 0x455   :  { %6437 = vmatprep.subr.bf16.mxu1 %v16551_v7  ;;  %v16646_v7 = vcombine.low %v3178_v13, %v3186_v14  ;;  %v16663_v22 = vcombine.high %v3194_v3, %v3202_v21  ;;  %v3289_v13 = vld [vmem:[#allocation11 + $0x890] sm:$0xff] }
 0x456   :  { %v3297_v14 = vld [vmem:[#allocation11 + $0x8d0] sm:$0xff] }
 0x457   :  { %6352 = vmatpush1.bf16.msra.mxu0 %v16548_v25  ;;  %v3210_v25 = vld [vmem:[#allocation11 + $0x618] sm:$0xff] }
 0x458   :  { %6438 = vmatpush1.bf16.msra.mxu1 %v16550_v27  ;;  %6353 = vmatprep.subr.bf16.mxu0 %v16565_v28  ;;  %v3218_v27 = vld [vmem:[#allocation11 + $0x658] sm:$0xff]  ;;  %v16660_v28 = vcombine.low %v3193_v19, %v3201_v20  ;;  %v16757_v19 = vcombine.high %v3289_v13, %v3297_v14  ;;  %v3305_v20 = vld [vmem:[#allocation11 + $0x910] sm:$0xff] }
 0x459   :  { %6439 = vmatprep.subr.bf16.mxu1 %v16567_v29  ;;  %v16662_v29 = vcombine.low %v3194_v3, %v3202_v21  ;;  %v16679_v33 = vcombine.high %v3210_v25, %v3218_v27  ;;  %v3313_v3 = vld [vmem:[#allocation11 + $0x950] sm:$0xff] }
 0x45b   :  { %6354 = vmatpush1.bf16.msra.mxu0 %v16564_v36  ;;  %v3226_v36 = vld [vmem:[#allocation11 + $0x698] sm:$0xff] }
 0x45c   :  { %6440 = vmatpush1.bf16.msra.mxu1 %v16566_v37  ;;  %6355 = vmatprep.subr.bf16.mxu0 %v16581_v38  ;;  %v3234_v37 = vld [vmem:[#allocation11 + $0x6d8] sm:$0xff]  ;;  %v16676_v38 = vcombine.low %v3209_v23, %v3217_v24  ;;  %v16773_v23 = vcombine.high %v3305_v20, %v3313_v3 }
 0x45d   :  { %6441 = vmatprep.subr.bf16.mxu1 %v16583_v39  ;;  %v16678_v39 = vcombine.low %v3210_v25, %v3218_v27  ;;  %v16695_v41 = vcombine.high %v3226_v36, %v3234_v37  ;;  %v3321_v25 = vld [vmem:[#allocation11 + $0x990] sm:$0xff] }
 0x45e   :  { %v3329_v27 = vld [vmem:[#allocation11 + $0x9d0] sm:$0xff] }
 0x45f   :  { %6356 = vmatpush1.bf16.msra.mxu0 %v16580_v44  ;;  %v3242_v44 = vld [vmem:[#allocation11 + $0x718] sm:$0xff] }
 0x460   :  { %6442 = vmatpush1.bf16.msra.mxu1 %v16582_v45  ;;  %6357 = vmatprep.subr.bf16.mxu0 %v16597_v46  ;;  %v3250_v45 = vld [vmem:[#allocation11 + $0x758] sm:$0xff]  ;;  %v16692_v46 = vcombine.low %v3225_v34, %v3233_v35  ;;  %v16789_v34 = vcombine.high %v3321_v25, %v3329_v27 }
 0x461   :  { %6443 = vmatprep.subr.bf16.mxu1 %v16599_v47  ;;  %v16694_v47 = vcombine.low %v3226_v36, %v3234_v37  ;;  %v16711_v49 = vcombine.high %v3242_v44, %v3250_v45  ;;  %v3337_v36 = vld [vmem:[#allocation11 + $0xa10] sm:$0xff] }
 0x462   :  { %v3345_v37 = vld [vmem:[#allocation11 + $0xa50] sm:$0xff] }
 0x463   :  { %6358 = vmatpush1.bf16.msra.mxu0 %v16596_v56  ;;  %v3258_v56 = vld [vmem:[#allocation11 + $0x798] sm:$0xff] }
 0x464   :  { %6444 = vmatpush1.bf16.msra.mxu1 %v16598_v57  ;;  %6359 = vmatprep.subr.bf16.mxu0 %v16613_v58  ;;  %v3266_v57 = vld [vmem:[#allocation11 + $0x7d8] sm:$0xff]  ;;  %v16708_v58 = vcombine.low %v3241_v42, %v3249_v43  ;;  %v16805_v42 = vcombine.high %v3337_v36, %v3345_v37 }
 0x465   :  { %6445 = vmatprep.subr.bf16.mxu1 %v16615_v59  ;;  %v16710_v59 = vcombine.low %v3242_v44, %v3250_v45  ;;  %v16727_v61 = vcombine.high %v3258_v56, %v3266_v57  ;;  %v3353_v44 = vld [vmem:[#allocation11 + $0xa90] sm:$0xff] }
 0x466   :  { %v3361_v45 = vld [vmem:[#allocation11 + $0xad0] sm:$0xff] }
 0x467   :  { %6360 = vmatpush1.bf16.msra.mxu0 %v16612_v1  ;;  %v3274_v1 = vld [vmem:[#allocation11 + $0x818] sm:$0xff] }
 0x468   :  { %6446 = vmatpush1.bf16.msra.mxu1 %v16614_v2  ;;  %6361 = vmatprep.subr.bf16.mxu0 %v16629_v4  ;;  %v3282_v2 = vld [vmem:[#allocation11 + $0x858] sm:$0xff]  ;;  %v16724_v4 = vcombine.low %v3257_v50, %v3265_v51  ;;  %v16821_v50 = vcombine.high %v3353_v44, %v3361_v45 }
 0x469   :  { %6447 = vmatprep.subr.bf16.mxu1 %v16631_v9  ;;  %v16726_v9 = vcombine.low %v3258_v56, %v3266_v57  ;;  %v16743_v12 = vcombine.high %v3274_v1, %v3282_v2  ;;  %v3369_v56 = vld [vmem:[#allocation11 + $0xb10] sm:$0xff] }
 0x46a   :  { %v3377_v57 = vld [vmem:[#allocation11 + $0xb50] sm:$0xff] }
 0x46b   :  { %6362 = vmatpush1.bf16.msra.mxu0 %v16628_v15  ;;  %v16740_v15 = vcombine.low %v3273_v62, %v3281_v63  ;;  %v16837_v62 = vcombine.high %v3369_v56, %v3377_v57 }
 0x46c   :  { %6448 = vmatpush1.bf16.msra.mxu1 %v16630_v16  ;;  %6363 = vmatprep.subr.bf16.mxu0 %v16645_v17  ;;  %v3290_v16 = vld [vmem:[#allocation11 + $0x898] sm:$0xff] }
 0x46d   :  { %6449 = vmatprep.subr.bf16.mxu1 %v16647_v18  ;;  %v3298_v17 = vld [vmem:[#allocation11 + $0x8d8] sm:$0xff]  ;;  %v16742_v18 = vcombine.low %v3274_v1, %v3282_v2  ;;  %v3385_v1 = vld [vmem:[#allocation11 + $0xb90] sm:$0xff] }
 0x46e   :  { %v16759_v21 = vcombine.high %v3290_v16, %v3298_v17  ;;  %v3393_v2 = vld [vmem:[#allocation11 + $0xbd0] sm:$0xff] }
 0x46f   :  { %6364 = vmatpush1.bf16.msra.mxu0 %v16644_v5  ;;  %v3306_v5 = vld [vmem:[#allocation11 + $0x918] sm:$0xff] }
 0x470   :  { %6450 = vmatpush1.bf16.msra.mxu1 %v16646_v7  ;;  %6365 = vmatprep.subr.bf16.mxu0 %v16661_v8  ;;  %v3314_v7 = vld [vmem:[#allocation11 + $0x958] sm:$0xff]  ;;  %v16756_v8 = vcombine.low %v3289_v13, %v3297_v14  ;;  %v16853_v13 = vcombine.high %v3385_v1, %v3393_v2 }
 0x471   :  { %6451 = vmatprep.subr.bf16.mxu1 %v16663_v22  ;;  %v16758_v22 = vcombine.low %v3290_v16, %v3298_v17  ;;  %v16775_v24 = vcombine.high %v3306_v5, %v3314_v7  ;;  %v3409_v16 = vld [vmem:[#allocation11 + $0xc50] sm:$0xff]  ;;  %v3402_v17 = vld [vmem:[#allocation11 + $0xc18] sm:$0xff] }
 0x473   :  { %6366 = vmatpush1.bf16.msra.mxu0 %v16660_v28  ;;  %v3322_v28 = vld [vmem:[#allocation11 + $0x998] sm:$0xff] }
 0x474   :  { %6452 = vmatpush1.bf16.msra.mxu1 %v16662_v29  ;;  %6367 = vmatprep.subr.bf16.mxu0 %v16677_v32  ;;  %v3330_v29 = vld [vmem:[#allocation11 + $0x9d8] sm:$0xff]  ;;  %v16772_v32 = vcombine.low %v3305_v20, %v3313_v3 }
 0x475   :  { %6453 = vmatprep.subr.bf16.mxu1 %v16679_v33  ;;  %v16774_v33 = vcombine.low %v3306_v5, %v3314_v7  ;;  %v16791_v35 = vcombine.high %v3322_v28, %v3330_v29  ;;  %v3417_v5 = vld [vmem:[#allocation11 + $0xc90] sm:$0xff] }
 0x476   :  { %v3425_v7 = vld [vmem:[#allocation11 + $0xcd0] sm:$0xff] }
 0x477   :  { %6368 = vmatpush1.bf16.msra.mxu0 %v16676_v38  ;;  %v3338_v38 = vld [vmem:[#allocation11 + $0xa18] sm:$0xff] }
 0x478   :  { %6454 = vmatpush1.bf16.msra.mxu1 %v16678_v39  ;;  %6369 = vmatprep.subr.bf16.mxu0 %v16693_v40  ;;  %v3346_v39 = vld [vmem:[#allocation11 + $0xa58] sm:$0xff]  ;;  %v16788_v40 = vcombine.low %v3321_v25, %v3329_v27  ;;  %v16885_v25 = vcombine.high %v3417_v5, %v3425_v7 }
 0x479   :  { %6455 = vmatprep.subr.bf16.mxu1 %v16695_v41  ;;  %v16790_v41 = vcombine.low %v3322_v28, %v3330_v29  ;;  %v16807_v43 = vcombine.high %v3338_v38, %v3346_v39  ;;  %v3433_v28 = vld [vmem:[#allocation11 + $0xd10] sm:$0xff] }
 0x47a   :  { %v3441_v29 = vld [vmem:[#allocation11 + $0xd50] sm:$0xff] }
 0x47b   :  { %6370 = vmatpush1.bf16.msra.mxu0 %v16692_v46  ;;  %v3354_v46 = vld [vmem:[#allocation11 + $0xa98] sm:$0xff] }
 0x47c   :  { %6456 = vmatpush1.bf16.msra.mxu1 %v16694_v47  ;;  %6371 = vmatprep.subr.bf16.mxu0 %v16709_v48  ;;  %v3362_v47 = vld [vmem:[#allocation11 + $0xad8] sm:$0xff]  ;;  %v16804_v48 = vcombine.low %v3337_v36, %v3345_v37  ;;  %v16901_v36 = vcombine.high %v3433_v28, %v3441_v29 }
 0x47d   :  { %6457 = vmatprep.subr.bf16.mxu1 %v16711_v49  ;;  %v16806_v49 = vcombine.low %v3338_v38, %v3346_v39  ;;  %v16823_v51 = vcombine.high %v3354_v46, %v3362_v47  ;;  %v3449_v38 = vld [vmem:[#allocation11 + $0xd90] sm:$0xff] }
 0x47e   :  { %v3457_v39 = vld [vmem:[#allocation11 + $0xdd0] sm:$0xff] }
 0x47f   :  { %6372 = vmatpush1.bf16.msra.mxu0 %v16708_v58  ;;  %v3370_v58 = vld [vmem:[#allocation11 + $0xb18] sm:$0xff] }
 0x480   :  { %6458 = vmatpush1.bf16.msra.mxu1 %v16710_v59  ;;  %6373 = vmatprep.subr.bf16.mxu0 %v16725_v60  ;;  %v3378_v59 = vld [vmem:[#allocation11 + $0xb58] sm:$0xff]  ;;  %v16820_v60 = vcombine.low %v3353_v44, %v3361_v45  ;;  %v16917_v44 = vcombine.high %v3449_v38, %v3457_v39 }
 0x481   :  { %6459 = vmatprep.subr.bf16.mxu1 %v16727_v61  ;;  %v16822_v61 = vcombine.low %v3354_v46, %v3362_v47  ;;  %v16839_v63 = vcombine.high %v3370_v58, %v3378_v59  ;;  %v3465_v46 = vld [vmem:[#allocation11 + $0xe10] sm:$0xff] }
 0x482   :  { %v3473_v47 = vld [vmem:[#allocation11 + $0xe50] sm:$0xff] }
 0x483   :  { %6374 = vmatpush1.bf16.msra.mxu0 %v16724_v4  ;;  %v3386_v4 = vld [vmem:[#allocation11 + $0xb98] sm:$0xff] }
 0x484   :  { %6460 = vmatpush1.bf16.msra.mxu1 %v16726_v9  ;;  %6386 = vmatprep.subr.bf16.mxu0 %v16741_v10  ;;  %v3394_v9 = vld [vmem:[#allocation11 + $0xbd8] sm:$0xff]  ;;  %v16836_v10 = vcombine.low %v3369_v56, %v3377_v57  ;;  %v16933_v56 = vcombine.high %v3465_v46, %v3473_v47 }
 0x485   :  { %6472 = vmatprep.subr.bf16.mxu1 %v16743_v12  ;;  %v16838_v12 = vcombine.low %v3370_v58, %v3378_v59  ;;  %v16855_v14 = vcombine.high %v3386_v4, %v3394_v9  ;;  %v16854_v20 = vcombine.low %v3386_v4, %v3394_v9  ;;  %v3481_v58 = vld [vmem:[#allocation11 + $0xe90] sm:$0xff] }
 0x486   :  { %6376 = vmatmul.mubr.bf16.vlgmr.msra.gmra.mrb[12].mxu0 %v21382_v26  ;;  %v3489_v59 = vld [vmem:[#allocation11 + $0xed0] sm:$0xff] }
 0x487   :  { %6462 = vmatmul.mubr.bf16.vlgmr.msra.gmra.mrb[16].mxu1 %v21382_v26  ;;  %6387 = vmatpush1.bf16.msra.mxu0 %v16740_v15  ;;  %v3401_v15 = vld [vmem:[#allocation11 + $0xc10] sm:$0xff] }
 0x488   :  { %6418 = vmatprep.mubr.bf16.mxu0 %v21388_v31  ;;  %6473 = vmatpush1.bf16.msra.mxu1 %v16742_v18  ;;  %v3410_v18 = vld [vmem:[#allocation11 + $0xc58] sm:$0xff]  ;;  %v16869_v3 = vcombine.high %v3401_v15, %v3409_v16  ;;  %v3497_v4 = vld [vmem:[#allocation11 + $0xf10] sm:$0xff] }
 0x489   :  { %6504 = vmatprep.mubr.bf16.mxu1 %v21388_v31  ;;  %6388 = vmatprep.subr.bf16.mxu0 %v16757_v19  ;;  %v16852_v19 = vcombine.low %v3385_v1, %v3393_v2  ;;  %v16949_v1 = vcombine.high %v3481_v58, %v3489_v59  ;;  %v3505_v9 = vld [vmem:[#allocation11 + $0xf50] sm:$0xff] }
 0x48a   :  { %6474 = vmatprep.subr.bf16.mxu1 %v16759_v21  ;;  %v16871_v21 = vcombine.high %v3402_v17, %v3410_v18 }
 0x48b   :  { %6389 = vmatpush1.bf16.msra.mxu0 %v16756_v8  ;;  %v3418_v8 = vld [vmem:[#allocation11 + $0xc98] sm:$0xff] }
 0x48c   :  { %6475 = vmatpush1.bf16.msra.mxu1 %v16758_v22  ;;  %6390 = vmatprep.subr.bf16.mxu0 %v16773_v23  ;;  %v3426_v22 = vld [vmem:[#allocation11 + $0xcd8] sm:$0xff]  ;;  %v16868_v23 = vcombine.low %v3401_v15, %v3409_v16  ;;  %v16965_v15 = vcombine.high %v3497_v4, %v3505_v9 }
 0x48d   :  { %6476 = vmatprep.subr.bf16.mxu1 %v16775_v24  ;;  %v16870_v24 = vcombine.low %v3402_v17, %v3410_v18  ;;  %v16887_v27 = vcombine.high %v3418_v8, %v3426_v22  ;;  %v3513_v17 = vld [vmem:[#allocation11 + $0xf90] sm:$0xff] }
 0x48e   :  { %v3521_v18 = vld [vmem:[#allocation11 + $0xfd0] sm:$0xff] }
 0x48f   :  { %6391 = vmatpush1.bf16.msra.mxu0 %v16772_v32  ;;  %v3434_v32 = vld [vmem:[#allocation11 + $0xd18] sm:$0xff] }
 0x490   :  { %6477 = vmatpush1.bf16.msra.mxu1 %v16774_v33  ;;  %6392 = vmatprep.subr.bf16.mxu0 %v16789_v34  ;;  %v3442_v33 = vld [vmem:[#allocation11 + $0xd58] sm:$0xff]  ;;  %v16884_v34 = vcombine.low %v3417_v5, %v3425_v7  ;;  %v16981_v5 = vcombine.high %v3513_v17, %v3521_v18 }
 0x491   :  { %6478 = vmatprep.subr.bf16.mxu1 %v16791_v35  ;;  %v16886_v35 = vcombine.low %v3418_v8, %v3426_v22  ;;  %v16903_v37 = vcombine.high %v3434_v32, %v3442_v33  ;;  %v3019_v8 = vld [vmem:[#allocation11 + $0x20] sm:$0xff] }
 0x492   :  { %v3027_v22 = vld [vmem:[#allocation11 + $0x60] sm:$0xff] }
 0x493   :  { %6393 = vmatpush1.bf16.msra.mxu0 %v16788_v40  ;;  %v3450_v40 = vld [vmem:[#allocation11 + $0xd98] sm:$0xff] }
 0x494   :  { %6479 = vmatpush1.bf16.msra.mxu1 %v16790_v41  ;;  %6394 = vmatprep.subr.bf16.mxu0 %v16805_v42  ;;  %v3458_v41 = vld [vmem:[#allocation11 + $0xdd8] sm:$0xff]  ;;  %v16900_v42 = vcombine.low %v3433_v28, %v3441_v29  ;;  %v16489_v28 = vcombine.high %v3019_v8, %v3027_v22 }
 0x495   :  { %6480 = vmatprep.subr.bf16.mxu1 %v16807_v43  ;;  %v16902_v43 = vcombine.low %v3434_v32, %v3442_v33  ;;  %v16919_v45 = vcombine.high %v3450_v40, %v3458_v41  ;;  %v3035_v32 = vld [vmem:[#allocation11 + $0xa0] sm:$0xff] }
 0x496   :  { %v3043_v33 = vld [vmem:[#allocation11 + $0xe0] sm:$0xff] }
 0x497   :  { %6395 = vmatpush1.bf16.msra.mxu0 %v16804_v48  ;;  %v3466_v48 = vld [vmem:[#allocation11 + $0xe18] sm:$0xff] }
 0x498   :  { %6481 = vmatpush1.bf16.msra.mxu1 %v16806_v49  ;;  %6396 = vmatprep.subr.bf16.mxu0 %v16821_v50  ;;  %v3474_v49 = vld [vmem:[#allocation11 + $0xe58] sm:$0xff]  ;;  %v16916_v50 = vcombine.low %v3449_v38, %v3457_v39  ;;  %v16505_v38 = vcombine.high %v3035_v32, %v3043_v33  ;;  %v3051_v39 = vld [vmem:[#allocation11 + $0x120] sm:$0xff] }
 0x499   :  { %6482 = vmatprep.subr.bf16.mxu1 %v16823_v51  ;;  %v16918_v51 = vcombine.low %v3450_v40, %v3458_v41  ;;  %v16935_v57 = vcombine.high %v3466_v48, %v3474_v49  ;;  %v3059_v40 = vld [vmem:[#allocation11 + $0x160] sm:$0xff] }
 0x49b   :  { %6397 = vmatpush1.bf16.msra.mxu0 %v16820_v60  ;;  %v3482_v60 = vld [vmem:[#allocation11 + $0xe98] sm:$0xff] }
 0x49c   :  { %6483 = vmatpush1.bf16.msra.mxu1 %v16822_v61  ;;  %6398 = vmatprep.subr.bf16.mxu0 %v16837_v62  ;;  %v3490_v61 = vld [vmem:[#allocation11 + $0xed8] sm:$0xff]  ;;  %v16932_v62 = vcombine.low %v3465_v46, %v3473_v47  ;;  %v16521_v46 = vcombine.high %v3051_v39, %v3059_v40 }
 0x49d   :  { %6484 = vmatprep.subr.bf16.mxu1 %v16839_v63  ;;  %v16934_v63 = vcombine.low %v3466_v48, %v3474_v49  ;;  %v16951_v2 = vcombine.high %v3482_v60, %v3490_v61  ;;  %v3067_v48 = vld [vmem:[#allocation11 + $0x1a0] sm:$0xff] }
 0x49e   :  { %v3075_v49 = vld [vmem:[#allocation11 + $0x1e0] sm:$0xff] }
 0x49f   :  { %6399 = vmatpush1.bf16.msra.mxu0 %v16836_v10  ;;  %v3498_v10 = vld [vmem:[#allocation11 + $0xf18] sm:$0xff] }
 0x4a0   :  { %6485 = vmatpush1.bf16.msra.mxu1 %v16838_v12  ;;  %6400 = vmatprep.subr.bf16.mxu0 %v16853_v13  ;;  %v3506_v12 = vld [vmem:[#allocation11 + $0xf58] sm:$0xff]  ;;  %v16948_v13 = vcombine.low %v3481_v58, %v3489_v59  ;;  %v16537_v58 = vcombine.high %v3067_v48, %v3075_v49 }
 0x4a1   :  { %6486 = vmatprep.subr.bf16.mxu1 %v16855_v14  ;;  %v16950_v14 = vcombine.low %v3482_v60, %v3490_v61  ;;  %v16967_v16 = vcombine.high %v3498_v10, %v3506_v12  ;;  %v3083_v60 = vld [vmem:[#allocation11 + $0x220] sm:$0xff] }
 0x4a2   :  { %v3091_v61 = vld [vmem:[#allocation11 + $0x260] sm:$0xff] }
 0x4a3   :  { %6401 = vmatpush1.bf16.msra.mxu0 %v16852_v19  ;;  %v3514_v19 = vld [vmem:[#allocation11 + $0xf98] sm:$0xff] }
 0x4a4   :  { %6487 = vmatpush1.bf16.msra.mxu1 %v16854_v20  ;;  %6402 = vmatprep.subr.bf16.mxu0 %v16869_v3  ;;  %v3522_v20 = vld [vmem:[#allocation11 + $0xfd8] sm:$0xff]  ;;  %v16964_v3 = vcombine.low %v3497_v4, %v3505_v9  ;;  %v16553_v4 = vcombine.high %v3083_v60, %v3091_v61 }
 0x4a5   :  { %6488 = vmatprep.subr.bf16.mxu1 %v16871_v21  ;;  %v16966_v21 = vcombine.low %v3498_v10, %v3506_v12  ;;  %v16983_v7 = vcombine.high %v3514_v19, %v3522_v20  ;;  %v3099_v10 = vld [vmem:[#allocation11 + $0x2a0] sm:$0xff] }
 0x4a6   :  { %v3107_v12 = vld [vmem:[#allocation11 + $0x2e0] sm:$0xff] }
 0x4a7   :  { %6403 = vmatpush1.bf16.msra.mxu0 %v16868_v23  ;;  %v3020_v23 = vld [vmem:[#allocation11 + $0x28] sm:$0xff] }
 0x4a8   :  { %6489 = vmatpush1.bf16.msra.mxu1 %v16870_v24  ;;  %6404 = vmatprep.subr.bf16.mxu0 %v16885_v25  ;;  %v3028_v24 = vld [vmem:[#allocation11 + $0x68] sm:$0xff]  ;;  %v16980_v25 = vcombine.low %v3513_v17, %v3521_v18  ;;  %v16569_v17 = vcombine.high %v3099_v10, %v3107_v12 }
 0x4a9   :  { %6490 = vmatprep.subr.bf16.mxu1 %v16887_v27  ;;  %v16982_v27 = vcombine.low %v3514_v19, %v3522_v20  ;;  %v16491_v29 = vcombine.high %v3020_v23, %v3028_v24  ;;  %v3115_v19 = vld [vmem:[#allocation11 + $0x320] sm:$0xff] }
 0x4aa   :  { %v3123_v20 = vld [vmem:[#allocation11 + $0x360] sm:$0xff] }
 0x4ab   :  { %6405 = vmatpush1.bf16.msra.mxu0 %v16884_v34  ;;  %v16488_v34 = vcombine.low %v3019_v8, %v3027_v22  ;;  %v16585_v8 = vcombine.high %v3115_v19, %v3123_v20 }
 0x4ac   :  { %6491 = vmatpush1.bf16.msra.mxu1 %v16886_v35  ;;  %6406 = vmatprep.subr.bf16.mxu0 %v16901_v36  ;;  %v3036_v35 = vld [vmem:[#allocation11 + $0xa8] sm:$0xff] }
 0x4ad   :  { %6492 = vmatprep.subr.bf16.mxu1 %v16903_v37  ;;  %v3044_v36 = vld [vmem:[#allocation11 + $0xe8] sm:$0xff]  ;;  %v16490_v37 = vcombine.low %v3020_v23, %v3028_v24  ;;  %v3131_v23 = vld [vmem:[#allocation11 + $0x3a0] sm:$0xff] }
 0x4ae   :  { %v16507_v41 = vcombine.high %v3036_v35, %v3044_v36  ;;  %v3139_v24 = vld [vmem:[#allocation11 + $0x3e0] sm:$0xff] }
 0x4af   :  { %6407 = vmatpush1.bf16.msra.mxu0 %v16900_v42  ;;  %v3052_v42 = vld [vmem:[#allocation11 + $0x128] sm:$0xff] }
 0x4b0   :  { %6493 = vmatpush1.bf16.msra.mxu1 %v16902_v43  ;;  %6408 = vmatprep.subr.bf16.mxu0 %v16917_v44  ;;  %v3060_v43 = vld [vmem:[#allocation11 + $0x168] sm:$0xff]  ;;  %v16504_v44 = vcombine.low %v3035_v32, %v3043_v33  ;;  %v16601_v32 = vcombine.high %v3131_v23, %v3139_v24 }
 0x4b1   :  { %6494 = vmatprep.subr.bf16.mxu1 %v16919_v45  ;;  %v16506_v45 = vcombine.low %v3036_v35, %v3044_v36  ;;  %v16523_v47 = vcombine.high %v3052_v42, %v3060_v43  ;;  %v3155_v35 = vld [vmem:[#allocation11 + $0x460] sm:$0xff]  ;;  %v3148_v36 = vld [vmem:[#allocation11 + $0x428] sm:$0xff] }
 0x4b3   :  { %6409 = vmatpush1.bf16.msra.mxu0 %v16916_v50  ;;  %v3068_v50 = vld [vmem:[#allocation11 + $0x1a8] sm:$0xff] }
 0x4b4   :  { %6495 = vmatpush1.bf16.msra.mxu1 %v16918_v51  ;;  %6410 = vmatprep.subr.bf16.mxu0 %v16933_v56  ;;  %v3076_v51 = vld [vmem:[#allocation11 + $0x1e8] sm:$0xff]  ;;  %v16520_v56 = vcombine.low %v3051_v39, %v3059_v40 }
 0x4b5   :  { %6496 = vmatprep.subr.bf16.mxu1 %v16935_v57  ;;  %v16522_v57 = vcombine.low %v3052_v42, %v3060_v43  ;;  %v16539_v59 = vcombine.high %v3068_v50, %v3076_v51  ;;  %v3163_v42 = vld [vmem:[#allocation11 + $0x4a0] sm:$0xff] }
 0x4b6   :  { %v3171_v43 = vld [vmem:[#allocation11 + $0x4e0] sm:$0xff] }
 0x4b7   :  { %6411 = vmatpush1.bf16.msra.mxu0 %v16932_v62  ;;  %v3084_v62 = vld [vmem:[#allocation11 + $0x228] sm:$0xff] }
 0x4b8   :  { %6497 = vmatpush1.bf16.msra.mxu1 %v16934_v63  ;;  %6412 = vmatprep.subr.bf16.mxu0 %v16949_v1  ;;  %v3092_v63 = vld [vmem:[#allocation11 + $0x268] sm:$0xff]  ;;  %v16536_v1 = vcombine.low %v3067_v48, %v3075_v49  ;;  %v16633_v48 = vcombine.high %v3163_v42, %v3171_v43 }
 0x4b9   :  { %6498 = vmatprep.subr.bf16.mxu1 %v16951_v2  ;;  %v16538_v2 = vcombine.low %v3068_v50, %v3076_v51  ;;  %v16555_v9 = vcombine.high %v3084_v62, %v3092_v63  ;;  %v3179_v50 = vld [vmem:[#allocation11 + $0x520] sm:$0xff] }
 0x4ba   :  { %v3187_v51 = vld [vmem:[#allocation11 + $0x560] sm:$0xff] }
 0x4bb   :  { %6413 = vmatpush1.bf16.msra.mxu0 %v16948_v13  ;;  %v3100_v13 = vld [vmem:[#allocation11 + $0x2a8] sm:$0xff] }
 0x4bc   :  { %6499 = vmatpush1.bf16.msra.mxu1 %v16950_v14  ;;  %6414 = vmatprep.subr.bf16.mxu0 %v16965_v15  ;;  %v3108_v14 = vld [vmem:[#allocation11 + $0x2e8] sm:$0xff]  ;;  %v16552_v15 = vcombine.low %v3083_v60, %v3091_v61  ;;  %v16649_v60 = vcombine.high %v3179_v50, %v3187_v51 }
 0x4bd   :  { %6500 = vmatprep.subr.bf16.mxu1 %v16967_v16  ;;  %v16554_v16 = vcombine.low %v3084_v62, %v3092_v63  ;;  %v16571_v18 = vcombine.high %v3100_v13, %v3108_v14  ;;  %v3195_v62 = vld [vmem:[#allocation11 + $0x5a0] sm:$0xff] }
 0x4be   :  { %v3203_v63 = vld [vmem:[#allocation11 + $0x5e0] sm:$0xff] }
 0x4bf   :  { %6415 = vmatpush1.bf16.msra.mxu0 %v16964_v3  ;;  %v3116_v3 = vld [vmem:[#allocation11 + $0x328] sm:$0xff] }
 0x4c0   :  { %6501 = vmatpush1.bf16.msra.mxu1 %v16966_v21  ;;  %6416 = vmatprep.subr.bf16.mxu0 %v16981_v5  ;;  %v3124_v21 = vld [vmem:[#allocation11 + $0x368] sm:$0xff]  ;;  %v16568_v5 = vcombine.low %v3099_v10, %v3107_v12  ;;  %v16665_v10 = vcombine.high %v3195_v62, %v3203_v63 }
 0x4c1   :  { %6502 = vmatprep.subr.bf16.mxu1 %v16983_v7  ;;  %v16570_v7 = vcombine.low %v3100_v13, %v3108_v14  ;;  %v16587_v22 = vcombine.high %v3116_v3, %v3124_v21  ;;  %v3211_v13 = vld [vmem:[#allocation11 + $0x620] sm:$0xff] }
 0x4c2   :  { %v3219_v14 = vld [vmem:[#allocation11 + $0x660] sm:$0xff] }
 0x4c3   :  { %6417 = vmatpush1.bf16.msra.mxu0 %v16980_v25  ;;  %v3132_v25 = vld [vmem:[#allocation11 + $0x3a8] sm:$0xff] }
 0x4c4   :  { %6503 = vmatpush1.bf16.msra.mxu1 %v16982_v27  ;;  %6515 = vmatprep.subr.bf16.mxu0 %v16489_v28  ;;  %v3140_v27 = vld [vmem:[#allocation11 + $0x3e8] sm:$0xff]  ;;  %v16584_v28 = vcombine.low %v3115_v19, %v3123_v20  ;;  %v16681_v19 = vcombine.high %v3211_v13, %v3219_v14 }
 0x4c5   :  { %6601 = vmatprep.subr.bf16.mxu1 %v16491_v29  ;;  %v16586_v29 = vcombine.low %v3116_v3, %v3124_v21  ;;  %v16603_v33 = vcombine.high %v3132_v25, %v3140_v27  ;;  %v16602_v39 = vcombine.low %v3132_v25, %v3140_v27  ;;  %v3227_v3 = vld [vmem:[#allocation11 + $0x6a0] sm:$0xff] }
 0x4c6   :  { %6419 = vmatmul.mubr.bf16.vlgmr.msra.gmra.mrb[12].mxu0 %v21384_v54  ;;  %v3235_v21 = vld [vmem:[#allocation11 + $0x6e0] sm:$0xff] }
 0x4c7   :  { %6505 = vmatmul.mubr.bf16.vlgmr.msra.gmra.mrb[16].mxu1 %v21384_v54  ;;  %6516 = vmatpush1.bf16.msra.mxu0 %v16488_v34  ;;  %v3147_v34 = vld [vmem:[#allocation11 + $0x420] sm:$0xff] }
 0x4c8   :  { %6547 = vmatprep.mubr.bf16.mxu0 %v21386_v30  ;;  %6602 = vmatpush1.bf16.msra.mxu1 %v16490_v37  ;;  %v3156_v37 = vld [vmem:[#allocation11 + $0x468] sm:$0xff]  ;;  %v16617_v40 = vcombine.high %v3147_v34, %v3155_v35  ;;  %v3243_v25 = vld [vmem:[#allocation11 + $0x720] sm:$0xff] }
 0x4c9   :  { %6633 = vmatprep.mubr.bf16.mxu1 %v21386_v30  ;;  %6517 = vmatprep.subr.bf16.mxu0 %v16505_v38  ;;  %v16600_v38 = vcombine.low %v3131_v23, %v3139_v24  ;;  %v16697_v23 = vcombine.high %v3227_v3, %v3235_v21  ;;  %v3251_v27 = vld [vmem:[#allocation11 + $0x760] sm:$0xff] }
 0x4ca   :  { %6603 = vmatprep.subr.bf16.mxu1 %v16507_v41  ;;  %v16619_v41 = vcombine.high %v3148_v36, %v3156_v37 }
 0x4cb   :  { %6518 = vmatpush1.bf16.msra.mxu0 %v16504_v44  ;;  %v3164_v44 = vld [vmem:[#allocation11 + $0x4a8] sm:$0xff] }
 0x4cc   :  { %6604 = vmatpush1.bf16.msra.mxu1 %v16506_v45  ;;  %6519 = vmatprep.subr.bf16.mxu0 %v16521_v46  ;;  %v3172_v45 = vld [vmem:[#allocation11 + $0x4e8] sm:$0xff]  ;;  %v16616_v46 = vcombine.low %v3147_v34, %v3155_v35  ;;  %v16713_v34 = vcombine.high %v3243_v25, %v3251_v27 }
 0x4cd   :  { %6605 = vmatprep.subr.bf16.mxu1 %v16523_v47  ;;  %v16618_v47 = vcombine.low %v3148_v36, %v3156_v37  ;;  %v16635_v49 = vcombine.high %v3164_v44, %v3172_v45  ;;  %v3259_v36 = vld [vmem:[#allocation11 + $0x7a0] sm:$0xff] }
 0x4ce   :  { %v3267_v37 = vld [vmem:[#allocation11 + $0x7e0] sm:$0xff] }
 0x4cf   :  { %6520 = vmatpush1.bf16.msra.mxu0 %v16520_v56  ;;  %v3180_v56 = vld [vmem:[#allocation11 + $0x528] sm:$0xff] }
 0x4d0   :  { %6606 = vmatpush1.bf16.msra.mxu1 %v16522_v57  ;;  %6521 = vmatprep.subr.bf16.mxu0 %v16537_v58  ;;  %v3188_v57 = vld [vmem:[#allocation11 + $0x568] sm:$0xff]  ;;  %v16632_v58 = vcombine.low %v3163_v42, %v3171_v43  ;;  %v16729_v42 = vcombine.high %v3259_v36, %v3267_v37 }
 0x4d1   :  { %6607 = vmatprep.subr.bf16.mxu1 %v16539_v59  ;;  %v16634_v59 = vcombine.low %v3164_v44, %v3172_v45  ;;  %v16651_v61 = vcombine.high %v3180_v56, %v3188_v57  ;;  %v3275_v44 = vld [vmem:[#allocation11 + $0x820] sm:$0xff] }
 0x4d2   :  { %v3283_v45 = vld [vmem:[#allocation11 + $0x860] sm:$0xff] }
 0x4d3   :  { %6522 = vmatpush1.bf16.msra.mxu0 %v16536_v1  ;;  %v3196_v1 = vld [vmem:[#allocation11 + $0x5a8] sm:$0xff] }
 0x4d4   :  { %6608 = vmatpush1.bf16.msra.mxu1 %v16538_v2  ;;  %6523 = vmatprep.subr.bf16.mxu0 %v16553_v4  ;;  %v3204_v2 = vld [vmem:[#allocation11 + $0x5e8] sm:$0xff]  ;;  %v16648_v4 = vcombine.low %v3179_v50, %v3187_v51  ;;  %v16745_v50 = vcombine.high %v3275_v44, %v3283_v45 }
 0x4d5   :  { %6609 = vmatprep.subr.bf16.mxu1 %v16555_v9  ;;  %v16650_v9 = vcombine.low %v3180_v56, %v3188_v57  ;;  %v16667_v12 = vcombine.high %v3196_v1, %v3204_v2  ;;  %v3291_v56 = vld [vmem:[#allocation11 + $0x8a0] sm:$0xff] }
 0x4d6   :  { %v3299_v57 = vld [vmem:[#allocation11 + $0x8e0] sm:$0xff] }
 0x4d7   :  { %6524 = vmatpush1.bf16.msra.mxu0 %v16552_v15  ;;  %v3212_v15 = vld [vmem:[#allocation11 + $0x628] sm:$0xff] }
 0x4d8   :  { %6610 = vmatpush1.bf16.msra.mxu1 %v16554_v16  ;;  %6525 = vmatprep.subr.bf16.mxu0 %v16569_v17  ;;  %v3220_v16 = vld [vmem:[#allocation11 + $0x668] sm:$0xff]  ;;  %v16664_v17 = vcombine.low %v3195_v62, %v3203_v63  ;;  %v16761_v62 = vcombine.high %v3291_v56, %v3299_v57  ;;  %v3307_v63 = vld [vmem:[#allocation11 + $0x920] sm:$0xff] }
 0x4d9   :  { %6611 = vmatprep.subr.bf16.mxu1 %v16571_v18  ;;  %v16666_v18 = vcombine.low %v3196_v1, %v3204_v2  ;;  %v16683_v20 = vcombine.high %v3212_v15, %v3220_v16  ;;  %v3315_v1 = vld [vmem:[#allocation11 + $0x960] sm:$0xff] }
 0x4db   :  { %6526 = vmatpush1.bf16.msra.mxu0 %v16568_v5  ;;  %v3228_v5 = vld [vmem:[#allocation11 + $0x6a8] sm:$0xff] }
 0x4dc   :  { %6612 = vmatpush1.bf16.msra.mxu1 %v16570_v7  ;;  %6527 = vmatprep.subr.bf16.mxu0 %v16585_v8  ;;  %v3236_v7 = vld [vmem:[#allocation11 + $0x6e8] sm:$0xff]  ;;  %v16680_v8 = vcombine.low %v3211_v13, %v3219_v14  ;;  %v16777_v13 = vcombine.high %v3307_v63, %v3315_v1 }
 0x4dd   :  { %6613 = vmatprep.subr.bf16.mxu1 %v16587_v22  ;;  %v16682_v22 = vcombine.low %v3212_v15, %v3220_v16  ;;  %v16699_v24 = vcombine.high %v3228_v5, %v3236_v7  ;;  %v3323_v15 = vld [vmem:[#allocation11 + $0x9a0] sm:$0xff] }
 0x4de   :  { %v3331_v16 = vld [vmem:[#allocation11 + $0x9e0] sm:$0xff] }
 0x4df   :  { %6528 = vmatpush1.bf16.msra.mxu0 %v16584_v28  ;;  %v3244_v28 = vld [vmem:[#allocation11 + $0x728] sm:$0xff] }
 0x4e0   :  { %6614 = vmatpush1.bf16.msra.mxu1 %v16586_v29  ;;  %6529 = vmatprep.subr.bf16.mxu0 %v16601_v32  ;;  %v3252_v29 = vld [vmem:[#allocation11 + $0x768] sm:$0xff]  ;;  %v16696_v32 = vcombine.low %v3227_v3, %v3235_v21  ;;  %v16793_v3 = vcombine.high %v3323_v15, %v3331_v16 }
 0x4e1   :  { %6615 = vmatprep.subr.bf16.mxu1 %v16603_v33  ;;  %v16698_v33 = vcombine.low %v3228_v5, %v3236_v7  ;;  %v16715_v35 = vcombine.high %v3244_v28, %v3252_v29  ;;  %v3339_v5 = vld [vmem:[#allocation11 + $0xa20] sm:$0xff] }
 0x4e2   :  { %v3347_v7 = vld [vmem:[#allocation11 + $0xa60] sm:$0xff] }
 0x4e3   :  { %6530 = vmatpush1.bf16.msra.mxu0 %v16600_v38  ;;  %v3260_v38 = vld [vmem:[#allocation11 + $0x7a8] sm:$0xff] }
 0x4e4   :  { %6616 = vmatpush1.bf16.msra.mxu1 %v16602_v39  ;;  %6531 = vmatprep.subr.bf16.mxu0 %v16617_v40  ;;  %v3268_v39 = vld [vmem:[#allocation11 + $0x7e8] sm:$0xff]  ;;  %v16712_v40 = vcombine.low %v3243_v25, %v3251_v27  ;;  %v16809_v25 = vcombine.high %v3339_v5, %v3347_v7 }
 0x4e5   :  { %6617 = vmatprep.subr.bf16.mxu1 %v16619_v41  ;;  %v16714_v41 = vcombine.low %v3244_v28, %v3252_v29  ;;  %v16731_v43 = vcombine.high %v3260_v38, %v3268_v39  ;;  %v3355_v28 = vld [vmem:[#allocation11 + $0xaa0] sm:$0xff] }
 0x4e6   :  { %v3363_v29 = vld [vmem:[#allocation11 + $0xae0] sm:$0xff] }
 0x4e7   :  { %6532 = vmatpush1.bf16.msra.mxu0 %v16616_v46  ;;  %v3276_v46 = vld [vmem:[#allocation11 + $0x828] sm:$0xff] }
 0x4e8   :  { %6618 = vmatpush1.bf16.msra.mxu1 %v16618_v47  ;;  %6533 = vmatprep.subr.bf16.mxu0 %v16633_v48  ;;  %v3284_v47 = vld [vmem:[#allocation11 + $0x868] sm:$0xff]  ;;  %v16728_v48 = vcombine.low %v3259_v36, %v3267_v37  ;;  %v16825_v37 = vcombine.high %v3355_v28, %v3363_v29 }
 0x4e9   :  { %6619 = vmatprep.subr.bf16.mxu1 %v16635_v49  ;;  %v16730_v49 = vcombine.low %v3260_v38, %v3268_v39  ;;  %v16747_v51 = vcombine.high %v3276_v46, %v3284_v47  ;;  %v3371_v39 = vld [vmem:[#allocation11 + $0xb20] sm:$0xff] }
 0x4eb   :  { %6534 = vmatpush1.bf16.msra.mxu0 %v16632_v58  ;;  %v16744_v58 = vcombine.low %v3275_v44, %v3283_v45  ;;  %v3380_v44 = vld [vmem:[#allocation11 + $0xb68] sm:$0xff] }
 0x4ec   :  { %6620 = vmatpush1.bf16.msra.mxu1 %v16634_v59  ;;  %6535 = vmatprep.subr.bf16.mxu0 %v16649_v60  ;;  %v3292_v59 = vld [vmem:[#allocation11 + $0x8a8] sm:$0xff] }
 0x4ed   :  { %6621 = vmatprep.subr.bf16.mxu1 %v16651_v61  ;;  %v3300_v60 = vld [vmem:[#allocation11 + $0x8e8] sm:$0xff]  ;;  %v16746_v61 = vcombine.low %v3276_v46, %v3284_v47  ;;  %v16824_v47 = vcombine.low %v3355_v28, %v3363_v29 }
 0x4ee   :  { %v16763_v2 = vcombine.high %v3292_v59, %v3300_v60  ;;  %v3412_v28 = vld [vmem:[#allocation11 + $0xc68] sm:$0xff] }
 0x4ef   :  { %6536 = vmatpush1.bf16.msra.mxu0 %v16648_v4  ;;  %v3308_v4 = vld [vmem:[#allocation11 + $0x928] sm:$0xff] }
 0x4f0   :  { %6622 = vmatpush1.bf16.msra.mxu1 %v16650_v9  ;;  %6537 = vmatprep.subr.bf16.mxu0 %v16665_v10  ;;  %v3316_v9 = vld [vmem:[#allocation11 + $0x968] sm:$0xff]  ;;  %v16760_v10 = vcombine.low %v3291_v56, %v3299_v57 }
 0x4f1   :  { %6623 = vmatprep.subr.bf16.mxu1 %v16667_v12  ;;  %v16762_v12 = vcombine.low %v3292_v59, %v3300_v60  ;;  %v16779_v14 = vcombine.high %v3308_v4, %v3316_v9 }
 0x4f3   :  { %6538 = vmatpush1.bf16.msra.mxu0 %v16664_v17  ;;  %v3324_v17 = vld [vmem:[#allocation11 + $0x9a8] sm:$0xff] }
 0x4f4   :  { %6624 = vmatpush1.bf16.msra.mxu1 %v16666_v18  ;;  %6539 = vmatprep.subr.bf16.mxu0 %v16681_v19  ;;  %v3332_v18 = vld [vmem:[#allocation11 + $0x9e8] sm:$0xff]  ;;  %v16776_v19 = vcombine.low %v3307_v63, %v3315_v1 }
 0x4f5   :  { %6625 = vmatprep.subr.bf16.mxu1 %v16683_v20  ;;  %v16778_v20 = vcombine.low %v3308_v4, %v3316_v9  ;;  %v16795_v21 = vcombine.high %v3324_v17, %v3332_v18  ;;  %v3388_v1 = vld [vmem:[#allocation11 + $0xba8] sm:$0xff] }
 0x4f7   :  { %6540 = vmatpush1.bf16.msra.mxu0 %v16680_v8  ;;  %v3340_v8 = vld [vmem:[#allocation11 + $0xa28] sm:$0xff] }
 0x4f8   :  { %6626 = vmatpush1.bf16.msra.mxu1 %v16682_v22  ;;  %6541 = vmatprep.subr.bf16.mxu0 %v16697_v23  ;;  %v3348_v22 = vld [vmem:[#allocation11 + $0xa68] sm:$0xff]  ;;  %v16792_v23 = vcombine.low %v3323_v15, %v3331_v16 }
 0x4f9   :  { %6627 = vmatprep.subr.bf16.mxu1 %v16699_v24  ;;  %v16794_v24 = vcombine.low %v3324_v17, %v3332_v18  ;;  %v16811_v27 = vcombine.high %v3340_v8, %v3348_v22  ;;  %v16810_v36 = vcombine.low %v3340_v8, %v3348_v22  ;;  %v3411_v8 = vld [vmem:[#allocation11 + $0xc60] sm:$0xff] }
 0x4fb   :  { %6542 = vmatpush1.bf16.msra.mxu0 %v16696_v32  ;;  %v3356_v32 = vld [vmem:[#allocation11 + $0xaa8] sm:$0xff] }
 0x4fc   :  { %6628 = vmatpush1.bf16.msra.mxu1 %v16698_v33  ;;  %6543 = vmatprep.subr.bf16.mxu0 %v16713_v34  ;;  %v3364_v33 = vld [vmem:[#allocation11 + $0xae8] sm:$0xff]  ;;  %v16808_v34 = vcombine.low %v3339_v5, %v3347_v7  ;;  %v3403_v7 = vld [vmem:[#allocation11 + $0xc20] sm:$0xff] }
 0x4fd   :  { %6629 = vmatprep.subr.bf16.mxu1 %v16715_v35  ;;  %v21412_v35 = vld [vmem:[#allocation13] sm:$0xff]  ;;  %v16827_v38 = vcombine.high %v3356_v32, %v3364_v33 }
 0x4fe   :  { %v3538_v45 = vrot.slane %v21412_v35, %v21358_v55  ;;  %v3546_v46 = vrot.slane %v21412_v35, %v21372_v11 }
 0x4ff   :  { %6544 = vmatpush1.bf16.msra.mxu0 %v16712_v40  ;;  %v3379_v40 = vld [vmem:[#allocation11 + $0xb60] sm:$0xff] }
 0x500   :  { %6630 = vmatpush1.bf16.msra.mxu1 %v16714_v41  ;;  %6545 = vmatprep.subr.bf16.mxu0 %v16729_v42  ;;  %v3534_v41 = vrot.slane %v21412_v35, %v21353_v53  ;;  %v3542_v42 = vrot.slane %v21412_v35, %v21369_v6  ;;  %v16840_v63 = vcombine.low %v3371_v39, %v3379_v40 }
 0x501   :  { %6631 = vmatprep.subr.bf16.mxu1 %v16731_v43  ;;  %v3372_v43 = vld [vmem:[#allocation11 + $0xb28] sm:$0xff] }
 0x503   :  { %6546 = vmatpush1.bf16.msra.mxu0 %v16728_v48  ;;  %v16826_v48 = vcombine.low %v3356_v32, %v3364_v33 }
 0x504   :  { %6632 = vmatpush1.bf16.msra.mxu1 %v16730_v49  ;;  %6558 = vmatprep.subr.bf16.mxu0 %v16745_v50  ;;  %v16841_v49 = vcombine.high %v3371_v39, %v3379_v40  ;;  %v3387_v50 = vld [vmem:[#allocation11 + $0xba0] sm:$0xff] }
 0x505   :  { %6644 = vmatprep.subr.bf16.mxu1 %v16747_v51  ;;  %v3395_v51 = vld [vmem:[#allocation11 + $0xbe0] sm:$0xff] }
 0x506   :  { %6548 = vmatmul.mubr.bf16.vlgmr.msra.gmra.mrb[16].mxu0 %v21382_v26 }
 0x507   :  { %6634 = vmatmul.mubr.bf16.vlgmr.msra.gmra.mrb[20].mxu1 %v21382_v26  ;;  %6559 = vmatpush1.bf16.msra.mxu0 %v16744_v58  ;;  %v16843_v58 = vcombine.high %v3372_v43, %v3380_v44 }
 0x508   :  { %6590 = vmatprep.mubr.bf16.mxu0 %v21388_v31  ;;  %6645 = vmatpush1.bf16.msra.mxu1 %v16746_v61 }
 0x509   :  { %6676 = vmatprep.mubr.bf16.mxu1 %v21388_v31  ;;  %6560 = vmatprep.subr.bf16.mxu0 %v16761_v62 }
 0x50a   :  { %6646 = vmatprep.subr.bf16.mxu1 %v16763_v2  ;;  %v3396_v2 = vld [vmem:[#allocation11 + $0xbe8] sm:$0xff] }
 0x50b   :  { %6561 = vmatpush1.bf16.msra.mxu0 %v16760_v10  ;;  %v16859_v5 = vcombine.high %v3388_v1, %v3396_v2 }
 0x50c   :  { %6647 = vmatpush1.bf16.msra.mxu1 %v16762_v12  ;;  %6562 = vmatprep.subr.bf16.mxu0 %v16777_v13  ;;  %v16842_v13 = vcombine.low %v3372_v43, %v3380_v44  ;;  %v3427_v43 = vld [vmem:[#allocation11 + $0xce0] sm:$0xff]  ;;  %v3420_v44 = vld [vmem:[#allocation11 + $0xca8] sm:$0xff] }
 0x50d   :  { %6648 = vmatprep.subr.bf16.mxu1 %v16779_v14  ;;  %v16856_v14 = vcombine.low %v3387_v50, %v3395_v51 }
 0x50f   :  { %6563 = vmatpush1.bf16.msra.mxu0 %v16776_v19  ;;  %v16857_v19 = vcombine.high %v3387_v50, %v3395_v51  ;;  %v3435_v50 = vld [vmem:[#allocation11 + $0xd20] sm:$0xff] }
 0x510   :  { %6649 = vmatpush1.bf16.msra.mxu1 %v16778_v20  ;;  %6564 = vmatprep.subr.bf16.mxu0 %v16793_v3  ;;  %v3443_v51 = vld [vmem:[#allocation11 + $0xd60] sm:$0xff] }
 0x511   :  { %6650 = vmatprep.subr.bf16.mxu1 %v16795_v21  ;;  %v16858_v21 = vcombine.low %v3388_v1, %v3396_v2  ;;  %v3452_v1 = vld [vmem:[#allocation11 + $0xda8] sm:$0xff] }
 0x512   :  { %v3460_v2 = vld [vmem:[#allocation11 + $0xde8] sm:$0xff] }
 0x513   :  { %6565 = vmatpush1.bf16.msra.mxu0 %v16792_v23 }
 0x514   :  { %6651 = vmatpush1.bf16.msra.mxu1 %v16794_v24  ;;  %6566 = vmatprep.subr.bf16.mxu0 %v16809_v25 }
 0x515   :  { %6652 = vmatprep.subr.bf16.mxu1 %v16811_v27  ;;  %v3404_v27 = vld [vmem:[#allocation11 + $0xc28] sm:$0xff] }
 0x517   :  { %6567 = vmatpush1.bf16.msra.mxu0 %v16808_v34 }
 0x518   :  { %6653 = vmatpush1.bf16.msra.mxu1 %v16810_v36  ;;  %6568 = vmatprep.subr.bf16.mxu0 %v16825_v37 }
 0x519   :  { %v6248_v56 = vpop.f32.mrb[8].mxu0  ;;  %v6334_v57 = vpop.f32.mrb[12].mxu1  ;;  %6654 = vmatprep.subr.bf16.mxu1 %v16827_v38  ;;  %v16873_v38 = vcombine.high %v3403_v7, %v3411_v8 }
 0x51a   :  { %v18353_v59 = vadd.f32 %v6248_v56, %v3534_v41  ;;  %v18357_v60 = vadd.f32 %v6334_v57, %v3542_v42  ;;  %v6250_v61 = vpop.f32.mrb[9].mxu0  ;;  %v6336_v62 = vpop.f32.mrb[13].mxu1  ;;  %v3436_v56 = vld [vmem:[#allocation11 + $0xd28] sm:$0xff] }
 0x51b   :  { %v18354_v4 = vadd.f32 %v6250_v61, %v3538_v45  ;;  %v18358_v9 = vadd.f32 %v6336_v62, %v3546_v46  ;;  %v6252_v10 = vpop.f32.mrb[10].mxu0  ;;  %v6338_v12 = vpop.f32.mrb[14].mxu1  ;;  %6569 = vmatpush1.bf16.msra.mxu0 %v16824_v47  ;;  %v16874_v47 = vcombine.low %v3404_v27, %v3412_v28  ;;  %v3444_v57 = vld [vmem:[#allocation11 + $0xd68] sm:$0xff]  ;;  %v3451_v62 = vld [vmem:[#allocation11 + $0xda0] sm:$0xff] }
 0x51c   :  { %v18355_v15 = vadd.f32 %v6252_v10, %v3534_v41  ;;  %v18359_v16 = vadd.f32 %v6338_v12, %v3542_v42  ;;  %6655 = vmatpush1.bf16.msra.mxu1 %v16826_v48  ;;  %v6254_v17 = vpop.f32.mrb[11].mxu0  ;;  %v6340_v18 = vpop.f32.mrb[15].mxu1  ;;  %6570 = vmatprep.subr.bf16.mxu0 %v16841_v49  ;;  %v6859_v22 = vmax.f32 %v18353_v59, 0.0  ;;  %v6861_v23 = vmax.f32 %v18357_v60, 0.0  ;;  %v3419_v42 = vld [vmem:[#allocation11 + $0xca0] sm:$0xff] }
 0x51d   :  { %v18356_v20 = vadd.f32 %v6254_v17, %v3538_v45  ;;  %v18360_v3 = vadd.f32 %v6340_v18, %v3546_v46  ;;  %6656 = vmatprep.subr.bf16.mxu1 %v16843_v58  ;;  %v6860_v29 = vmax.f32 %v18354_v4, 0.0  ;;  %v6862_v32 = vmax.f32 %v18358_v9, 0.0  ;;  %v3428_v45 = vld [vmem:[#allocation11 + $0xce8] sm:$0xff] }
 0x51e   :  { %v6875_v24 = vmax.f32 %v18355_v15, 0.0  ;;  %v6877_v25 = vmax.f32 %v18359_v16, 0.0  ;;  %v16875_v41 = vcombine.high %v3404_v27, %v3412_v28  ;;  %v16872_v46 = vcombine.low %v3403_v7, %v3411_v8  ;;  %v3468_v15 = vld [vmem:[#allocation11 + $0xe28] sm:$0xff]  ;;  %v3507_v27 = vld [vmem:[#allocation11 + $0xf60] sm:$0xff] }
 0x51f   :  { %v6876_v33 = vmax.f32 %v18356_v20, 0.0  ;;  %v6878_v34 = vmax.f32 %v18360_v3, 0.0  ;;  %6571 = vmatpush1.bf16.msra.mxu0 %v16840_v63  ;;  %v16889_v48 = vcombine.high %v3419_v42, %v3427_v43  ;;  %v16891_v49 = vcombine.high %v3420_v44, %v3428_v45  ;;  %v3459_v63 = vld [vmem:[#allocation11 + $0xde0] sm:$0xff]  ;;  %v3476_v16 = vld [vmem:[#allocation11 + $0xe68] sm:$0xff] }
 0x520   :  { %v21422_v36 = vpack.c.bf16 %v6875_v24, %v6859_v22  ;;  %v21424_v37 = vpack.c.bf16 %v6877_v25, %v6861_v23  ;;  %6657 = vmatpush1.bf16.msra.mxu1 %v16842_v13  ;;  %6572 = vmatprep.subr.bf16.mxu0 %v16857_v19  ;;  %v16888_v58 = vcombine.low %v3419_v42, %v3427_v43  ;;  %v3467_v13 = vld [vmem:[#allocation11 + $0xe20] sm:$0xff]  ;;  %v3492_v7 = vld [vmem:[#allocation11 + $0xee8] sm:$0xff] }
 0x521   :  { %v21426_v39 = vpack.c.bf16 %v6876_v33, %v6860_v29  ;;  %v21428_v40 = vpack.c.bf16 %v6878_v34, %v6862_v32  ;;  %6658 = vmatprep.subr.bf16.mxu1 %v16859_v5  ;;  %v16890_v59 = vcombine.low %v3420_v44, %v3428_v45  ;;  %v16905_v60 = vcombine.high %v3435_v50, %v3443_v51  ;;  %v3483_v3 = vld [vmem:[#allocation11 + $0xea0] sm:$0xff]  ;;  %v3484_v5 = vld [vmem:[#allocation11 + $0xea8] sm:$0xff] }
 0x522   :  { %v16907_v61 = vcombine.high %v3436_v56, %v3444_v57  ;;  %v16904_v4 = vcombine.low %v3435_v50, %v3443_v51  ;;  %v16906_v9 = vcombine.low %v3436_v56, %v3444_v57  ;;  %v16921_v10 = vcombine.high %v3451_v62, %v3459_v63  ;;  %v3499_v25 = vld [vmem:[#allocation11 + $0xf20] sm:$0xff]  ;;  %v3500_v28 = vld [vmem:[#allocation11 + $0xf28] sm:$0xff]  ;;  %v3029_v50 = vld [vmem:[#allocation11 + $0x70] sm:$0xff] }
 0x523   :  { %6573 = vmatpush1.bf16.msra.mxu0 %v16856_v14  ;;  %v16923_v12 = vcombine.high %v3452_v1, %v3460_v2  ;;  %v3475_v14 = vld [vmem:[#allocation11 + $0xe60] sm:$0xff]  ;;  %v16920_v17 = vcombine.low %v3451_v62, %v3459_v63  ;;  %v16922_v18 = vcombine.low %v3452_v1, %v3460_v2  ;;  %v16939_v20 = vcombine.high %v3468_v15, %v3476_v16  ;;  %v3508_v29 = vld [vmem:[#allocation11 + $0xf68] sm:$0xff]  ;;  %v3022_v51 = vld [vmem:[#allocation11 + $0x38] sm:$0xff] }
 0x524   :  { %6659 = vmatpush1.bf16.msra.mxu1 %v16858_v21  ;;  %6574 = vmatprep.subr.bf16.mxu0 %v16873_v38  ;;  %v16937_v19 = vcombine.high %v3467_v13, %v3475_v14  ;;  %v3491_v21 = vld [vmem:[#allocation11 + $0xee0] sm:$0xff]  ;;  %v16936_v8 = vcombine.low %v3467_v13, %v3475_v14  ;;  %v16938_v22 = vcombine.low %v3468_v15, %v3476_v16  ;;  %v3516_v43 = vld [vmem:[#allocation11 + $0xfa8] sm:$0xff]  ;;  %v3030_v56 = vld [vmem:[#allocation11 + $0x78] sm:$0xff] }
 0x525   :  { %6660 = vmatprep.subr.bf16.mxu1 %v16875_v41  ;;  %v16953_v23 = vcombine.high %v3483_v3, %v3491_v21  ;;  %v16955_v24 = vcombine.high %v3484_v5, %v3492_v7  ;;  %v16952_v32 = vcombine.low %v3483_v3, %v3491_v21  ;;  %v16954_v33 = vcombine.low %v3484_v5, %v3492_v7  ;;  %v3515_v41 = vld [vmem:[#allocation11 + $0xfa0] sm:$0xff]  ;;  %v3524_v44 = vld [vmem:[#allocation11 + $0xfe8] sm:$0xff]  ;;  %v3045_v62 = vld [vmem:[#allocation11 + $0xf0] sm:$0xff] }
 0x526   :  { %v16969_v34 = vcombine.high %v3499_v25, %v3507_v27  ;;  %v16971_v38 = vcombine.high %v3500_v28, %v3508_v29  ;;  %v3523_v42 = vld [vmem:[#allocation11 + $0xfe0] sm:$0xff]  ;;  %v16968_v45 = vcombine.low %v3499_v25, %v3507_v27  ;;  %v3038_v1 = vld [vmem:[#allocation11 + $0xb8] sm:$0xff]  ;;  %v3077_v3 = vld [vmem:[#allocation11 + $0x1f0] sm:$0xff] }
 0x527   :  { %6575 = vmatpush1.bf16.msra.mxu0 %v16872_v46  ;;  %v16970_v46 = vcombine.low %v3500_v28, %v3508_v29  ;;  %v16984_v57 = vcombine.low %v3515_v41, %v3523_v42  ;;  %v3046_v2 = vld [vmem:[#allocation11 + $0xf8] sm:$0xff]  ;;  %v3093_v25 = vld [vmem:[#allocation11 + $0x270] sm:$0xff] }
 0x528   :  { %6661 = vmatpush1.bf16.msra.mxu1 %v16874_v47  ;;  %6576 = vmatprep.subr.bf16.mxu0 %v16889_v48  ;;  %v16985_v47 = vcombine.high %v3515_v41, %v3523_v42  ;;  %v16987_v48 = vcombine.high %v3516_v43, %v3524_v44  ;;  %v16511_v13 = vcombine.high %v3038_v1, %v3046_v2  ;;  %v3054_v14 = vld [vmem:[#allocation11 + $0x138] sm:$0xff] }
 0x529   :  { %6662 = vmatprep.subr.bf16.mxu1 %v16891_v49  ;;  %v3021_v49 = vld [vmem:[#allocation11 + $0x30] sm:$0xff]  ;;  %v3062_v15 = vld [vmem:[#allocation11 + $0x178] sm:$0xff] }
 0x52a   :  { %v16492_v63 = vcombine.low %v3021_v49, %v3029_v50  ;;  %v3070_v21 = vld [vmem:[#allocation11 + $0x1b8] sm:$0xff] }
 0x52b   :  { %6577 = vmatpush1.bf16.msra.mxu0 %v16888_v58  ;;  %v16986_v58 = vcombine.low %v3516_v43, %v3524_v44  ;;  %v3078_v5 = vld [vmem:[#allocation11 + $0x1f8] sm:$0xff] }
 0x52c   :  { %6663 = vmatpush1.bf16.msra.mxu1 %v16890_v59  ;;  %6578 = vmatprep.subr.bf16.mxu0 %v16905_v60  ;;  %v16493_v59 = vcombine.high %v3021_v49, %v3029_v50  ;;  %v16495_v60 = vcombine.high %v3022_v51, %v3030_v56  ;;  %v3086_v27 = vld [vmem:[#allocation11 + $0x238] sm:$0xff]  ;;  %v16542_v29 = vcombine.low %v3070_v21, %v3078_v5 }
 0x52d   :  { %6664 = vmatprep.subr.bf16.mxu1 %v16907_v61  ;;  %v3037_v61 = vld [vmem:[#allocation11 + $0xb0] sm:$0xff]  ;;  %v3094_v28 = vld [vmem:[#allocation11 + $0x278] sm:$0xff] }
 0x52e   :  { %v16508_v16 = vcombine.low %v3037_v61, %v3045_v62  ;;  %v3102_v41 = vld [vmem:[#allocation11 + $0x2b8] sm:$0xff]  ;;  %v16558_v44 = vcombine.low %v3086_v27, %v3094_v28 }
 0x52f   :  { %6579 = vmatpush1.bf16.msra.mxu0 %v16904_v4  ;;  %v16494_v4 = vcombine.low %v3022_v51, %v3030_v56  ;;  %v3110_v42 = vld [vmem:[#allocation11 + $0x2f8] sm:$0xff] }
 0x530   :  { %6665 = vmatpush1.bf16.msra.mxu1 %v16906_v9  ;;  %6580 = vmatprep.subr.bf16.mxu0 %v16921_v10  ;;  %v16509_v9 = vcombine.high %v3037_v61, %v3045_v62  ;;  %v3053_v10 = vld [vmem:[#allocation11 + $0x130] sm:$0xff]  ;;  %v3118_v49 = vld [vmem:[#allocation11 + $0x338] sm:$0xff]  ;;  %v16574_v56 = vcombine.low %v3102_v41, %v3110_v42 }
 0x531   :  { %6666 = vmatprep.subr.bf16.mxu1 %v16923_v12  ;;  %v3061_v12 = vld [vmem:[#allocation11 + $0x170] sm:$0xff]  ;;  %v3126_v50 = vld [vmem:[#allocation11 + $0x378] sm:$0xff] }
 0x532   :  { %v16524_v7 = vcombine.low %v3053_v10, %v3061_v12  ;;  %v3134_v61 = vld [vmem:[#allocation11 + $0x3b8] sm:$0xff] }
 0x533   :  { %6581 = vmatpush1.bf16.msra.mxu0 %v16920_v17  ;;  %v16510_v17 = vcombine.low %v3038_v1, %v3046_v2  ;;  %v3142_v62 = vld [vmem:[#allocation11 + $0x3f8] sm:$0xff]  ;;  %v16590_v1 = vcombine.low %v3118_v49, %v3126_v50 }
 0x534   :  { %6667 = vmatpush1.bf16.msra.mxu1 %v16922_v18  ;;  %6582 = vmatprep.subr.bf16.mxu0 %v16937_v19  ;;  %v16525_v18 = vcombine.high %v3053_v10, %v3061_v12  ;;  %v16527_v19 = vcombine.high %v3054_v14, %v3062_v15  ;;  %v3157_v10 = vld [vmem:[#allocation11 + $0x470] sm:$0xff]  ;;  %v3150_v12 = vld [vmem:[#allocation11 + $0x438] sm:$0xff] }
 0x535   :  { %6668 = vmatprep.subr.bf16.mxu1 %v16939_v20  ;;  %v3069_v20 = vld [vmem:[#allocation11 + $0x1b0] sm:$0xff] }
 0x537   :  { %6583 = vmatpush1.bf16.msra.mxu0 %v16936_v8  ;;  %v16526_v8 = vcombine.low %v3054_v14, %v3062_v15  ;;  %v16606_v15 = vcombine.low %v3134_v61, %v3142_v62 }
 0x538   :  { %6669 = vmatpush1.bf16.msra.mxu1 %v16938_v22  ;;  %6584 = vmatprep.subr.bf16.mxu0 %v16953_v23  ;;  %v16541_v22 = vcombine.high %v3069_v20, %v3077_v3  ;;  %v16543_v23 = vcombine.high %v3070_v21, %v3078_v5 }
 0x539   :  { %6670 = vmatprep.subr.bf16.mxu1 %v16955_v24  ;;  %v3085_v24 = vld [vmem:[#allocation11 + $0x230] sm:$0xff] }
 0x53a   :  { %v16556_v43 = vcombine.low %v3085_v24, %v3093_v25 }
 0x53b   :  { %6585 = vmatpush1.bf16.msra.mxu0 %v16952_v32  ;;  %v16557_v32 = vcombine.high %v3085_v24, %v3093_v25  ;;  %v3182_v24 = vld [vmem:[#allocation11 + $0x538] sm:$0xff] }
 0x53c   :  { %6671 = vmatpush1.bf16.msra.mxu1 %v16954_v33  ;;  %6586 = vmatprep.subr.bf16.mxu0 %v16969_v34  ;;  %v16559_v33 = vcombine.high %v3086_v27, %v3094_v28  ;;  %v3101_v34 = vld [vmem:[#allocation11 + $0x2b0] sm:$0xff]  ;;  %v3190_v25 = vld [vmem:[#allocation11 + $0x578] sm:$0xff] }
 0x53d   :  { %6672 = vmatprep.subr.bf16.mxu1 %v16971_v38  ;;  %v3109_v38 = vld [vmem:[#allocation11 + $0x2f0] sm:$0xff] }
 0x53e   :  { %v16572_v51 = vcombine.low %v3101_v34, %v3109_v38 }
 0x53f   :  { %6587 = vmatpush1.bf16.msra.mxu0 %v16968_v45  ;;  %v16573_v45 = vcombine.high %v3101_v34, %v3109_v38  ;;  %v3198_v34 = vld [vmem:[#allocation11 + $0x5b8] sm:$0xff] }
 0x540   :  { %6673 = vmatpush1.bf16.msra.mxu1 %v16970_v46  ;;  %6588 = vmatprep.subr.bf16.mxu0 %v16985_v47  ;;  %v16575_v46 = vcombine.high %v3102_v41, %v3110_v42  ;;  %v3117_v47 = vld [vmem:[#allocation11 + $0x330] sm:$0xff]  ;;  %v3206_v38 = vld [vmem:[#allocation11 + $0x5f8] sm:$0xff]  ;;  %v16654_v42 = vcombine.low %v3182_v24, %v3190_v25 }
 0x541   :  { %6674 = vmatprep.subr.bf16.mxu1 %v16987_v48  ;;  %v3125_v48 = vld [vmem:[#allocation11 + $0x370] sm:$0xff] }
 0x543   :  { %6589 = vmatpush1.bf16.msra.mxu0 %v16984_v57  ;;  %v16589_v57 = vcombine.high %v3117_v47, %v3125_v48 }
 0x544   :  { %6675 = vmatpush1.bf16.msra.mxu1 %v16986_v58  ;;  %6687 = vmatprep.subr.bf16.mxu0 %v16493_v59  ;;  %v16591_v58 = vcombine.high %v3118_v49, %v3126_v50  ;;  %v3133_v59 = vld [vmem:[#allocation11 + $0x3b0] sm:$0xff]  ;;  %v16670_v50 = vcombine.low %v3198_v34, %v3206_v38 }
 0x545   :  { %6773 = vmatprep.subr.bf16.mxu1 %v16495_v60  ;;  %v3141_v60 = vld [vmem:[#allocation11 + $0x3f0] sm:$0xff] }
 0x546   :  { %6591 = vmatmul.mubr.bf16.vlgmr.msra.gmra.mrb[16].mxu0 %v21384_v54  ;;  %v16605_v2 = vcombine.high %v3133_v59, %v3141_v60  ;;  %v16604_v14 = vcombine.low %v3133_v59, %v3141_v60  ;;  %v3230_v59 = vld [vmem:[#allocation11 + $0x6b8] sm:$0xff] }
 0x547   :  { %6677 = vmatmul.mubr.bf16.vlgmr.msra.gmra.mrb[20].mxu1 %v21384_v54  ;;  %6688 = vmatpush1.bf16.msra.mxu0 %v16492_v63  ;;  %v16588_v63 = vcombine.low %v3117_v47, %v3125_v48  ;;  %v3214_v47 = vld [vmem:[#allocation11 + $0x638] sm:$0xff] }
 0x548   :  { %6719 = vmatprep.mubr.bf16.mxu0 %v21386_v30  ;;  %6774 = vmatpush1.bf16.msra.mxu1 %v16494_v4  ;;  %v16607_v4 = vcombine.high %v3134_v61, %v3142_v62  ;;  %v3222_v48 = vld [vmem:[#allocation11 + $0x678] sm:$0xff] }
 0x549   :  { %6805 = vmatprep.mubr.bf16.mxu1 %v21386_v30  ;;  %6689 = vmatprep.subr.bf16.mxu0 %v16509_v9  ;;  %v16540_v30 = vcombine.low %v3069_v20, %v3077_v3  ;;  %v3149_v9 = vld [vmem:[#allocation11 + $0x430] sm:$0xff]  ;;  %v3166_v20 = vld [vmem:[#allocation11 + $0x4b8] sm:$0xff]  ;;  %v16686_v62 = vcombine.low %v3214_v47, %v3222_v48 }
 0x54a   :  { %6775 = vmatprep.subr.bf16.mxu1 %v16511_v13  ;;  %v3158_v13 = vld [vmem:[#allocation11 + $0x478] sm:$0xff]  ;;  %v16620_v21 = vcombine.low %v3149_v9, %v3157_v10 }
 0x54b   :  { %6690 = vmatpush1.bf16.msra.mxu0 %v16508_v16  ;;  %v16621_v16 = vcombine.high %v3149_v9, %v3157_v10  ;;  %v3174_v3 = vld [vmem:[#allocation11 + $0x4f8] sm:$0xff]  ;;  %v16622_v5 = vcombine.low %v3150_v12, %v3158_v13 }
 0x54c   :  { %6776 = vmatpush1.bf16.msra.mxu1 %v16510_v17  ;;  %6691 = vmatprep.subr.bf16.mxu0 %v16525_v18  ;;  %v16623_v17 = vcombine.high %v3150_v12, %v3158_v13  ;;  %v3165_v18 = vld [vmem:[#allocation11 + $0x4b0] sm:$0xff]  ;;  %v16638_v28 = vcombine.low %v3166_v20, %v3174_v3  ;;  %v3238_v60 = vld [vmem:[#allocation11 + $0x6f8] sm:$0xff] }
 0x54d   :  { %6777 = vmatprep.subr.bf16.mxu1 %v16527_v19  ;;  %v3173_v19 = vld [vmem:[#allocation11 + $0x4f0] sm:$0xff]  ;;  %v3246_v9 = vld [vmem:[#allocation11 + $0x738] sm:$0xff]  ;;  %v16702_v13 = vcombine.low %v3230_v59, %v3238_v60 }
 0x54e   :  { %v16636_v27 = vcombine.low %v3165_v18, %v3173_v19  ;;  %v3254_v10 = vld [vmem:[#allocation11 + $0x778] sm:$0xff] }
 0x54f   :  { %6692 = vmatpush1.bf16.msra.mxu0 %v16524_v7  ;;  %v16637_v7 = vcombine.high %v3165_v18, %v3173_v19  ;;  %v3262_v18 = vld [vmem:[#allocation11 + $0x7b8] sm:$0xff] }
 0x550   :  { %6778 = vmatpush1.bf16.msra.mxu1 %v16526_v8  ;;  %6693 = vmatprep.subr.bf16.mxu0 %v16541_v22  ;;  %v16639_v8 = vcombine.high %v3166_v20, %v3174_v3  ;;  %v3181_v22 = vld [vmem:[#allocation11 + $0x530] sm:$0xff]  ;;  %v3270_v19 = vld [vmem:[#allocation11 + $0x7f8] sm:$0xff]  ;;  %v16718_v3 = vcombine.low %v3246_v9, %v3254_v10 }
 0x551   :  { %6779 = vmatprep.subr.bf16.mxu1 %v16543_v23  ;;  %v3189_v23 = vld [vmem:[#allocation11 + $0x570] sm:$0xff] }
 0x552   :  { %v16652_v41 = vcombine.low %v3181_v22, %v3189_v23 }
 0x553   :  { %6694 = vmatpush1.bf16.msra.mxu0 %v16540_v30  ;;  %v16653_v30 = vcombine.high %v3181_v22, %v3189_v23  ;;  %v3278_v22 = vld [vmem:[#allocation11 + $0x838] sm:$0xff] }
 0x554   :  { %6780 = vmatpush1.bf16.msra.mxu1 %v16542_v29  ;;  %6695 = vmatprep.subr.bf16.mxu0 %v16557_v32  ;;  %v16655_v29 = vcombine.high %v3182_v24, %v3190_v25  ;;  %v3197_v32 = vld [vmem:[#allocation11 + $0x5b0] sm:$0xff]  ;;  %v3286_v23 = vld [vmem:[#allocation11 + $0x878] sm:$0xff]  ;;  %v16734_v25 = vcombine.low %v3262_v18, %v3270_v19 }
 0x555   :  { %6781 = vmatprep.subr.bf16.mxu1 %v16559_v33  ;;  %v3205_v33 = vld [vmem:[#allocation11 + $0x5f0] sm:$0xff] }
 0x556   :  { %v16668_v49 = vcombine.low %v3197_v32, %v3205_v33 }
 0x557   :  { %6696 = vmatpush1.bf16.msra.mxu0 %v16556_v43  ;;  %v16669_v43 = vcombine.high %v3197_v32, %v3205_v33  ;;  %v3294_v33 = vld [vmem:[#allocation11 + $0x8b8] sm:$0xff] }
 0x558   :  { %6782 = vmatpush1.bf16.msra.mxu1 %v16558_v44  ;;  %6697 = vmatprep.subr.bf16.mxu0 %v16573_v45  ;;  %v16671_v44 = vcombine.high %v3198_v34, %v3206_v38  ;;  %v3213_v45 = vld [vmem:[#allocation11 + $0x630] sm:$0xff]  ;;  %v3302_v34 = vld [vmem:[#allocation11 + $0x8f8] sm:$0xff]  ;;  %v16750_v38 = vcombine.low %v3278_v22, %v3286_v23 }
 0x559   :  { %6783 = vmatprep.subr.bf16.mxu1 %v16575_v46  ;;  %v3221_v46 = vld [vmem:[#allocation11 + $0x670] sm:$0xff] }
 0x55a   :  { %v16684_v61 = vcombine.low %v3213_v45, %v3221_v46 }
 0x55b   :  { %6698 = vmatpush1.bf16.msra.mxu0 %v16572_v51  ;;  %v16685_v51 = vcombine.high %v3213_v45, %v3221_v46  ;;  %v3310_v45 = vld [vmem:[#allocation11 + $0x938] sm:$0xff] }
 0x55c   :  { %6784 = vmatpush1.bf16.msra.mxu1 %v16574_v56  ;;  %6699 = vmatprep.subr.bf16.mxu0 %v16589_v57  ;;  %v16687_v56 = vcombine.high %v3214_v47, %v3222_v48  ;;  %v3229_v57 = vld [vmem:[#allocation11 + $0x6b0] sm:$0xff]  ;;  %v3318_v46 = vld [vmem:[#allocation11 + $0x978] sm:$0xff]  ;;  %v16766_v48 = vcombine.low %v3294_v33, %v3302_v34 }
 0x55d   :  { %6785 = vmatprep.subr.bf16.mxu1 %v16591_v58  ;;  %v3237_v58 = vld [vmem:[#allocation11 + $0x6f0] sm:$0xff] }
 0x55e   :  { %v16700_v12 = vcombine.low %v3229_v57, %v3237_v58 }
 0x55f   :  { %6700 = vmatpush1.bf16.msra.mxu0 %v16588_v63  ;;  %v16701_v63 = vcombine.high %v3229_v57, %v3237_v58  ;;  %v3326_v57 = vld [vmem:[#allocation11 + $0x9b8] sm:$0xff] }
 0x560   :  { %6786 = vmatpush1.bf16.msra.mxu1 %v16590_v1  ;;  %6701 = vmatprep.subr.bf16.mxu0 %v16605_v2  ;;  %v16703_v1 = vcombine.high %v3230_v59, %v3238_v60  ;;  %v3245_v2 = vld [vmem:[#allocation11 + $0x730] sm:$0xff]  ;;  %v3334_v58 = vld [vmem:[#allocation11 + $0x9f8] sm:$0xff] }
 0x561   :  { %6787 = vmatprep.subr.bf16.mxu1 %v16607_v4  ;;  %v3253_v4 = vld [vmem:[#allocation11 + $0x770] sm:$0xff] }
 0x562   :  { %v16716_v20 = vcombine.low %v3245_v2, %v3253_v4 }
 0x563   :  { %6702 = vmatpush1.bf16.msra.mxu0 %v16604_v14  ;;  %v16717_v14 = vcombine.high %v3245_v2, %v3253_v4  ;;  %v3350_v2 = vld [vmem:[#allocation11 + $0xa78] sm:$0xff]  ;;  %v16798_v4 = vcombine.low %v3326_v57, %v3334_v58 }
 0x564   :  { %6788 = vmatpush1.bf16.msra.mxu1 %v16606_v15  ;;  %6703 = vmatprep.subr.bf16.mxu0 %v16621_v16  ;;  %v16719_v15 = vcombine.high %v3246_v9, %v3254_v10  ;;  %v3261_v16 = vld [vmem:[#allocation11 + $0x7b0] sm:$0xff] }
 0x565   :  { %6789 = vmatprep.subr.bf16.mxu1 %v16623_v17  ;;  %v3269_v17 = vld [vmem:[#allocation11 + $0x7f0] sm:$0xff] }
 0x566   :  { %v16732_v24 = vcombine.low %v3261_v16, %v3269_v17 }
 0x567   :  { %6704 = vmatpush1.bf16.msra.mxu0 %v16620_v21  ;;  %v16733_v21 = vcombine.high %v3261_v16, %v3269_v17  ;;  %v3366_v16 = vld [vmem:[#allocation11 + $0xaf8] sm:$0xff] }
 0x568   :  { %6790 = vmatpush1.bf16.msra.mxu1 %v16622_v5  ;;  %6705 = vmatprep.subr.bf16.mxu0 %v16637_v7  ;;  %v16735_v5 = vcombine.high %v3262_v18, %v3270_v19  ;;  %v3277_v7 = vld [vmem:[#allocation11 + $0x830] sm:$0xff]  ;;  %v21442_v18 = vsub.s32 6, %v21350_v52  ;;  %v21445_v19 = vsub.s32 5, %v21350_v52 }
 0x569   :  { %6791 = vmatprep.subr.bf16.mxu1 %v16639_v8  ;;  %v3285_v8 = vld [vmem:[#allocation11 + $0x870] sm:$0xff] }
 0x56a   :  { %v16748_v32 = vcombine.low %v3277_v7, %v3285_v8 }
 0x56b   :  { %6706 = vmatpush1.bf16.msra.mxu0 %v16636_v27  ;;  %v16749_v27 = vcombine.high %v3277_v7, %v3285_v8  ;;  %v3373_v7 = vld [vmem:[#allocation11 + $0xb30] sm:$0xff] }
 0x56c   :  { %6792 = vmatpush1.bf16.msra.mxu1 %v16638_v28  ;;  %6707 = vmatprep.subr.bf16.mxu0 %v16653_v30  ;;  %v16751_v28 = vcombine.high %v3278_v22, %v3286_v23  ;;  %v3293_v30 = vld [vmem:[#allocation11 + $0x8b0] sm:$0xff]  ;;  %v3374_v23 = vld [vmem:[#allocation11 + $0xb38] sm:$0xff] }
 0x56d   :  { %6793 = vmatprep.subr.bf16.mxu1 %v16655_v29  ;;  %v3301_v29 = vld [vmem:[#allocation11 + $0x8f0] sm:$0xff] }
 0x56e   :  { %v16764_v47 = vcombine.low %v3293_v30, %v3301_v29  ;;  %v3381_v8 = vld [vmem:[#allocation11 + $0xb70] sm:$0xff] }
 0x56f   :  { %6708 = vmatpush1.bf16.msra.mxu0 %v16652_v41  ;;  %v16765_v41 = vcombine.high %v3293_v30, %v3301_v29  ;;  %v16845_v29 = vcombine.high %v3373_v7, %v3381_v8 }
 0x570   :  { %6794 = vmatpush1.bf16.msra.mxu1 %v16654_v42  ;;  %6709 = vmatprep.subr.bf16.mxu0 %v16669_v43  ;;  %v3309_v42 = vld [vmem:[#allocation11 + $0x930] sm:$0xff] }
 0x571   :  { %6795 = vmatprep.subr.bf16.mxu1 %v16671_v44  ;;  %v3317_v43 = vld [vmem:[#allocation11 + $0x970] sm:$0xff]  ;;  %v16767_v44 = vcombine.high %v3294_v33, %v3302_v34 }
 0x572   :  { %v16780_v59 = vcombine.low %v3309_v42, %v3317_v43  ;;  %v3389_v34 = vld [vmem:[#allocation11 + $0xbb0] sm:$0xff] }
 0x573   :  { %6710 = vmatpush1.bf16.msra.mxu0 %v16668_v49  ;;  %v16781_v49 = vcombine.high %v3309_v42, %v3317_v43 }
 0x574   :  { %6796 = vmatpush1.bf16.msra.mxu1 %v16670_v50  ;;  %6711 = vmatprep.subr.bf16.mxu0 %v16685_v51  ;;  %v16783_v50 = vcombine.high %v3310_v45, %v3318_v46  ;;  %v3325_v51 = vld [vmem:[#allocation11 + $0x9b0] sm:$0xff] }
 0x575   :  { %6797 = vmatprep.subr.bf16.mxu1 %v16687_v56  ;;  %v3333_v56 = vld [vmem:[#allocation11 + $0x9f0] sm:$0xff] }
 0x576   :  { %v16797_v60 = vcombine.high %v3325_v51, %v3333_v56 }
 0x577   :  { %6712 = vmatpush1.bf16.msra.mxu0 %v16684_v61  ;;  %v16799_v61 = vcombine.high %v3326_v57, %v3334_v58 }
 0x578   :  { %6798 = vmatpush1.bf16.msra.mxu1 %v16686_v62  ;;  %6713 = vmatprep.subr.bf16.mxu0 %v16701_v63  ;;  %v3341_v62 = vld [vmem:[#allocation11 + $0xa30] sm:$0xff] }
 0x579   :  { %6799 = vmatprep.subr.bf16.mxu1 %v16703_v1  ;;  %v3349_v63 = vld [vmem:[#allocation11 + $0xa70] sm:$0xff]  ;;  %v3342_v1 = vld [vmem:[#allocation11 + $0xa38] sm:$0xff] }
 0x57a   :  { %v16813_v9 = vcombine.high %v3341_v62, %v3349_v63  ;;  %v16815_v10 = vcombine.high %v3342_v1, %v3350_v2  ;;  %v16812_v17 = vcombine.low %v3341_v62, %v3349_v63 }
 0x57b   :  { %6714 = vmatpush1.bf16.msra.mxu0 %v16700_v12  ;;  %v3357_v12 = vld [vmem:[#allocation11 + $0xab0] sm:$0xff] }
 0x57c   :  { %6800 = vmatpush1.bf16.msra.mxu1 %v16702_v13  ;;  %6715 = vmatprep.subr.bf16.mxu0 %v16717_v14  ;;  %v3365_v13 = vld [vmem:[#allocation11 + $0xaf0] sm:$0xff]  ;;  %v21439_v14 = vsub.s32 4, %v21350_v52 }
 0x57d   :  { %6801 = vmatprep.subr.bf16.mxu1 %v16719_v15  ;;  %v3358_v15 = vld [vmem:[#allocation11 + $0xab8] sm:$0xff] }
 0x57e   :  { %v3550_v22 = vrot.slane %v21412_v35, %v21439_v14  ;;  %v16830_v30 = vcombine.low %v3358_v15, %v3366_v16 }
 0x57f   :  { %6716 = vmatpush1.bf16.msra.mxu0 %v16716_v20  ;;  %v16814_v20 = vcombine.low %v3342_v1, %v3350_v2  ;;  %v3405_v1 = vld [vmem:[#allocation11 + $0xc30] sm:$0xff] }
 0x580   :  { %6802 = vmatpush1.bf16.msra.mxu1 %v16718_v3  ;;  %6717 = vmatprep.subr.bf16.mxu0 %v16733_v21  ;;  %v21448_v3 = vsub.s32 7, %v21350_v52  ;;  %v16829_v21 = vcombine.high %v3357_v12, %v3365_v13  ;;  %v3413_v2 = vld [vmem:[#allocation11 + $0xc70] sm:$0xff] }
 0x581   :  { %6803 = vmatprep.subr.bf16.mxu1 %v16735_v5  ;;  %v16831_v5 = vcombine.high %v3358_v15, %v3366_v16 }
 0x582   :  { %v3562_v52 = vrot.slane %v21412_v35, %v21448_v3 }
 0x583   :  { %6718 = vmatpush1.bf16.msra.mxu0 %v16732_v24  ;;  %v3382_v24 = vld [vmem:[#allocation11 + $0xb78] sm:$0xff] }
 0x584   :  { %6804 = vmatpush1.bf16.msra.mxu1 %v16734_v25  ;;  %6730 = vmatprep.subr.bf16.mxu0 %v16749_v27  ;;  %v3558_v25 = vrot.slane %v21412_v35, %v21442_v18  ;;  %v3554_v27 = vrot.slane %v21412_v35, %v21445_v19  ;;  %v16847_v33 = vcombine.high %v3374_v23, %v3382_v24 }
 0x585   :  { %6816 = vmatprep.subr.bf16.mxu1 %v16751_v28  ;;  %v16828_v28 = vcombine.low %v3357_v12, %v3365_v13  ;;  %v16846_v35 = vcombine.low %v3374_v23, %v3382_v24  ;;  %v3406_v12 = vld [vmem:[#allocation11 + $0xc38] sm:$0xff] }
 0x586   :  { %6720 = vmatmul.mubr.bf16.vlgmr.msra.gmra.mrb[20].mxu0 %v21382_v26  ;;  %v3414_v13 = vld [vmem:[#allocation11 + $0xc78] sm:$0xff] }
 0x587   :  { %6806 = vmatmul.mubr.bf16.vlgmr.msra.gmra.mrb[24].mxu1 %v21382_v26  ;;  %6731 = vmatpush1.bf16.msra.mxu0 %v16748_v32  ;;  %v16782_v26 = vcombine.low %v3310_v45, %v3318_v46  ;;  %v3398_v45 = vld [vmem:[#allocation11 + $0xbf8] sm:$0xff]  ;;  %v16879_v24 = vcombine.high %v3406_v12, %v3414_v13 }
 0x588   :  { %6762 = vmatprep.mubr.bf16.mxu0 %v21388_v31  ;;  %6817 = vmatpush1.bf16.msra.mxu1 %v16750_v38  ;;  %v3397_v38 = vld [vmem:[#allocation11 + $0xbf0] sm:$0xff] }
 0x589   :  { %6848 = vmatprep.mubr.bf16.mxu1 %v21388_v31  ;;  %6732 = vmatprep.subr.bf16.mxu0 %v16765_v41  ;;  %v16796_v31 = vcombine.low %v3325_v51, %v3333_v56  ;;  %v16860_v62 = vcombine.low %v3389_v34, %v3397_v38 }
 0x58a   :  { %6818 = vmatprep.subr.bf16.mxu1 %v16767_v44  ;;  %v3390_v44 = vld [vmem:[#allocation11 + $0xbb8] sm:$0xff] }
 0x58b   :  { %6733 = vmatpush1.bf16.msra.mxu0 %v16764_v47  ;;  %v16863_v63 = vcombine.high %v3390_v44, %v3398_v45 }
 0x58c   :  { %6819 = vmatpush1.bf16.msra.mxu1 %v16766_v48  ;;  %6734 = vmatprep.subr.bf16.mxu0 %v16781_v49 }
 0x58d   :  { %6820 = vmatprep.subr.bf16.mxu1 %v16783_v50  ;;  %v16844_v50 = vcombine.low %v3373_v7, %v3381_v8  ;;  %v16877_v8 = vcombine.high %v3405_v1, %v3413_v2 }
 0x58f   :  { %6735 = vmatpush1.bf16.msra.mxu0 %v16780_v59  ;;  %v16861_v59 = vcombine.high %v3389_v34, %v3397_v38  ;;  %v3437_v38 = vld [vmem:[#allocation11 + $0xd30] sm:$0xff] }
 0x590   :  { %6821 = vmatpush1.bf16.msra.mxu1 %v16782_v26  ;;  %6736 = vmatprep.subr.bf16.mxu0 %v16797_v60 }
 0x591   :  { %6822 = vmatprep.subr.bf16.mxu1 %v16799_v61 }
 0x593   :  { %6737 = vmatpush1.bf16.msra.mxu0 %v16796_v31 }
 0x594   :  { %6823 = vmatpush1.bf16.msra.mxu1 %v16798_v4  ;;  %6738 = vmatprep.subr.bf16.mxu0 %v16813_v9 }
 0x595   :  { %6824 = vmatprep.subr.bf16.mxu1 %v16815_v10  ;;  %v16862_v10 = vcombine.low %v3390_v44, %v3398_v45 }
 0x597   :  { %6739 = vmatpush1.bf16.msra.mxu0 %v16812_v17 }
 0x598   :  { %6825 = vmatpush1.bf16.msra.mxu1 %v16814_v20  ;;  %6740 = vmatprep.subr.bf16.mxu0 %v16829_v21 }
 0x599   :  { %v6420_v32 = vpop.f32.mrb[12].mxu0  ;;  %6826 = vmatprep.subr.bf16.mxu1 %v16831_v5 }
 0x59a   :  { %v18361_v41 = vadd.f32 %v6420_v32, %v3550_v22  ;;  %v6506_v42 = vpop.f32.mrb[16].mxu1  ;;  %v6422_v43 = vpop.f32.mrb[13].mxu0  ;;  %v16878_v32 = vcombine.low %v3406_v12, %v3414_v13 }
 0x59b   :  { %v18365_v46 = vadd.f32 %v6506_v42, %v3558_v25  ;;  %v18362_v47 = vadd.f32 %v6422_v43, %v3554_v27  ;;  %v6508_v48 = vpop.f32.mrb[17].mxu1  ;;  %v6424_v49 = vpop.f32.mrb[14].mxu0  ;;  %6741 = vmatpush1.bf16.msra.mxu0 %v16828_v28  ;;  %v3438_v42 = vld [vmem:[#allocation11 + $0xd38] sm:$0xff] }
 0x59c   :  { %v18366_v51 = vadd.f32 %v6508_v48, %v3562_v52  ;;  %v18363_v56 = vadd.f32 %v6424_v49, %v3550_v22  ;;  %v6510_v57 = vpop.f32.mrb[18].mxu1  ;;  %6827 = vmatpush1.bf16.msra.mxu1 %v16830_v30  ;;  %v6426_v58 = vpop.f32.mrb[15].mxu0  ;;  %6742 = vmatprep.subr.bf16.mxu0 %v16845_v29  ;;  %v6863_v31 = vmax.f32 %v18361_v41, 0.0  ;;  %v3430_v30 = vld [vmem:[#allocation11 + $0xcf8] sm:$0xff]  ;;  %v16876_v29 = vcombine.low %v3405_v1, %v3413_v2  ;;  %v3445_v41 = vld [vmem:[#allocation11 + $0xd70] sm:$0xff] }
 0x59d   :  { %v18367_v26 = vadd.f32 %v6510_v57, %v3558_v25  ;;  %v18364_v60 = vadd.f32 %v6426_v58, %v3554_v27  ;;  %v6512_v61 = vpop.f32.mrb[19].mxu1  ;;  %6828 = vmatprep.subr.bf16.mxu1 %v16847_v33  ;;  %v6865_v15 = vmax.f32 %v18365_v46, 0.0  ;;  %v6864_v16 = vmax.f32 %v18362_v47, 0.0  ;;  %v3421_v25 = vld [vmem:[#allocation11 + $0xcb0] sm:$0xff]  ;;  %v3446_v43 = vld [vmem:[#allocation11 + $0xd78] sm:$0xff] }
 0x59e   :  { %v6879_v4 = vmax.f32 %v18363_v56, 0.0  ;;  %v18368_v9 = vadd.f32 %v6512_v61, %v3562_v52  ;;  %v6866_v21 = vmax.f32 %v18366_v51, 0.0  ;;  %v3429_v27 = vld [vmem:[#allocation11 + $0xcf0] sm:$0xff]  ;;  %v3422_v52 = vld [vmem:[#allocation11 + $0xcb8] sm:$0xff]  ;;  %v16909_v46 = vcombine.high %v3437_v38, %v3445_v41 }
 0x59f   :  { %v6881_v17 = vmax.f32 %v18367_v26, 0.0  ;;  %v6880_v20 = vmax.f32 %v18364_v60, 0.0  ;;  %6743 = vmatpush1.bf16.msra.mxu0 %v16844_v50  ;;  %v16893_v33 = vcombine.high %v3421_v25, %v3429_v27  ;;  %v16895_v34 = vcombine.high %v3422_v52, %v3430_v30  ;;  %v3453_v48 = vld [vmem:[#allocation11 + $0xdb0] sm:$0xff]  ;;  %v3454_v50 = vld [vmem:[#allocation11 + $0xdb8] sm:$0xff] }
 0x5a0   :  { %v21458_v5 = vpack.c.bf16 %v6879_v4, %v6863_v31  ;;  %v6882_v7 = vmax.f32 %v18368_v9, 0.0  ;;  %6829 = vmatpush1.bf16.msra.mxu1 %v16846_v35  ;;  %6744 = vmatprep.subr.bf16.mxu0 %v16861_v59  ;;  %v16892_v44 = vcombine.low %v3421_v25, %v3429_v27  ;;  %v16894_v45 = vcombine.low %v3422_v52, %v3430_v30  ;;  %v3461_v49 = vld [vmem:[#allocation11 + $0xdf0] sm:$0xff]  ;;  %v3462_v35 = vld [vmem:[#allocation11 + $0xdf8] sm:$0xff] }
 0x5a1   :  { %v21460_v22 = vpack.c.bf16 %v6881_v17, %v6865_v15  ;;  %v21462_v23 = vpack.c.bf16 %v6880_v20, %v6864_v16  ;;  %6830 = vmatprep.subr.bf16.mxu1 %v16863_v63  ;;  %v16911_v47 = vcombine.high %v3438_v42, %v3446_v43  ;;  %v16908_v51 = vcombine.low %v3437_v38, %v3445_v41  ;;  %v3469_v59 = vld [vmem:[#allocation11 + $0xe30] sm:$0xff]  ;;  %v3470_v60 = vld [vmem:[#allocation11 + $0xe38] sm:$0xff] }
 0x5a2   :  { %v21464_v28 = vpack.c.bf16 %v6882_v7, %v6866_v21  ;;  %v16910_v56 = vcombine.low %v3438_v42, %v3446_v43  ;;  %v16925_v57 = vcombine.high %v3453_v48, %v3461_v49  ;;  %v16927_v58 = vcombine.high %v3454_v50, %v3462_v35  ;;  %v3477_v26 = vld [vmem:[#allocation11 + $0xe70] sm:$0xff]  ;;  %v3478_v61 = vld [vmem:[#allocation11 + $0xe78] sm:$0xff] }
 0x5a3   :  { %6745 = vmatpush1.bf16.msra.mxu0 %v16860_v62  ;;  %v16924_v62 = vcombine.low %v3453_v48, %v3461_v49  ;;  %v16926_v63 = vcombine.low %v3454_v50, %v3462_v35  ;;  %v16941_v1 = vcombine.high %v3469_v59, %v3477_v26  ;;  %v16943_v2 = vcombine.high %v3470_v60, %v3478_v61  ;;  %v3485_v31 = vld [vmem:[#allocation11 + $0xeb0] sm:$0xff]  ;;  %v3486_v9 = vld [vmem:[#allocation11 + $0xeb8] sm:$0xff] }
 0x5a4   :  { %6831 = vmatpush1.bf16.msra.mxu1 %v16862_v10  ;;  %6746 = vmatprep.subr.bf16.mxu0 %v16877_v8  ;;  %v3493_v4 = vld [vmem:[#allocation11 + $0xef0] sm:$0xff]  ;;  %v3494_v10 = vld [vmem:[#allocation11 + $0xef8] sm:$0xff]  ;;  %v16940_v12 = vcombine.low %v3469_v59, %v3477_v26  ;;  %v16942_v13 = vcombine.low %v3470_v60, %v3478_v61  ;;  %v19130_v59 = vld [vmem:[#allocation14 + $0x58] sm:$0xff]  }
 0x5a5   :  { %6832 = vmatprep.subr.bf16.mxu1 %v16879_v24  ;;  %v16957_v15 = vcombine.high %v3485_v31, %v3493_v4  ;;  %v16959_v16 = vcombine.high %v3486_v9, %v3494_v10  ;;  %v3501_v17 = vld [vmem:[#allocation11 + $0xf30] sm:$0xff]  ;;  %v3502_v21 = vld [vmem:[#allocation11 + $0xf38] sm:$0xff]  ;;  %v16956_v8 = vcombine.low %v3485_v31, %v3493_v4  ;;  %v16958_v24 = vcombine.low %v3486_v9, %v3494_v10  ;;  %v19132_v26 = vld [vmem:[#allocation14 + $0x18] sm:$0xff]  }
 0x5a6   :  { %v3509_v20 = vld [vmem:[#allocation11 + $0xf70] sm:$0xff]  ;;  %v3510_v7 = vld [vmem:[#allocation11 + $0xf78] sm:$0xff]  ;;  %v19142_v4 = vld [vmem:[#allocation14 + $0x70] sm:$0xff]  }
 0x5a7   :  { %6747 = vmatpush1.bf16.msra.mxu0 %v16876_v29  ;;  %v16973_v25 = vcombine.high %v3501_v17, %v3509_v20  ;;  %v16975_v27 = vcombine.high %v3502_v21, %v3510_v7  ;;  %v3517_v52 = vld [vmem:[#allocation11 + $0xfb0] sm:$0xff]  ;;  %v3518_v29 = vld [vmem:[#allocation11 + $0xfb8] sm:$0xff]  ;;  %v19143_v9 = vld [vmem:[#allocation14 + $0xf0] sm:$0xff]  }
 0x5a8   :  { %6833 = vmatpush1.bf16.msra.mxu1 %v16878_v32  ;;  %6748 = vmatprep.subr.bf16.mxu0 %v16893_v33  ;;  %v3525_v30 = vld [vmem:[#allocation11 + $0xff0] sm:$0xff]  ;;  %v3526_v32 = vld [vmem:[#allocation11 + $0xff8] sm:$0xff]  ;;  %v16972_v33 = vcombine.low %v3501_v17, %v3509_v20  ;;  %v19144_v10 = vld [vmem:[#allocation14 + $0x30] sm:$0xff]  }
 0x5a9   :  { %6834 = vmatprep.subr.bf16.mxu1 %v16895_v34  ;;  %v16974_v34 = vcombine.low %v3502_v21, %v3510_v7  ;;  %v16989_v38 = vcombine.high %v3517_v52, %v3525_v30  ;;  %v16991_v41 = vcombine.high %v3518_v29, %v3526_v32  ;;  %v16988_v42 = vcombine.low %v3517_v52, %v3525_v30  ;;  %v19122_v48 = vld [vmem:[#allocation14 + $0x48] sm:$0xff]   ;;  %v19134_v60 = vld [vmem:[#allocation14 + $0x60] sm:$0xff]   ;;  %v19149_v17 = vld [vmem:[#allocation14 + $0xb8] sm:$0xff]  }
 0x5aa   :  { %v16990_v43 = vcombine.low %v3518_v29, %v3526_v32  ;;  %v19123_v49 = vld [vmem:[#allocation14 + $0xc8] sm:$0xff]   ;;  %v19135_v61 = vld [vmem:[#allocation14 + $0xe0] sm:$0xff]   ;;  %v19158_v30 = vld [vmem:[#allocation14 + $0x150] sm:$0xff]  }
 0x5ab   :  { %6749 = vmatpush1.bf16.msra.mxu0 %v16892_v44  ;;  %v19118_v44 = vld [vmem:[#allocation14 + $0x40] sm:$0xff]   ;;  %v19124_v50 = vld [vmem:[#allocation14 + $0x8] sm:$0xff]   ;;  %v19159_v29 = vld [vmem:[#allocation14 + $0x1d0] sm:$0xff]  }
 0x5ac   :  { %6835 = vmatpush1.bf16.msra.mxu1 %v16894_v45  ;;  %6750 = vmatprep.subr.bf16.mxu0 %v16909_v46  ;;  %v19119_v45 = vld [vmem:[#allocation14 + $0xc0] sm:$0xff]   ;;  %v19125_v35 = vld [vmem:[#allocation14 + $0x88] sm:$0xff]   ;;  %v19160_v32 = vld [vmem:[#allocation14 + $0x110] sm:$0xff]  }
 0x5ad   :  { %6836 = vmatprep.subr.bf16.mxu1 %v16911_v47  ;;  %v19120_v46 = vld [vmem:[#allocation14] sm:$0xff]   ;;  %v19141_v31 = vld [vmem:[#allocation14 + $0xa8] sm:$0xff]  }
 0x5ae   :  { %v19121_v47 = vld [vmem:[#allocation14 + $0x80] sm:$0xff]   ;;  %v19157_v52 = vld [vmem:[#allocation14 + $0x188] sm:$0xff]  }
 0x5af   :  { %6751 = vmatpush1.bf16.msra.mxu0 %v16908_v51  ;;  %v19126_v51 = vld [vmem:[#allocation14 + $0x50] sm:$0xff]   ;;  %v19150_v20 = vld [vmem:[#allocation14 + $0x140] sm:$0xff]  }
 0x5b0   :  { %6837 = vmatpush1.bf16.msra.mxu1 %v16910_v56  ;;  %6752 = vmatprep.subr.bf16.mxu0 %v16925_v57  ;;  %v19127_v56 = vld [vmem:[#allocation14 + $0xd0] sm:$0xff]   ;;  %v19151_v21 = vld [vmem:[#allocation14 + $0x1c0] sm:$0xff]  }
 0x5b1   :  { %6838 = vmatprep.subr.bf16.mxu1 %v16927_v58  ;;  %v19128_v57 = vld [vmem:[#allocation14 + $0x10] sm:$0xff]   ;;  %v19152_v7 = vld [vmem:[#allocation14 + $0x100] sm:$0xff]  }
 0x5b2   :  { %v19129_v58 = vld [vmem:[#allocation14 + $0x90] sm:$0xff]  }
 0x5b3   :  { %6753 = vmatpush1.bf16.msra.mxu0 %v16924_v62  ;;  %v19137_v62 = vld [vmem:[#allocation14 + $0xa0] sm:$0xff]  }
 0x5b4   :  { %6839 = vmatpush1.bf16.msra.mxu1 %v16926_v63  ;;  %6754 = vmatprep.subr.bf16.mxu0 %v16941_v1  ;;  %v19138_v63 = vld [vmem:[#allocation14 + $0x68] sm:$0xff]  }
 0x5b5   :  { %6840 = vmatprep.subr.bf16.mxu1 %v16943_v2  ;;  %v19139_v1 = vld [vmem:[#allocation14 + $0xe8] sm:$0xff]  }
 0x5b6   :  { %v19140_v2 = vld [vmem:[#allocation14 + $0x28] sm:$0xff]  }
 0x5b7   :  { %6755 = vmatpush1.bf16.msra.mxu0 %v16940_v12  ;;  %v19145_v12 = vld [vmem:[#allocation14 + $0xb0] sm:$0xff]  }
 0x5b8   :  { %6841 = vmatpush1.bf16.msra.mxu1 %v16942_v13  ;;  %6756 = vmatprep.subr.bf16.mxu0 %v16957_v15  ;;  %v19146_v13 = vld [vmem:[#allocation14 + $0x78] sm:$0xff]  }
 0x5b9   :  { %6842 = vmatprep.subr.bf16.mxu1 %v16959_v16  ;;  %v19147_v15 = vld [vmem:[#allocation14 + $0xf8] sm:$0xff]  }
 0x5ba   :  { %v19148_v16 = vld [vmem:[#allocation14 + $0x38] sm:$0xff]  }
 0x5bb   :  { %6757 = vmatpush1.bf16.msra.mxu0 %v16956_v8  ;;  %v19153_v8 = vld [vmem:[#allocation14 + $0x180] sm:$0xff]  }
 0x5bc   :  { %6843 = vmatpush1.bf16.msra.mxu1 %v16958_v24  ;;  %6758 = vmatprep.subr.bf16.mxu0 %v16973_v25  ;;  %v19154_v24 = vld [vmem:[#allocation14 + $0x148] sm:$0xff]  }
 0x5bd   :  { %6844 = vmatprep.subr.bf16.mxu1 %v16975_v27  ;;  %v19155_v25 = vld [vmem:[#allocation14 + $0x1c8] sm:$0xff]  }
 0x5be   :  { %v19156_v27 = vld [vmem:[#allocation14 + $0x108] sm:$0xff]  }
 0x5bf   :  { %6759 = vmatpush1.bf16.msra.mxu0 %v16972_v33  ;;  %v19162_v33 = vld [vmem:[#allocation14 + $0x158] sm:$0xff]  }
 0x5c0   :  { %6845 = vmatpush1.bf16.msra.mxu1 %v16974_v34  ;;  %6760 = vmatprep.subr.bf16.mxu0 %v16989_v38  ;;  %v19164_v34 = vld [vmem:[#allocation14 + $0x118] sm:$0xff]   ;;  %v19166_v38 = vld [vmem:[#allocation14 + $0x160] sm:$0xff]  }
 0x5c1   :  { %6846 = vmatprep.subr.bf16.mxu1 %v16991_v41  ;;  %v19167_v41 = vld [vmem:[#allocation14 + $0x1e0] sm:$0xff]  }
 0x5c3   :  { %6761 = vmatpush1.bf16.msra.mxu0 %v16988_v42  ;;  %v19169_v42 = vld [vmem:[#allocation14 + $0x1a0] sm:$0xff]  }
 0x5c4   :  { %6847 = vmatpush1.bf16.msra.mxu1 %v16990_v43  ;;  %18113 = vmatprep.subr.bf16.mxu0 %v19118_v44  ;;  %v19170_v43 = vld [vmem:[#allocation14 + $0x168] sm:$0xff]  }
 0x5c5   :  { %18135 = vmatprep.subr.bf16.mxu1 %v19119_v45  ;;  %v19171_v44 = vld [vmem:[#allocation14 + $0x1e8] sm:$0xff]  }
 0x5c6   :  { %6763 = vmatmul.mubr.bf16.vlgmr.msra.gmra.mrb[20].mxu0 %v21384_v54  ;;  %v19172_v45 = vld [vmem:[#allocation14 + $0x128] sm:$0xff]  }
 0x5c7   :  { %6849 = vmatmul.mubr.bf16.vlgmr.msra.gmra.mrb[24].mxu1 %v21384_v54  ;;  %18114 = vmatpush3.bf16.msra.mxu0 %v19120_v46  ;;  %v19131_v54 = vld [vmem:[#allocation14 + $0xd8] sm:$0xff]   ;;  %v19173_v46 = vld [vmem:[#allocation14 + $0x1a8] sm:$0xff]  }
 0x5c8   :  { %7970 = vmatprep.mubr.bf16.mxu0 %v21426_v39  ;;  %18136 = vmatpush3.bf16.msra.mxu1 %v19121_v47  ;;  %v19133_v39 = vld [vmem:[#allocation14 + $0x98] sm:$0xff]   ;;  %v19174_v47 = vld [vmem:[#allocation14 + $0x170] sm:$0xff]  }
 0x5c9   :  { %8011 = vmatprep.mubr.bf16.mxu1 %v21428_v40  ;;  %18115 = vmatprep.subr.bf16.mxu0 %v19122_v48  ;;  %v19136_v40 = vld [vmem:[#allocation14 + $0x20] sm:$0xff]   ;;  %v19175_v48 = vld [vmem:[#allocation14 + $0x1f0] sm:$0xff]  }
 0x5ca   :  { %18137 = vmatprep.subr.bf16.mxu1 %v19123_v49  ;;  %v19176_v49 = vld [vmem:[#allocation14 + $0x130] sm:$0xff]  }
 0x5cb   :  { %18116 = vmatpush3.bf16.msra.mxu0 %v19124_v50  ;;  %v19177_v50 = vld [vmem:[#allocation14 + $0x1b0] sm:$0xff]  }
 0x5cc   :  { %18138 = vmatpush3.bf16.msra.mxu1 %v19125_v35  ;;  %18117 = vmatprep.subr.bf16.mxu0 %v19126_v51  ;;  %v19178_v35 = vld [vmem:[#allocation14 + $0x178] sm:$0xff]  }
 0x5cd   :  { %18139 = vmatprep.subr.bf16.mxu1 %v19127_v56  ;;  %v19179_v51 = vld [vmem:[#allocation14 + $0x1f8] sm:$0xff]  }
 0x5ce   :  { %v19180_v56 = vld [vmem:[#allocation14 + $0x138] sm:$0xff]  }
 0x5cf   :  { %18118 = vmatpush3.bf16.msra.mxu0 %v19128_v57  ;;  %v19181_v57 = vld [vmem:[#allocation14 + $0x1b8] sm:$0xff]  }
 0x5d0   :  { %18140 = vmatpush3.bf16.msra.mxu1 %v19129_v58  ;;  %18119 = vmatprep.subr.bf16.mxu0 %v19130_v59  ;;  %v19182_v58 = vld [vmem:[#allocation14 + $0x240] sm:$0xff]  }
 0x5d1   :  { %18141 = vmatprep.subr.bf16.mxu1 %v19131_v54  ;;  %v19183_v59 = vld [vmem:[#allocation14 + $0x2c0] sm:$0xff]  }
 0x5d2   :  { %v19184_v54 = vld [vmem:[#allocation14 + $0x200] sm:$0xff]  }
 0x5d3   :  { %18120 = vmatpush3.bf16.msra.mxu0 %v19132_v26  ;;  %v19185_v26 = vld [vmem:[#allocation14 + $0x280] sm:$0xff]  }
 0x5d4   :  { %18142 = vmatpush3.bf16.msra.mxu1 %v19133_v39  ;;  %18121 = vmatprep.subr.bf16.mxu0 %v19134_v60  ;;  %v19186_v39 = vld [vmem:[#allocation14 + $0x248] sm:$0xff]  }
 0x5d5   :  { %18143 = vmatprep.subr.bf16.mxu1 %v19135_v61  ;;  %v19187_v60 = vld [vmem:[#allocation14 + $0x2c8] sm:$0xff]  }
 0x5d6   :  { %v19188_v61 = vld [vmem:[#allocation14 + $0x208] sm:$0xff]  }
 0x5d7   :  { %18122 = vmatpush3.bf16.msra.mxu0 %v19136_v40  ;;  %v19189_v40 = vld [vmem:[#allocation14 + $0x288] sm:$0xff]  }
 0x5d8   :  { %18144 = vmatpush3.bf16.msra.mxu1 %v19137_v62  ;;  %18123 = vmatprep.subr.bf16.mxu0 %v19138_v63  ;;  %v19190_v62 = vld [vmem:[#allocation14 + $0x250] sm:$0xff]  }
 0x5d9   :  { %18145 = vmatprep.subr.bf16.mxu1 %v19139_v1  ;;  %v19191_v63 = vld [vmem:[#allocation14 + $0x2d0] sm:$0xff]  }
 0x5da   :  { %v19192_v1 = vld [vmem:[#allocation14 + $0x210] sm:$0xff]  }
 0x5db   :  { %18124 = vmatpush3.bf16.msra.mxu0 %v19140_v2  ;;  %v19193_v2 = vld [vmem:[#allocation14 + $0x290] sm:$0xff]  }
 0x5dc   :  { %18146 = vmatpush3.bf16.msra.mxu1 %v19141_v31  ;;  %18125 = vmatprep.subr.bf16.mxu0 %v19142_v4  ;;  %v19194_v31 = vld [vmem:[#allocation14 + $0x258] sm:$0xff]  }
 0x5dd   :  { %18147 = vmatprep.subr.bf16.mxu1 %v19143_v9  ;;  %v19195_v4 = vld [vmem:[#allocation14 + $0x2d8] sm:$0xff]   ;;  %v19198_v9 = vld [vmem:[#allocation14 + $0x260] sm:$0xff]  }
 0x5df   :  { %18126 = vmatpush3.bf16.msra.mxu0 %v19144_v10  ;;  %v19199_v10 = vld [vmem:[#allocation14 + $0x2e0] sm:$0xff]  }
 0x5e0   :  { %18148 = vmatpush3.bf16.msra.mxu1 %v19145_v12  ;;  %18127 = vmatprep.subr.bf16.mxu0 %v19146_v13  ;;  %v19200_v12 = vld [vmem:[#allocation14 + $0x220] sm:$0xff]   ;;  %v21476_v13 = vld [vmem:[#allocation13 + $0x8] sm:$0xff] }
 0x5e1   :  { %18149 = vmatprep.subr.bf16.mxu1 %v19147_v15  ;;  %v19201_v15 = vld [vmem:[#allocation14 + $0x2a0] sm:$0xff]  }
 0x5e3   :  { %18128 = vmatpush3.bf16.msra.mxu0 %v19148_v16  ;;  %v19202_v16 = vld [vmem:[#allocation14 + $0x268] sm:$0xff]  }
 0x5e4   :  { %18150 = vmatpush3.bf16.msra.mxu1 %v19149_v17  ;;  %18157 = vmatprep.subr.bf16.mxu0 %v19150_v20  ;;  %v19203_v17 = vld [vmem:[#allocation14 + $0x2e8] sm:$0xff]   ;;  %v3566_v20 = vrot.slane %v21476_v13, %v21353_v53 }
 0x5e5   :  { %18179 = vmatprep.subr.bf16.mxu1 %v19151_v21  ;;  %v3574_v21 = vrot.slane %v21476_v13, %v21369_v6 }
 0x5e6   :  { %7971 = vmatmul.mubr.bf16.vlgmr.msra.gmra.mrb[24].mxu0 %v21422_v36  ;;  %v19161_v36 = vld [vmem:[#allocation14 + $0x190] sm:$0xff]  }
 0x5e7   :  { %8012 = vmatmul.mubr.bf16.vlgmr.msra.gmra.mrb[28].mxu1 %v21424_v37  ;;  %18158 = vmatpush3.bf16.msra.mxu0 %v19152_v7  ;;  %v19163_v37 = vld [vmem:[#allocation14 + $0x1d8] sm:$0xff]   ;;  %v3570_v7 = vrot.slane %v21476_v13, %v21358_v55 }
 0x5e8   :  { %8052 = vmatprep.mubr.bf16.mxu0 %v21462_v23  ;;  %18180 = vmatpush3.bf16.msra.mxu1 %v19153_v8  ;;  %v19165_v23 = vld [vmem:[#allocation14 + $0x198] sm:$0xff]   ;;  %v19204_v8 = vld [vmem:[#allocation14 + $0x228] sm:$0xff]  }
 0x5e9   :  { %8093 = vmatprep.mubr.bf16.mxu1 %v21464_v28  ;;  %18159 = vmatprep.subr.bf16.mxu0 %v19154_v24  ;;  %v19168_v28 = vld [vmem:[#allocation14 + $0x120] sm:$0xff]   ;;  %v3578_v24 = vrot.slane %v21476_v13, %v21372_v11 }
 0x5ea   :  { %18181 = vmatprep.subr.bf16.mxu1 %v19155_v25  ;;  %v19205_v25 = vld [vmem:[#allocation14 + $0x2a8] sm:$0xff]  }
 0x5eb   :  { %18160 = vmatpush3.bf16.msra.mxu0 %v19156_v27  ;;  %v19206_v27 = vld [vmem:[#allocation14 + $0x270] sm:$0xff]  }
 0x5ec   :  { %18182 = vmatpush3.bf16.msra.mxu1 %v19157_v52  ;;  %18161 = vmatprep.subr.bf16.mxu0 %v19158_v30  ;;  %v19207_v30 = vld [vmem:[#allocation14 + $0x2f0] sm:$0xff]  }
 0x5ed   :  { %18183 = vmatprep.subr.bf16.mxu1 %v19159_v29 }
 0x5ef   :  { %18162 = vmatpush3.bf16.msra.mxu0 %v19160_v32 }
 0x5f0   :  { %18184 = vmatpush3.bf16.msra.mxu1 %v19161_v36  ;;  %18163 = vmatprep.subr.bf16.mxu0 %v19162_v33 }
 0x5f1   :  { %18185 = vmatprep.subr.bf16.mxu1 %v19163_v37 }
 0x5f3   :  { %18164 = vmatpush3.bf16.msra.mxu0 %v19164_v34 }
 0x5f4   :  { %18186 = vmatpush3.bf16.msra.mxu1 %v19165_v23  ;;  %18165 = vmatprep.subr.bf16.mxu0 %v19166_v38  ;;  %v19208_v38 = vld [vmem:[#allocation14 + $0x230] sm:$0xff]  }
 0x5f5   :  { %18187 = vmatprep.subr.bf16.mxu1 %v19167_v41 }
 0x5f7   :  { %18166 = vmatpush3.bf16.msra.mxu0 %v19168_v28 }
 0x5f8   :  { %18188 = vmatpush3.bf16.msra.mxu1 %v19169_v42  ;;  %18167 = vmatprep.subr.bf16.mxu0 %v19170_v43 }
 0x5f9   :  { %18189 = vmatprep.subr.bf16.mxu1 %v19171_v44  ;;  %v19209_v44 = vld [vmem:[#allocation14 + $0x2b0] sm:$0xff]  }
 0x5fb   :  { %18168 = vmatpush3.bf16.msra.mxu0 %v19172_v45  ;;  %v19210_v45 = vld [vmem:[#allocation14 + $0x278] sm:$0xff]  }
 0x5fc   :  { %18190 = vmatpush3.bf16.msra.mxu1 %v19173_v46  ;;  %18169 = vmatprep.subr.bf16.mxu0 %v19174_v47 }
 0x5fd   :  { %18191 = vmatprep.subr.bf16.mxu1 %v19175_v48 }
 0x5ff   :  { %18170 = vmatpush3.bf16.msra.mxu0 %v19176_v49  ;;  %v19211_v49 = vld [vmem:[#allocation14 + $0x2f8] sm:$0xff]  }
 0x600   :  { %18192 = vmatpush3.bf16.msra.mxu1 %v19177_v50  ;;  %18171 = vmatprep.subr.bf16.mxu0 %v19178_v35 }
 0x601   :  { %18193 = vmatprep.subr.bf16.mxu1 %v19179_v51 }
 0x603   :  { %18172 = vmatpush3.bf16.msra.mxu0 %v19180_v56 }
 0x604   :  { %18194 = vmatpush3.bf16.msra.mxu1 %v19181_v57  ;;  %18201 = vmatprep.subr.bf16.mxu0 %v19182_v58 }
 0x605   :  { %18223 = vmatprep.subr.bf16.mxu1 %v19183_v59 }
 0x606   :  { %8053 = vmatmul.mubr.bf16.vlgmr.msra.gmra.mrb[28].mxu0 %v21458_v5  ;;  %v19196_v5 = vld [vmem:[#allocation14 + $0x218] sm:$0xff]  }
 0x607   :  { %8094 = vmatmul.mubr.bf16.vlgmr.msra.gmra.mrb[32].mxu1 %v21460_v22  ;;  %18202 = vmatpush3.bf16.msra.mxu0 %v19184_v54  ;;  %v19197_v22 = vld [vmem:[#allocation14 + $0x298] sm:$0xff]  }
 0x608   :  { %18224 = vmatpush3.bf16.msra.mxu1 %v19185_v26  ;;  %18203 = vmatprep.subr.bf16.mxu0 %v19186_v39  ;;  %v19212_v54 = vld [vmem:[#allocation14 + $0x238] sm:$0xff]  }
 0x609   :  { %18225 = vmatprep.subr.bf16.mxu1 %v19187_v60 }
 0x60b   :  { %18204 = vmatpush3.bf16.msra.mxu0 %v19188_v61  ;;  %v19213_v61 = vld [vmem:[#allocation14 + $0x2b8] sm:$0xff]  }
 0x60c   :  { %18226 = vmatpush3.bf16.msra.mxu1 %v19189_v40  ;;  %18205 = vmatprep.subr.bf16.mxu0 %v19190_v62 }
 0x60d   :  { %18227 = vmatprep.subr.bf16.mxu1 %v19191_v63  ;;  %v19214_v63 = vld [vmem:[#allocation14 + $0x340] sm:$0xff]  }
 0x60f   :  { %18206 = vmatpush3.bf16.msra.mxu0 %v19192_v1  ;;  %v19215_v1 = vld [vmem:[#allocation14 + $0x3c0] sm:$0xff]  }
 0x610   :  { %18228 = vmatpush3.bf16.msra.mxu1 %v19193_v2  ;;  %18207 = vmatprep.subr.bf16.mxu0 %v19194_v31  ;;  %v19216_v31 = vld [vmem:[#allocation14 + $0x300] sm:$0xff]  }
 0x611   :  { %18229 = vmatprep.subr.bf16.mxu1 %v19195_v4  ;;  %v19217_v4 = vld [vmem:[#allocation14 + $0x380] sm:$0xff]  }
 0x613   :  { %18208 = vmatpush3.bf16.msra.mxu0 %v19196_v5  ;;  %v19218_v5 = vld [vmem:[#allocation14 + $0x348] sm:$0xff]  }
 0x614   :  { %18230 = vmatpush3.bf16.msra.mxu1 %v19197_v22  ;;  %18209 = vmatprep.subr.bf16.mxu0 %v19198_v9  ;;  %v19219_v22 = vld [vmem:[#allocation14 + $0x3c8] sm:$0xff]  }
 0x615   :  { %18231 = vmatprep.subr.bf16.mxu1 %v19199_v10  ;;  %v19220_v9 = vld [vmem:[#allocation14 + $0x308] sm:$0xff]  }
 0x616   :  { %v19221_v10 = vld [vmem:[#allocation14 + $0x388] sm:$0xff]  }
 0x617   :  { %18210 = vmatpush3.bf16.msra.mxu0 %v19200_v12  ;;  %v19222_v12 = vld [vmem:[#allocation14 + $0x350] sm:$0xff]  }
 0x618   :  { %18232 = vmatpush3.bf16.msra.mxu1 %v19201_v15  ;;  %18211 = vmatprep.subr.bf16.mxu0 %v19202_v16  ;;  %v19223_v15 = vld [vmem:[#allocation14 + $0x3d0] sm:$0xff]  }
 0x619   :  { %v6592_v52 = vpop.f32.mrb[16].mxu0  ;;  %18233 = vmatprep.subr.bf16.mxu1 %v19203_v17  ;;  %v19224_v16 = vld [vmem:[#allocation14 + $0x310] sm:$0xff]  }
 0x61a   :  { %v18369_v29 = vadd.f32 %v6592_v52, %v3566_v20  ;;  %v6678_v32 = vpop.f32.mrb[20].mxu1  ;;  %v6594_v36 = vpop.f32.mrb[17].mxu0  ;;  %v19225_v17 = vld [vmem:[#allocation14 + $0x390] sm:$0xff]   ;;  %v19233_v52 = vld [vmem:[#allocation14 + $0x3a0] sm:$0xff]  }
 0x61b   :  { %v18373_v33 = vadd.f32 %v6678_v32, %v3574_v21  ;;  %v18370_v37 = vadd.f32 %v6594_v36, %v3570_v7  ;;  %v6680_v34 = vpop.f32.mrb[21].mxu1  ;;  %v6596_v23 = vpop.f32.mrb[18].mxu0  ;;  %18212 = vmatpush3.bf16.msra.mxu0 %v19204_v8  ;;  %v19229_v8 = vld [vmem:[#allocation14 + $0x398] sm:$0xff]   ;;  %v19236_v32 = vld [vmem:[#allocation14 + $0x328] sm:$0xff]  }
 0x61c   :  { %v18374_v41 = vadd.f32 %v6680_v34, %v3578_v24  ;;  %v18371_v28 = vadd.f32 %v6596_v23, %v3566_v20  ;;  %v6682_v42 = vpop.f32.mrb[22].mxu1  ;;  %18234 = vmatpush3.bf16.msra.mxu1 %v19205_v25  ;;  %v6598_v43 = vpop.f32.mrb[19].mxu0  ;;  %18213 = vmatprep.subr.bf16.mxu0 %v19206_v27  ;;  %v6867_v50 = vmax.f32 %v18369_v29, 0.0  ;;  %v19226_v20 = vld [vmem:[#allocation14 + $0x358] sm:$0xff]   ;;  %v19231_v25 = vld [vmem:[#allocation14 + $0x3e0] sm:$0xff]   ;;  %v19235_v29 = vld [vmem:[#allocation14 + $0x3e8] sm:$0xff]  }
 0x61d   :  { %v18375_v46 = vadd.f32 %v6682_v42, %v3574_v21  ;;  %v18372_v47 = vadd.f32 %v6598_v43, %v3570_v7  ;;  %v6684_v48 = vpop.f32.mrb[23].mxu1  ;;  %18235 = vmatprep.subr.bf16.mxu1 %v19207_v30  ;;  %v6869_v56 = vmax.f32 %v18373_v33, 0.0  ;;  %v6868_v57 = vmax.f32 %v18370_v37, 0.0  ;;  %v19227_v21 = vld [vmem:[#allocation14 + $0x3d8] sm:$0xff]   ;;  %v19232_v27 = vld [vmem:[#allocation14 + $0x320] sm:$0xff]   ;;  %v19234_v30 = vld [vmem:[#allocation14 + $0x368] sm:$0xff]  }
 0x61e   :  { %v6883_v35 = vmax.f32 %v18371_v28, 0.0  ;;  %v18376_v51 = vadd.f32 %v6684_v48, %v3578_v24  ;;  %v6870_v26 = vmax.f32 %v18374_v41, 0.0  ;;  %v19228_v7 = vld [vmem:[#allocation14 + $0x318] sm:$0xff]   ;;  %v19230_v24 = vld [vmem:[#allocation14 + $0x360] sm:$0xff]   ;;  %v19237_v36 = vld [vmem:[#allocation14 + $0x3a8] sm:$0xff]  }
 0x61f   :  { %v6885_v58 = vmax.f32 %v18375_v46, 0.0  ;;  %v6884_v59 = vmax.f32 %v18372_v47, 0.0  ;;  %18214 = vmatpush3.bf16.msra.mxu0 %v19208_v38  ;;  %v19238_v33 = vld [vmem:[#allocation14 + $0x370] sm:$0xff]   ;;  %v19242_v38 = vld [vmem:[#allocation14 + $0x378] sm:$0xff]   ;;  %v8269_v43 = vld [vmem:[#allocation17] sm:$0xff] }
 0x620   :  { %v6899_v39 = vpack.c.bf16 %v6883_v35, %v6867_v50  ;;  %v6886_v60 = vmax.f32 %v18376_v51, 0.0  ;;  %18236 = vmatpush3.bf16.msra.mxu1 %v19209_v44  ;;  %18215 = vmatprep.subr.bf16.mxu0 %v19210_v45  ;;  %v19239_v37 = vld [vmem:[#allocation14 + $0x3f0] sm:$0xff]   ;;  %v19243_v41 = vld [vmem:[#allocation14 + $0x3f8] sm:$0xff]   ;;  %v8277_v44 = vld [vmem:[#allocation17 + $0x40] sm:$0xff]  ;;  %v3590_v50 = vrot.slane %v21476_v13, %v21442_v18  ;;  %v3586_v35 = vrot.slane %v21476_v13, %v21445_v19 }
 0x621   :  { %v6901_v40 = vpack.c.bf16 %v6885_v58, %v6869_v56  ;;  %v6900_v62 = vpack.c.bf16 %v6884_v59, %v6868_v57  ;;  %18237 = vmatprep.subr.bf16.mxu1 %v19211_v49  ;;  %v19240_v34 = vld [vmem:[#allocation14 + $0x330] sm:$0xff]   ;;  %v19244_v28 = vld [vmem:[#allocation14 + $0x338] sm:$0xff]   ;;  %v17122_v46 = vcombine.high %v8269_v43, %v8277_v44  ;;  %v3582_v49 = vrot.slane %v21476_v13, %v21439_v14 }
 0x622   :  { %v6902_v2 = vpack.c.bf16 %v6886_v60, %v6870_v26  ;;  %v19241_v23 = vld [vmem:[#allocation14 + $0x3b0] sm:$0xff]   ;;  %v19245_v42 = vld [vmem:[#allocation14 + $0x3b8] sm:$0xff]   ;;  %v3594_v51 = vrot.slane %v21476_v13, %v21448_v3 }
 0x623   :  { %18216 = vmatpush3.bf16.msra.mxu0 %v19212_v54  ;;  %8134 = vmatprep.mubr.bf16.mxu0 %v6900_v62  ;;  %v8270_v45 = vld [vmem:[#allocation17 + $0x8] sm:$0xff] }
 0x624   :  { %18238 = vmatpush3.bf16.msra.mxu1 %v19213_v61  ;;  %8175 = vmatprep.mubr.bf16.mxu1 %v6902_v2  ;;  %v8278_v47 = vld [vmem:[#allocation17 + $0x48] sm:$0xff] }
 0x625   :  { %18245 = vmatprep.subr.bf16.mxu0 %v19214_v63  ;;  %18267 = vmatprep.subr.bf16.mxu1 %v19215_v1  ;;  %v17124_v48 = vcombine.high %v8270_v45, %v8278_v47 }
 0x626   :  { %8135 = vmatmul.mubr.bf16.vlgmr.msra.gmra.mrb[32].mxu0 %v6899_v39 }
 0x627   :  { %8176 = vmatmul.mubr.bf16.vlgmr.msra.gmra.mrb[36].mxu1 %v6901_v40  ;;  %18246 = vmatpush3.bf16.msra.mxu0 %v19216_v31 }
 0x628   :  { %18268 = vmatpush3.bf16.msra.mxu1 %v19217_v4  ;;  %18247 = vmatprep.subr.bf16.mxu0 %v19218_v5 }
 0x629   :  { %18269 = vmatprep.subr.bf16.mxu1 %v19219_v22 }
 0x62b   :  { %18248 = vmatpush3.bf16.msra.mxu0 %v19220_v9 }
 0x62c   :  { %18270 = vmatpush3.bf16.msra.mxu1 %v19221_v10  ;;  %18249 = vmatprep.subr.bf16.mxu0 %v19222_v12 }
 0x62d   :  { %18271 = vmatprep.subr.bf16.mxu1 %v19223_v15  ;;  %v8285_v15 = vld [vmem:[#allocation17 + $0x80] sm:$0xff] }
 0x62f   :  { %18250 = vmatpush3.bf16.msra.mxu0 %v19224_v16  ;;  %v8293_v16 = vld [vmem:[#allocation17 + $0xc0] sm:$0xff] }
 0x630   :  { %18272 = vmatpush3.bf16.msra.mxu1 %v19225_v17  ;;  %18251 = vmatprep.subr.bf16.mxu0 %v19226_v20 }
 0x631   :  { %18273 = vmatprep.subr.bf16.mxu1 %v19227_v21 }
 0x633   :  { %18252 = vmatpush3.bf16.msra.mxu0 %v19228_v7  ;;  %v8286_v7 = vld [vmem:[#allocation17 + $0x88] sm:$0xff] }
 0x634   :  { %18274 = vmatpush3.bf16.msra.mxu1 %v19229_v8  ;;  %18253 = vmatprep.subr.bf16.mxu0 %v19230_v24  ;;  %v8294_v8 = vld [vmem:[#allocation17 + $0xc8] sm:$0xff] }
 0x635   :  { %18275 = vmatprep.subr.bf16.mxu1 %v19231_v25 }
 0x637   :  { %18254 = vmatpush3.bf16.msra.mxu0 %v19232_v27  ;;  %v17121_v27 = vcombine.low %v8269_v43, %v8277_v44  ;;  %v8325_v43 = vld [vmem:[#allocation17 + $0x1c0] sm:$0xff]  ;;  %v8318_v44 = vld [vmem:[#allocation17 + $0x188] sm:$0xff] }
 0x638   :  { %18276 = vmatpush3.bf16.msra.mxu1 %v19233_v52  ;;  %18255 = vmatprep.subr.bf16.mxu0 %v19234_v30  ;;  %v17123_v30 = vcombine.low %v8270_v45, %v8278_v47  ;;  %v8326_v45 = vld [vmem:[#allocation17 + $0x1c8] sm:$0xff] }
 0x639   :  { %18277 = vmatprep.subr.bf16.mxu1 %v19235_v29  ;;  %v17138_v29 = vcombine.high %v8285_v15, %v8293_v16 }
 0x63b   :  { %18256 = vmatpush3.bf16.msra.mxu0 %v19236_v32  ;;  %v17140_v32 = vcombine.high %v8286_v7, %v8294_v8 }
 0x63c   :  { %18278 = vmatpush3.bf16.msra.mxu1 %v19237_v36  ;;  %18257 = vmatprep.subr.bf16.mxu0 %v19238_v33  ;;  %v8301_v36 = vld [vmem:[#allocation17 + $0x100] sm:$0xff] }
 0x63d   :  { %18279 = vmatprep.subr.bf16.mxu1 %v19239_v37  ;;  %v8309_v33 = vld [vmem:[#allocation17 + $0x140] sm:$0xff]  ;;  %v8302_v37 = vld [vmem:[#allocation17 + $0x108] sm:$0xff] }
 0x63f   :  { %18258 = vmatpush3.bf16.msra.mxu0 %v19240_v34  ;;  %v8310_v34 = vld [vmem:[#allocation17 + $0x148] sm:$0xff] }
 0x640   :  { %18280 = vmatpush3.bf16.msra.mxu1 %v19241_v23  ;;  %18259 = vmatprep.subr.bf16.mxu0 %v19242_v38  ;;  %v17137_v23 = vcombine.low %v8285_v15, %v8293_v16  ;;  %v17139_v38 = vcombine.low %v8286_v7, %v8294_v8  ;;  %v17155_v47 = vcombine.low %v8302_v37, %v8310_v34 }
 0x641   :  { %18281 = vmatprep.subr.bf16.mxu1 %v19243_v41  ;;  %v17154_v41 = vcombine.high %v8301_v36, %v8309_v33 }
 0x643   :  { %18260 = vmatpush3.bf16.msra.mxu0 %v19244_v28  ;;  %v17156_v28 = vcombine.high %v8302_v37, %v8310_v34 }
 0x644   :  { %18282 = vmatpush3.bf16.msra.mxu1 %v19245_v42  ;;  %9121 = vmatprep.subr.bf16.mxu0 %v17122_v46  ;;  %v8317_v42 = vld [vmem:[#allocation17 + $0x180] sm:$0xff]  ;;  %v17153_v46 = vcombine.low %v8301_v36, %v8309_v33 }
 0x645   :  { %9164 = vmatprep.subr.bf16.mxu1 %v17124_v48  ;;  %v17170_v48 = vcombine.high %v8317_v42, %v8325_v43 }
 0x699   :  { %v6764_v56 = vpop.f32.mrb[20].mxu0 }
 0x69a   :  { %v18377_v57 = vadd.f32 %v6764_v56, %v3582_v49  ;;  %v6850_v58 = vpop.f32.mrb[24].mxu1  ;;  %v6766_v59 = vpop.f32.mrb[21].mxu0  ;;  %v8342_v56 = vld [vmem:[#allocation17 + $0x248] sm:$0xff] }
 0x69b   :  { %v18381_v54 = vadd.f32 %v6850_v58, %v3590_v50  ;;  %v18378_v26 = vadd.f32 %v6766_v59, %v3586_v35  ;;  %v6852_v39 = vpop.f32.mrb[25].mxu1  ;;  %v6768_v60 = vpop.f32.mrb[22].mxu0  ;;  %v17171_v58 = vcombine.low %v8318_v44, %v8326_v45 }
 0x69c   :  { %v18382_v61 = vadd.f32 %v6852_v39, %v3594_v51  ;;  %v18379_v40 = vadd.f32 %v6768_v60, %v3582_v49  ;;  %v6854_v62 = vpop.f32.mrb[26].mxu1  ;;  %v6770_v63 = vpop.f32.mrb[23].mxu0  ;;  %v6871_v4 = vmax.f32 %v18377_v57, 0.0  ;;  %v17172_v49 = vcombine.high %v8318_v44, %v8326_v45  ;;  %v8357_v39 = vld [vmem:[#allocation17 + $0x2c0] sm:$0xff]  ;;  %v8350_v60 = vld [vmem:[#allocation17 + $0x288] sm:$0xff] }
 0x69d   :  { %v18383_v1 = vadd.f32 %v6854_v62, %v3590_v50  ;;  %v18380_v2 = vadd.f32 %v6770_v63, %v3586_v35  ;;  %v6856_v31 = vpop.f32.mrb[27].mxu1  ;;  %v6873_v9 = vmax.f32 %v18381_v54, 0.0  ;;  %v6872_v13 = vmax.f32 %v18378_v26, 0.0  ;;  %v8333_v50 = vld [vmem:[#allocation17 + $0x200] sm:$0xff] }
 0x69e   :  { %v6887_v5 = vmax.f32 %v18379_v40, 0.0  ;;  %v18384_v22 = vadd.f32 %v6856_v31, %v3594_v51  ;;  %v6874_v17 = vmax.f32 %v18382_v61, 0.0  ;;  %v8341_v35 = vld [vmem:[#allocation17 + $0x240] sm:$0xff]  ;;  %v8334_v51 = vld [vmem:[#allocation17 + $0x208] sm:$0xff]  ;;  %v17169_v57 = vcombine.low %v8317_v42, %v8325_v43 }
 0x69f   :  { %v6889_v10 = vmax.f32 %v18383_v1, 0.0  ;;  %v6888_v12 = vmax.f32 %v18380_v2, 0.0  ;;  %v17186_v59 = vcombine.high %v8333_v50, %v8341_v35  ;;  %v17188_v54 = vcombine.high %v8334_v51, %v8342_v56  ;;  %v8349_v26 = vld [vmem:[#allocation17 + $0x280] sm:$0xff]  ;;  %v8358_v61 = vld [vmem:[#allocation17 + $0x2c8] sm:$0xff] }
 0x6a0   :  { %v6903_v20 = vpack.c.bf16 %v6887_v5, %v6871_v4  ;;  %v6890_v21 = vmax.f32 %v18384_v22, 0.0  ;;  %v17185_v40 = vcombine.low %v8333_v50, %v8341_v35  ;;  %v17187_v62 = vcombine.low %v8334_v51, %v8342_v56  ;;  %v16992_v22 = vld [vmem:[#allocation16] ss:$0 sm:$0xff]  ;;  %v8374_v56 = vld [vmem:[#allocation17 + $0x348] sm:$0xff] }
 0x6a1   :  { %v6905_v24 = vpack.c.bf16 %v6889_v10, %v6873_v9  ;;  %v6904_v25 = vpack.c.bf16 %v6888_v12, %v6872_v13  ;;  %v17202_v63 = vcombine.high %v8349_v26, %v8357_v39  ;;  %v17204_v1 = vcombine.high %v8350_v60, %v8358_v61 }
 0x6a2   :  { %v6906_v52 = vpack.c.bf16 %v6890_v21, %v6874_v17  ;;  %v17201_v2 = vcombine.low %v8349_v26, %v8357_v39  ;;  %v17203_v31 = vcombine.low %v8350_v60, %v8358_v61 }
 0x6a3   :  { %8216 = vmatprep.mubr.bf16.mxu0 %v6904_v25 }
 0x6a4   :  { %8257 = vmatprep.mubr.bf16.mxu1 %v6906_v52  ;;  %8217 = vmatmul.mubr.bf16.vlgmr.msra.gmra.mrb[36].mxu0 %v6903_v20 }
 0x6a5   :  { %8258 = vmatmul.mubr.bf16.vlgmr.msra.gmra.mrb[40].mxu1 %v6905_v24  ;;  %9122 = vmatpush1.bf16.msra.mxu0 %v17121_v27 }
 0x6a6   :  { %9165 = vmatpush1.bf16.msra.mxu1 %v17123_v30  ;;  %9123 = vmatprep.subr.bf16.mxu0 %v17138_v29 }
 0x6a7   :  { %9166 = vmatprep.subr.bf16.mxu1 %v17140_v32  ;;  %9153 = vmatprep.mubr.bf16.mxu0 %v20991_v0 }
 0x6a8   :  { %9196 = vmatprep.mubr.bf16.mxu1 %v20991_v0 }
 0x6a9   :  { %9124 = vmatpush1.bf16.msra.mxu0 %v17137_v23 }
 0x6aa   :  { %9167 = vmatpush1.bf16.msra.mxu1 %v17139_v38  ;;  %9125 = vmatprep.subr.bf16.mxu0 %v17154_v41 }
 0x6ab   :  { %9168 = vmatprep.subr.bf16.mxu1 %v17156_v28 }
 0x6ad   :  { %9126 = vmatpush1.bf16.msra.mxu0 %v17153_v46 }
 0x6ae   :  { %9169 = vmatpush1.bf16.msra.mxu1 %v17155_v47  ;;  %9127 = vmatprep.subr.bf16.mxu0 %v17170_v48  ;;  %v8365_v47 = vld [vmem:[#allocation17 + $0x300] sm:$0xff] }
 0x6af   :  { %9170 = vmatprep.subr.bf16.mxu1 %v17172_v49  ;;  %v8373_v48 = vld [vmem:[#allocation17 + $0x340] sm:$0xff]  ;;  %v8366_v49 = vld [vmem:[#allocation17 + $0x308] sm:$0xff] }
 0x6b0   :  { %v17218_v51 = vcombine.high %v8365_v47, %v8373_v48  ;;  %v17219_v26 = vcombine.low %v8366_v49, %v8374_v56  ;;  %v17220_v39 = vcombine.high %v8366_v49, %v8374_v56  ;;  %v8296_v49 = vld [vmem:[#allocation17 + $0xd8] sm:$0xff] }
 0x6b1   :  { %9128 = vmatpush1.bf16.msra.mxu0 %v17169_v57 }
 0x6b2   :  { %9171 = vmatpush1.bf16.msra.mxu1 %v17171_v58  ;;  %9129 = vmatprep.subr.bf16.mxu0 %v17186_v59 }
 0x6b3   :  { %9172 = vmatprep.subr.bf16.mxu1 %v17188_v54  ;;  %v17217_v54 = vcombine.low %v8365_v47, %v8373_v48  ;;  %v8295_v47 = vld [vmem:[#allocation17 + $0xd0] sm:$0xff]  ;;  %v8288_v48 = vld [vmem:[#allocation17 + $0x98] sm:$0xff] }
 0x6b4   :  { %v17144_v56 = vcombine.high %v8288_v48, %v8296_v49 }
 0x6b5   :  { %9130 = vmatpush1.bf16.msra.mxu0 %v17185_v40 }
 0x6b6   :  { %9173 = vmatpush1.bf16.msra.mxu1 %v17187_v62  ;;  %9131 = vmatprep.subr.bf16.mxu0 %v17202_v63 }
 0x6b7   :  { %9174 = vmatprep.subr.bf16.mxu1 %v17204_v1 }
 0x6b9   :  { %v18129_v4 = vpop.f32.mrb[24].mxu0  ;;  %9132 = vmatpush1.bf16.msra.mxu0 %v17201_v2  ;;  %v8381_v2 = vld [vmem:[#allocation17 + $0x380] sm:$0xff] }
 0x6ba   :  { %v18151_v5 = vpop.f32.mrb[28].mxu1  ;;  %v18130_v9 = vpop.f32.mrb[25].mxu0  ;;  %9175 = vmatpush1.bf16.msra.mxu1 %v17203_v31  ;;  %9133 = vmatprep.subr.bf16.mxu0 %v17218_v51  ;;  %v8389_v31 = vld [vmem:[#allocation17 + $0x3c0] sm:$0xff] }
 0x6bb   :  { %v18131_v13 = vadd.f32 %v18130_v9, %v18129_v4  ;;  %v18152_v10 = vpop.f32.mrb[29].mxu1  ;;  %v18132_v12 = vpop.f32.mrb[26].mxu0  ;;  %9176 = vmatprep.subr.bf16.mxu1 %v17220_v39  ;;  %v8382_v4 = vld [vmem:[#allocation17 + $0x388] sm:$0xff]  ;;  %v17143_v39 = vcombine.low %v8288_v48, %v8296_v49  ;;  %v8281_v48 = vld [vmem:[#allocation17 + $0x60] sm:$0xff] }
 0x6bc   :  { %v18153_v15 = vadd.f32 %v18152_v10, %v18151_v5  ;;  %v18154_v16 = vpop.f32.mrb[30].mxu1  ;;  %v18133_v17 = vpop.f32.mrb[27].mxu0  ;;  %v8390_v9 = vld [vmem:[#allocation17 + $0x3c8] sm:$0xff] }
 0x6bd   :  { %v7973_v20 = vadd.f32 %v18131_v13, %v16992_v22  ;;  %v18134_v21 = vadd.f32 %v18133_v17, %v18132_v12  ;;  %v18155_v7 = vpop.f32.mrb[31].mxu1  ;;  %9134 = vmatpush1.bf16.msra.mxu0 %v17217_v54  ;;  %v17233_v12 = vcombine.low %v8381_v2, %v8389_v31  ;;  %v8312_v54 = vld [vmem:[#allocation17 + $0x158] sm:$0xff]  ;;  %v8274_v49 = vld [vmem:[#allocation17 + $0x28] sm:$0xff] }
 0x6be   :  { %v18156_v8 = vadd.f32 %v18155_v7, %v18154_v16  ;;  %9177 = vmatpush1.bf16.msra.mxu1 %v17219_v26  ;;  %v17236_v16 = vcombine.high %v8382_v4, %v8390_v9  ;;  %v8272_v7 = vld [vmem:[#allocation17 + $0x18] sm:$0xff] }
 0x6bf   :  { %v8014_v24 = vadd.f32 %v18153_v15, %v7973_v20  ;;  %v7976_v25 = vadd.f32 %v18134_v21, %v16992_v22  ;;  %v17234_v22 = vcombine.high %v8381_v2, %v8389_v31  ;;  %v17235_v15 = vcombine.low %v8382_v4, %v8390_v9  ;;  %v8271_v20 = vld [vmem:[#allocation17 + $0x10] sm:$0xff] }
 0x6c0   :  { %v8279_v21 = vld [vmem:[#allocation17 + $0x50] sm:$0xff]  ;;  %9178 = vmatprep.subr.bf16.mxu1 %v17236_v16 }
 0x6c1   :  { %v8017_v27 = vadd.f32 %v18156_v8, %v7976_v25  ;;  %9135 = vmatprep.subr.bf16.mxu0 %v17234_v22  ;;  %v17125_v8 = vcombine.low %v8271_v20, %v8279_v21  ;;  %v8280_v25 = vld [vmem:[#allocation17 + $0x58] sm:$0xff]  ;;  %v8335_v22 = vld [vmem:[#allocation17 + $0x210] sm:$0xff] }
 0x6c2   :  { %9136 = vmatpush1.bf16.msra.mxu0 %v17233_v12  ;;  %9179 = vmatpush1.bf16.msra.mxu1 %v17235_v15  ;;  %v8343_v9 = vld [vmem:[#allocation17 + $0x250] sm:$0xff] }
 0x6c3   :  { %v17190_v16 = vcombine.high %v8335_v22, %v8343_v9 }
 0x6d9   :  { %v18173_v52 = vpop.f32.mrb[28].mxu0 }
 0x6da   :  { %v18195_v30 = vpop.f32.mrb[32].mxu1  ;;  %v18174_v29 = vpop.f32.mrb[29].mxu0 }
 0x6db   :  { %v18175_v32 = vadd.f32 %v18174_v29, %v18173_v52  ;;  %v18196_v36 = vpop.f32.mrb[33].mxu1  ;;  %v18176_v33 = vpop.f32.mrb[30].mxu0  ;;  %v17128_v52 = vcombine.high %v8272_v7, %v8280_v25 }
 0x6dc   :  { %v18197_v37 = vadd.f32 %v18196_v36, %v18195_v30  ;;  %v18198_v34 = vpop.f32.mrb[34].mxu1  ;;  %v18177_v23 = vpop.f32.mrb[31].mxu0 }
 0x6dd   :  { %v8055_v38 = vadd.f32 %v18175_v32, %v8014_v24  ;;  %v18178_v41 = vadd.f32 %v18177_v23, %v18176_v33  ;;  %v18199_v28 = vpop.f32.mrb[35].mxu1  ;;  %v17126_v24 = vcombine.high %v8271_v20, %v8279_v21  ;;  %9250 = vmatprep.subr.bf16.mxu1 %v17128_v52  ;;  %v8351_v20 = vld [vmem:[#allocation17 + $0x290] sm:$0xff] }
 0x6de   :  { %v18200_v42 = vadd.f32 %v18199_v28, %v18198_v34  ;;  %v8359_v21 = vld [vmem:[#allocation17 + $0x2d0] sm:$0xff] }
 0x6df   :  { %v8096_v43 = vadd.f32 %v18197_v37, %v8055_v38  ;;  %v8058_v44 = vadd.f32 %v18178_v41, %v8017_v27  ;;  %v17127_v27 = vcombine.low %v8272_v7, %v8280_v25  ;;  %9207 = vmatprep.subr.bf16.mxu0 %v17126_v24  ;;  %v8352_v7 = vld [vmem:[#allocation17 + $0x298] sm:$0xff]  ;;  %v17189_v24 = vcombine.low %v8335_v22, %v8343_v9 }
 0x6e1   :  { %v8099_v45 = vadd.f32 %v18200_v42, %v8058_v44 }
 0x6f9   :  { %v18217_v46 = vpop.f32.mrb[32].mxu0 }
 0x6fa   :  { %v18239_v50 = vpop.f32.mrb[36].mxu1  ;;  %v18218_v35 = vpop.f32.mrb[33].mxu0 }
 0x6fb   :  { %v18219_v57 = vadd.f32 %v18218_v35, %v18217_v46  ;;  %v18240_v58 = vpop.f32.mrb[37].mxu1  ;;  %v18220_v59 = vpop.f32.mrb[34].mxu0  ;;  %v8287_v46 = vld [vmem:[#allocation17 + $0x90] sm:$0xff] }
 0x6fc   :  { %v18241_v60 = vadd.f32 %v18240_v58, %v18239_v50  ;;  %v18242_v61 = vpop.f32.mrb[38].mxu1  ;;  %v18221_v40 = vpop.f32.mrb[35].mxu0  ;;  %v17142_v51 = vcombine.high %v8287_v46, %v8295_v47  ;;  %v8311_v58 = vld [vmem:[#allocation17 + $0x150] sm:$0xff]  ;;  %v17141_v26 = vcombine.low %v8287_v46, %v8295_v47  ;;  %v8273_v47 = vld [vmem:[#allocation17 + $0x20] sm:$0xff] }
 0x6fd   :  { %v8137_v62 = vadd.f32 %v18219_v57, %v8096_v43  ;;  %v18222_v63 = vadd.f32 %v18221_v40, %v18220_v59  ;;  %v18243_v1 = vpop.f32.mrb[39].mxu1  ;;  %v8303_v57 = vld [vmem:[#allocation17 + $0x110] sm:$0xff]  ;;  %v8304_v59 = vld [vmem:[#allocation17 + $0x118] sm:$0xff] }
 0x6fe   :  { %v18244_v5 = vadd.f32 %v18243_v1, %v18242_v61  ;;  %v17160_v61 = vcombine.high %v8304_v59, %v8312_v54  ;;  %v8319_v40 = vld [vmem:[#allocation17 + $0x190] sm:$0xff]  ;;  %v8328_v1 = vld [vmem:[#allocation17 + $0x1d8] sm:$0xff]  ;;  %v17157_v2 = vcombine.low %v8303_v57, %v8311_v58  ;;  %v17159_v31 = vcombine.low %v8304_v59, %v8312_v54  ;;  %v8289_v59 = vld [vmem:[#allocation17 + $0xa0] sm:$0xff] }
 0x6ff   :  { %v8178_v13 = vadd.f32 %v18241_v60, %v8137_v62  ;;  %v8140_v10 = vadd.f32 %v18222_v63, %v8099_v45  ;;  %v17158_v60 = vcombine.high %v8303_v57, %v8311_v58  ;;  %v8327_v62 = vld [vmem:[#allocation17 + $0x1d0] sm:$0xff]  ;;  %v8320_v63 = vld [vmem:[#allocation17 + $0x198] sm:$0xff]  ;;  %v17130_v57 = vcombine.high %v8273_v47, %v8281_v48  ;;  %v8297_v54 = vld [vmem:[#allocation17 + $0xe0] sm:$0xff] }
 0x700   :  { %v17174_v4 = vcombine.high %v8319_v40, %v8327_v62  ;;  %v17173_v12 = vcombine.low %v8319_v40, %v8327_v62  ;;  %v17175_v15 = vcombine.low %v8320_v63, %v8328_v1  ;;  %v17146_v40 = vcombine.high %v8289_v59, %v8297_v54 }
 0x701   :  { %v8181_v17 = vadd.f32 %v18244_v5, %v8140_v10  ;;  %v17176_v5 = vcombine.high %v8320_v63, %v8328_v1  ;;  %v8344_v10 = vld [vmem:[#allocation17 + $0x258] sm:$0xff]  ;;  %v8305_v63 = vld [vmem:[#allocation17 + $0x120] sm:$0xff] }
 0x702   :  { %v8313_v1 = vld [vmem:[#allocation17 + $0x160] sm:$0xff] }
 0x703   :  { %v17162_v22 = vcombine.high %v8305_v63, %v8313_v1 }
 0x777   :  { %v18261_v30 = vpop.f32.mrb[36].mxu0 }
 0x778   :  { %v18283_v29 = vpop.f32.mrb[40].mxu1  ;;  %v18262_v32 = vpop.f32.mrb[37].mxu0 }
 0x779   :  { %v18263_v36 = vadd.f32 %v18262_v32, %v18261_v30  ;;  %v18284_v33 = vpop.f32.mrb[41].mxu1  ;;  %v18264_v37 = vpop.f32.mrb[38].mxu0  ;;  %v8367_v30 = vld [vmem:[#allocation17 + $0x310] sm:$0xff]  ;;  %v8368_v32 = vld [vmem:[#allocation17 + $0x318] sm:$0xff] }
 0x77a   :  { %v18285_v34 = vadd.f32 %v18284_v33, %v18283_v29  ;;  %v18286_v23 = vpop.f32.mrb[42].mxu1  ;;  %v18265_v38 = vpop.f32.mrb[39].mxu0  ;;  %v8375_v29 = vld [vmem:[#allocation17 + $0x350] sm:$0xff]  ;;  %v17205_v33 = vcombine.low %v8351_v20, %v8359_v21 }
 0x77b   :  { %v8219_v41 = vadd.f32 %v18263_v36, %v8178_v13  ;;  %v18266_v28 = vadd.f32 %v18265_v38, %v18264_v37  ;;  %v18287_v42 = vpop.f32.mrb[43].mxu1  ;;  %v8336_v13 = vld [vmem:[#allocation17 + $0x218] sm:$0xff]  ;;  %v8383_v38 = vld [vmem:[#allocation17 + $0x390] sm:$0xff] }
 0x77c   :  { %v18288_v43 = vadd.f32 %v18287_v42, %v18286_v23  ;;  %v17191_v25 = vcombine.low %v8336_v13, %v8344_v10  ;;  %v8376_v36 = vld [vmem:[#allocation17 + $0x358] sm:$0xff] }
 0x77d   :  { %v8260_v44 = vadd.f32 %v18285_v34, %v8219_v41  ;;  %v8222_v45 = vadd.f32 %v18266_v28, %v8181_v17  ;;  %v17192_v17 = vcombine.high %v8336_v13, %v8344_v10  ;;  %v17222_v34 = vcombine.high %v8367_v30, %v8375_v29  ;;  %v8391_v41 = vld [vmem:[#allocation17 + $0x3d0] sm:$0xff]  ;;  %v8384_v28 = vld [vmem:[#allocation17 + $0x398] sm:$0xff]  ;;  %v8321_v13 = vld [vmem:[#allocation17 + $0x1a0] sm:$0xff] }
 0x77e   :  { %v17224_v23 = vcombine.high %v8368_v32, %v8376_v36  ;;  %v8392_v42 = vld [vmem:[#allocation17 + $0x3d8] sm:$0xff]  ;;  %v8329_v10 = vld [vmem:[#allocation17 + $0x1e0] sm:$0xff] }
 0x77f   :  { %8266 = vst [vmem:[#allocation29] sm:$0xff] %v8260_v44  ;;  %v8263_v50 = vadd.f32 %v18288_v43, %v8222_v45  ;;  %v17221_v43 = vcombine.low %v8367_v30, %v8375_v29  ;;  %v17238_v45 = vcombine.high %v8383_v38, %v8391_v41  ;;  %v17240_v46 = vcombine.high %v8384_v28, %v8392_v42 }
 0x781   :  { %8267 = vst [vmem:[#allocation29 + $0x8] sm:$0xff] %v8263_v50  ;;  %v21496_v35 = vpack.c.bf16 %v8263_v50, %v8260_v44  ;;  %v17223_v44 = vcombine.low %v8368_v32, %v8376_v36  ;;  %v8282_v50 = vld [vmem:[#allocation17 + $0x68] sm:$0xff]  ;;  %v8353_v32 = vld [vmem:[#allocation17 + $0x2a0] sm:$0xff] }
 0x782   :  { %v17132_v58 = vcombine.high %v8274_v49, %v8282_v50  ;;  %v8361_v36 = vld [vmem:[#allocation17 + $0x2e0] sm:$0xff] }
 0x783   :  { %9154 = vmatmul.mubr.bf16.vlgmr.msra.gmra.mrb[40].mxu0 %v21496_v35  ;;  %9197 = vmatmul.mubr.bf16.vlgmr.msra.gmra.mrb[44].mxu1 %v21496_v35 }
 0x784   :  { %9208 = vmatpush1.bf16.msra.mxu0 %v17125_v8  ;;  %9251 = vmatpush1.bf16.msra.mxu1 %v17127_v27  ;;  %v8360_v8 = vld [vmem:[#allocation17 + $0x2d8] sm:$0xff]  ;;  %v17206_v27 = vcombine.high %v8351_v20, %v8359_v21  ;;  %v17178_v20 = vcombine.high %v8321_v13, %v8329_v10 }
 0x785   :  { %9209 = vmatprep.subr.bf16.mxu0 %v17142_v51  ;;  %9252 = vmatprep.subr.bf16.mxu1 %v17144_v56  ;;  %v17208_v52 = vcombine.high %v8352_v7, %v8360_v8  ;;  %v17207_v37 = vcombine.low %v8352_v7, %v8360_v8  ;;  %v17237_v51 = vcombine.low %v8383_v38, %v8391_v41  ;;  %v8337_v7 = vld [vmem:[#allocation17 + $0x220] sm:$0xff] }
 0x786   :  { %9239 = vmatprep.mubr.bf16.mxu0 %v20991_v0  ;;  %9282 = vmatprep.mubr.bf16.mxu1 %v20991_v0  ;;  %v17239_v56 = vcombine.low %v8384_v28, %v8392_v42  ;;  %v8345_v8 = vld [vmem:[#allocation17 + $0x260] sm:$0xff]  ;;  %v17210_v38 = vcombine.high %v8353_v32, %v8361_v36 }
 0x787   :  { %v17194_v30 = vcombine.high %v8337_v7, %v8345_v8  ;;  %v8369_v28 = vld [vmem:[#allocation17 + $0x320] sm:$0xff] }
 0x788   :  { %9210 = vmatpush1.bf16.msra.mxu0 %v17141_v26  ;;  %9253 = vmatpush1.bf16.msra.mxu1 %v17143_v39  ;;  %v8290_v26 = vld [vmem:[#allocation17 + $0xa8] sm:$0xff]  ;;  %v8377_v42 = vld [vmem:[#allocation17 + $0x360] sm:$0xff] }
 0x789   :  { %9211 = vmatprep.subr.bf16.mxu0 %v17158_v60  ;;  %9254 = vmatprep.subr.bf16.mxu1 %v17160_v61  ;;  %v8298_v39 = vld [vmem:[#allocation17 + $0xe8] sm:$0xff]  ;;  %v17129_v60 = vcombine.low %v8273_v47, %v8281_v48  ;;  %v17131_v61 = vcombine.low %v8274_v49, %v8282_v50  ;;  %v17226_v47 = vcombine.high %v8369_v28, %v8377_v42  ;;  %v8385_v49 = vld [vmem:[#allocation17 + $0x3a0] sm:$0xff] }
 0x78a   :  { %v17148_v62 = vcombine.high %v8290_v26, %v8298_v39  ;;  %v8393_v50 = vld [vmem:[#allocation17 + $0x3e0] sm:$0xff] }
 0x78c   :  { %9212 = vmatpush1.bf16.msra.mxu0 %v17157_v2  ;;  %9255 = vmatpush1.bf16.msra.mxu1 %v17159_v31  ;;  %v8306_v2 = vld [vmem:[#allocation17 + $0x128] sm:$0xff] }
 0x78d   :  { %9213 = vmatprep.subr.bf16.mxu0 %v17174_v4  ;;  %9256 = vmatprep.subr.bf16.mxu1 %v17176_v5  ;;  %v8314_v31 = vld [vmem:[#allocation17 + $0x168] sm:$0xff]  ;;  %v17145_v4 = vcombine.low %v8289_v59, %v8297_v54  ;;  %v17147_v5 = vcombine.low %v8290_v26, %v8298_v39  ;;  %v17242_v59 = vcombine.high %v8385_v49, %v8393_v50  ;;  %v8275_v26 = vld [vmem:[#allocation17 + $0x30] sm:$0xff] }
 0x78e   :  { %v17164_v9 = vcombine.high %v8306_v2, %v8314_v31  ;;  %v8283_v39 = vld [vmem:[#allocation17 + $0x70] sm:$0xff] }
 0x790   :  { %9214 = vmatpush1.bf16.msra.mxu0 %v17173_v12  ;;  %9257 = vmatpush1.bf16.msra.mxu1 %v17175_v15  ;;  %v8322_v12 = vld [vmem:[#allocation17 + $0x1a8] sm:$0xff] }
 0x791   :  { %9215 = vmatprep.subr.bf16.mxu0 %v17190_v16  ;;  %9258 = vmatprep.subr.bf16.mxu1 %v17192_v17  ;;  %v8330_v15 = vld [vmem:[#allocation17 + $0x1e8] sm:$0xff]  ;;  %v17161_v16 = vcombine.low %v8305_v63, %v8313_v1  ;;  %v17163_v17 = vcombine.low %v8306_v2, %v8314_v31  ;;  %v17134_v63 = vcombine.high %v8275_v26, %v8283_v39  ;;  %v8291_v2 = vld [vmem:[#allocation17 + $0xb0] sm:$0xff] }
 0x792   :  { %v17180_v21 = vcombine.high %v8322_v12, %v8330_v15  ;;  %v8299_v31 = vld [vmem:[#allocation17 + $0xf0] sm:$0xff] }
 0x794   :  { %9216 = vmatpush1.bf16.msra.mxu0 %v17189_v24  ;;  %9259 = vmatpush1.bf16.msra.mxu1 %v17191_v25  ;;  %v8338_v24 = vld [vmem:[#allocation17 + $0x228] sm:$0xff] }
 0x795   :  { %9217 = vmatprep.subr.bf16.mxu0 %v17206_v27  ;;  %9260 = vmatprep.subr.bf16.mxu1 %v17208_v52  ;;  %v8346_v25 = vld [vmem:[#allocation17 + $0x268] sm:$0xff]  ;;  %v17177_v27 = vcombine.low %v8321_v13, %v8329_v10  ;;  %v17179_v52 = vcombine.low %v8322_v12, %v8330_v15  ;;  %v17150_v13 = vcombine.high %v8291_v2, %v8299_v31  ;;  %v8307_v12 = vld [vmem:[#allocation17 + $0x130] sm:$0xff] }
 0x796   :  { %v17196_v29 = vcombine.high %v8338_v24, %v8346_v25  ;;  %v8315_v15 = vld [vmem:[#allocation17 + $0x170] sm:$0xff] }
 0x798   :  { %9218 = vmatpush1.bf16.msra.mxu0 %v17205_v33  ;;  %9261 = vmatpush1.bf16.msra.mxu1 %v17207_v37  ;;  %v8354_v33 = vld [vmem:[#allocation17 + $0x2a8] sm:$0xff] }
 0x799   :  { %9219 = vmatprep.subr.bf16.mxu0 %v17222_v34  ;;  %9262 = vmatprep.subr.bf16.mxu1 %v17224_v23  ;;  %v8362_v37 = vld [vmem:[#allocation17 + $0x2e8] sm:$0xff]  ;;  %v17193_v34 = vcombine.low %v8337_v7, %v8345_v8  ;;  %v17195_v23 = vcombine.low %v8338_v24, %v8346_v25  ;;  %v17166_v7 = vcombine.high %v8307_v12, %v8315_v15  ;;  %v8323_v24 = vld [vmem:[#allocation17 + $0x1b0] sm:$0xff] }
 0x79a   :  { %v17212_v41 = vcombine.high %v8354_v33, %v8362_v37  ;;  %v8331_v25 = vld [vmem:[#allocation17 + $0x1f0] sm:$0xff] }
 0x79c   :  { %9220 = vmatpush1.bf16.msra.mxu0 %v17221_v43  ;;  %9263 = vmatpush1.bf16.msra.mxu1 %v17223_v44  ;;  %v8370_v43 = vld [vmem:[#allocation17 + $0x328] sm:$0xff] }
 0x79d   :  { %9221 = vmatprep.subr.bf16.mxu0 %v17238_v45  ;;  %9264 = vmatprep.subr.bf16.mxu1 %v17240_v46  ;;  %v8378_v44 = vld [vmem:[#allocation17 + $0x368] sm:$0xff]  ;;  %v17209_v45 = vcombine.low %v8353_v32, %v8361_v36  ;;  %v17211_v46 = vcombine.low %v8354_v33, %v8362_v37  ;;  %v17182_v32 = vcombine.high %v8323_v24, %v8331_v25  ;;  %v8339_v33 = vld [vmem:[#allocation17 + $0x230] sm:$0xff] }
 0x79e   :  { %v17228_v48 = vcombine.high %v8370_v43, %v8378_v44  ;;  %v8347_v37 = vld [vmem:[#allocation17 + $0x270] sm:$0xff] }
 0x7a0   :  { %9222 = vmatpush1.bf16.msra.mxu0 %v17237_v51  ;;  %9265 = vmatpush1.bf16.msra.mxu1 %v17239_v56  ;;  %v8386_v51 = vld [vmem:[#allocation17 + $0x3a8] sm:$0xff] }
 0x7a1   :  { %9293 = vmatprep.subr.bf16.mxu0 %v17130_v57  ;;  %9336 = vmatprep.subr.bf16.mxu1 %v17132_v58  ;;  %v8394_v56 = vld [vmem:[#allocation17 + $0x3e8] sm:$0xff]  ;;  %v17225_v57 = vcombine.low %v8369_v28, %v8377_v42  ;;  %v17227_v58 = vcombine.low %v8370_v43, %v8378_v44  ;;  %v17198_v28 = vcombine.high %v8339_v33, %v8347_v37  ;;  %v8355_v42 = vld [vmem:[#allocation17 + $0x2b0] sm:$0xff]  ;;  %v8356_v44 = vld [vmem:[#allocation17 + $0x2b8] sm:$0xff] }
 0x7a2   :  { %v17244_v54 = vcombine.high %v8386_v51, %v8394_v56  ;;  %v8363_v43 = vld [vmem:[#allocation17 + $0x2f0] sm:$0xff] }
 0x7a3   :  { %9240 = vmatmul.mubr.bf16.vlgmr.msra.gmra.mrb[44].mxu0 %v21496_v35  ;;  %9283 = vmatmul.mubr.bf16.vlgmr.msra.gmra.mrb[48].mxu1 %v21496_v35 }
 0x7a4   :  { %9294 = vmatpush1.bf16.msra.mxu0 %v17129_v60  ;;  %9337 = vmatpush1.bf16.msra.mxu1 %v17131_v61  ;;  %v8276_v60 = vld [vmem:[#allocation17 + $0x38] sm:$0xff] }
 0x7a5   :  { %9295 = vmatprep.subr.bf16.mxu0 %v17146_v40  ;;  %9338 = vmatprep.subr.bf16.mxu1 %v17148_v62  ;;  %v8284_v61 = vld [vmem:[#allocation17 + $0x78] sm:$0xff]  ;;  %v17241_v40 = vcombine.low %v8385_v49, %v8393_v50  ;;  %v17243_v62 = vcombine.low %v8386_v51, %v8394_v56  ;;  %v8371_v50 = vld [vmem:[#allocation17 + $0x330] sm:$0xff] }
 0x7a6   :  { %9325 = vmatprep.mubr.bf16.mxu0 %v20991_v0  ;;  %9368 = vmatprep.mubr.bf16.mxu1 %v20991_v0  ;;  %v17136_v1 = vcombine.high %v8276_v60, %v8284_v61  ;;  %v8379_v51 = vld [vmem:[#allocation17 + $0x370] sm:$0xff]  ;;  %v8372_v56 = vld [vmem:[#allocation17 + $0x338] sm:$0xff] }
 0x7a8   :  { %9296 = vmatpush1.bf16.msra.mxu0 %v17145_v4  ;;  %9339 = vmatpush1.bf16.msra.mxu1 %v17147_v5  ;;  %v8292_v4 = vld [vmem:[#allocation17 + $0xb8] sm:$0xff] }
 0x7a9   :  { %9297 = vmatprep.subr.bf16.mxu0 %v17162_v22  ;;  %9340 = vmatprep.subr.bf16.mxu1 %v17164_v9  ;;  %v8300_v5 = vld [vmem:[#allocation17 + $0xf8] sm:$0xff]  ;;  %v17133_v22 = vcombine.low %v8275_v26, %v8283_v39  ;;  %v17135_v9 = vcombine.low %v8276_v60, %v8284_v61  ;;  %v8387_v39 = vld [vmem:[#allocation17 + $0x3b0] sm:$0xff] }
 0x7aa   :  { %v17152_v10 = vcombine.high %v8292_v4, %v8300_v5  ;;  %v8395_v60 = vld [vmem:[#allocation17 + $0x3f0] sm:$0xff]  ;;  %v8388_v61 = vld [vmem:[#allocation17 + $0x3b8] sm:$0xff] }
 0x7ac   :  { %9298 = vmatpush1.bf16.msra.mxu0 %v17161_v16  ;;  %9341 = vmatpush1.bf16.msra.mxu1 %v17163_v17  ;;  %v8308_v16 = vld [vmem:[#allocation17 + $0x138] sm:$0xff] }
 0x7ad   :  { %9299 = vmatprep.subr.bf16.mxu0 %v17178_v20  ;;  %9342 = vmatprep.subr.bf16.mxu1 %v17180_v21  ;;  %v8316_v17 = vld [vmem:[#allocation17 + $0x178] sm:$0xff]  ;;  %v17149_v20 = vcombine.low %v8291_v2, %v8299_v31  ;;  %v17151_v21 = vcombine.low %v8292_v4, %v8300_v5  ;;  %v17245_v31 = vcombine.low %v8387_v39, %v8395_v60  ;;  %v19248_v5 = vld [vmem:[#allocation20 + $0x4] ss:$16 sps:$4 sm:$0xff]  }
 0x7ae   :  { %v17168_v8 = vcombine.high %v8308_v16, %v8316_v17 }
 0x7b0   :  { %9300 = vmatpush1.bf16.msra.mxu0 %v17177_v27  ;;  %9343 = vmatpush1.bf16.msra.mxu1 %v17179_v52  ;;  %v8324_v27 = vld [vmem:[#allocation17 + $0x1b8] sm:$0xff] }
 0x7b1   :  { %9301 = vmatprep.subr.bf16.mxu0 %v17194_v30  ;;  %9344 = vmatprep.subr.bf16.mxu1 %v17196_v29  ;;  %v8332_v52 = vld [vmem:[#allocation17 + $0x1f8] sm:$0xff]  ;;  %v17165_v30 = vcombine.low %v8307_v12, %v8315_v15  ;;  %v17167_v29 = vcombine.low %v8308_v16, %v8316_v17  ;;  %v19252_v15 = vld [vmem:[#allocation20 + $0x20] ss:$16 sps:$4 sm:$0xff]   ;;  %v19260_v17 = vld [vmem:[#allocation20 + $0x44] ss:$16 sps:$4 sm:$0xff]  }
 0x7b2   :  { %v17184_v36 = vcombine.high %v8324_v27, %v8332_v52  ;;  %v19257_v12 = vld [vmem:[#allocation20 + $0x2c] ss:$16 sps:$4 sm:$0xff]   ;;  %v19255_v16 = vld [vmem:[#allocation20 + $0x28] ss:$16 sps:$4 sm:$0xff]  }
 0x7b4   :  { %9302 = vmatpush1.bf16.msra.mxu0 %v17193_v34  ;;  %9345 = vmatpush1.bf16.msra.mxu1 %v17195_v23  ;;  %v8340_v34 = vld [vmem:[#allocation17 + $0x238] sm:$0xff] }
 0x7b5   :  { %9303 = vmatprep.subr.bf16.mxu0 %v17210_v38  ;;  %9346 = vmatprep.subr.bf16.mxu1 %v17212_v41  ;;  %v8348_v23 = vld [vmem:[#allocation17 + $0x278] sm:$0xff]  ;;  %v17181_v38 = vcombine.low %v8323_v24, %v8331_v25  ;;  %v17183_v41 = vcombine.low %v8324_v27, %v8332_v52  ;;  %v19264_v25 = vld [vmem:[#allocation20 + $0x60] ss:$16 sps:$4 sm:$0xff]   ;;  %v19272_v27 = vld [vmem:[#allocation20 + $0x84] ss:$16 sps:$4 sm:$0xff]  }
 0x7b6   :  { %v19269_v24 = vld [vmem:[#allocation20 + $0x6c] ss:$16 sps:$4 sm:$0xff]  }
 0x7b7   :  { %v19275_v52 = vld [vmem:[#allocation20 + $0x8c] ss:$16 sps:$4 sm:$0xff]  }
 0x7b8   :  { %9304 = vmatpush1.bf16.msra.mxu0 %v17209_v45  ;;  %9347 = vmatpush1.bf16.msra.mxu1 %v17211_v46  ;;  %v8364_v45 = vld [vmem:[#allocation17 + $0x2f8] sm:$0xff]  ;;  %v17197_v46 = vcombine.low %v8339_v33, %v8347_v37  ;;  %v19276_v33 = vld [vmem:[#allocation20 + $0xa0] ss:$16 sps:$4 sm:$0xff]  }
 0x7b9   :  { %9305 = vmatprep.subr.bf16.mxu0 %v17226_v47  ;;  %9348 = vmatprep.subr.bf16.mxu1 %v17228_v48  ;;  %v17199_v47 = vcombine.low %v8340_v34, %v8348_v23  ;;  %v17214_v48 = vcombine.high %v8355_v42, %v8363_v43  ;;  %v17216_v49 = vcombine.high %v8356_v44, %v8364_v45  ;;  %v19279_v37 = vld [vmem:[#allocation20 + $0xa8] ss:$16 sps:$4 sm:$0xff]  }
 0x7bc   :  { %9306 = vmatpush1.bf16.msra.mxu0 %v17225_v57  ;;  %9349 = vmatpush1.bf16.msra.mxu1 %v17227_v58  ;;  %v8380_v57 = vld [vmem:[#allocation17 + $0x378] sm:$0xff]  ;;  %v17213_v58 = vcombine.low %v8355_v42, %v8363_v43  ;;  %v19288_v42 = vld [vmem:[#allocation20 + $0xe0] ss:$16 sps:$4 sm:$0xff]  }
 0x7bd   :  { %9307 = vmatprep.subr.bf16.mxu0 %v17242_v59  ;;  %9350 = vmatprep.subr.bf16.mxu1 %v17244_v54  ;;  %v17215_v59 = vcombine.low %v8356_v44, %v8364_v45  ;;  %v17230_v54 = vcombine.high %v8371_v50, %v8379_v51  ;;  %v17232_v26 = vcombine.high %v8372_v56, %v8380_v57  ;;  %v19291_v43 = vld [vmem:[#allocation20 + $0xe8] ss:$16 sps:$4 sm:$0xff]   ;;  %v19296_v44 = vld [vmem:[#allocation20 + $0x104] ss:$16 sps:$4 sm:$0xff]   ;;  %v19299_v45 = vld [vmem:[#allocation20 + $0x10c] ss:$16 sps:$4 sm:$0xff]  }
 0x7c0   :  { %9308 = vmatpush1.bf16.msra.mxu0 %v17241_v40  ;;  %9351 = vmatpush1.bf16.msra.mxu1 %v17243_v62  ;;  %v8396_v40 = vld [vmem:[#allocation17 + $0x3f8] sm:$0xff]  ;;  %v17229_v62 = vcombine.low %v8371_v50, %v8379_v51  ;;  %v19300_v50 = vld [vmem:[#allocation20 + $0x120] ss:$16 sps:$4 sm:$0xff]  }
 0x7c1   :  { %9379 = vmatprep.subr.bf16.mxu0 %v17134_v63  ;;  %9422 = vmatprep.subr.bf16.mxu1 %v17136_v1  ;;  %v17231_v63 = vcombine.low %v8372_v56, %v8380_v57  ;;  %v17246_v1 = vcombine.high %v8387_v39, %v8395_v60  ;;  %v17248_v2 = vcombine.high %v8388_v61, %v8396_v40  ;;  %v19303_v51 = vld [vmem:[#allocation20 + $0x128] ss:$16 sps:$4 sm:$0xff]   ;;  %v19308_v56 = vld [vmem:[#allocation20 + $0x144] ss:$16 sps:$4 sm:$0xff]   ;;  %v19311_v57 = vld [vmem:[#allocation20 + $0x14c] ss:$16 sps:$4 sm:$0xff]  }
 0x7c2   :  { %v17247_v4 = vcombine.low %v8388_v61, %v8396_v40  ;;  %v19312_v39 = vld [vmem:[#allocation20 + $0x160] ss:$16 sps:$4 sm:$0xff]   ;;  %v19315_v60 = vld [vmem:[#allocation20 + $0x168] ss:$16 sps:$4 sm:$0xff]   ;;  %v19320_v61 = vld [vmem:[#allocation20 + $0x184] ss:$16 sps:$4 sm:$0xff]  }
 0x7c3   :  { %9326 = vmatmul.mubr.bf16.vlgmr.msra.gmra.mrb[48].mxu0 %v21496_v35  ;;  %9369 = vmatmul.mubr.bf16.vlgmr.msra.gmra.mrb[52].mxu1 %v21496_v35  ;;  %v19323_v40 = vld [vmem:[#allocation20 + $0x18c] ss:$16 sps:$4 sm:$0xff]  }
 0x7c4   :  { %9380 = vmatpush1.bf16.msra.mxu0 %v17133_v22  ;;  %9423 = vmatpush1.bf16.msra.mxu1 %v17135_v9  ;;  %v19251_v22 = vld [vmem:[#allocation20 + $0xc] ss:$16 sps:$4 sm:$0xff]   ;;  %v19246_v9 = vld [vmem:[#allocation20] ss:$16 sps:$4 sm:$0xff]  }
 0x7c5   :  { %9381 = vmatprep.subr.bf16.mxu0 %v17150_v13  ;;  %9424 = vmatprep.subr.bf16.mxu1 %v17152_v10  ;;  %v19249_v13 = vld [vmem:[#allocation20 + $0x8] ss:$16 sps:$4 sm:$0xff]   ;;  %v19254_v10 = vld [vmem:[#allocation20 + $0x24] ss:$16 sps:$4 sm:$0xff]  }
 0x7c6   :  { %9411 = vmatprep.mubr.bf16.mxu0 %v20991_v0  ;;  %9454 = vmatprep.mubr.bf16.mxu1 %v20991_v0  ;;  %v17200_v0 = vcombine.high %v8340_v34, %v8348_v23  ;;  %v19284_v34 = vld [vmem:[#allocation20 + $0xc4] ss:$16 sps:$4 sm:$0xff]   ;;  %v19287_v23 = vld [vmem:[#allocation20 + $0xcc] ss:$16 sps:$4 sm:$0xff]  }
 0x7c8   :  { %9382 = vmatpush1.bf16.msra.mxu0 %v17149_v20  ;;  %9425 = vmatpush1.bf16.msra.mxu1 %v17151_v21  ;;  %v19263_v20 = vld [vmem:[#allocation20 + $0x4c] ss:$16 sps:$4 sm:$0xff]   ;;  %v19258_v21 = vld [vmem:[#allocation20 + $0x40] ss:$16 sps:$4 sm:$0xff]  }
 0x7c9   :  { %9383 = vmatprep.subr.bf16.mxu0 %v17166_v7  ;;  %9426 = vmatprep.subr.bf16.mxu1 %v17168_v8  ;;  %v19261_v7 = vld [vmem:[#allocation20 + $0x48] ss:$16 sps:$4 sm:$0xff]   ;;  %v19266_v8 = vld [vmem:[#allocation20 + $0x64] ss:$16 sps:$4 sm:$0xff]  }
 0x7cc   :  { %9384 = vmatpush1.bf16.msra.mxu0 %v17165_v30  ;;  %9427 = vmatpush1.bf16.msra.mxu1 %v17167_v29  ;;  %v19270_v30 = vld [vmem:[#allocation20 + $0x80] ss:$16 sps:$4 sm:$0xff]   ;;  %v19273_v29 = vld [vmem:[#allocation20 + $0x88] ss:$16 sps:$4 sm:$0xff]  }
 0x7cd   :  { %9385 = vmatprep.subr.bf16.mxu0 %v17182_v32  ;;  %9428 = vmatprep.subr.bf16.mxu1 %v17184_v36  ;;  %v19278_v32 = vld [vmem:[#allocation20 + $0xa4] ss:$16 sps:$4 sm:$0xff]   ;;  %v19281_v36 = vld [vmem:[#allocation20 + $0xac] ss:$16 sps:$4 sm:$0xff]  }
 0x7d0   :  { %9386 = vmatpush1.bf16.msra.mxu0 %v17181_v38  ;;  %9429 = vmatpush1.bf16.msra.mxu1 %v17183_v41  ;;  %v19282_v38 = vld [vmem:[#allocation20 + $0xc0] ss:$16 sps:$4 sm:$0xff]   ;;  %v19285_v41 = vld [vmem:[#allocation20 + $0xc8] ss:$16 sps:$4 sm:$0xff]  }
 0x7d1   :  { %9387 = vmatprep.subr.bf16.mxu0 %v17198_v28  ;;  %9430 = vmatprep.subr.bf16.mxu1 %v17200_v0  ;;  %v19290_v28 = vld [vmem:[#allocation20 + $0xe4] ss:$16 sps:$4 sm:$0xff]   ;;  %v19293_v0 = vld [vmem:[#allocation20 + $0xec] ss:$16 sps:$4 sm:$0xff]  }
 0x7d4   :  { %9388 = vmatpush1.bf16.msra.mxu0 %v17197_v46  ;;  %9431 = vmatpush1.bf16.msra.mxu1 %v17199_v47  ;;  %v19294_v46 = vld [vmem:[#allocation20 + $0x100] ss:$16 sps:$4 sm:$0xff]   ;;  %v19297_v47 = vld [vmem:[#allocation20 + $0x108] ss:$16 sps:$4 sm:$0xff]  }
 0x7d5   :  { %9389 = vmatprep.subr.bf16.mxu0 %v17214_v48  ;;  %9432 = vmatprep.subr.bf16.mxu1 %v17216_v49  ;;  %v19302_v48 = vld [vmem:[#allocation20 + $0x124] ss:$16 sps:$4 sm:$0xff]   ;;  %v19305_v49 = vld [vmem:[#allocation20 + $0x12c] ss:$16 sps:$4 sm:$0xff]  }
 0x7d8   :  { %9390 = vmatpush1.bf16.msra.mxu0 %v17213_v58  ;;  %9433 = vmatpush1.bf16.msra.mxu1 %v17215_v59  ;;  %v19306_v58 = vld [vmem:[#allocation20 + $0x140] ss:$16 sps:$4 sm:$0xff]   ;;  %v19309_v59 = vld [vmem:[#allocation20 + $0x148] ss:$16 sps:$4 sm:$0xff]  }
 0x7d9   :  { %9391 = vmatprep.subr.bf16.mxu0 %v17230_v54  ;;  %9434 = vmatprep.subr.bf16.mxu1 %v17232_v26  ;;  %v19314_v54 = vld [vmem:[#allocation20 + $0x164] ss:$16 sps:$4 sm:$0xff]   ;;  %v19317_v26 = vld [vmem:[#allocation20 + $0x16c] ss:$16 sps:$4 sm:$0xff]  }
 0x7dc   :  { %9392 = vmatpush1.bf16.msra.mxu0 %v17229_v62  ;;  %9435 = vmatpush1.bf16.msra.mxu1 %v17231_v63  ;;  %v19318_v62 = vld [vmem:[#allocation20 + $0x180] ss:$16 sps:$4 sm:$0xff]   ;;  %v19321_v63 = vld [vmem:[#allocation20 + $0x188] ss:$16 sps:$4 sm:$0xff]  }
 0x7dd   :  { %9393 = vmatprep.subr.bf16.mxu0 %v17246_v1  ;;  %9436 = vmatprep.subr.bf16.mxu1 %v17248_v2  ;;  %v19326_v1 = vld [vmem:[#allocation20 + $0x1a4] ss:$16 sps:$4 sm:$0xff]   ;;  %v19329_v2 = vld [vmem:[#allocation20 + $0x1ac] ss:$16 sps:$4 sm:$0xff]  }
 0x7e0   :  { %9394 = vmatpush1.bf16.msra.mxu0 %v17245_v31  ;;  %9437 = vmatpush1.bf16.msra.mxu1 %v17247_v4  ;;  %v19324_v31 = vld [vmem:[#allocation20 + $0x1a0] ss:$16 sps:$4 sm:$0xff]   ;;  %v19327_v4 = vld [vmem:[#allocation20 + $0x1a8] ss:$16 sps:$4 sm:$0xff]  }
 0x7e1   :  { %12607 = vmatprep.subr.bf16.mxu0 %v19248_v5  ;;  %12951 = vmatprep.subr.bf16.mxu1 %v19251_v22  ;;  %v19332_v5 = vld [vmem:[#allocation20 + $0x1c4] ss:$16 sps:$4 sm:$0xff]   ;;  %v19335_v22 = vld [vmem:[#allocation20 + $0x1cc] ss:$16 sps:$4 sm:$0xff]  }
 0x7e3   :  { %9412 = vmatmul.mubr.bf16.vlgmr.msra.gmra.mrb[52].mxu0 %v21496_v35  ;;  %9455 = vmatmul.mubr.bf16.vlgmr.msra.gmra.mrb[56].mxu1 %v21496_v35  ;;  %v19267_v35 = vld [vmem:[#allocation20 + $0x68] ss:$16 sps:$4 sm:$0xff]  }
 0x7e4   :  { %12608 = vmatpush1.bf16.msra.mxu0 %v19246_v9  ;;  %12952 = vmatpush1.bf16.msra.mxu1 %v19249_v13  ;;  %v19330_v9 = vld [vmem:[#allocation20 + $0x1c0] ss:$16 sps:$4 sm:$0xff]   ;;  %v19333_v13 = vld [vmem:[#allocation20 + $0x1c8] ss:$16 sps:$4 sm:$0xff]  }
 0x7e5   :  { %12609 = vmatprep.subr.bf16.mxu0 %v19254_v10  ;;  %12953 = vmatprep.subr.bf16.mxu1 %v19257_v12  ;;  %v19338_v10 = vld [vmem:[#allocation20 + $0x1e4] ss:$16 sps:$4 sm:$0xff]   ;;  %v19341_v12 = vld [vmem:[#allocation20 + $0x1ec] ss:$16 sps:$4 sm:$0xff]  }
 0x7e8   :  { %12610 = vmatpush1.bf16.msra.mxu0 %v19252_v15  ;;  %12954 = vmatpush1.bf16.msra.mxu1 %v19255_v16  ;;  %v19336_v15 = vld [vmem:[#allocation20 + $0x1e0] ss:$16 sps:$4 sm:$0xff]   ;;  %v19339_v16 = vld [vmem:[#allocation20 + $0x1e8] ss:$16 sps:$4 sm:$0xff]  }
 0x7e9   :  { %12611 = vmatprep.subr.bf16.mxu0 %v19260_v17  ;;  %12955 = vmatprep.subr.bf16.mxu1 %v19263_v20  ;;  %v19344_v17 = vld [vmem:[#allocation20 + $0x204] ss:$16 sps:$4 sm:$0xff]   ;;  %v19347_v20 = vld [vmem:[#allocation20 + $0x20c] ss:$16 sps:$4 sm:$0xff]  }
 0x7ec   :  { %12612 = vmatpush1.bf16.msra.mxu0 %v19258_v21  ;;  %12956 = vmatpush1.bf16.msra.mxu1 %v19261_v7  ;;  %v21512_v21 = vld [vmem:[#allocation19] sm:$0xff] }
 0x7ed   :  { %12613 = vmatprep.subr.bf16.mxu0 %v19266_v8  ;;  %12957 = vmatprep.subr.bf16.mxu1 %v19269_v24  ;;  %v8404_v7 = vrot.slane %v21512_v21, %v21353_v53  ;;  %v8412_v8 = vrot.slane %v21512_v21, %v21369_v6  ;;  %v8408_v24 = vrot.slane %v21512_v21, %v21358_v55 }
 0x7f0   :  { %12614 = vmatpush1.bf16.msra.mxu0 %v19264_v25  ;;  %12958 = vmatpush1.bf16.msra.mxu1 %v19267_v35  ;;  %v8416_v25 = vrot.slane %v21512_v21, %v21372_v11 }
 0x7f1   :  { %12615 = vmatprep.subr.bf16.mxu0 %v19272_v27  ;;  %12959 = vmatprep.subr.bf16.mxu1 %v19275_v52 }
 0x7f4   :  { %12616 = vmatpush1.bf16.msra.mxu0 %v19270_v30  ;;  %12960 = vmatpush1.bf16.msra.mxu1 %v19273_v29 }
 0x7f5   :  { %12617 = vmatprep.subr.bf16.mxu0 %v19278_v32  ;;  %12961 = vmatprep.subr.bf16.mxu1 %v19281_v36 }
 0x7f8   :  { %12618 = vmatpush1.bf16.msra.mxu0 %v19276_v33  ;;  %12962 = vmatpush1.bf16.msra.mxu1 %v19279_v37 }
 0x7f9   :  { %12619 = vmatprep.subr.bf16.mxu0 %v19284_v34  ;;  %12963 = vmatprep.subr.bf16.mxu1 %v19287_v23 }
 0x7fc   :  { %12620 = vmatpush1.bf16.msra.mxu0 %v19282_v38  ;;  %12964 = vmatpush1.bf16.msra.mxu1 %v19285_v41 }
 0x7fd   :  { %12621 = vmatprep.subr.bf16.mxu0 %v19290_v28  ;;  %12965 = vmatprep.subr.bf16.mxu1 %v19293_v0 }
 0x800   :  { %12622 = vmatpush1.bf16.msra.mxu0 %v19288_v42  ;;  %12966 = vmatpush1.bf16.msra.mxu1 %v19291_v43 }
 0x801   :  { %12623 = vmatprep.subr.bf16.mxu0 %v19296_v44  ;;  %12967 = vmatprep.subr.bf16.mxu1 %v19299_v45 }
 0x804   :  { %12624 = vmatpush1.bf16.msra.mxu0 %v19294_v46  ;;  %12968 = vmatpush1.bf16.msra.mxu1 %v19297_v47 }
 0x805   :  { %12625 = vmatprep.subr.bf16.mxu0 %v19302_v48  ;;  %12969 = vmatprep.subr.bf16.mxu1 %v19305_v49 }
 0x808   :  { %12626 = vmatpush1.bf16.msra.mxu0 %v19300_v50  ;;  %12970 = vmatpush1.bf16.msra.mxu1 %v19303_v51 }
 0x809   :  { %12627 = vmatprep.subr.bf16.mxu0 %v19308_v56  ;;  %12971 = vmatprep.subr.bf16.mxu1 %v19311_v57 }
 0x80c   :  { %12628 = vmatpush1.bf16.msra.mxu0 %v19306_v58  ;;  %12972 = vmatpush1.bf16.msra.mxu1 %v19309_v59  ;;  %v19342_v59 = vld [vmem:[#allocation20 + $0x200] ss:$16 sps:$4 sm:$0xff]  }
 0x80d   :  { %12629 = vmatprep.subr.bf16.mxu0 %v19314_v54  ;;  %12973 = vmatprep.subr.bf16.mxu1 %v19317_v26  ;;  %v19345_v54 = vld [vmem:[#allocation20 + $0x208] ss:$16 sps:$4 sm:$0xff]   ;;  %v19350_v26 = vld [vmem:[#allocation20 + $0x224] ss:$16 sps:$4 sm:$0xff]  }
 0x810   :  { %12630 = vmatpush1.bf16.msra.mxu0 %v19312_v39  ;;  %12974 = vmatpush1.bf16.msra.mxu1 %v19315_v60  ;;  %v19353_v39 = vld [vmem:[#allocation20 + $0x22c] ss:$16 sps:$4 sm:$0xff]   ;;  %v19348_v60 = vld [vmem:[#allocation20 + $0x220] ss:$16 sps:$4 sm:$0xff]  }
 0x811   :  { %12631 = vmatprep.subr.bf16.mxu0 %v19320_v61  ;;  %12975 = vmatprep.subr.bf16.mxu1 %v19323_v40  ;;  %v19351_v61 = vld [vmem:[#allocation20 + $0x228] ss:$16 sps:$4 sm:$0xff]   ;;  %v19356_v40 = vld [vmem:[#allocation20 + $0x244] ss:$16 sps:$4 sm:$0xff]  }
 0x814   :  { %12632 = vmatpush1.bf16.msra.mxu0 %v19318_v62  ;;  %12976 = vmatpush1.bf16.msra.mxu1 %v19321_v63  ;;  %v19359_v62 = vld [vmem:[#allocation20 + $0x24c] ss:$16 sps:$4 sm:$0xff]   ;;  %v19354_v63 = vld [vmem:[#allocation20 + $0x240] ss:$16 sps:$4 sm:$0xff]  }
 0x815   :  { %12633 = vmatprep.subr.bf16.mxu0 %v19326_v1  ;;  %12977 = vmatprep.subr.bf16.mxu1 %v19329_v2  ;;  %v19357_v1 = vld [vmem:[#allocation20 + $0x248] ss:$16 sps:$4 sm:$0xff]   ;;  %v19362_v2 = vld [vmem:[#allocation20 + $0x264] ss:$16 sps:$4 sm:$0xff]  }
 0x818   :  { %12634 = vmatpush1.bf16.msra.mxu0 %v19324_v31  ;;  %12978 = vmatpush1.bf16.msra.mxu1 %v19327_v4  ;;  %v19365_v31 = vld [vmem:[#allocation20 + $0x26c] ss:$16 sps:$4 sm:$0xff]   ;;  %v19360_v4 = vld [vmem:[#allocation20 + $0x260] ss:$16 sps:$4 sm:$0xff]  }
 0x819   :  { %12635 = vmatprep.subr.bf16.mxu0 %v19332_v5  ;;  %12979 = vmatprep.subr.bf16.mxu1 %v19335_v22  ;;  %v19363_v5 = vld [vmem:[#allocation20 + $0x268] ss:$16 sps:$4 sm:$0xff]   ;;  %v19368_v22 = vld [vmem:[#allocation20 + $0x284] ss:$16 sps:$4 sm:$0xff]  }
 0x81c   :  { %12636 = vmatpush1.bf16.msra.mxu0 %v19330_v9  ;;  %12980 = vmatpush1.bf16.msra.mxu1 %v19333_v13  ;;  %v19371_v9 = vld [vmem:[#allocation20 + $0x28c] ss:$16 sps:$4 sm:$0xff]   ;;  %v19366_v13 = vld [vmem:[#allocation20 + $0x280] ss:$16 sps:$4 sm:$0xff]  }
 0x81d   :  { %12637 = vmatprep.subr.bf16.mxu0 %v19338_v10  ;;  %12981 = vmatprep.subr.bf16.mxu1 %v19341_v12  ;;  %v19369_v10 = vld [vmem:[#allocation20 + $0x288] ss:$16 sps:$4 sm:$0xff]   ;;  %v19374_v12 = vld [vmem:[#allocation20 + $0x2a4] ss:$16 sps:$4 sm:$0xff]  }
 0x820   :  { %12638 = vmatpush1.bf16.msra.mxu0 %v19336_v15  ;;  %12982 = vmatpush1.bf16.msra.mxu1 %v19339_v16  ;;  %v19377_v15 = vld [vmem:[#allocation20 + $0x2ac] ss:$16 sps:$4 sm:$0xff]   ;;  %v19372_v16 = vld [vmem:[#allocation20 + $0x2a0] ss:$16 sps:$4 sm:$0xff]  }
 0x821   :  { %12650 = vmatprep.subr.bf16.mxu0 %v19344_v17  ;;  %12994 = vmatprep.subr.bf16.mxu1 %v19347_v20  ;;  %v19375_v17 = vld [vmem:[#allocation20 + $0x2a8] ss:$16 sps:$4 sm:$0xff]   ;;  %v8420_v20 = vrot.slane %v21512_v21, %v21439_v14 }
 0x856   :  { %v9155_v35 = vpop.f32.mrb[40].mxu0  ;;  %v9198_v27 = vpop.f32.mrb[44].mxu1 }
 0x857   :  { %v9156_v52 = vadd.f32 %v9155_v35, %v8404_v7  ;;  %v9199_v30 = vadd.f32 %v9198_v27, %v8412_v8  ;;  %v9157_v29 = vpop.f32.mrb[41].mxu0  ;;  %v9200_v32 = vpop.f32.mrb[45].mxu1  ;;  %v8432_v35 = vrot.slane %v21512_v21, %v21448_v3 }
 0x858   :  { %v9158_v36 = vadd.f32 %v9157_v29, %v8408_v24  ;;  %v9201_v33 = vadd.f32 %v9200_v32, %v8416_v25  ;;  %v9159_v37 = vpop.f32.mrb[42].mxu0  ;;  %v9202_v34 = vpop.f32.mrb[46].mxu1  ;;  %v19381_v29 = vld [vmem:[#allocation20 + $0x2c8] ss:$16 sps:$4 sm:$0xff]  }
 0x859   :  { %v9160_v23 = vadd.f32 %v9159_v37, %v8404_v7  ;;  %v9203_v38 = vadd.f32 %v9202_v34, %v8412_v8  ;;  %v9161_v41 = vpop.f32.mrb[43].mxu0  ;;  %v9204_v28 = vpop.f32.mrb[47].mxu1  ;;  %v9465_v43 = vmax.f32 %v9156_v52, 0.0  ;;  %v9467_v44 = vmax.f32 %v9199_v30, 0.0  ;;  %v19380_v8 = vld [vmem:[#allocation20 + $0x2c4] ss:$16 sps:$4 sm:$0xff]  }
 0x85a   :  { %v9162_v0 = vadd.f32 %v9161_v41, %v8408_v24  ;;  %v9205_v42 = vadd.f32 %v9204_v28, %v8416_v25  ;;  %v9466_v47 = vmax.f32 %v9158_v36, 0.0  ;;  %v9468_v48 = vmax.f32 %v9201_v33, 0.0  ;;  %v19383_v24 = vld [vmem:[#allocation20 + $0x2cc] ss:$16 sps:$4 sm:$0xff]   ;;  %v19378_v30 = vld [vmem:[#allocation20 + $0x2c0] ss:$16 sps:$4 sm:$0xff]  }
 0x85b   :  { %v9481_v45 = vmax.f32 %v9160_v23, 0.0  ;;  %v9483_v46 = vmax.f32 %v9203_v38, 0.0  ;;  %v8428_v7 = vrot.slane %v21512_v21, %v21442_v18  ;;  %v8424_v25 = vrot.slane %v21512_v21, %v21445_v19  ;;  %v19386_v34 = vld [vmem:[#allocation20 + $0x2e4] ss:$16 sps:$4 sm:$0xff]   ;;  %v19389_v23 = vld [vmem:[#allocation20 + $0x2ec] ss:$16 sps:$4 sm:$0xff]  }
 0x85c   :  { %v9482_v49 = vmax.f32 %v9162_v0, 0.0  ;;  %v9484_v50 = vmax.f32 %v9205_v42, 0.0 }
 0x85d   :  { %v9497_v51 = vpack.c.bf16 %v9481_v45, %v9465_v43  ;;  %v21522_v56 = vpack.c.bf16 %v9483_v46, %v9467_v44 }
 0x85e   :  { %v9498_v57 = vpack.c.bf16 %v9482_v49, %v9466_v47  ;;  %v9500_v58 = vpack.c.bf16 %v9484_v50, %v9468_v48  ;;  %v19384_v47 = vld [vmem:[#allocation20 + $0x2e0] ss:$16 sps:$4 sm:$0xff]   ;;  %v19387_v48 = vld [vmem:[#allocation20 + $0x2e8] ss:$16 sps:$4 sm:$0xff]   ;;  %v19392_v49 = vld [vmem:[#allocation20 + $0x304] ss:$16 sps:$4 sm:$0xff]  }
 0x860   :  { %12639 = vmatprep.mubr.bf16.mxu0 %v9498_v57  ;;  %12983 = vmatprep.mubr.bf16.mxu1 %v9498_v57 }
 0x861   :  { %12640 = vmatmul.mubr.bf16.vlgmr.msra.gmra.mrb[56].mxu0 %v9497_v51  ;;  %12984 = vmatmul.mubr.bf16.vlgmr.msra.gmra.mrb[60].mxu1 %v9497_v51 }
 0x862   :  { %12651 = vmatpush1.bf16.msra.mxu0 %v19342_v59  ;;  %12995 = vmatpush1.bf16.msra.mxu1 %v19345_v54  ;;  %v19395_v59 = vld [vmem:[#allocation20 + $0x30c] ss:$16 sps:$4 sm:$0xff]  }
 0x863   :  { %12682 = vmatprep.mubr.bf16.mxu0 %v9500_v58  ;;  %13026 = vmatprep.mubr.bf16.mxu1 %v9500_v58 }
 0x864   :  { %12652 = vmatprep.subr.bf16.mxu0 %v19350_v26  ;;  %12996 = vmatprep.subr.bf16.mxu1 %v19353_v39 }
 0x866   :  { %12653 = vmatpush1.bf16.msra.mxu0 %v19348_v60  ;;  %12997 = vmatpush1.bf16.msra.mxu1 %v19351_v61 }
 0x867   :  { %12654 = vmatprep.subr.bf16.mxu0 %v19356_v40  ;;  %12998 = vmatprep.subr.bf16.mxu1 %v19359_v62 }
 0x86a   :  { %12655 = vmatpush1.bf16.msra.mxu0 %v19354_v63  ;;  %12999 = vmatpush1.bf16.msra.mxu1 %v19357_v1  ;;  %v19390_v1 = vld [vmem:[#allocation20 + $0x300] ss:$16 sps:$4 sm:$0xff]  }
 0x86b   :  { %12656 = vmatprep.subr.bf16.mxu0 %v19362_v2  ;;  %13000 = vmatprep.subr.bf16.mxu1 %v19365_v31  ;;  %v19393_v2 = vld [vmem:[#allocation20 + $0x308] ss:$16 sps:$4 sm:$0xff]   ;;  %v19398_v31 = vld [vmem:[#allocation20 + $0x324] ss:$16 sps:$4 sm:$0xff]  }
 0x86e   :  { %12657 = vmatpush1.bf16.msra.mxu0 %v19360_v4  ;;  %13001 = vmatpush1.bf16.msra.mxu1 %v19363_v5  ;;  %v19401_v4 = vld [vmem:[#allocation20 + $0x32c] ss:$16 sps:$4 sm:$0xff]   ;;  %v19396_v5 = vld [vmem:[#allocation20 + $0x320] ss:$16 sps:$4 sm:$0xff]  }
 0x86f   :  { %12658 = vmatprep.subr.bf16.mxu0 %v19368_v22  ;;  %13002 = vmatprep.subr.bf16.mxu1 %v19371_v9  ;;  %v19399_v22 = vld [vmem:[#allocation20 + $0x328] ss:$16 sps:$4 sm:$0xff]   ;;  %v19404_v9 = vld [vmem:[#allocation20 + $0x344] ss:$16 sps:$4 sm:$0xff]  }
 0x872   :  { %12659 = vmatpush1.bf16.msra.mxu0 %v19366_v13  ;;  %13003 = vmatpush1.bf16.msra.mxu1 %v19369_v10  ;;  %v19407_v13 = vld [vmem:[#allocation20 + $0x34c] ss:$16 sps:$4 sm:$0xff]   ;;  %v19402_v10 = vld [vmem:[#allocation20 + $0x340] ss:$16 sps:$4 sm:$0xff]  }
 0x873   :  { %12660 = vmatprep.subr.bf16.mxu0 %v19374_v12  ;;  %13004 = vmatprep.subr.bf16.mxu1 %v19377_v15  ;;  %v19405_v12 = vld [vmem:[#allocation20 + $0x348] ss:$16 sps:$4 sm:$0xff]   ;;  %v19410_v15 = vld [vmem:[#allocation20 + $0x364] ss:$16 sps:$4 sm:$0xff]  }
 0x876   :  { %v9241_v27 = vpop.f32.mrb[44].mxu0  ;;  %v9284_v52 = vpop.f32.mrb[48].mxu1  ;;  %12661 = vmatpush1.bf16.msra.mxu0 %v19372_v16  ;;  %13005 = vmatpush1.bf16.msra.mxu1 %v19375_v17  ;;  %v19413_v16 = vld [vmem:[#allocation20 + $0x36c] ss:$16 sps:$4 sm:$0xff]   ;;  %v19408_v17 = vld [vmem:[#allocation20 + $0x360] ss:$16 sps:$4 sm:$0xff]  }
 0x877   :  { %v9242_v32 = vadd.f32 %v9241_v27, %v8420_v20  ;;  %v9285_v36 = vadd.f32 %v9284_v52, %v8428_v7  ;;  %v9243_v33 = vpop.f32.mrb[45].mxu0  ;;  %v9286_v37 = vpop.f32.mrb[49].mxu1  ;;  %12662 = vmatprep.subr.bf16.mxu0 %v19380_v8  ;;  %13006 = vmatprep.subr.bf16.mxu1 %v19383_v24  ;;  %v19419_v8 = vld [vmem:[#allocation20 + $0x38c] ss:$16 sps:$4 sm:$0xff]   ;;  %v19414_v24 = vld [vmem:[#allocation20 + $0x380] ss:$16 sps:$4 sm:$0xff]  }
 0x878   :  { %v9244_v38 = vadd.f32 %v9243_v33, %v8424_v25  ;;  %v9287_v41 = vadd.f32 %v9286_v37, %v8432_v35  ;;  %v9245_v28 = vpop.f32.mrb[46].mxu0  ;;  %v9288_v0 = vpop.f32.mrb[50].mxu1  ;;  %v19425_v27 = vld [vmem:[#allocation20 + $0x3ac] ss:$16 sps:$4 sm:$0xff]   ;;  %v19428_v33 = vld [vmem:[#allocation20 + $0x3c4] ss:$16 sps:$4 sm:$0xff]  }
 0x879   :  { %v9246_v42 = vadd.f32 %v9245_v28, %v8420_v20  ;;  %v9289_v21 = vadd.f32 %v9288_v0, %v8428_v7  ;;  %v9247_v43 = vpop.f32.mrb[47].mxu0  ;;  %v9290_v44 = vpop.f32.mrb[51].mxu1  ;;  %v9469_v50 = vmax.f32 %v9242_v32, 0.0  ;;  %v9471_v51 = vmax.f32 %v9285_v36, 0.0  ;;  %v19411_v20 = vld [vmem:[#allocation20 + $0x368] ss:$16 sps:$4 sm:$0xff]  }
 0x87a   :  { %v9248_v45 = vadd.f32 %v9247_v43, %v8424_v25  ;;  %v9291_v46 = vadd.f32 %v9290_v44, %v8432_v35  ;;  %12663 = vmatpush1.bf16.msra.mxu0 %v19378_v30  ;;  %13007 = vmatpush1.bf16.msra.mxu1 %v19381_v29  ;;  %v9470_v54 = vmax.f32 %v9244_v38, 0.0  ;;  %v9472_v26 = vmax.f32 %v9287_v41, 0.0  ;;  %v19416_v7 = vld [vmem:[#allocation20 + $0x384] ss:$16 sps:$4 sm:$0xff]   ;;  %v19417_v25 = vld [vmem:[#allocation20 + $0x388] ss:$16 sps:$4 sm:$0xff]  }
 0x87b   :  { %v9485_v57 = vmax.f32 %v9246_v42, 0.0  ;;  %v9487_v58 = vmax.f32 %v9289_v21, 0.0  ;;  %12664 = vmatprep.subr.bf16.mxu0 %v19386_v34  ;;  %13008 = vmatprep.subr.bf16.mxu1 %v19389_v23  ;;  %v19422_v35 = vld [vmem:[#allocation20 + $0x3a4] ss:$16 sps:$4 sm:$0xff]   ;;  %v21540_v52 = vld [vmem:[#allocation19 + $0x8] sm:$0xff] }
 0x87c   :  { %v9486_v39 = vmax.f32 %v9248_v45, 0.0  ;;  %v9488_v60 = vmax.f32 %v9291_v46, 0.0  ;;  %v19420_v30 = vld [vmem:[#allocation20 + $0x3a0] ss:$16 sps:$4 sm:$0xff]   ;;  %v19423_v29 = vld [vmem:[#allocation20 + $0x3a8] ss:$16 sps:$4 sm:$0xff]   ;;  %v8436_v32 = vrot.slane %v21540_v52, %v21353_v53  ;;  %v8444_v36 = vrot.slane %v21540_v52, %v21369_v6 }
 0x87d   :  { %v21532_v61 = vpack.c.bf16 %v9485_v57, %v9469_v50  ;;  %v21534_v40 = vpack.c.bf16 %v9487_v58, %v9471_v51  ;;  %v19431_v37 = vld [vmem:[#allocation20 + $0x3cc] ss:$16 sps:$4 sm:$0xff]   ;;  %v8440_v34 = vrot.slane %v21540_v52, %v21358_v55  ;;  %v8448_v23 = vrot.slane %v21540_v52, %v21372_v11  ;;  %v19426_v28 = vld [vmem:[#allocation20 + $0x3c0] ss:$16 sps:$4 sm:$0xff]   ;;  %v19429_v0 = vld [vmem:[#allocation20 + $0x3c8] ss:$16 sps:$4 sm:$0xff]  }
 0x87e   :  { %v21536_v62 = vpack.c.bf16 %v9486_v39, %v9470_v54  ;;  %v21538_v63 = vpack.c.bf16 %v9488_v60, %v9472_v26  ;;  %12665 = vmatpush1.bf16.msra.mxu0 %v19384_v47  ;;  %13009 = vmatpush1.bf16.msra.mxu1 %v19387_v48  ;;  %v19434_v45 = vld [vmem:[#allocation20 + $0x3e4] ss:$16 sps:$4 sm:$0xff]   ;;  %v19437_v46 = vld [vmem:[#allocation20 + $0x3ec] ss:$16 sps:$4 sm:$0xff]   ;;  %v19432_v39 = vld [vmem:[#allocation20 + $0x3e0] ss:$16 sps:$4 sm:$0xff]  }
 0x87f   :  { %12666 = vmatprep.subr.bf16.mxu0 %v19392_v49  ;;  %13010 = vmatprep.subr.bf16.mxu1 %v19395_v59  ;;  %v19435_v60 = vld [vmem:[#allocation20 + $0x3e8] ss:$16 sps:$4 sm:$0xff]  }
 0x882   :  { %12667 = vmatpush1.bf16.msra.mxu0 %v19390_v1  ;;  %13011 = vmatpush1.bf16.msra.mxu1 %v19393_v2  ;;  %v19440_v1 = vld [vmem:[#allocation20 + $0x404] ss:$16 sps:$4 sm:$0xff]  }
 0x883   :  { %12668 = vmatprep.subr.bf16.mxu0 %v19398_v31  ;;  %13012 = vmatprep.subr.bf16.mxu1 %v19401_v4 }
 0x886   :  { %12669 = vmatpush1.bf16.msra.mxu0 %v19396_v5  ;;  %13013 = vmatpush1.bf16.msra.mxu1 %v19399_v22  ;;  %v19443_v22 = vld [vmem:[#allocation20 + $0x40c] ss:$16 sps:$4 sm:$0xff]  }
 0x887   :  { %12670 = vmatprep.subr.bf16.mxu0 %v19404_v9  ;;  %13014 = vmatprep.subr.bf16.mxu1 %v19407_v13 }
 0x88a   :  { %12671 = vmatpush1.bf16.msra.mxu0 %v19402_v10  ;;  %13015 = vmatpush1.bf16.msra.mxu1 %v19405_v12 }
 0x88b   :  { %12672 = vmatprep.subr.bf16.mxu0 %v19410_v15  ;;  %13016 = vmatprep.subr.bf16.mxu1 %v19413_v16 }
 0x88e   :  { %12673 = vmatpush1.bf16.msra.mxu0 %v19408_v17  ;;  %13017 = vmatpush1.bf16.msra.mxu1 %v19411_v20 }
 0x88f   :  { %12674 = vmatprep.subr.bf16.mxu0 %v19416_v7  ;;  %13018 = vmatprep.subr.bf16.mxu1 %v19419_v8  ;;  %v19438_v7 = vld [vmem:[#allocation20 + $0x400] ss:$16 sps:$4 sm:$0xff]   ;;  %v19441_v8 = vld [vmem:[#allocation20 + $0x408] ss:$16 sps:$4 sm:$0xff]  }
 0x892   :  { %12675 = vmatpush1.bf16.msra.mxu0 %v19414_v24  ;;  %13019 = vmatpush1.bf16.msra.mxu1 %v19417_v25  ;;  %v19446_v24 = vld [vmem:[#allocation20 + $0x424] ss:$16 sps:$4 sm:$0xff]   ;;  %v19449_v25 = vld [vmem:[#allocation20 + $0x42c] ss:$16 sps:$4 sm:$0xff]  }
 0x893   :  { %12676 = vmatprep.subr.bf16.mxu0 %v19422_v35  ;;  %13020 = vmatprep.subr.bf16.mxu1 %v19425_v27  ;;  %v19444_v35 = vld [vmem:[#allocation20 + $0x420] ss:$16 sps:$4 sm:$0xff]   ;;  %v19447_v27 = vld [vmem:[#allocation20 + $0x428] ss:$16 sps:$4 sm:$0xff]  }
 0x896   :  { %v9327_v38 = vpop.f32.mrb[48].mxu0  ;;  %v9370_v41 = vpop.f32.mrb[52].mxu1  ;;  %12677 = vmatpush1.bf16.msra.mxu0 %v19420_v30  ;;  %13021 = vmatpush1.bf16.msra.mxu1 %v19423_v29  ;;  %v19452_v30 = vld [vmem:[#allocation20 + $0x444] ss:$16 sps:$4 sm:$0xff]   ;;  %v19455_v29 = vld [vmem:[#allocation20 + $0x44c] ss:$16 sps:$4 sm:$0xff]  }
 0x897   :  { %v9328_v42 = vadd.f32 %v9327_v38, %v8436_v32  ;;  %v9371_v21 = vadd.f32 %v9370_v41, %v8444_v36  ;;  %v9329_v43 = vpop.f32.mrb[49].mxu0  ;;  %v9372_v44 = vpop.f32.mrb[53].mxu1  ;;  %12678 = vmatprep.subr.bf16.mxu0 %v19428_v33  ;;  %13022 = vmatprep.subr.bf16.mxu1 %v19431_v37  ;;  %v19458_v33 = vld [vmem:[#allocation20 + $0x464] ss:$16 sps:$4 sm:$0xff]   ;;  %v19456_v37 = vld [vmem:[#allocation20 + $0x460] ss:$16 sps:$4 sm:$0xff]  }
 0x898   :  { %v9330_v47 = vadd.f32 %v9329_v43, %v8440_v34  ;;  %v9373_v48 = vadd.f32 %v9372_v44, %v8448_v23  ;;  %v9331_v49 = vpop.f32.mrb[50].mxu0  ;;  %v9374_v50 = vpop.f32.mrb[54].mxu1  ;;  %v19462_v38 = vld [vmem:[#allocation20 + $0x480] ss:$16 sps:$4 sm:$0xff]   ;;  %v19465_v41 = vld [vmem:[#allocation20 + $0x488] ss:$16 sps:$4 sm:$0xff]   ;;  %v8452_v43 = vrot.slane %v21540_v52, %v21439_v14  ;;  %v8460_v44 = vrot.slane %v21540_v52, %v21442_v18 }
 0x899   :  { %v9332_v51 = vadd.f32 %v9331_v49, %v8436_v32  ;;  %v9375_v57 = vadd.f32 %v9374_v50, %v8444_v36  ;;  %v9333_v58 = vpop.f32.mrb[51].mxu0  ;;  %v9376_v59 = vpop.f32.mrb[55].mxu1  ;;  %v9473_v2 = vmax.f32 %v9328_v42, 0.0  ;;  %v9475_v31 = vmax.f32 %v9371_v21, 0.0  ;;  %v19450_v32 = vld [vmem:[#allocation20 + $0x440] ss:$16 sps:$4 sm:$0xff]  }
 0x89a   :  { %v9334_v54 = vadd.f32 %v9333_v58, %v8440_v34  ;;  %v9377_v26 = vadd.f32 %v9376_v59, %v8448_v23  ;;  %12679 = vmatpush1.bf16.msra.mxu0 %v19426_v28  ;;  %13023 = vmatpush1.bf16.msra.mxu1 %v19429_v0  ;;  %v9474_v9 = vmax.f32 %v9330_v47, 0.0  ;;  %v9476_v13 = vmax.f32 %v9373_v48, 0.0  ;;  %v19453_v36 = vld [vmem:[#allocation20 + $0x448] ss:$16 sps:$4 sm:$0xff]   ;;  %v19464_v23 = vld [vmem:[#allocation20 + $0x484] ss:$16 sps:$4 sm:$0xff]  }
 0x89b   :  { %v9489_v4 = vmax.f32 %v9332_v51, 0.0  ;;  %v9491_v5 = vmax.f32 %v9375_v57, 0.0  ;;  %12680 = vmatprep.subr.bf16.mxu0 %v19434_v45  ;;  %13024 = vmatprep.subr.bf16.mxu1 %v19437_v46  ;;  %v19459_v34 = vld [vmem:[#allocation20 + $0x468] ss:$16 sps:$4 sm:$0xff]   ;;  %v19470_v28 = vld [vmem:[#allocation20 + $0x4a4] ss:$16 sps:$4 sm:$0xff]   ;;  %v8456_v46 = vrot.slane %v21540_v52, %v21445_v19  ;;  %v8464_v47 = vrot.slane %v21540_v52, %v21448_v3 }
 0x89c   :  { %v9490_v10 = vmax.f32 %v9334_v54, 0.0  ;;  %v9492_v12 = vmax.f32 %v9377_v26, 0.0  ;;  %v19473_v0 = vld [vmem:[#allocation20 + $0x4ac] ss:$16 sps:$4 sm:$0xff]   ;;  %v19468_v42 = vld [vmem:[#allocation20 + $0x4a0] ss:$16 sps:$4 sm:$0xff]  }
 0x89d   :  { %v21550_v15 = vpack.c.bf16 %v9489_v4, %v9473_v2  ;;  %v21552_v16 = vpack.c.bf16 %v9491_v5, %v9475_v31  ;;  %v19471_v21 = vld [vmem:[#allocation20 + $0x4a8] ss:$16 sps:$4 sm:$0xff]   ;;  %v19476_v45 = vld [vmem:[#allocation20 + $0x4c4] ss:$16 sps:$4 sm:$0xff]   ;;  %v19479_v48 = vld [vmem:[#allocation20 + $0x4cc] ss:$16 sps:$4 sm:$0xff]  }
 0x89e   :  { %v21554_v17 = vpack.c.bf16 %v9490_v10, %v9474_v9  ;;  %v21556_v20 = vpack.c.bf16 %v9492_v12, %v9476_v13  ;;  %12681 = vmatpush1.bf16.msra.mxu0 %v19432_v39  ;;  %13025 = vmatpush1.bf16.msra.mxu1 %v19435_v60  ;;  %v19474_v51 = vld [vmem:[#allocation20 + $0x4c0] ss:$16 sps:$4 sm:$0xff]   ;;  %v19477_v26 = vld [vmem:[#allocation20 + $0x4c8] ss:$16 sps:$4 sm:$0xff]   ;;  %v19482_v39 = vld [vmem:[#allocation20 + $0x4e4] ss:$16 sps:$4 sm:$0xff]  }
 0x89f   :  { %12693 = vmatprep.subr.bf16.mxu0 %v19440_v1  ;;  %13037 = vmatprep.subr.bf16.mxu1 %v19443_v22  ;;  %v19485_v4 = vld [vmem:[#allocation20 + $0x4ec] ss:$16 sps:$4 sm:$0xff]   ;;  %v19480_v10 = vld [vmem:[#allocation20 + $0x4e0] ss:$16 sps:$4 sm:$0xff]   ;;  %v19483_v12 = vld [vmem:[#allocation20 + $0x4e8] ss:$16 sps:$4 sm:$0xff]  }
 0x8a1   :  { %12683 = vmatmul.mubr.bf16.vlgmr.msra.gmra.mrb[56].mxu0 %v21522_v56  ;;  %13027 = vmatmul.mubr.bf16.vlgmr.msra.gmra.mrb[60].mxu1 %v21522_v56  ;;  %v19461_v56 = vld [vmem:[#allocation20 + $0x46c] ss:$16 sps:$4 sm:$0xff]  }
 0x8a2   :  { %12694 = vmatpush1.bf16.msra.mxu0 %v19438_v7  ;;  %12725 = vmatprep.mubr.bf16.mxu0 %v21536_v62 }
 0x8a3   :  { %13038 = vmatpush1.bf16.msra.mxu1 %v19441_v8  ;;  %13069 = vmatprep.mubr.bf16.mxu1 %v21536_v62  ;;  %v19467_v62 = vld [vmem:[#allocation20 + $0x48c] ss:$16 sps:$4 sm:$0xff]  }
 0x8a4   :  { %12695 = vmatprep.subr.bf16.mxu0 %v19446_v24  ;;  %13039 = vmatprep.subr.bf16.mxu1 %v19449_v25 }
 0x8a6   :  { %12696 = vmatpush1.bf16.msra.mxu0 %v19444_v35  ;;  %v19488_v35 = vld [vmem:[#allocation20 + $0x504] ss:$16 sps:$4 sm:$0xff]  }
 0x8a7   :  { %13040 = vmatpush1.bf16.msra.mxu1 %v19447_v27  ;;  %12697 = vmatprep.subr.bf16.mxu0 %v19452_v30 }
 0x8a8   :  { %13041 = vmatprep.subr.bf16.mxu1 %v19455_v29 }
 0x8aa   :  { %12698 = vmatpush1.bf16.msra.mxu0 %v19450_v32 }
 0x8ab   :  { %13042 = vmatpush1.bf16.msra.mxu1 %v19453_v36  ;;  %12699 = vmatprep.subr.bf16.mxu0 %v19458_v33  ;;  %v19491_v36 = vld [vmem:[#allocation20 + $0x50c] ss:$16 sps:$4 sm:$0xff]  }
 0x8ac   :  { %13043 = vmatprep.subr.bf16.mxu1 %v19461_v56 }
 0x8ae   :  { %12700 = vmatpush1.bf16.msra.mxu0 %v19456_v37 }
 0x8af   :  { %13044 = vmatpush1.bf16.msra.mxu1 %v19459_v34  ;;  %12701 = vmatprep.subr.bf16.mxu0 %v19464_v23  ;;  %v19486_v23 = vld [vmem:[#allocation20 + $0x500] ss:$16 sps:$4 sm:$0xff]  }
 0x8b0   :  { %13045 = vmatprep.subr.bf16.mxu1 %v19467_v62  ;;  %v19489_v62 = vld [vmem:[#allocation20 + $0x508] ss:$16 sps:$4 sm:$0xff]  }
 0x8b2   :  { %12702 = vmatpush1.bf16.msra.mxu0 %v19462_v38  ;;  %v19494_v38 = vld [vmem:[#allocation20 + $0x524] ss:$16 sps:$4 sm:$0xff]  }
 0x8b3   :  { %13046 = vmatpush1.bf16.msra.mxu1 %v19465_v41  ;;  %12703 = vmatprep.subr.bf16.mxu0 %v19470_v28  ;;  %v19497_v41 = vld [vmem:[#allocation20 + $0x52c] ss:$16 sps:$4 sm:$0xff]   ;;  %v19492_v28 = vld [vmem:[#allocation20 + $0x520] ss:$16 sps:$4 sm:$0xff]  }
 0x8b4   :  { %13047 = vmatprep.subr.bf16.mxu1 %v19473_v0  ;;  %v19495_v0 = vld [vmem:[#allocation20 + $0x528] ss:$16 sps:$4 sm:$0xff]  }
 0x8b6   :  { %v9413_v49 = vpop.f32.mrb[52].mxu0  ;;  %v9456_v50 = vpop.f32.mrb[56].mxu1  ;;  %12704 = vmatpush1.bf16.msra.mxu0 %v19468_v42  ;;  %v19500_v42 = vld [vmem:[#allocation20 + $0x544] ss:$16 sps:$4 sm:$0xff]  }
 0x8b7   :  { %v9414_v57 = vadd.f32 %v9413_v49, %v8452_v43  ;;  %v9457_v58 = vadd.f32 %v9456_v50, %v8460_v44  ;;  %13048 = vmatpush1.bf16.msra.mxu1 %v19471_v21  ;;  %v9415_v59 = vpop.f32.mrb[53].mxu0  ;;  %v9458_v54 = vpop.f32.mrb[57].mxu1  ;;  %12705 = vmatprep.subr.bf16.mxu0 %v19476_v45  ;;  %v19503_v21 = vld [vmem:[#allocation20 + $0x54c] ss:$16 sps:$4 sm:$0xff]   ;;  %v19506_v45 = vld [vmem:[#allocation20 + $0x564] ss:$16 sps:$4 sm:$0xff]  }
 0x8b8   :  { %v9416_v60 = vadd.f32 %v9415_v59, %v8456_v46  ;;  %v9459_v1 = vadd.f32 %v9458_v54, %v8464_v47  ;;  %v9417_v2 = vpop.f32.mrb[54].mxu0  ;;  %v9460_v31 = vpop.f32.mrb[58].mxu1  ;;  %13049 = vmatprep.subr.bf16.mxu1 %v19479_v48  ;;  %v19507_v48 = vld [vmem:[#allocation20 + $0x568] ss:$16 sps:$4 sm:$0xff]   ;;  %v19512_v49 = vld [vmem:[#allocation20 + $0x584] ss:$16 sps:$4 sm:$0xff]  }
 0x8b9   :  { %v9418_v3 = vadd.f32 %v9417_v2, %v8452_v43  ;;  %v9461_v52 = vadd.f32 %v9460_v31, %v8460_v44  ;;  %v9419_v5 = vpop.f32.mrb[55].mxu0  ;;  %v9462_v22 = vpop.f32.mrb[59].mxu1  ;;  %v9477_v7 = vmax.f32 %v9414_v57, 0.0  ;;  %v9479_v8 = vmax.f32 %v9457_v58, 0.0  ;;  %v19498_v43 = vld [vmem:[#allocation20 + $0x540] ss:$16 sps:$4 sm:$0xff]  }
 0x8ba   :  { %v9420_v9 = vadd.f32 %v9419_v5, %v8456_v46  ;;  %v9463_v13 = vadd.f32 %v9462_v22, %v8464_v47  ;;  %12706 = vmatpush1.bf16.msra.mxu0 %v19474_v51  ;;  %v9478_v27 = vmax.f32 %v9416_v60, 0.0  ;;  %v9480_v30 = vmax.f32 %v9459_v1, 0.0  ;;  %v19501_v44 = vld [vmem:[#allocation20 + $0x548] ss:$16 sps:$4 sm:$0xff]   ;;  %v19509_v46 = vld [vmem:[#allocation20 + $0x56c] ss:$16 sps:$4 sm:$0xff]  }
 0x8bb   :  { %v9493_v24 = vmax.f32 %v9418_v3, 0.0  ;;  %v9495_v25 = vmax.f32 %v9461_v52, 0.0  ;;  %13050 = vmatpush1.bf16.msra.mxu1 %v19477_v26  ;;  %12707 = vmatprep.subr.bf16.mxu0 %v19482_v39  ;;  %v19504_v47 = vld [vmem:[#allocation20 + $0x560] ss:$16 sps:$4 sm:$0xff]   ;;  %v19515_v50 = vld [vmem:[#allocation20 + $0x58c] ss:$16 sps:$4 sm:$0xff]  }
 0x8bc   :  { %v9494_v29 = vmax.f32 %v9420_v9, 0.0  ;;  %v9496_v32 = vmax.f32 %v9463_v13, 0.0  ;;  %13051 = vmatprep.subr.bf16.mxu1 %v19485_v4  ;;  %v19510_v51 = vld [vmem:[#allocation20 + $0x580] ss:$16 sps:$4 sm:$0xff]   ;;  %v19513_v57 = vld [vmem:[#allocation20 + $0x588] ss:$16 sps:$4 sm:$0xff]  }
 0x8bd   :  { %v21570_v33 = vpack.c.bf16 %v9493_v24, %v9477_v7  ;;  %v21572_v56 = vpack.c.bf16 %v9495_v25, %v9479_v8  ;;  %v19518_v58 = vld [vmem:[#allocation20 + $0x5a4] ss:$16 sps:$4 sm:$0xff]   ;;  %v19521_v59 = vld [vmem:[#allocation20 + $0x5ac] ss:$16 sps:$4 sm:$0xff]   ;;  %v19516_v54 = vld [vmem:[#allocation20 + $0x5a0] ss:$16 sps:$4 sm:$0xff]  }
 0x8be   :  { %v21574_v37 = vpack.c.bf16 %v9494_v29, %v9478_v27  ;;  %v21576_v34 = vpack.c.bf16 %v9496_v32, %v9480_v30  ;;  %12708 = vmatpush1.bf16.msra.mxu0 %v19480_v10  ;;  %v19519_v26 = vld [vmem:[#allocation20 + $0x5a8] ss:$16 sps:$4 sm:$0xff]   ;;  %v19524_v39 = vld [vmem:[#allocation20 + $0x5c4] ss:$16 sps:$4 sm:$0xff]   ;;  %v19527_v60 = vld [vmem:[#allocation20 + $0x5cc] ss:$16 sps:$4 sm:$0xff]  }
 0x8bf   :  { %13052 = vmatpush1.bf16.msra.mxu1 %v19483_v12  ;;  %12709 = vmatprep.subr.bf16.mxu0 %v19488_v35  ;;  %v19522_v1 = vld [vmem:[#allocation20 + $0x5c0] ss:$16 sps:$4 sm:$0xff]   ;;  %v19525_v2 = vld [vmem:[#allocation20 + $0x5c8] ss:$16 sps:$4 sm:$0xff]   ;;  %v19530_v31 = vld [vmem:[#allocation20 + $0x5e4] ss:$16 sps:$4 sm:$0xff]  }
 0x8c0   :  { %13053 = vmatprep.subr.bf16.mxu1 %v19491_v36  ;;  %v19533_v4 = vld [vmem:[#allocation20 + $0x5ec] ss:$16 sps:$4 sm:$0xff]   ;;  %v19528_v3 = vld [vmem:[#allocation20 + $0x5e0] ss:$16 sps:$4 sm:$0xff]   ;;  %v19531_v52 = vld [vmem:[#allocation20 + $0x5e8] ss:$16 sps:$4 sm:$0xff]  }
 0x8c1   :  { %v19536_v5 = vld [vmem:[#allocation20 + $0x604] ss:$16 sps:$4 sm:$0xff]   ;;  %v19539_v22 = vld [vmem:[#allocation20 + $0x60c] ss:$16 sps:$4 sm:$0xff]   ;;  %v19534_v9 = vld [vmem:[#allocation20 + $0x600] ss:$16 sps:$4 sm:$0xff]  }
 0x8c2   :  { %12710 = vmatpush1.bf16.msra.mxu0 %v19486_v23  ;;  %v19537_v13 = vld [vmem:[#allocation20 + $0x608] ss:$16 sps:$4 sm:$0xff]   ;;  %v19542_v10 = vld [vmem:[#allocation20 + $0x624] ss:$16 sps:$4 sm:$0xff]   ;;  %v19545_v12 = vld [vmem:[#allocation20 + $0x62c] ss:$16 sps:$4 sm:$0xff]  }
 0x8c3   :  { %13054 = vmatpush1.bf16.msra.mxu1 %v19489_v62  ;;  %12711 = vmatprep.subr.bf16.mxu0 %v19494_v38  ;;  %v19540_v7 = vld [vmem:[#allocation20 + $0x620] ss:$16 sps:$4 sm:$0xff]   ;;  %v19543_v8 = vld [vmem:[#allocation20 + $0x628] ss:$16 sps:$4 sm:$0xff]   ;;  %v19548_v24 = vld [vmem:[#allocation20 + $0x644] ss:$16 sps:$4 sm:$0xff]  }
 0x8c4   :  { %13055 = vmatprep.subr.bf16.mxu1 %v19497_v41  ;;  %v19551_v25 = vld [vmem:[#allocation20 + $0x64c] ss:$16 sps:$4 sm:$0xff]   ;;  %v19546_v35 = vld [vmem:[#allocation20 + $0x640] ss:$16 sps:$4 sm:$0xff]   ;;  %v19549_v27 = vld [vmem:[#allocation20 + $0x648] ss:$16 sps:$4 sm:$0xff]  }
 0x8c5   :  { %v19554_v30 = vld [vmem:[#allocation20 + $0x664] ss:$16 sps:$4 sm:$0xff]   ;;  %v19552_v29 = vld [vmem:[#allocation20 + $0x660] ss:$16 sps:$4 sm:$0xff]   ;;  %v19555_v32 = vld [vmem:[#allocation20 + $0x668] ss:$16 sps:$4 sm:$0xff]  }
 0x8c6   :  { %12712 = vmatpush1.bf16.msra.mxu0 %v19492_v28  ;;  %v19560_v36 = vld [vmem:[#allocation20 + $0x684] ss:$16 sps:$4 sm:$0xff]   ;;  %v19563_v23 = vld [vmem:[#allocation20 + $0x68c] ss:$16 sps:$4 sm:$0xff]   ;;  %v19561_v62 = vld [vmem:[#allocation20 + $0x688] ss:$16 sps:$4 sm:$0xff]  }
 0x8c7   :  { %13056 = vmatpush1.bf16.msra.mxu1 %v19495_v0  ;;  %12713 = vmatprep.subr.bf16.mxu0 %v19500_v42  ;;  %v19566_v38 = vld [vmem:[#allocation20 + $0x6a4] ss:$16 sps:$4 sm:$0xff]   ;;  %v19569_v41 = vld [vmem:[#allocation20 + $0x6ac] ss:$16 sps:$4 sm:$0xff]   ;;  %v19564_v28 = vld [vmem:[#allocation20 + $0x6a0] ss:$16 sps:$4 sm:$0xff]  }
 0x8c8   :  { %13057 = vmatprep.subr.bf16.mxu1 %v19503_v21  ;;  %v19567_v0 = vld [vmem:[#allocation20 + $0x6a8] ss:$16 sps:$4 sm:$0xff]   ;;  %v19572_v42 = vld [vmem:[#allocation20 + $0x6c4] ss:$16 sps:$4 sm:$0xff]   ;;  %v19575_v21 = vld [vmem:[#allocation20 + $0x6cc] ss:$16 sps:$4 sm:$0xff]  }
 0x8ca   :  { %12714 = vmatpush1.bf16.msra.mxu0 %v19498_v43  ;;  %v19570_v43 = vld [vmem:[#allocation20 + $0x6c0] ss:$16 sps:$4 sm:$0xff]  }
 0x8cb   :  { %13058 = vmatpush1.bf16.msra.mxu1 %v19501_v44  ;;  %12715 = vmatprep.subr.bf16.mxu0 %v19506_v45  ;;  %v19573_v44 = vld [vmem:[#allocation20 + $0x6c8] ss:$16 sps:$4 sm:$0xff]   ;;  %v19578_v45 = vld [vmem:[#allocation20 + $0x6e4] ss:$16 sps:$4 sm:$0xff]  }
 0x8cc   :  { %13059 = vmatprep.subr.bf16.mxu1 %v19509_v46  ;;  %v19581_v46 = vld [vmem:[#allocation20 + $0x6ec] ss:$16 sps:$4 sm:$0xff]  }
 0x8ce   :  { %12716 = vmatpush1.bf16.msra.mxu0 %v19504_v47  ;;  %v19576_v47 = vld [vmem:[#allocation20 + $0x6e0] ss:$16 sps:$4 sm:$0xff]  }
 0x8cf   :  { %13060 = vmatpush1.bf16.msra.mxu1 %v19507_v48  ;;  %12717 = vmatprep.subr.bf16.mxu0 %v19512_v49  ;;  %v19579_v48 = vld [vmem:[#allocation20 + $0x6e8] ss:$16 sps:$4 sm:$0xff]   ;;  %v19584_v49 = vld [vmem:[#allocation20 + $0x704] ss:$16 sps:$4 sm:$0xff]  }
 0x8d0   :  { %13061 = vmatprep.subr.bf16.mxu1 %v19515_v50  ;;  %v19587_v50 = vld [vmem:[#allocation20 + $0x70c] ss:$16 sps:$4 sm:$0xff]  }
 0x8d2   :  { %12718 = vmatpush1.bf16.msra.mxu0 %v19510_v51  ;;  %v19582_v51 = vld [vmem:[#allocation20 + $0x700] ss:$16 sps:$4 sm:$0xff]  }
 0x8d3   :  { %13062 = vmatpush1.bf16.msra.mxu1 %v19513_v57  ;;  %12719 = vmatprep.subr.bf16.mxu0 %v19518_v58  ;;  %v19585_v57 = vld [vmem:[#allocation20 + $0x708] ss:$16 sps:$4 sm:$0xff]   ;;  %v19590_v58 = vld [vmem:[#allocation20 + $0x724] ss:$16 sps:$4 sm:$0xff]  }
 0x8d4   :  { %13063 = vmatprep.subr.bf16.mxu1 %v19521_v59  ;;  %v19593_v59 = vld [vmem:[#allocation20 + $0x72c] ss:$16 sps:$4 sm:$0xff]  }
 0x8d6   :  { %12720 = vmatpush1.bf16.msra.mxu0 %v19516_v54  ;;  %v19588_v54 = vld [vmem:[#allocation20 + $0x720] ss:$16 sps:$4 sm:$0xff]  }
 0x8d7   :  { %13064 = vmatpush1.bf16.msra.mxu1 %v19519_v26  ;;  %12721 = vmatprep.subr.bf16.mxu0 %v19524_v39  ;;  %v19591_v26 = vld [vmem:[#allocation20 + $0x728] ss:$16 sps:$4 sm:$0xff]   ;;  %v19596_v39 = vld [vmem:[#allocation20 + $0x744] ss:$16 sps:$4 sm:$0xff]  }
 0x8d8   :  { %13065 = vmatprep.subr.bf16.mxu1 %v19527_v60  ;;  %v19599_v60 = vld [vmem:[#allocation20 + $0x74c] ss:$16 sps:$4 sm:$0xff]  }
 0x8da   :  { %12722 = vmatpush1.bf16.msra.mxu0 %v19522_v1  ;;  %v19594_v1 = vld [vmem:[#allocation20 + $0x740] ss:$16 sps:$4 sm:$0xff]  }
 0x8db   :  { %13066 = vmatpush1.bf16.msra.mxu1 %v19525_v2  ;;  %12723 = vmatprep.subr.bf16.mxu0 %v19530_v31  ;;  %v19597_v2 = vld [vmem:[#allocation20 + $0x748] ss:$16 sps:$4 sm:$0xff]   ;;  %v19602_v31 = vld [vmem:[#allocation20 + $0x764] ss:$16 sps:$4 sm:$0xff]  }
 0x8dc   :  { %13067 = vmatprep.subr.bf16.mxu1 %v19533_v4  ;;  %v19605_v4 = vld [vmem:[#allocation20 + $0x76c] ss:$16 sps:$4 sm:$0xff]  }
 0x8de   :  { %12724 = vmatpush1.bf16.msra.mxu0 %v19528_v3  ;;  %v19600_v3 = vld [vmem:[#allocation20 + $0x760] ss:$16 sps:$4 sm:$0xff]  }
 0x8df   :  { %13068 = vmatpush1.bf16.msra.mxu1 %v19531_v52  ;;  %12736 = vmatprep.subr.bf16.mxu0 %v19536_v5  ;;  %v19603_v52 = vld [vmem:[#allocation20 + $0x768] ss:$16 sps:$4 sm:$0xff]   ;;  %v19608_v5 = vld [vmem:[#allocation20 + $0x784] ss:$16 sps:$4 sm:$0xff]  }
 0x8e0   :  { %13080 = vmatprep.subr.bf16.mxu1 %v19539_v22  ;;  %v19611_v22 = vld [vmem:[#allocation20 + $0x78c] ss:$16 sps:$4 sm:$0xff]  }
 0x8e1   :  { %12726 = vmatmul.mubr.bf16.vlgmr.msra.gmra.mrb[56].mxu0 %v21532_v61 }
 0x8e2   :  { %13070 = vmatmul.mubr.bf16.vlgmr.msra.gmra.mrb[60].mxu1 %v21532_v61  ;;  %12737 = vmatpush1.bf16.msra.mxu0 %v19534_v9  ;;  %v19557_v61 = vld [vmem:[#allocation20 + $0x66c] ss:$16 sps:$4 sm:$0xff]   ;;  %v19606_v9 = vld [vmem:[#allocation20 + $0x780] ss:$16 sps:$4 sm:$0xff]  }
 0x8e3   :  { %12768 = vmatprep.mubr.bf16.mxu0 %v21538_v63  ;;  %13081 = vmatpush1.bf16.msra.mxu1 %v19537_v13  ;;  %v19609_v13 = vld [vmem:[#allocation20 + $0x788] ss:$16 sps:$4 sm:$0xff]  }
 0x8e4   :  { %13112 = vmatprep.mubr.bf16.mxu1 %v21538_v63  ;;  %12738 = vmatprep.subr.bf16.mxu0 %v19542_v10  ;;  %v19558_v63 = vld [vmem:[#allocation20 + $0x680] ss:$16 sps:$4 sm:$0xff]   ;;  %v19614_v10 = vld [vmem:[#allocation20 + $0x7a4] ss:$16 sps:$4 sm:$0xff]  }
 0x8e5   :  { %13082 = vmatprep.subr.bf16.mxu1 %v19545_v12  ;;  %v19617_v12 = vld [vmem:[#allocation20 + $0x7ac] ss:$16 sps:$4 sm:$0xff]  }
 0x8e6   :  { %12739 = vmatpush1.bf16.msra.mxu0 %v19540_v7  ;;  %v19612_v7 = vld [vmem:[#allocation20 + $0x7a0] ss:$16 sps:$4 sm:$0xff]  }
 0x8e7   :  { %13083 = vmatpush1.bf16.msra.mxu1 %v19543_v8  ;;  %12740 = vmatprep.subr.bf16.mxu0 %v19548_v24  ;;  %v19615_v8 = vld [vmem:[#allocation20 + $0x7a8] ss:$16 sps:$4 sm:$0xff]   ;;  %v19620_v24 = vld [vmem:[#allocation20 + $0x7c4] ss:$16 sps:$4 sm:$0xff]  }
 0x8e8   :  { %13084 = vmatprep.subr.bf16.mxu1 %v19551_v25  ;;  %v19623_v25 = vld [vmem:[#allocation20 + $0x7cc] ss:$16 sps:$4 sm:$0xff]  }
 0x8ea   :  { %12741 = vmatpush1.bf16.msra.mxu0 %v19546_v35  ;;  %v19618_v35 = vld [vmem:[#allocation20 + $0x7c0] ss:$16 sps:$4 sm:$0xff]  }
 0x8eb   :  { %13085 = vmatpush1.bf16.msra.mxu1 %v19549_v27  ;;  %12742 = vmatprep.subr.bf16.mxu0 %v19554_v30  ;;  %v19621_v27 = vld [vmem:[#allocation20 + $0x7c8] ss:$16 sps:$4 sm:$0xff]   ;;  %v19626_v30 = vld [vmem:[#allocation20 + $0x7e4] ss:$16 sps:$4 sm:$0xff]  }
 0x8ec   :  { %13086 = vmatprep.subr.bf16.mxu1 %v19557_v61  ;;  %v19629_v61 = vld [vmem:[#allocation20 + $0x7ec] ss:$16 sps:$4 sm:$0xff]  }
 0x8ee   :  { %12743 = vmatpush1.bf16.msra.mxu0 %v19552_v29  ;;  %v19624_v29 = vld [vmem:[#allocation20 + $0x7e0] ss:$16 sps:$4 sm:$0xff]  }
 0x8ef   :  { %13087 = vmatpush1.bf16.msra.mxu1 %v19555_v32  ;;  %12744 = vmatprep.subr.bf16.mxu0 %v19560_v36  ;;  %v19627_v32 = vld [vmem:[#allocation20 + $0x7e8] ss:$16 sps:$4 sm:$0xff]   ;;  %v19632_v36 = vld [vmem:[#allocation20 + $0x804] ss:$16 sps:$4 sm:$0xff]  }
 0x8f0   :  { %13088 = vmatprep.subr.bf16.mxu1 %v19563_v23  ;;  %v19635_v23 = vld [vmem:[#allocation20 + $0x80c] ss:$16 sps:$4 sm:$0xff]  }
 0x8f2   :  { %12745 = vmatpush1.bf16.msra.mxu0 %v19558_v63  ;;  %v19630_v63 = vld [vmem:[#allocation20 + $0x800] ss:$16 sps:$4 sm:$0xff]  }
 0x8f3   :  { %13089 = vmatpush1.bf16.msra.mxu1 %v19561_v62  ;;  %12746 = vmatprep.subr.bf16.mxu0 %v19566_v38  ;;  %v19633_v62 = vld [vmem:[#allocation20 + $0x808] ss:$16 sps:$4 sm:$0xff]   ;;  %v19638_v38 = vld [vmem:[#allocation20 + $0x824] ss:$16 sps:$4 sm:$0xff]  }
 0x8f4   :  { %13090 = vmatprep.subr.bf16.mxu1 %v19569_v41  ;;  %v19641_v41 = vld [vmem:[#allocation20 + $0x82c] ss:$16 sps:$4 sm:$0xff]  }
 0x8f6   :  { %12747 = vmatpush1.bf16.msra.mxu0 %v19564_v28  ;;  %v19636_v28 = vld [vmem:[#allocation20 + $0x820] ss:$16 sps:$4 sm:$0xff]  }
 0x8f7   :  { %13091 = vmatpush1.bf16.msra.mxu1 %v19567_v0  ;;  %12748 = vmatprep.subr.bf16.mxu0 %v19572_v42  ;;  %v19639_v0 = vld [vmem:[#allocation20 + $0x828] ss:$16 sps:$4 sm:$0xff]   ;;  %v19644_v42 = vld [vmem:[#allocation20 + $0x844] ss:$16 sps:$4 sm:$0xff]  }
 0x8f8   :  { %13092 = vmatprep.subr.bf16.mxu1 %v19575_v21  ;;  %v19647_v21 = vld [vmem:[#allocation20 + $0x84c] ss:$16 sps:$4 sm:$0xff]  }
 0x8fa   :  { %12749 = vmatpush1.bf16.msra.mxu0 %v19570_v43  ;;  %v19642_v43 = vld [vmem:[#allocation20 + $0x840] ss:$16 sps:$4 sm:$0xff]  }
 0x8fb   :  { %13093 = vmatpush1.bf16.msra.mxu1 %v19573_v44  ;;  %12750 = vmatprep.subr.bf16.mxu0 %v19578_v45  ;;  %v19645_v44 = vld [vmem:[#allocation20 + $0x848] ss:$16 sps:$4 sm:$0xff]   ;;  %v19650_v45 = vld [vmem:[#allocation20 + $0x864] ss:$16 sps:$4 sm:$0xff]  }
 0x8fc   :  { %13094 = vmatprep.subr.bf16.mxu1 %v19581_v46  ;;  %v19648_v46 = vld [vmem:[#allocation20 + $0x860] ss:$16 sps:$4 sm:$0xff]  }
 0x8fe   :  { %12751 = vmatpush1.bf16.msra.mxu0 %v19576_v47  ;;  %v19651_v47 = vld [vmem:[#allocation20 + $0x868] ss:$16 sps:$4 sm:$0xff]  }
 0x8ff   :  { %13095 = vmatpush1.bf16.msra.mxu1 %v19579_v48  ;;  %12752 = vmatprep.subr.bf16.mxu0 %v19584_v49  ;;  %v19656_v48 = vld [vmem:[#allocation20 + $0x884] ss:$16 sps:$4 sm:$0xff]   ;;  %v19659_v49 = vld [vmem:[#allocation20 + $0x88c] ss:$16 sps:$4 sm:$0xff]  }
 0x900   :  { %13096 = vmatprep.subr.bf16.mxu1 %v19587_v50  ;;  %v19657_v50 = vld [vmem:[#allocation20 + $0x888] ss:$16 sps:$4 sm:$0xff]  }
 0x902   :  { %12753 = vmatpush1.bf16.msra.mxu0 %v19582_v51  ;;  %v19662_v51 = vld [vmem:[#allocation20 + $0x8a4] ss:$16 sps:$4 sm:$0xff]  }
 0x903   :  { %13097 = vmatpush1.bf16.msra.mxu1 %v19585_v57  ;;  %12754 = vmatprep.subr.bf16.mxu0 %v19590_v58  ;;  %v19665_v57 = vld [vmem:[#allocation20 + $0x8ac] ss:$16 sps:$4 sm:$0xff]   ;;  %v19660_v58 = vld [vmem:[#allocation20 + $0x8a0] ss:$16 sps:$4 sm:$0xff]  }
 0x904   :  { %13098 = vmatprep.subr.bf16.mxu1 %v19593_v59  ;;  %v19663_v59 = vld [vmem:[#allocation20 + $0x8a8] ss:$16 sps:$4 sm:$0xff]  }
 0x906   :  { %12755 = vmatpush1.bf16.msra.mxu0 %v19588_v54  ;;  %v19668_v54 = vld [vmem:[#allocation20 + $0x8c4] ss:$16 sps:$4 sm:$0xff]  }
 0x907   :  { %13099 = vmatpush1.bf16.msra.mxu1 %v19591_v26  ;;  %12756 = vmatprep.subr.bf16.mxu0 %v19596_v39  ;;  %v19671_v26 = vld [vmem:[#allocation20 + $0x8cc] ss:$16 sps:$4 sm:$0xff]   ;;  %v19666_v39 = vld [vmem:[#allocation20 + $0x8c0] ss:$16 sps:$4 sm:$0xff]  }
 0x908   :  { %13100 = vmatprep.subr.bf16.mxu1 %v19599_v60  ;;  %v19669_v60 = vld [vmem:[#allocation20 + $0x8c8] ss:$16 sps:$4 sm:$0xff]  }
 0x90a   :  { %12757 = vmatpush1.bf16.msra.mxu0 %v19594_v1  ;;  %v19674_v1 = vld [vmem:[#allocation20 + $0x8e4] ss:$16 sps:$4 sm:$0xff]  }
 0x90b   :  { %13101 = vmatpush1.bf16.msra.mxu1 %v19597_v2  ;;  %12758 = vmatprep.subr.bf16.mxu0 %v19602_v31  ;;  %v19677_v2 = vld [vmem:[#allocation20 + $0x8ec] ss:$16 sps:$4 sm:$0xff]   ;;  %v19672_v31 = vld [vmem:[#allocation20 + $0x8e0] ss:$16 sps:$4 sm:$0xff]  }
 0x90c   :  { %13102 = vmatprep.subr.bf16.mxu1 %v19605_v4  ;;  %v19675_v4 = vld [vmem:[#allocation20 + $0x8e8] ss:$16 sps:$4 sm:$0xff]  }
 0x90e   :  { %12759 = vmatpush1.bf16.msra.mxu0 %v19600_v3  ;;  %v19680_v3 = vld [vmem:[#allocation20 + $0x904] ss:$16 sps:$4 sm:$0xff]  }
 0x90f   :  { %13103 = vmatpush1.bf16.msra.mxu1 %v19603_v52  ;;  %12760 = vmatprep.subr.bf16.mxu0 %v19608_v5  ;;  %v19683_v52 = vld [vmem:[#allocation20 + $0x90c] ss:$16 sps:$4 sm:$0xff]   ;;  %v19678_v5 = vld [vmem:[#allocation20 + $0x900] ss:$16 sps:$4 sm:$0xff]  }
 0x910   :  { %13104 = vmatprep.subr.bf16.mxu1 %v19611_v22  ;;  %v19681_v22 = vld [vmem:[#allocation20 + $0x908] ss:$16 sps:$4 sm:$0xff]  }
 0x912   :  { %12761 = vmatpush1.bf16.msra.mxu0 %v19606_v9  ;;  %v19686_v9 = vld [vmem:[#allocation20 + $0x924] ss:$16 sps:$4 sm:$0xff]  }
 0x913   :  { %13105 = vmatpush1.bf16.msra.mxu1 %v19609_v13  ;;  %12762 = vmatprep.subr.bf16.mxu0 %v19614_v10  ;;  %v19689_v13 = vld [vmem:[#allocation20 + $0x92c] ss:$16 sps:$4 sm:$0xff]   ;;  %v19684_v10 = vld [vmem:[#allocation20 + $0x920] ss:$16 sps:$4 sm:$0xff]  }
 0x914   :  { %13106 = vmatprep.subr.bf16.mxu1 %v19617_v12  ;;  %v19687_v12 = vld [vmem:[#allocation20 + $0x928] ss:$16 sps:$4 sm:$0xff]  }
 0x916   :  { %12763 = vmatpush1.bf16.msra.mxu0 %v19612_v7  ;;  %v19692_v7 = vld [vmem:[#allocation20 + $0x944] ss:$16 sps:$4 sm:$0xff]  }
 0x917   :  { %13107 = vmatpush1.bf16.msra.mxu1 %v19615_v8  ;;  %12764 = vmatprep.subr.bf16.mxu0 %v19620_v24  ;;  %v19695_v8 = vld [vmem:[#allocation20 + $0x94c] ss:$16 sps:$4 sm:$0xff]   ;;  %v19690_v24 = vld [vmem:[#allocation20 + $0x940] ss:$16 sps:$4 sm:$0xff]  }
 0x918   :  { %13108 = vmatprep.subr.bf16.mxu1 %v19623_v25  ;;  %v19693_v25 = vld [vmem:[#allocation20 + $0x948] ss:$16 sps:$4 sm:$0xff]  }
 0x91a   :  { %12765 = vmatpush1.bf16.msra.mxu0 %v19618_v35  ;;  %v19698_v35 = vld [vmem:[#allocation20 + $0x964] ss:$16 sps:$4 sm:$0xff]  }
 0x91b   :  { %13109 = vmatpush1.bf16.msra.mxu1 %v19621_v27  ;;  %12766 = vmatprep.subr.bf16.mxu0 %v19626_v30  ;;  %v19701_v27 = vld [vmem:[#allocation20 + $0x96c] ss:$16 sps:$4 sm:$0xff]   ;;  %v19696_v30 = vld [vmem:[#allocation20 + $0x960] ss:$16 sps:$4 sm:$0xff]  }
 0x91c   :  { %13110 = vmatprep.subr.bf16.mxu1 %v19629_v61  ;;  %v19699_v61 = vld [vmem:[#allocation20 + $0x968] ss:$16 sps:$4 sm:$0xff]  }
 0x91e   :  { %12767 = vmatpush1.bf16.msra.mxu0 %v19624_v29  ;;  %v19704_v29 = vld [vmem:[#allocation20 + $0x984] ss:$16 sps:$4 sm:$0xff]  }
 0x91f   :  { %13111 = vmatpush1.bf16.msra.mxu1 %v19627_v32  ;;  %12779 = vmatprep.subr.bf16.mxu0 %v19632_v36  ;;  %v19707_v32 = vld [vmem:[#allocation20 + $0x98c] ss:$16 sps:$4 sm:$0xff]   ;;  %v19702_v36 = vld [vmem:[#allocation20 + $0x980] ss:$16 sps:$4 sm:$0xff]  }
 0x920   :  { %13123 = vmatprep.subr.bf16.mxu1 %v19635_v23  ;;  %v19705_v23 = vld [vmem:[#allocation20 + $0x988] ss:$16 sps:$4 sm:$0xff]  }
 0x921   :  { %12769 = vmatmul.mubr.bf16.vlgmr.msra.gmra.mrb[56].mxu0 %v21534_v40 }
 0x922   :  { %13113 = vmatmul.mubr.bf16.vlgmr.msra.gmra.mrb[60].mxu1 %v21534_v40  ;;  %12780 = vmatpush1.bf16.msra.mxu0 %v19630_v63  ;;  %v19653_v40 = vld [vmem:[#allocation20 + $0x86c] ss:$16 sps:$4 sm:$0xff]   ;;  %v19710_v63 = vld [vmem:[#allocation20 + $0x9a4] ss:$16 sps:$4 sm:$0xff]  }
 0x923   :  { %12811 = vmatprep.mubr.bf16.mxu0 %v21554_v17  ;;  %13124 = vmatpush1.bf16.msra.mxu1 %v19633_v62  ;;  %v19713_v62 = vld [vmem:[#allocation20 + $0x9ac] ss:$16 sps:$4 sm:$0xff]  }
 0x924   :  { %13155 = vmatprep.mubr.bf16.mxu1 %v21554_v17  ;;  %12781 = vmatprep.subr.bf16.mxu0 %v19638_v38  ;;  %v19654_v17 = vld [vmem:[#allocation20 + $0x880] ss:$16 sps:$4 sm:$0xff]  }
 0x925   :  { %13125 = vmatprep.subr.bf16.mxu1 %v19641_v41  ;;  %v19708_v38 = vld [vmem:[#allocation20 + $0x9a0] ss:$16 sps:$4 sm:$0xff]   ;;  %v19711_v41 = vld [vmem:[#allocation20 + $0x9a8] ss:$16 sps:$4 sm:$0xff]  }
 0x926   :  { %12782 = vmatpush1.bf16.msra.mxu0 %v19636_v28  ;;  %v19716_v28 = vld [vmem:[#allocation20 + $0x9c4] ss:$16 sps:$4 sm:$0xff]  }
 0x927   :  { %13126 = vmatpush1.bf16.msra.mxu1 %v19639_v0  ;;  %12783 = vmatprep.subr.bf16.mxu0 %v19644_v42  ;;  %v19719_v0 = vld [vmem:[#allocation20 + $0x9cc] ss:$16 sps:$4 sm:$0xff]   ;;  %v19714_v42 = vld [vmem:[#allocation20 + $0x9c0] ss:$16 sps:$4 sm:$0xff]  }
 0x928   :  { %13127 = vmatprep.subr.bf16.mxu1 %v19647_v21  ;;  %v19717_v21 = vld [vmem:[#allocation20 + $0x9c8] ss:$16 sps:$4 sm:$0xff]  }
 0x92a   :  { %12784 = vmatpush1.bf16.msra.mxu0 %v19642_v43  ;;  %v19722_v43 = vld [vmem:[#allocation20 + $0x9e4] ss:$16 sps:$4 sm:$0xff]  }
 0x92b   :  { %13128 = vmatpush1.bf16.msra.mxu1 %v19645_v44  ;;  %12785 = vmatprep.subr.bf16.mxu0 %v19650_v45  ;;  %v19725_v44 = vld [vmem:[#allocation20 + $0x9ec] ss:$16 sps:$4 sm:$0xff]   ;;  %v19720_v45 = vld [vmem:[#allocation20 + $0x9e0] ss:$16 sps:$4 sm:$0xff]  }
 0x92c   :  { %13129 = vmatprep.subr.bf16.mxu1 %v19653_v40  ;;  %v19723_v40 = vld [vmem:[#allocation20 + $0x9e8] ss:$16 sps:$4 sm:$0xff]  }
 0x92e   :  { %12786 = vmatpush1.bf16.msra.mxu0 %v19648_v46  ;;  %v19728_v46 = vld [vmem:[#allocation20 + $0xa04] ss:$16 sps:$4 sm:$0xff]  }
 0x92f   :  { %13130 = vmatpush1.bf16.msra.mxu1 %v19651_v47  ;;  %12787 = vmatprep.subr.bf16.mxu0 %v19656_v48  ;;  %v19731_v47 = vld [vmem:[#allocation20 + $0xa0c] ss:$16 sps:$4 sm:$0xff]   ;;  %v19726_v48 = vld [vmem:[#allocation20 + $0xa00] ss:$16 sps:$4 sm:$0xff]  }
 0x930   :  { %13131 = vmatprep.subr.bf16.mxu1 %v19659_v49  ;;  %v19729_v49 = vld [vmem:[#allocation20 + $0xa08] ss:$16 sps:$4 sm:$0xff]  }
 0x932   :  { %12788 = vmatpush1.bf16.msra.mxu0 %v19654_v17  ;;  %v19734_v17 = vld [vmem:[#allocation20 + $0xa24] ss:$16 sps:$4 sm:$0xff]  }
 0x933   :  { %13132 = vmatpush1.bf16.msra.mxu1 %v19657_v50  ;;  %12789 = vmatprep.subr.bf16.mxu0 %v19662_v51  ;;  %v19737_v50 = vld [vmem:[#allocation20 + $0xa2c] ss:$16 sps:$4 sm:$0xff]   ;;  %v19732_v51 = vld [vmem:[#allocation20 + $0xa20] ss:$16 sps:$4 sm:$0xff]  }
 0x934   :  { %13133 = vmatprep.subr.bf16.mxu1 %v19665_v57  ;;  %v19735_v57 = vld [vmem:[#allocation20 + $0xa28] ss:$16 sps:$4 sm:$0xff]  }
 0x936   :  { %12790 = vmatpush1.bf16.msra.mxu0 %v19660_v58  ;;  %v19740_v58 = vld [vmem:[#allocation20 + $0xa44] ss:$16 sps:$4 sm:$0xff]  }
 0x937   :  { %13134 = vmatpush1.bf16.msra.mxu1 %v19663_v59  ;;  %12791 = vmatprep.subr.bf16.mxu0 %v19668_v54  ;;  %v19743_v59 = vld [vmem:[#allocation20 + $0xa4c] ss:$16 sps:$4 sm:$0xff]   ;;  %v19738_v54 = vld [vmem:[#allocation20 + $0xa40] ss:$16 sps:$4 sm:$0xff]  }
 0x938   :  { %13135 = vmatprep.subr.bf16.mxu1 %v19671_v26  ;;  %v19741_v26 = vld [vmem:[#allocation20 + $0xa48] ss:$16 sps:$4 sm:$0xff]  }
 0x93a   :  { %12792 = vmatpush1.bf16.msra.mxu0 %v19666_v39  ;;  %v19746_v39 = vld [vmem:[#allocation20 + $0xa64] ss:$16 sps:$4 sm:$0xff]  }
 0x93b   :  { %13136 = vmatpush1.bf16.msra.mxu1 %v19669_v60  ;;  %12793 = vmatprep.subr.bf16.mxu0 %v19674_v1  ;;  %v19744_v60 = vld [vmem:[#allocation20 + $0xa60] ss:$16 sps:$4 sm:$0xff]   ;;  %v19747_v1 = vld [vmem:[#allocation20 + $0xa68] ss:$16 sps:$4 sm:$0xff]  }
 0x93c   :  { %13137 = vmatprep.subr.bf16.mxu1 %v19677_v2  ;;  %v19752_v2 = vld [vmem:[#allocation20 + $0xa84] ss:$16 sps:$4 sm:$0xff]  }
 0x93e   :  { %12794 = vmatpush1.bf16.msra.mxu0 %v19672_v31  ;;  %v19755_v31 = vld [vmem:[#allocation20 + $0xa8c] ss:$16 sps:$4 sm:$0xff]  }
 0x93f   :  { %13138 = vmatpush1.bf16.msra.mxu1 %v19675_v4  ;;  %12795 = vmatprep.subr.bf16.mxu0 %v19680_v3  ;;  %v19753_v4 = vld [vmem:[#allocation20 + $0xa88] ss:$16 sps:$4 sm:$0xff]   ;;  %v19758_v3 = vld [vmem:[#allocation20 + $0xaa4] ss:$16 sps:$4 sm:$0xff]  }
 0x940   :  { %13139 = vmatprep.subr.bf16.mxu1 %v19683_v52  ;;  %v19761_v52 = vld [vmem:[#allocation20 + $0xaac] ss:$16 sps:$4 sm:$0xff]  }
 0x942   :  { %12796 = vmatpush1.bf16.msra.mxu0 %v19678_v5  ;;  %v19756_v5 = vld [vmem:[#allocation20 + $0xaa0] ss:$16 sps:$4 sm:$0xff]  }
 0x943   :  { %13140 = vmatpush1.bf16.msra.mxu1 %v19681_v22  ;;  %12797 = vmatprep.subr.bf16.mxu0 %v19686_v9  ;;  %v19759_v22 = vld [vmem:[#allocation20 + $0xaa8] ss:$16 sps:$4 sm:$0xff]   ;;  %v19764_v9 = vld [vmem:[#allocation20 + $0xac4] ss:$16 sps:$4 sm:$0xff]  }
 0x944   :  { %13141 = vmatprep.subr.bf16.mxu1 %v19689_v13  ;;  %v19767_v13 = vld [vmem:[#allocation20 + $0xacc] ss:$16 sps:$4 sm:$0xff]  }
 0x946   :  { %12798 = vmatpush1.bf16.msra.mxu0 %v19684_v10  ;;  %v19762_v10 = vld [vmem:[#allocation20 + $0xac0] ss:$16 sps:$4 sm:$0xff]  }
 0x947   :  { %13142 = vmatpush1.bf16.msra.mxu1 %v19687_v12  ;;  %12799 = vmatprep.subr.bf16.mxu0 %v19692_v7  ;;  %v19765_v12 = vld [vmem:[#allocation20 + $0xac8] ss:$16 sps:$4 sm:$0xff]   ;;  %v19770_v7 = vld [vmem:[#allocation20 + $0xae4] ss:$16 sps:$4 sm:$0xff]  }
 0x948   :  { %13143 = vmatprep.subr.bf16.mxu1 %v19695_v8  ;;  %v19773_v8 = vld [vmem:[#allocation20 + $0xaec] ss:$16 sps:$4 sm:$0xff]  }
 0x94a   :  { %12800 = vmatpush1.bf16.msra.mxu0 %v19690_v24  ;;  %v19768_v24 = vld [vmem:[#allocation20 + $0xae0] ss:$16 sps:$4 sm:$0xff]  }
 0x94b   :  { %13144 = vmatpush1.bf16.msra.mxu1 %v19693_v25  ;;  %12801 = vmatprep.subr.bf16.mxu0 %v19698_v35  ;;  %v19771_v25 = vld [vmem:[#allocation20 + $0xae8] ss:$16 sps:$4 sm:$0xff]   ;;  %v19776_v35 = vld [vmem:[#allocation20 + $0xb04] ss:$16 sps:$4 sm:$0xff]  }
 0x94c   :  { %13145 = vmatprep.subr.bf16.mxu1 %v19701_v27  ;;  %v19779_v27 = vld [vmem:[#allocation20 + $0xb0c] ss:$16 sps:$4 sm:$0xff]  }
 0x94e   :  { %12802 = vmatpush1.bf16.msra.mxu0 %v19696_v30  ;;  %v19774_v30 = vld [vmem:[#allocation20 + $0xb00] ss:$16 sps:$4 sm:$0xff]  }
 0x94f   :  { %13146 = vmatpush1.bf16.msra.mxu1 %v19699_v61  ;;  %12803 = vmatprep.subr.bf16.mxu0 %v19704_v29  ;;  %v19777_v61 = vld [vmem:[#allocation20 + $0xb08] ss:$16 sps:$4 sm:$0xff]   ;;  %v19782_v29 = vld [vmem:[#allocation20 + $0xb24] ss:$16 sps:$4 sm:$0xff]  }
 0x950   :  { %13147 = vmatprep.subr.bf16.mxu1 %v19707_v32  ;;  %v19785_v32 = vld [vmem:[#allocation20 + $0xb2c] ss:$16 sps:$4 sm:$0xff]  }
 0x952   :  { %12804 = vmatpush1.bf16.msra.mxu0 %v19702_v36  ;;  %v19780_v36 = vld [vmem:[#allocation20 + $0xb20] ss:$16 sps:$4 sm:$0xff]  }
 0x953   :  { %13148 = vmatpush1.bf16.msra.mxu1 %v19705_v23  ;;  %12805 = vmatprep.subr.bf16.mxu0 %v19710_v63  ;;  %v19783_v23 = vld [vmem:[#allocation20 + $0xb28] ss:$16 sps:$4 sm:$0xff]   ;;  %v19788_v63 = vld [vmem:[#allocation20 + $0xb44] ss:$16 sps:$4 sm:$0xff]  }
 0x954   :  { %13149 = vmatprep.subr.bf16.mxu1 %v19713_v62  ;;  %v19791_v62 = vld [vmem:[#allocation20 + $0xb4c] ss:$16 sps:$4 sm:$0xff]  }
 0x956   :  { %12806 = vmatpush1.bf16.msra.mxu0 %v19708_v38  ;;  %v19786_v38 = vld [vmem:[#allocation20 + $0xb40] ss:$16 sps:$4 sm:$0xff]  }
 0x957   :  { %13150 = vmatpush1.bf16.msra.mxu1 %v19711_v41  ;;  %12807 = vmatprep.subr.bf16.mxu0 %v19716_v28  ;;  %v19789_v41 = vld [vmem:[#allocation20 + $0xb48] ss:$16 sps:$4 sm:$0xff]   ;;  %v19794_v28 = vld [vmem:[#allocation20 + $0xb64] ss:$16 sps:$4 sm:$0xff]  }
 0x958   :  { %13151 = vmatprep.subr.bf16.mxu1 %v19719_v0  ;;  %v19797_v0 = vld [vmem:[#allocation20 + $0xb6c] ss:$16 sps:$4 sm:$0xff]  }
 0x95a   :  { %12808 = vmatpush1.bf16.msra.mxu0 %v19714_v42  ;;  %v19792_v42 = vld [vmem:[#allocation20 + $0xb60] ss:$16 sps:$4 sm:$0xff]  }
 0x95b   :  { %13152 = vmatpush1.bf16.msra.mxu1 %v19717_v21  ;;  %12809 = vmatprep.subr.bf16.mxu0 %v19722_v43  ;;  %v19795_v21 = vld [vmem:[#allocation20 + $0xb68] ss:$16 sps:$4 sm:$0xff]   ;;  %v19800_v43 = vld [vmem:[#allocation20 + $0xb84] ss:$16 sps:$4 sm:$0xff]  }
 0x95c   :  { %13153 = vmatprep.subr.bf16.mxu1 %v19725_v44  ;;  %v19803_v44 = vld [vmem:[#allocation20 + $0xb8c] ss:$16 sps:$4 sm:$0xff]  }
 0x95e   :  { %12810 = vmatpush1.bf16.msra.mxu0 %v19720_v45  ;;  %v19798_v45 = vld [vmem:[#allocation20 + $0xb80] ss:$16 sps:$4 sm:$0xff]  }
 0x95f   :  { %13154 = vmatpush1.bf16.msra.mxu1 %v19723_v40  ;;  %12822 = vmatprep.subr.bf16.mxu0 %v19728_v46  ;;  %v19801_v40 = vld [vmem:[#allocation20 + $0xb88] ss:$16 sps:$4 sm:$0xff]   ;;  %v19806_v46 = vld [vmem:[#allocation20 + $0xba4] ss:$16 sps:$4 sm:$0xff]  }
 0x960   :  { %13166 = vmatprep.subr.bf16.mxu1 %v19731_v47  ;;  %v19809_v47 = vld [vmem:[#allocation20 + $0xbac] ss:$16 sps:$4 sm:$0xff]  }
 0x961   :  { %12812 = vmatmul.mubr.bf16.vlgmr.msra.gmra.mrb[56].mxu0 %v21550_v15 }
 0x962   :  { %13156 = vmatmul.mubr.bf16.vlgmr.msra.gmra.mrb[60].mxu1 %v21550_v15  ;;  %12823 = vmatpush1.bf16.msra.mxu0 %v19726_v48  ;;  %v19749_v15 = vld [vmem:[#allocation20 + $0xa6c] ss:$16 sps:$4 sm:$0xff]   ;;  %v19804_v48 = vld [vmem:[#allocation20 + $0xba0] ss:$16 sps:$4 sm:$0xff]  }
 0x963   :  { %12854 = vmatprep.mubr.bf16.mxu0 %v21556_v20  ;;  %13167 = vmatpush1.bf16.msra.mxu1 %v19729_v49  ;;  %v19807_v49 = vld [vmem:[#allocation20 + $0xba8] ss:$16 sps:$4 sm:$0xff]  }
 0x964   :  { %13198 = vmatprep.mubr.bf16.mxu1 %v21556_v20  ;;  %12824 = vmatprep.subr.bf16.mxu0 %v19734_v17  ;;  %v19750_v20 = vld [vmem:[#allocation20 + $0xa80] ss:$16 sps:$4 sm:$0xff]   ;;  %v19812_v17 = vld [vmem:[#allocation20 + $0xbc4] ss:$16 sps:$4 sm:$0xff]  }
 0x965   :  { %13168 = vmatprep.subr.bf16.mxu1 %v19737_v50  ;;  %v19815_v50 = vld [vmem:[#allocation20 + $0xbcc] ss:$16 sps:$4 sm:$0xff]  }
 0x966   :  { %12825 = vmatpush1.bf16.msra.mxu0 %v19732_v51  ;;  %v19810_v51 = vld [vmem:[#allocation20 + $0xbc0] ss:$16 sps:$4 sm:$0xff]  }
 0x967   :  { %13169 = vmatpush1.bf16.msra.mxu1 %v19735_v57  ;;  %12826 = vmatprep.subr.bf16.mxu0 %v19740_v58  ;;  %v19813_v57 = vld [vmem:[#allocation20 + $0xbc8] ss:$16 sps:$4 sm:$0xff]   ;;  %v19818_v58 = vld [vmem:[#allocation20 + $0xbe4] ss:$16 sps:$4 sm:$0xff]  }
 0x968   :  { %13170 = vmatprep.subr.bf16.mxu1 %v19743_v59  ;;  %v19821_v59 = vld [vmem:[#allocation20 + $0xbec] ss:$16 sps:$4 sm:$0xff]  }
 0x96a   :  { %12827 = vmatpush1.bf16.msra.mxu0 %v19738_v54  ;;  %v19816_v54 = vld [vmem:[#allocation20 + $0xbe0] ss:$16 sps:$4 sm:$0xff]  }
 0x96b   :  { %13171 = vmatpush1.bf16.msra.mxu1 %v19741_v26  ;;  %12828 = vmatprep.subr.bf16.mxu0 %v19746_v39  ;;  %v19819_v26 = vld [vmem:[#allocation20 + $0xbe8] ss:$16 sps:$4 sm:$0xff]   ;;  %v19824_v39 = vld [vmem:[#allocation20 + $0xc04] ss:$16 sps:$4 sm:$0xff]  }
 0x96c   :  { %13172 = vmatprep.subr.bf16.mxu1 %v19749_v15  ;;  %v19827_v15 = vld [vmem:[#allocation20 + $0xc0c] ss:$16 sps:$4 sm:$0xff]  }
 0x96e   :  { %12829 = vmatpush1.bf16.msra.mxu0 %v19744_v60  ;;  %v19822_v60 = vld [vmem:[#allocation20 + $0xc00] ss:$16 sps:$4 sm:$0xff]  }
 0x96f   :  { %13173 = vmatpush1.bf16.msra.mxu1 %v19747_v1  ;;  %12830 = vmatprep.subr.bf16.mxu0 %v19752_v2  ;;  %v19825_v1 = vld [vmem:[#allocation20 + $0xc08] ss:$16 sps:$4 sm:$0xff]   ;;  %v19830_v2 = vld [vmem:[#allocation20 + $0xc24] ss:$16 sps:$4 sm:$0xff]  }
 0x970   :  { %13174 = vmatprep.subr.bf16.mxu1 %v19755_v31  ;;  %v19833_v31 = vld [vmem:[#allocation20 + $0xc2c] ss:$16 sps:$4 sm:$0xff]  }
 0x972   :  { %12831 = vmatpush1.bf16.msra.mxu0 %v19750_v20  ;;  %v19828_v20 = vld [vmem:[#allocation20 + $0xc20] ss:$16 sps:$4 sm:$0xff]  }
 0x973   :  { %13175 = vmatpush1.bf16.msra.mxu1 %v19753_v4  ;;  %12832 = vmatprep.subr.bf16.mxu0 %v19758_v3  ;;  %v19831_v4 = vld [vmem:[#allocation20 + $0xc28] ss:$16 sps:$4 sm:$0xff]   ;;  %v19836_v3 = vld [vmem:[#allocation20 + $0xc44] ss:$16 sps:$4 sm:$0xff]  }
 0x974   :  { %13176 = vmatprep.subr.bf16.mxu1 %v19761_v52  ;;  %v19839_v52 = vld [vmem:[#allocation20 + $0xc4c] ss:$16 sps:$4 sm:$0xff]  }
 0x976   :  { %12833 = vmatpush1.bf16.msra.mxu0 %v19756_v5  ;;  %v19834_v5 = vld [vmem:[#allocation20 + $0xc40] ss:$16 sps:$4 sm:$0xff]  }
 0x977   :  { %13177 = vmatpush1.bf16.msra.mxu1 %v19759_v22  ;;  %12834 = vmatprep.subr.bf16.mxu0 %v19764_v9  ;;  %v19837_v22 = vld [vmem:[#allocation20 + $0xc48] ss:$16 sps:$4 sm:$0xff]   ;;  %v19842_v9 = vld [vmem:[#allocation20 + $0xc64] ss:$16 sps:$4 sm:$0xff]  }
 0x978   :  { %13178 = vmatprep.subr.bf16.mxu1 %v19767_v13  ;;  %v19840_v13 = vld [vmem:[#allocation20 + $0xc60] ss:$16 sps:$4 sm:$0xff]  }
 0x97a   :  { %12835 = vmatpush1.bf16.msra.mxu0 %v19762_v10  ;;  %v19843_v10 = vld [vmem:[#allocation20 + $0xc68] ss:$16 sps:$4 sm:$0xff]  }
 0x97b   :  { %13179 = vmatpush1.bf16.msra.mxu1 %v19765_v12  ;;  %12836 = vmatprep.subr.bf16.mxu0 %v19770_v7  ;;  %v19848_v12 = vld [vmem:[#allocation20 + $0xc84] ss:$16 sps:$4 sm:$0xff]   ;;  %v19851_v7 = vld [vmem:[#allocation20 + $0xc8c] ss:$16 sps:$4 sm:$0xff]  }
 0x97c   :  { %13180 = vmatprep.subr.bf16.mxu1 %v19773_v8  ;;  %v19849_v8 = vld [vmem:[#allocation20 + $0xc88] ss:$16 sps:$4 sm:$0xff]  }
 0x97e   :  { %12837 = vmatpush1.bf16.msra.mxu0 %v19768_v24  ;;  %v19854_v24 = vld [vmem:[#allocation20 + $0xca4] ss:$16 sps:$4 sm:$0xff]  }
 0x97f   :  { %13181 = vmatpush1.bf16.msra.mxu1 %v19771_v25  ;;  %12838 = vmatprep.subr.bf16.mxu0 %v19776_v35  ;;  %v19857_v25 = vld [vmem:[#allocation20 + $0xcac] ss:$16 sps:$4 sm:$0xff]   ;;  %v19852_v35 = vld [vmem:[#allocation20 + $0xca0] ss:$16 sps:$4 sm:$0xff]  }
 0x980   :  { %13182 = vmatprep.subr.bf16.mxu1 %v19779_v27  ;;  %v19855_v27 = vld [vmem:[#allocation20 + $0xca8] ss:$16 sps:$4 sm:$0xff]  }
 0x982   :  { %12839 = vmatpush1.bf16.msra.mxu0 %v19774_v30  ;;  %v19860_v30 = vld [vmem:[#allocation20 + $0xcc4] ss:$16 sps:$4 sm:$0xff]  }
 0x983   :  { %13183 = vmatpush1.bf16.msra.mxu1 %v19777_v61  ;;  %12840 = vmatprep.subr.bf16.mxu0 %v19782_v29  ;;  %v19863_v61 = vld [vmem:[#allocation20 + $0xccc] ss:$16 sps:$4 sm:$0xff]   ;;  %v19858_v29 = vld [vmem:[#allocation20 + $0xcc0] ss:$16 sps:$4 sm:$0xff]  }
 0x984   :  { %13184 = vmatprep.subr.bf16.mxu1 %v19785_v32  ;;  %v19861_v32 = vld [vmem:[#allocation20 + $0xcc8] ss:$16 sps:$4 sm:$0xff]  }
 0x986   :  { %12841 = vmatpush1.bf16.msra.mxu0 %v19780_v36  ;;  %v19866_v36 = vld [vmem:[#allocation20 + $0xce4] ss:$16 sps:$4 sm:$0xff]  }
 0x987   :  { %13185 = vmatpush1.bf16.msra.mxu1 %v19783_v23  ;;  %12842 = vmatprep.subr.bf16.mxu0 %v19788_v63  ;;  %v19869_v23 = vld [vmem:[#allocation20 + $0xcec] ss:$16 sps:$4 sm:$0xff]   ;;  %v19864_v63 = vld [vmem:[#allocation20 + $0xce0] ss:$16 sps:$4 sm:$0xff]  }
 0x988   :  { %13186 = vmatprep.subr.bf16.mxu1 %v19791_v62  ;;  %v19867_v62 = vld [vmem:[#allocation20 + $0xce8] ss:$16 sps:$4 sm:$0xff]  }
 0x98a   :  { %12843 = vmatpush1.bf16.msra.mxu0 %v19786_v38  ;;  %v19872_v38 = vld [vmem:[#allocation20 + $0xd04] ss:$16 sps:$4 sm:$0xff]  }
 0x98b   :  { %13187 = vmatpush1.bf16.msra.mxu1 %v19789_v41  ;;  %12844 = vmatprep.subr.bf16.mxu0 %v19794_v28  ;;  %v19875_v41 = vld [vmem:[#allocation20 + $0xd0c] ss:$16 sps:$4 sm:$0xff]   ;;  %v19870_v28 = vld [vmem:[#allocation20 + $0xd00] ss:$16 sps:$4 sm:$0xff]  }
 0x98c   :  { %13188 = vmatprep.subr.bf16.mxu1 %v19797_v0  ;;  %v19873_v0 = vld [vmem:[#allocation20 + $0xd08] ss:$16 sps:$4 sm:$0xff]  }
 0x98e   :  { %12845 = vmatpush1.bf16.msra.mxu0 %v19792_v42  ;;  %v19878_v42 = vld [vmem:[#allocation20 + $0xd24] ss:$16 sps:$4 sm:$0xff]  }
 0x98f   :  { %13189 = vmatpush1.bf16.msra.mxu1 %v19795_v21  ;;  %12846 = vmatprep.subr.bf16.mxu0 %v19800_v43  ;;  %v19881_v21 = vld [vmem:[#allocation20 + $0xd2c] ss:$16 sps:$4 sm:$0xff]   ;;  %v19876_v43 = vld [vmem:[#allocation20 + $0xd20] ss:$16 sps:$4 sm:$0xff]  }
 0x990   :  { %13190 = vmatprep.subr.bf16.mxu1 %v19803_v44  ;;  %v19879_v44 = vld [vmem:[#allocation20 + $0xd28] ss:$16 sps:$4 sm:$0xff]  }
 0x992   :  { %12847 = vmatpush1.bf16.msra.mxu0 %v19798_v45  ;;  %v19884_v45 = vld [vmem:[#allocation20 + $0xd44] ss:$16 sps:$4 sm:$0xff]  }
 0x993   :  { %13191 = vmatpush1.bf16.msra.mxu1 %v19801_v40  ;;  %12848 = vmatprep.subr.bf16.mxu0 %v19806_v46  ;;  %v19887_v40 = vld [vmem:[#allocation20 + $0xd4c] ss:$16 sps:$4 sm:$0xff]   ;;  %v19882_v46 = vld [vmem:[#allocation20 + $0xd40] ss:$16 sps:$4 sm:$0xff]  }
 0x994   :  { %13192 = vmatprep.subr.bf16.mxu1 %v19809_v47  ;;  %v19885_v47 = vld [vmem:[#allocation20 + $0xd48] ss:$16 sps:$4 sm:$0xff]  }
 0x996   :  { %12849 = vmatpush1.bf16.msra.mxu0 %v19804_v48  ;;  %v19890_v48 = vld [vmem:[#allocation20 + $0xd64] ss:$16 sps:$4 sm:$0xff]  }
 0x997   :  { %13193 = vmatpush1.bf16.msra.mxu1 %v19807_v49  ;;  %12850 = vmatprep.subr.bf16.mxu0 %v19812_v17  ;;  %v19893_v49 = vld [vmem:[#allocation20 + $0xd6c] ss:$16 sps:$4 sm:$0xff]   ;;  %v19888_v17 = vld [vmem:[#allocation20 + $0xd60] ss:$16 sps:$4 sm:$0xff]  }
 0x998   :  { %13194 = vmatprep.subr.bf16.mxu1 %v19815_v50  ;;  %v19891_v50 = vld [vmem:[#allocation20 + $0xd68] ss:$16 sps:$4 sm:$0xff]  }
 0x99a   :  { %12851 = vmatpush1.bf16.msra.mxu0 %v19810_v51  ;;  %v19896_v51 = vld [vmem:[#allocation20 + $0xd84] ss:$16 sps:$4 sm:$0xff]  }
 0x99b   :  { %13195 = vmatpush1.bf16.msra.mxu1 %v19813_v57  ;;  %12852 = vmatprep.subr.bf16.mxu0 %v19818_v58  ;;  %v19899_v57 = vld [vmem:[#allocation20 + $0xd8c] ss:$16 sps:$4 sm:$0xff]   ;;  %v19894_v58 = vld [vmem:[#allocation20 + $0xd80] ss:$16 sps:$4 sm:$0xff]  }
 0x99c   :  { %13196 = vmatprep.subr.bf16.mxu1 %v19821_v59  ;;  %v19897_v59 = vld [vmem:[#allocation20 + $0xd88] ss:$16 sps:$4 sm:$0xff]  }
 0x99e   :  { %12853 = vmatpush1.bf16.msra.mxu0 %v19816_v54  ;;  %v19902_v54 = vld [vmem:[#allocation20 + $0xda4] ss:$16 sps:$4 sm:$0xff]  }
 0x99f   :  { %13197 = vmatpush1.bf16.msra.mxu1 %v19819_v26  ;;  %12865 = vmatprep.subr.bf16.mxu0 %v19824_v39  ;;  %v19905_v26 = vld [vmem:[#allocation20 + $0xdac] ss:$16 sps:$4 sm:$0xff]   ;;  %v19900_v39 = vld [vmem:[#allocation20 + $0xda0] ss:$16 sps:$4 sm:$0xff]  }
 0x9a0   :  { %13209 = vmatprep.subr.bf16.mxu1 %v19827_v15  ;;  %v19903_v15 = vld [vmem:[#allocation20 + $0xda8] ss:$16 sps:$4 sm:$0xff]  }
 0x9a1   :  { %12855 = vmatmul.mubr.bf16.vlgmr.msra.gmra.mrb[56].mxu0 %v21552_v16 }
 0x9a2   :  { %13199 = vmatmul.mubr.bf16.vlgmr.msra.gmra.mrb[60].mxu1 %v21552_v16  ;;  %12866 = vmatpush1.bf16.msra.mxu0 %v19822_v60  ;;  %v19845_v16 = vld [vmem:[#allocation20 + $0xc6c] ss:$16 sps:$4 sm:$0xff]   ;;  %v19908_v60 = vld [vmem:[#allocation20 + $0xdc4] ss:$16 sps:$4 sm:$0xff]  }
 0x9a3   :  { %12897 = vmatprep.mubr.bf16.mxu0 %v21574_v37  ;;  %13210 = vmatpush1.bf16.msra.mxu1 %v19825_v1  ;;  %v19911_v1 = vld [vmem:[#allocation20 + $0xdcc] ss:$16 sps:$4 sm:$0xff]  }
 0x9a4   :  { %13241 = vmatprep.mubr.bf16.mxu1 %v21574_v37  ;;  %12867 = vmatprep.subr.bf16.mxu0 %v19830_v2  ;;  %v19846_v37 = vld [vmem:[#allocation20 + $0xc80] ss:$16 sps:$4 sm:$0xff]  }
 0x9a5   :  { %13211 = vmatprep.subr.bf16.mxu1 %v19833_v31  ;;  %v19906_v2 = vld [vmem:[#allocation20 + $0xdc0] ss:$16 sps:$4 sm:$0xff]   ;;  %v19909_v31 = vld [vmem:[#allocation20 + $0xdc8] ss:$16 sps:$4 sm:$0xff]  }
 0x9a6   :  { %12868 = vmatpush1.bf16.msra.mxu0 %v19828_v20  ;;  %v19914_v20 = vld [vmem:[#allocation20 + $0xde4] ss:$16 sps:$4 sm:$0xff]  }
 0x9a7   :  { %13212 = vmatpush1.bf16.msra.mxu1 %v19831_v4  ;;  %12869 = vmatprep.subr.bf16.mxu0 %v19836_v3  ;;  %v19917_v4 = vld [vmem:[#allocation20 + $0xdec] ss:$16 sps:$4 sm:$0xff]   ;;  %v19912_v3 = vld [vmem:[#allocation20 + $0xde0] ss:$16 sps:$4 sm:$0xff]  }
 0x9a8   :  { %13213 = vmatprep.subr.bf16.mxu1 %v19839_v52  ;;  %v19915_v52 = vld [vmem:[#allocation20 + $0xde8] ss:$16 sps:$4 sm:$0xff]  }
 0x9aa   :  { %12870 = vmatpush1.bf16.msra.mxu0 %v19834_v5  ;;  %v19920_v5 = vld [vmem:[#allocation20 + $0xe04] ss:$16 sps:$4 sm:$0xff]  }
 0x9ab   :  { %13214 = vmatpush1.bf16.msra.mxu1 %v19837_v22  ;;  %12871 = vmatprep.subr.bf16.mxu0 %v19842_v9  ;;  %v19923_v22 = vld [vmem:[#allocation20 + $0xe0c] ss:$16 sps:$4 sm:$0xff]   ;;  %v19918_v9 = vld [vmem:[#allocation20 + $0xe00] ss:$16 sps:$4 sm:$0xff]  }
 0x9ac   :  { %13215 = vmatprep.subr.bf16.mxu1 %v19845_v16  ;;  %v19921_v16 = vld [vmem:[#allocation20 + $0xe08] ss:$16 sps:$4 sm:$0xff]  }
 0x9ae   :  { %12872 = vmatpush1.bf16.msra.mxu0 %v19840_v13  ;;  %v19926_v13 = vld [vmem:[#allocation20 + $0xe24] ss:$16 sps:$4 sm:$0xff]  }
 0x9af   :  { %13216 = vmatpush1.bf16.msra.mxu1 %v19843_v10  ;;  %12873 = vmatprep.subr.bf16.mxu0 %v19848_v12  ;;  %v19929_v10 = vld [vmem:[#allocation20 + $0xe2c] ss:$16 sps:$4 sm:$0xff]   ;;  %v19924_v12 = vld [vmem:[#allocation20 + $0xe20] ss:$16 sps:$4 sm:$0xff]  }
 0x9b0   :  { %13217 = vmatprep.subr.bf16.mxu1 %v19851_v7  ;;  %v19927_v7 = vld [vmem:[#allocation20 + $0xe28] ss:$16 sps:$4 sm:$0xff]  }
 0x9b2   :  { %12874 = vmatpush1.bf16.msra.mxu0 %v19846_v37  ;;  %v19932_v37 = vld [vmem:[#allocation20 + $0xe44] ss:$16 sps:$4 sm:$0xff]  }
 0x9b3   :  { %13218 = vmatpush1.bf16.msra.mxu1 %v19849_v8  ;;  %12875 = vmatprep.subr.bf16.mxu0 %v19854_v24  ;;  %v19935_v8 = vld [vmem:[#allocation20 + $0xe4c] ss:$16 sps:$4 sm:$0xff]   ;;  %v19930_v24 = vld [vmem:[#allocation20 + $0xe40] ss:$16 sps:$4 sm:$0xff]  }
 0x9b4   :  { %13219 = vmatprep.subr.bf16.mxu1 %v19857_v25  ;;  %v19933_v25 = vld [vmem:[#allocation20 + $0xe48] ss:$16 sps:$4 sm:$0xff]  }
 0x9b6   :  { %12876 = vmatpush1.bf16.msra.mxu0 %v19852_v35  ;;  %v19938_v35 = vld [vmem:[#allocation20 + $0xe64] ss:$16 sps:$4 sm:$0xff]  }
 0x9b7   :  { %13220 = vmatpush1.bf16.msra.mxu1 %v19855_v27  ;;  %12877 = vmatprep.subr.bf16.mxu0 %v19860_v30  ;;  %v19936_v27 = vld [vmem:[#allocation20 + $0xe60] ss:$16 sps:$4 sm:$0xff]   ;;  %v19939_v30 = vld [vmem:[#allocation20 + $0xe68] ss:$16 sps:$4 sm:$0xff]  }
 0x9b8   :  { %13221 = vmatprep.subr.bf16.mxu1 %v19863_v61  ;;  %v19944_v61 = vld [vmem:[#allocation20 + $0xe84] ss:$16 sps:$4 sm:$0xff]  }
 0x9ba   :  { %12878 = vmatpush1.bf16.msra.mxu0 %v19858_v29  ;;  %v19947_v29 = vld [vmem:[#allocation20 + $0xe8c] ss:$16 sps:$4 sm:$0xff]  }
 0x9bb   :  { %13222 = vmatpush1.bf16.msra.mxu1 %v19861_v32  ;;  %12879 = vmatprep.subr.bf16.mxu0 %v19866_v36  ;;  %v19945_v32 = vld [vmem:[#allocation20 + $0xe88] ss:$16 sps:$4 sm:$0xff]   ;;  %v19950_v36 = vld [vmem:[#allocation20 + $0xea4] ss:$16 sps:$4 sm:$0xff]  }
 0x9bc   :  { %13223 = vmatprep.subr.bf16.mxu1 %v19869_v23  ;;  %v19953_v23 = vld [vmem:[#allocation20 + $0xeac] ss:$16 sps:$4 sm:$0xff]  }
 0x9be   :  { %12880 = vmatpush1.bf16.msra.mxu0 %v19864_v63  ;;  %v19948_v63 = vld [vmem:[#allocation20 + $0xea0] ss:$16 sps:$4 sm:$0xff]  }
 0x9bf   :  { %13224 = vmatpush1.bf16.msra.mxu1 %v19867_v62  ;;  %12881 = vmatprep.subr.bf16.mxu0 %v19872_v38  ;;  %v19951_v62 = vld [vmem:[#allocation20 + $0xea8] ss:$16 sps:$4 sm:$0xff]   ;;  %v19956_v38 = vld [vmem:[#allocation20 + $0xec4] ss:$16 sps:$4 sm:$0xff]  }
 0x9c0   :  { %13225 = vmatprep.subr.bf16.mxu1 %v19875_v41  ;;  %v19959_v41 = vld [vmem:[#allocation20 + $0xecc] ss:$16 sps:$4 sm:$0xff]  }
 0x9c2   :  { %12882 = vmatpush1.bf16.msra.mxu0 %v19870_v28  ;;  %v19954_v28 = vld [vmem:[#allocation20 + $0xec0] ss:$16 sps:$4 sm:$0xff]  }
 0x9c3   :  { %13226 = vmatpush1.bf16.msra.mxu1 %v19873_v0  ;;  %12883 = vmatprep.subr.bf16.mxu0 %v19878_v42  ;;  %v19957_v0 = vld [vmem:[#allocation20 + $0xec8] ss:$16 sps:$4 sm:$0xff]   ;;  %v19962_v42 = vld [vmem:[#allocation20 + $0xee4] ss:$16 sps:$4 sm:$0xff]  }
 0x9c4   :  { %13227 = vmatprep.subr.bf16.mxu1 %v19881_v21  ;;  %v19965_v21 = vld [vmem:[#allocation20 + $0xeec] ss:$16 sps:$4 sm:$0xff]  }
 0x9c6   :  { %12884 = vmatpush1.bf16.msra.mxu0 %v19876_v43  ;;  %v19960_v43 = vld [vmem:[#allocation20 + $0xee0] ss:$16 sps:$4 sm:$0xff]  }
 0x9c7   :  { %13228 = vmatpush1.bf16.msra.mxu1 %v19879_v44  ;;  %12885 = vmatprep.subr.bf16.mxu0 %v19884_v45  ;;  %v19963_v44 = vld [vmem:[#allocation20 + $0xee8] ss:$16 sps:$4 sm:$0xff]   ;;  %v19968_v45 = vld [vmem:[#allocation20 + $0xf04] ss:$16 sps:$4 sm:$0xff]  }
 0x9c8   :  { %13229 = vmatprep.subr.bf16.mxu1 %v19887_v40  ;;  %v19971_v40 = vld [vmem:[#allocation20 + $0xf0c] ss:$16 sps:$4 sm:$0xff]  }
 0x9ca   :  { %12886 = vmatpush1.bf16.msra.mxu0 %v19882_v46  ;;  %v19966_v46 = vld [vmem:[#allocation20 + $0xf00] ss:$16 sps:$4 sm:$0xff]  }
 0x9cb   :  { %13230 = vmatpush1.bf16.msra.mxu1 %v19885_v47  ;;  %12887 = vmatprep.subr.bf16.mxu0 %v19890_v48  ;;  %v19969_v47 = vld [vmem:[#allocation20 + $0xf08] ss:$16 sps:$4 sm:$0xff]   ;;  %v19974_v48 = vld [vmem:[#allocation20 + $0xf24] ss:$16 sps:$4 sm:$0xff]  }
 0x9cc   :  { %13231 = vmatprep.subr.bf16.mxu1 %v19893_v49  ;;  %v19977_v49 = vld [vmem:[#allocation20 + $0xf2c] ss:$16 sps:$4 sm:$0xff]  }
 0x9ce   :  { %12888 = vmatpush1.bf16.msra.mxu0 %v19888_v17  ;;  %v19972_v17 = vld [vmem:[#allocation20 + $0xf20] ss:$16 sps:$4 sm:$0xff]  }
 0x9cf   :  { %13232 = vmatpush1.bf16.msra.mxu1 %v19891_v50  ;;  %12889 = vmatprep.subr.bf16.mxu0 %v19896_v51  ;;  %v19975_v50 = vld [vmem:[#allocation20 + $0xf28] ss:$16 sps:$4 sm:$0xff]   ;;  %v19980_v51 = vld [vmem:[#allocation20 + $0xf44] ss:$16 sps:$4 sm:$0xff]  }
 0x9d0   :  { %13233 = vmatprep.subr.bf16.mxu1 %v19899_v57  ;;  %v19983_v57 = vld [vmem:[#allocation20 + $0xf4c] ss:$16 sps:$4 sm:$0xff]  }
 0x9d2   :  { %12890 = vmatpush1.bf16.msra.mxu0 %v19894_v58  ;;  %v19978_v58 = vld [vmem:[#allocation20 + $0xf40] ss:$16 sps:$4 sm:$0xff]  }
 0x9d3   :  { %13234 = vmatpush1.bf16.msra.mxu1 %v19897_v59  ;;  %12891 = vmatprep.subr.bf16.mxu0 %v19902_v54  ;;  %v19981_v59 = vld [vmem:[#allocation20 + $0xf48] ss:$16 sps:$4 sm:$0xff]   ;;  %v19986_v54 = vld [vmem:[#allocation20 + $0xf64] ss:$16 sps:$4 sm:$0xff]  }
 0x9d4   :  { %13235 = vmatprep.subr.bf16.mxu1 %v19905_v26  ;;  %v19989_v26 = vld [vmem:[#allocation20 + $0xf6c] ss:$16 sps:$4 sm:$0xff]  }
 0x9d6   :  { %12892 = vmatpush1.bf16.msra.mxu0 %v19900_v39  ;;  %v19984_v39 = vld [vmem:[#allocation20 + $0xf60] ss:$16 sps:$4 sm:$0xff]  }
 0x9d7   :  { %13236 = vmatpush1.bf16.msra.mxu1 %v19903_v15  ;;  %12893 = vmatprep.subr.bf16.mxu0 %v19908_v60  ;;  %v19987_v15 = vld [vmem:[#allocation20 + $0xf68] ss:$16 sps:$4 sm:$0xff]   ;;  %v19992_v60 = vld [vmem:[#allocation20 + $0xf84] ss:$16 sps:$4 sm:$0xff]  }
 0x9d8   :  { %13237 = vmatprep.subr.bf16.mxu1 %v19911_v1  ;;  %v19995_v1 = vld [vmem:[#allocation20 + $0xf8c] ss:$16 sps:$4 sm:$0xff]  }
 0x9da   :  { %12894 = vmatpush1.bf16.msra.mxu0 %v19906_v2  ;;  %v19990_v2 = vld [vmem:[#allocation20 + $0xf80] ss:$16 sps:$4 sm:$0xff]  }
 0x9db   :  { %13238 = vmatpush1.bf16.msra.mxu1 %v19909_v31  ;;  %12895 = vmatprep.subr.bf16.mxu0 %v19914_v20  ;;  %v19993_v31 = vld [vmem:[#allocation20 + $0xf88] ss:$16 sps:$4 sm:$0xff]   ;;  %v19998_v20 = vld [vmem:[#allocation20 + $0xfa4] ss:$16 sps:$4 sm:$0xff]  }
 0x9dc   :  { %13239 = vmatprep.subr.bf16.mxu1 %v19917_v4  ;;  %v20001_v4 = vld [vmem:[#allocation20 + $0xfac] ss:$16 sps:$4 sm:$0xff]  }
 0x9de   :  { %12896 = vmatpush1.bf16.msra.mxu0 %v19912_v3  ;;  %v19996_v3 = vld [vmem:[#allocation20 + $0xfa0] ss:$16 sps:$4 sm:$0xff]  }
 0x9df   :  { %13240 = vmatpush1.bf16.msra.mxu1 %v19915_v52  ;;  %12908 = vmatprep.subr.bf16.mxu0 %v19920_v5  ;;  %v19999_v52 = vld [vmem:[#allocation20 + $0xfa8] ss:$16 sps:$4 sm:$0xff]   ;;  %v20004_v5 = vld [vmem:[#allocation20 + $0xfc4] ss:$16 sps:$4 sm:$0xff]  }
 0x9e0   :  { %13252 = vmatprep.subr.bf16.mxu1 %v19923_v22  ;;  %v20007_v22 = vld [vmem:[#allocation20 + $0xfcc] ss:$16 sps:$4 sm:$0xff]  }
 0x9e1   :  { %12898 = vmatmul.mubr.bf16.vlgmr.msra.gmra.mrb[56].mxu0 %v21570_v33 }
 0x9e2   :  { %13242 = vmatmul.mubr.bf16.vlgmr.msra.gmra.mrb[60].mxu1 %v21570_v33  ;;  %12909 = vmatpush1.bf16.msra.mxu0 %v19918_v9  ;;  %v19941_v33 = vld [vmem:[#allocation20 + $0xe6c] ss:$16 sps:$4 sm:$0xff]   ;;  %v20002_v9 = vld [vmem:[#allocation20 + $0xfc0] ss:$16 sps:$4 sm:$0xff]  }
 0x9e3   :  { %12940 = vmatprep.mubr.bf16.mxu0 %v21576_v34  ;;  %13253 = vmatpush1.bf16.msra.mxu1 %v19921_v16  ;;  %v20005_v16 = vld [vmem:[#allocation20 + $0xfc8] ss:$16 sps:$4 sm:$0xff]  }
 0x9e4   :  { %13284 = vmatprep.mubr.bf16.mxu1 %v21576_v34  ;;  %12910 = vmatprep.subr.bf16.mxu0 %v19926_v13  ;;  %v19942_v34 = vld [vmem:[#allocation20 + $0xe80] ss:$16 sps:$4 sm:$0xff]   ;;  %v20010_v13 = vld [vmem:[#allocation20 + $0xfe4] ss:$16 sps:$4 sm:$0xff]  }
 0x9e5   :  { %13254 = vmatprep.subr.bf16.mxu1 %v19929_v10  ;;  %v20013_v10 = vld [vmem:[#allocation20 + $0xfec] ss:$16 sps:$4 sm:$0xff]  }
 0x9e6   :  { %12911 = vmatpush1.bf16.msra.mxu0 %v19924_v12  ;;  %v20008_v12 = vld [vmem:[#allocation20 + $0xfe0] ss:$16 sps:$4 sm:$0xff]  }
 0x9e7   :  { %13255 = vmatpush1.bf16.msra.mxu1 %v19927_v7  ;;  %12912 = vmatprep.subr.bf16.mxu0 %v19932_v37  ;;  %v20011_v7 = vld [vmem:[#allocation20 + $0xfe8] ss:$16 sps:$4 sm:$0xff]  }
 0x9e8   :  { %13256 = vmatprep.subr.bf16.mxu1 %v19935_v8  ;;  %v20016_v37 = vld [vmem:[#allocation23 + $0x4] ss:$16 sps:$4 sm:$0xff]   ;;  %v20019_v8 = vld [vmem:[#allocation23 + $0xc] ss:$16 sps:$4 sm:$0xff]  }
 0x9ea   :  { %12913 = vmatpush1.bf16.msra.mxu0 %v19930_v24  ;;  %v20014_v24 = vld [vmem:[#allocation23] ss:$16 sps:$4 sm:$0xff]  }
 0x9eb   :  { %13257 = vmatpush1.bf16.msra.mxu1 %v19933_v25  ;;  %12914 = vmatprep.subr.bf16.mxu0 %v19938_v35  ;;  %v20017_v25 = vld [vmem:[#allocation23 + $0x8] ss:$16 sps:$4 sm:$0xff]   ;;  %v20022_v35 = vld [vmem:[#allocation23 + $0x24] ss:$16 sps:$4 sm:$0xff]  }
 0x9ec   :  { %13258 = vmatprep.subr.bf16.mxu1 %v19941_v33  ;;  %v20025_v33 = vld [vmem:[#allocation23 + $0x2c] ss:$16 sps:$4 sm:$0xff]  }
 0x9ee   :  { %12915 = vmatpush1.bf16.msra.mxu0 %v19936_v27  ;;  %v20020_v27 = vld [vmem:[#allocation23 + $0x20] ss:$16 sps:$4 sm:$0xff]  }
 0x9ef   :  { %13259 = vmatpush1.bf16.msra.mxu1 %v19939_v30  ;;  %12916 = vmatprep.subr.bf16.mxu0 %v19944_v61  ;;  %v20023_v30 = vld [vmem:[#allocation23 + $0x28] ss:$16 sps:$4 sm:$0xff]   ;;  %v20028_v61 = vld [vmem:[#allocation23 + $0x44] ss:$16 sps:$4 sm:$0xff]  }
 0x9f0   :  { %13260 = vmatprep.subr.bf16.mxu1 %v19947_v29  ;;  %v20031_v29 = vld [vmem:[#allocation23 + $0x4c] ss:$16 sps:$4 sm:$0xff]  }
 0x9f2   :  { %12917 = vmatpush1.bf16.msra.mxu0 %v19942_v34  ;;  %v20026_v34 = vld [vmem:[#allocation23 + $0x40] ss:$16 sps:$4 sm:$0xff]  }
 0x9f3   :  { %13261 = vmatpush1.bf16.msra.mxu1 %v19945_v32  ;;  %12918 = vmatprep.subr.bf16.mxu0 %v19950_v36  ;;  %v20029_v32 = vld [vmem:[#allocation23 + $0x48] ss:$16 sps:$4 sm:$0xff]   ;;  %v20034_v36 = vld [vmem:[#allocation23 + $0x64] ss:$16 sps:$4 sm:$0xff]  }
 0x9f4   :  { %13262 = vmatprep.subr.bf16.mxu1 %v19953_v23  ;;  %v20037_v23 = vld [vmem:[#allocation23 + $0x6c] ss:$16 sps:$4 sm:$0xff]  }
 0x9f6   :  { %12919 = vmatpush1.bf16.msra.mxu0 %v19948_v63  ;;  %v20032_v63 = vld [vmem:[#allocation23 + $0x60] ss:$16 sps:$4 sm:$0xff]  }
 0x9f7   :  { %13263 = vmatpush1.bf16.msra.mxu1 %v19951_v62  ;;  %12920 = vmatprep.subr.bf16.mxu0 %v19956_v38  ;;  %v20040_v62 = vld [vmem:[#allocation23 + $0x84] ss:$16 sps:$4 sm:$0xff]   ;;  %v20043_v38 = vld [vmem:[#allocation23 + $0x8c] ss:$16 sps:$4 sm:$0xff]  }
 0x9f8   :  { %13264 = vmatprep.subr.bf16.mxu1 %v19959_v41  ;;  %v20038_v41 = vld [vmem:[#allocation23 + $0x80] ss:$16 sps:$4 sm:$0xff]  }
 0x9fa   :  { %12921 = vmatpush1.bf16.msra.mxu0 %v19954_v28  ;;  %v20041_v28 = vld [vmem:[#allocation23 + $0x88] ss:$16 sps:$4 sm:$0xff]  }
 0x9fb   :  { %13265 = vmatpush1.bf16.msra.mxu1 %v19957_v0  ;;  %12922 = vmatprep.subr.bf16.mxu0 %v19962_v42  ;;  %v20046_v0 = vld [vmem:[#allocation23 + $0xa4] ss:$16 sps:$4 sm:$0xff]   ;;  %v20049_v42 = vld [vmem:[#allocation23 + $0xac] ss:$16 sps:$4 sm:$0xff]  }
 0x9fc   :  { %13266 = vmatprep.subr.bf16.mxu1 %v19965_v21  ;;  %v20044_v21 = vld [vmem:[#allocation23 + $0xa0] ss:$16 sps:$4 sm:$0xff]  }
 0x9fe   :  { %12923 = vmatpush1.bf16.msra.mxu0 %v19960_v43  ;;  %v20047_v43 = vld [vmem:[#allocation23 + $0xa8] ss:$16 sps:$4 sm:$0xff]  }
 0x9ff   :  { %13267 = vmatpush1.bf16.msra.mxu1 %v19963_v44  ;;  %12924 = vmatprep.subr.bf16.mxu0 %v19968_v45  ;;  %v20052_v44 = vld [vmem:[#allocation23 + $0xc4] ss:$16 sps:$4 sm:$0xff]   ;;  %v20055_v45 = vld [vmem:[#allocation23 + $0xcc] ss:$16 sps:$4 sm:$0xff]  }
 0xa00   :  { %13268 = vmatprep.subr.bf16.mxu1 %v19971_v40  ;;  %v20050_v40 = vld [vmem:[#allocation23 + $0xc0] ss:$16 sps:$4 sm:$0xff]  }
 0xa02   :  { %12925 = vmatpush1.bf16.msra.mxu0 %v19966_v46  ;;  %v20053_v46 = vld [vmem:[#allocation23 + $0xc8] ss:$16 sps:$4 sm:$0xff]  }
 0xa03   :  { %13269 = vmatpush1.bf16.msra.mxu1 %v19969_v47  ;;  %12926 = vmatprep.subr.bf16.mxu0 %v19974_v48  ;;  %v20058_v47 = vld [vmem:[#allocation23 + $0xe4] ss:$16 sps:$4 sm:$0xff]   ;;  %v20061_v48 = vld [vmem:[#allocation23 + $0xec] ss:$16 sps:$4 sm:$0xff]  }
 0xa04   :  { %13270 = vmatprep.subr.bf16.mxu1 %v19977_v49  ;;  %v20056_v49 = vld [vmem:[#allocation23 + $0xe0] ss:$16 sps:$4 sm:$0xff]  }
 0xa06   :  { %12927 = vmatpush1.bf16.msra.mxu0 %v19972_v17  ;;  %v20059_v17 = vld [vmem:[#allocation23 + $0xe8] ss:$16 sps:$4 sm:$0xff]  }
 0xa07   :  { %13271 = vmatpush1.bf16.msra.mxu1 %v19975_v50  ;;  %12928 = vmatprep.subr.bf16.mxu0 %v19980_v51  ;;  %v20064_v50 = vld [vmem:[#allocation23 + $0x104] ss:$16 sps:$4 sm:$0xff]   ;;  %v20067_v51 = vld [vmem:[#allocation23 + $0x10c] ss:$16 sps:$4 sm:$0xff]  }
 0xa08   :  { %13272 = vmatprep.subr.bf16.mxu1 %v19983_v57  ;;  %v20062_v57 = vld [vmem:[#allocation23 + $0x100] ss:$16 sps:$4 sm:$0xff]  }
 0xa0a   :  { %12929 = vmatpush1.bf16.msra.mxu0 %v19978_v58  ;;  %v20065_v58 = vld [vmem:[#allocation23 + $0x108] ss:$16 sps:$4 sm:$0xff]  }
 0xa0b   :  { %13273 = vmatpush1.bf16.msra.mxu1 %v19981_v59  ;;  %12930 = vmatprep.subr.bf16.mxu0 %v19986_v54  ;;  %v20070_v59 = vld [vmem:[#allocation23 + $0x124] ss:$16 sps:$4 sm:$0xff]   ;;  %v20073_v54 = vld [vmem:[#allocation23 + $0x12c] ss:$16 sps:$4 sm:$0xff]  }
 0xa0c   :  { %13274 = vmatprep.subr.bf16.mxu1 %v19989_v26  ;;  %v20068_v26 = vld [vmem:[#allocation23 + $0x120] ss:$16 sps:$4 sm:$0xff]  }
 0xa0e   :  { %12931 = vmatpush1.bf16.msra.mxu0 %v19984_v39  ;;  %v20071_v39 = vld [vmem:[#allocation23 + $0x128] ss:$16 sps:$4 sm:$0xff]  }
 0xa0f   :  { %13275 = vmatpush1.bf16.msra.mxu1 %v19987_v15  ;;  %12932 = vmatprep.subr.bf16.mxu0 %v19992_v60  ;;  %v20076_v15 = vld [vmem:[#allocation23 + $0x144] ss:$16 sps:$4 sm:$0xff]   ;;  %v20079_v60 = vld [vmem:[#allocation23 + $0x14c] ss:$16 sps:$4 sm:$0xff]  }
 0xa10   :  { %13276 = vmatprep.subr.bf16.mxu1 %v19995_v1  ;;  %v20074_v1 = vld [vmem:[#allocation23 + $0x140] ss:$16 sps:$4 sm:$0xff]  }
 0xa12   :  { %12933 = vmatpush1.bf16.msra.mxu0 %v19990_v2  ;;  %v20077_v2 = vld [vmem:[#allocation23 + $0x148] ss:$16 sps:$4 sm:$0xff]  }
 0xa13   :  { %13277 = vmatpush1.bf16.msra.mxu1 %v19993_v31  ;;  %12934 = vmatprep.subr.bf16.mxu0 %v19998_v20  ;;  %v20082_v31 = vld [vmem:[#allocation23 + $0x164] ss:$16 sps:$4 sm:$0xff]   ;;  %v20085_v20 = vld [vmem:[#allocation23 + $0x16c] ss:$16 sps:$4 sm:$0xff]  }
 0xa14   :  { %13278 = vmatprep.subr.bf16.mxu1 %v20001_v4  ;;  %v20080_v4 = vld [vmem:[#allocation23 + $0x160] ss:$16 sps:$4 sm:$0xff]  }
 0xa16   :  { %12935 = vmatpush1.bf16.msra.mxu0 %v19996_v3  ;;  %v20083_v3 = vld [vmem:[#allocation23 + $0x168] ss:$16 sps:$4 sm:$0xff]  }
 0xa17   :  { %13279 = vmatpush1.bf16.msra.mxu1 %v19999_v52  ;;  %12936 = vmatprep.subr.bf16.mxu0 %v20004_v5  ;;  %v20088_v52 = vld [vmem:[#allocation23 + $0x184] ss:$16 sps:$4 sm:$0xff]   ;;  %v20091_v5 = vld [vmem:[#allocation23 + $0x18c] ss:$16 sps:$4 sm:$0xff]  }
 0xa18   :  { %13280 = vmatprep.subr.bf16.mxu1 %v20007_v22  ;;  %v20086_v22 = vld [vmem:[#allocation23 + $0x180] ss:$16 sps:$4 sm:$0xff]  }
 0xa1a   :  { %12937 = vmatpush1.bf16.msra.mxu0 %v20002_v9  ;;  %v20089_v9 = vld [vmem:[#allocation23 + $0x188] ss:$16 sps:$4 sm:$0xff]  }
 0xa1b   :  { %13281 = vmatpush1.bf16.msra.mxu1 %v20005_v16  ;;  %12938 = vmatprep.subr.bf16.mxu0 %v20010_v13  ;;  %v20094_v16 = vld [vmem:[#allocation23 + $0x1a4] ss:$16 sps:$4 sm:$0xff]   ;;  %v20097_v13 = vld [vmem:[#allocation23 + $0x1ac] ss:$16 sps:$4 sm:$0xff]  }
 0xa1c   :  { %13282 = vmatprep.subr.bf16.mxu1 %v20013_v10  ;;  %v20092_v10 = vld [vmem:[#allocation23 + $0x1a0] ss:$16 sps:$4 sm:$0xff]  }
 0xa1e   :  { %12939 = vmatpush1.bf16.msra.mxu0 %v20008_v12  ;;  %v20095_v12 = vld [vmem:[#allocation23 + $0x1a8] ss:$16 sps:$4 sm:$0xff]  }
 0xa1f   :  { %13283 = vmatpush1.bf16.msra.mxu1 %v20011_v7  ;;  %14097 = vmatprep.subr.bf16.mxu0 %v20016_v37  ;;  %v20100_v7 = vld [vmem:[#allocation23 + $0x1c4] ss:$16 sps:$4 sm:$0xff]   ;;  %v20103_v37 = vld [vmem:[#allocation23 + $0x1cc] ss:$16 sps:$4 sm:$0xff]  }
 0xa20   :  { %14183 = vmatprep.subr.bf16.mxu1 %v20019_v8  ;;  %v20098_v8 = vld [vmem:[#allocation23 + $0x1c0] ss:$16 sps:$4 sm:$0xff]  }
 0xa21   :  { %12941 = vmatmul.mubr.bf16.vlgmr.msra.gmra.mrb[56].mxu0 %v21572_v56 }
 0xa22   :  { %13285 = vmatmul.mubr.bf16.vlgmr.msra.gmra.mrb[60].mxu1 %v21572_v56  ;;  %14098 = vmatpush1.bf16.msra.mxu0 %v20014_v24  ;;  %v20035_v56 = vld [vmem:[#allocation23 + $0x68] ss:$16 sps:$4 sm:$0xff]  }
 0xa23   :  { %14184 = vmatpush1.bf16.msra.mxu1 %v20017_v25  ;;  %14099 = vmatprep.subr.bf16.mxu0 %v20022_v35  ;;  %v20101_v24 = vld [vmem:[#allocation23 + $0x1c8] ss:$16 sps:$4 sm:$0xff]   ;;  %v20106_v25 = vld [vmem:[#allocation23 + $0x1e4] ss:$16 sps:$4 sm:$0xff]   ;;  %v20109_v35 = vld [vmem:[#allocation23 + $0x1ec] ss:$16 sps:$4 sm:$0xff]  }
 0xa24   :  { %14185 = vmatprep.subr.bf16.mxu1 %v20025_v33  ;;  %v20104_v33 = vld [vmem:[#allocation23 + $0x1e0] ss:$16 sps:$4 sm:$0xff]  }
 0xa26   :  { %14100 = vmatpush1.bf16.msra.mxu0 %v20020_v27  ;;  %v20107_v27 = vld [vmem:[#allocation23 + $0x1e8] ss:$16 sps:$4 sm:$0xff]  }
 0xa27   :  { %14186 = vmatpush1.bf16.msra.mxu1 %v20023_v30  ;;  %14101 = vmatprep.subr.bf16.mxu0 %v20028_v61  ;;  %v20112_v30 = vld [vmem:[#allocation23 + $0x204] ss:$16 sps:$4 sm:$0xff]   ;;  %v20115_v61 = vld [vmem:[#allocation23 + $0x20c] ss:$16 sps:$4 sm:$0xff]  }
 0xa28   :  { %14187 = vmatprep.subr.bf16.mxu1 %v20031_v29  ;;  %v10025_v29 = vld [vmem:[#allocation22] sm:$0xf] }
 0xa2a   :  { %14102 = vmatpush1.bf16.msra.mxu0 %v20026_v34  ;;  %v10030_v34 = vrot.slane %v10025_v29, %v21353_v53 }
 0xa2b   :  { %14188 = vmatpush1.bf16.msra.mxu1 %v20029_v32  ;;  %14103 = vmatprep.subr.bf16.mxu0 %v20034_v36  ;;  %v10038_v32 = vrot.slane %v10025_v29, %v21369_v6  ;;  %v10034_v36 = vrot.slane %v10025_v29, %v21358_v55 }
 0xa2c   :  { %14189 = vmatprep.subr.bf16.mxu1 %v20037_v23  ;;  %v10042_v23 = vrot.slane %v10025_v29, %v21372_v11  ;;  %v20146_v29 = vld [vmem:[#allocation23 + $0x2c0] ss:$16 sps:$4 sm:$0xff]  }
 0xa2e   :  { %14104 = vmatpush1.bf16.msra.mxu0 %v20032_v63 }
 0xa2f   :  { %14190 = vmatpush1.bf16.msra.mxu1 %v20035_v56  ;;  %14105 = vmatprep.subr.bf16.mxu0 %v20040_v62 }
 0xa30   :  { %14191 = vmatprep.subr.bf16.mxu1 %v20043_v38 }
 0xa32   :  { %14106 = vmatpush1.bf16.msra.mxu0 %v20038_v41 }
 0xa33   :  { %14192 = vmatpush1.bf16.msra.mxu1 %v20041_v28  ;;  %14107 = vmatprep.subr.bf16.mxu0 %v20046_v0 }
 0xa34   :  { %14193 = vmatprep.subr.bf16.mxu1 %v20049_v42 }
 0xa36   :  { %14108 = vmatpush1.bf16.msra.mxu0 %v20044_v21 }
 0xa37   :  { %14194 = vmatpush1.bf16.msra.mxu1 %v20047_v43  ;;  %14109 = vmatprep.subr.bf16.mxu0 %v20052_v44 }
 0xa38   :  { %14195 = vmatprep.subr.bf16.mxu1 %v20055_v45 }
 0xa3a   :  { %14110 = vmatpush1.bf16.msra.mxu0 %v20050_v40 }
 0xa3b   :  { %14196 = vmatpush1.bf16.msra.mxu1 %v20053_v46  ;;  %14111 = vmatprep.subr.bf16.mxu0 %v20058_v47 }
 0xa3c   :  { %14197 = vmatprep.subr.bf16.mxu1 %v20061_v48 }
 0xa3e   :  { %14112 = vmatpush1.bf16.msra.mxu0 %v20056_v49 }
 0xa3f   :  { %14198 = vmatpush1.bf16.msra.mxu1 %v20059_v17  ;;  %14113 = vmatprep.subr.bf16.mxu0 %v20064_v50 }
 0xa40   :  { %14199 = vmatprep.subr.bf16.mxu1 %v20067_v51 }
 0xa42   :  { %14114 = vmatpush1.bf16.msra.mxu0 %v20062_v57 }
 0xa43   :  { %14200 = vmatpush1.bf16.msra.mxu1 %v20065_v58  ;;  %14115 = vmatprep.subr.bf16.mxu0 %v20070_v59 }
 0xa44   :  { %14201 = vmatprep.subr.bf16.mxu1 %v20073_v54 }
 0xa46   :  { %14116 = vmatpush1.bf16.msra.mxu0 %v20068_v26 }
 0xa47   :  { %14202 = vmatpush1.bf16.msra.mxu1 %v20071_v39  ;;  %14117 = vmatprep.subr.bf16.mxu0 %v20076_v15 }
 0xa48   :  { %14203 = vmatprep.subr.bf16.mxu1 %v20079_v60  ;;  %v20110_v60 = vld [vmem:[#allocation23 + $0x200] ss:$16 sps:$4 sm:$0xff]  }
 0xa4a   :  { %14118 = vmatpush1.bf16.msra.mxu0 %v20074_v1  ;;  %v20113_v1 = vld [vmem:[#allocation23 + $0x208] ss:$16 sps:$4 sm:$0xff]  }
 0xa4b   :  { %14204 = vmatpush1.bf16.msra.mxu1 %v20077_v2  ;;  %14119 = vmatprep.subr.bf16.mxu0 %v20082_v31  ;;  %v20118_v31 = vld [vmem:[#allocation23 + $0x224] ss:$16 sps:$4 sm:$0xff]  }
 0xa4c   :  { %14205 = vmatprep.subr.bf16.mxu1 %v20085_v20  ;;  %v20121_v20 = vld [vmem:[#allocation23 + $0x22c] ss:$16 sps:$4 sm:$0xff]  }
 0xa4e   :  { %14120 = vmatpush1.bf16.msra.mxu0 %v20080_v4  ;;  %v20116_v4 = vld [vmem:[#allocation23 + $0x220] ss:$16 sps:$4 sm:$0xff]  }
 0xa4f   :  { %14206 = vmatpush1.bf16.msra.mxu1 %v20083_v3  ;;  %14121 = vmatprep.subr.bf16.mxu0 %v20088_v52  ;;  %v20119_v3 = vld [vmem:[#allocation23 + $0x228] ss:$16 sps:$4 sm:$0xff]   ;;  %v20124_v52 = vld [vmem:[#allocation23 + $0x244] ss:$16 sps:$4 sm:$0xff]  }
 0xa50   :  { %14207 = vmatprep.subr.bf16.mxu1 %v20091_v5  ;;  %v20127_v5 = vld [vmem:[#allocation23 + $0x24c] ss:$16 sps:$4 sm:$0xff]  }
 0xa52   :  { %14122 = vmatpush1.bf16.msra.mxu0 %v20086_v22  ;;  %v20122_v22 = vld [vmem:[#allocation23 + $0x240] ss:$16 sps:$4 sm:$0xff]  }
 0xa53   :  { %14208 = vmatpush1.bf16.msra.mxu1 %v20089_v9  ;;  %14123 = vmatprep.subr.bf16.mxu0 %v20094_v16  ;;  %v20125_v9 = vld [vmem:[#allocation23 + $0x248] ss:$16 sps:$4 sm:$0xff]   ;;  %v20130_v16 = vld [vmem:[#allocation23 + $0x264] ss:$16 sps:$4 sm:$0xff]  }
 0xa54   :  { %14209 = vmatprep.subr.bf16.mxu1 %v20097_v13  ;;  %v20133_v13 = vld [vmem:[#allocation23 + $0x26c] ss:$16 sps:$4 sm:$0xff]  }
 0xa56   :  { %14124 = vmatpush1.bf16.msra.mxu0 %v20092_v10  ;;  %v20128_v10 = vld [vmem:[#allocation23 + $0x260] ss:$16 sps:$4 sm:$0xff]  }
 0xa57   :  { %14210 = vmatpush1.bf16.msra.mxu1 %v20095_v12  ;;  %14125 = vmatprep.subr.bf16.mxu0 %v20100_v7  ;;  %v20131_v12 = vld [vmem:[#allocation23 + $0x268] ss:$16 sps:$4 sm:$0xff]   ;;  %v20136_v7 = vld [vmem:[#allocation23 + $0x284] ss:$16 sps:$4 sm:$0xff]  }
 0xa58   :  { %14211 = vmatprep.subr.bf16.mxu1 %v20103_v37  ;;  %v20139_v37 = vld [vmem:[#allocation23 + $0x28c] ss:$16 sps:$4 sm:$0xff]  }
 0xa5a   :  { %14126 = vmatpush1.bf16.msra.mxu0 %v20098_v8  ;;  %v20134_v8 = vld [vmem:[#allocation23 + $0x280] ss:$16 sps:$4 sm:$0xff]  }
 0xa5b   :  { %14212 = vmatpush1.bf16.msra.mxu1 %v20101_v24  ;;  %14127 = vmatprep.subr.bf16.mxu0 %v20106_v25  ;;  %v20137_v24 = vld [vmem:[#allocation23 + $0x288] ss:$16 sps:$4 sm:$0xff]   ;;  %v20142_v25 = vld [vmem:[#allocation23 + $0x2a4] ss:$16 sps:$4 sm:$0xff]  }
 0xa5c   :  { %14213 = vmatprep.subr.bf16.mxu1 %v20109_v35  ;;  %v20145_v35 = vld [vmem:[#allocation23 + $0x2ac] ss:$16 sps:$4 sm:$0xff]  }
 0xa5e   :  { %14128 = vmatpush1.bf16.msra.mxu0 %v20104_v33  ;;  %v20140_v33 = vld [vmem:[#allocation23 + $0x2a0] ss:$16 sps:$4 sm:$0xff]  }
 0xa5f   :  { %14214 = vmatpush1.bf16.msra.mxu1 %v20107_v27  ;;  %14140 = vmatprep.subr.bf16.mxu0 %v20112_v30  ;;  %v20143_v27 = vld [vmem:[#allocation23 + $0x2a8] ss:$16 sps:$4 sm:$0xff]   ;;  %v20148_v30 = vld [vmem:[#allocation23 + $0x2c4] ss:$16 sps:$4 sm:$0xff]  }
 0xa60   :  { %14226 = vmatprep.subr.bf16.mxu1 %v20115_v61  ;;  %v20151_v61 = vld [vmem:[#allocation23 + $0x2cc] ss:$16 sps:$4 sm:$0xff]  }
 0xaf4   :  { %v12942_v63 = vpop.f32.mrb[56].mxu0 }
 0xaf5   :  { %v18385_v56 = vadd.f32 %v12942_v63, %v10030_v34  ;;  %v13286_v62 = vpop.f32.mrb[60].mxu1  ;;  %v12944_v38 = vpop.f32.mrb[57].mxu0  ;;  %v20155_v63 = vld [vmem:[#allocation23 + $0x2e8] ss:$16 sps:$4 sm:$0xff]  }
 0xaf6   :  { %v18389_v41 = vadd.f32 %v13286_v62, %v10038_v32  ;;  %v18386_v28 = vadd.f32 %v12944_v38, %v10034_v36  ;;  %v13288_v0 = vpop.f32.mrb[61].mxu1  ;;  %v12946_v42 = vpop.f32.mrb[58].mxu0  ;;  %v20163_v62 = vld [vmem:[#allocation23 + $0x30c] ss:$16 sps:$4 sm:$0xff]   ;;  %v20158_v38 = vld [vmem:[#allocation23 + $0x300] ss:$16 sps:$4 sm:$0xff]  }
 0xaf7   :  { %v18390_v21 = vadd.f32 %v13288_v0, %v10042_v23  ;;  %v18387_v43 = vadd.f32 %v12946_v42, %v10030_v34  ;;  %v13290_v44 = vpop.f32.mrb[62].mxu1  ;;  %v12948_v45 = vpop.f32.mrb[59].mxu0  ;;  %v13295_v48 = vmax.f32 %v18385_v56, 0.0  ;;  %v20149_v34 = vld [vmem:[#allocation23 + $0x2c8] ss:$16 sps:$4 sm:$0xff]  }
 0xaf8   :  { %v18391_v40 = vadd.f32 %v13290_v44, %v10038_v32  ;;  %v18388_v46 = vadd.f32 %v12948_v45, %v10034_v36  ;;  %v13292_v47 = vpop.f32.mrb[63].mxu1  ;;  %v13297_v50 = vmax.f32 %v18389_v41, 0.0  ;;  %v13296_v51 = vmax.f32 %v18386_v28, 0.0  ;;  %v20154_v32 = vld [vmem:[#allocation23 + $0x2e4] ss:$16 sps:$4 sm:$0xff]  }
 0xaf9   :  { %v13299_v49 = vmax.f32 %v18387_v43, 0.0  ;;  %v18392_v17 = vadd.f32 %v13292_v47, %v10042_v23  ;;  %v13298_v59 = vmax.f32 %v18390_v21, 0.0  ;;  %v20157_v36 = vld [vmem:[#allocation23 + $0x2ec] ss:$16 sps:$4 sm:$0xff]   ;;  %v20152_v23 = vld [vmem:[#allocation23 + $0x2e0] ss:$16 sps:$4 sm:$0xff]  }
 0xafa   :  { %v13301_v57 = vmax.f32 %v18391_v40, 0.0  ;;  %v13300_v58 = vmax.f32 %v18388_v46, 0.0  ;;  %v20160_v56 = vld [vmem:[#allocation23 + $0x304] ss:$16 sps:$4 sm:$0xff]   ;;  %v20161_v41 = vld [vmem:[#allocation23 + $0x308] ss:$16 sps:$4 sm:$0xff]  }
 0xafb   :  { %v13303_v54 = vpack.c.bf16 %v13299_v49, %v13295_v48  ;;  %v13302_v26 = vmax.f32 %v18392_v17, 0.0  ;;  %v20166_v28 = vld [vmem:[#allocation23 + $0x324] ss:$16 sps:$4 sm:$0xff]   ;;  %v20169_v0 = vld [vmem:[#allocation23 + $0x32c] ss:$16 sps:$4 sm:$0xff]  }
 0xafc   :  { %v21604_v39 = vpack.c.bf16 %v13301_v57, %v13297_v50  ;;  %v13304_v15 = vpack.c.bf16 %v13300_v58, %v13296_v51  ;;  %v20164_v42 = vld [vmem:[#allocation23 + $0x320] ss:$16 sps:$4 sm:$0xff]   ;;  %v20167_v21 = vld [vmem:[#allocation23 + $0x328] ss:$16 sps:$4 sm:$0xff]   ;;  %v20172_v43 = vld [vmem:[#allocation23 + $0x344] ss:$16 sps:$4 sm:$0xff]  }
 0xafd   :  { %v13306_v2 = vpack.c.bf16 %v13302_v26, %v13298_v59  ;;  %v20175_v44 = vld [vmem:[#allocation23 + $0x34c] ss:$16 sps:$4 sm:$0xff]   ;;  %v20170_v45 = vld [vmem:[#allocation23 + $0x340] ss:$16 sps:$4 sm:$0xff]   ;;  %v20173_v40 = vld [vmem:[#allocation23 + $0x348] ss:$16 sps:$4 sm:$0xff]  }
 0xafe   :  { %14129 = vmatprep.mubr.bf16.mxu0 %v13304_v15  ;;  %14215 = vmatprep.mubr.bf16.mxu1 %v13304_v15  ;;  %v20178_v46 = vld [vmem:[#allocation23 + $0x364] ss:$16 sps:$4 sm:$0xff]   ;;  %v20181_v47 = vld [vmem:[#allocation23 + $0x36c] ss:$16 sps:$4 sm:$0xff]   ;;  %v20176_v48 = vld [vmem:[#allocation23 + $0x360] ss:$16 sps:$4 sm:$0xff]  }
 0xaff   :  { %14130 = vmatmul.mubr.bf16.vlgmr.msra.gmra.mrb[60].mxu0 %v13303_v54  ;;  %14216 = vmatmul.mubr.bf16.vlgmr.msra.gmra.mrb[64].mxu1 %v13303_v54  ;;  %v20179_v49 = vld [vmem:[#allocation23 + $0x368] ss:$16 sps:$4 sm:$0xff]   ;;  %v20184_v17 = vld [vmem:[#allocation23 + $0x384] ss:$16 sps:$4 sm:$0xff]   ;;  %v20187_v50 = vld [vmem:[#allocation23 + $0x38c] ss:$16 sps:$4 sm:$0xff]  }
 0xb00   :  { %14141 = vmatpush1.bf16.msra.mxu0 %v20110_v60  ;;  %14227 = vmatpush1.bf16.msra.mxu1 %v20113_v1  ;;  %v20182_v51 = vld [vmem:[#allocation23 + $0x380] ss:$16 sps:$4 sm:$0xff]   ;;  %v20185_v57 = vld [vmem:[#allocation23 + $0x388] ss:$16 sps:$4 sm:$0xff]   ;;  %v20190_v58 = vld [vmem:[#allocation23 + $0x3a4] ss:$16 sps:$4 sm:$0xff]  }
 0xb01   :  { %14172 = vmatprep.mubr.bf16.mxu0 %v13306_v2  ;;  %14258 = vmatprep.mubr.bf16.mxu1 %v13306_v2  ;;  %v20193_v59 = vld [vmem:[#allocation23 + $0x3ac] ss:$16 sps:$4 sm:$0xff]   ;;  %v20188_v54 = vld [vmem:[#allocation23 + $0x3a0] ss:$16 sps:$4 sm:$0xff]   ;;  %v20191_v26 = vld [vmem:[#allocation23 + $0x3a8] ss:$16 sps:$4 sm:$0xff]  }
 0xb02   :  { %14142 = vmatprep.subr.bf16.mxu0 %v20118_v31  ;;  %14228 = vmatprep.subr.bf16.mxu1 %v20121_v20  ;;  %v20196_v15 = vld [vmem:[#allocation23 + $0x3c4] ss:$16 sps:$4 sm:$0xff]   ;;  %v20199_v60 = vld [vmem:[#allocation23 + $0x3cc] ss:$16 sps:$4 sm:$0xff]   ;;  %v20194_v1 = vld [vmem:[#allocation23 + $0x3c0] ss:$16 sps:$4 sm:$0xff]  }
 0xb03   :  { %v20197_v2 = vld [vmem:[#allocation23 + $0x3c8] ss:$16 sps:$4 sm:$0xff]   ;;  %v20202_v31 = vld [vmem:[#allocation23 + $0x3e4] ss:$16 sps:$4 sm:$0xff]   ;;  %v20205_v20 = vld [vmem:[#allocation23 + $0x3ec] ss:$16 sps:$4 sm:$0xff]  }
 0xb04   :  { %14143 = vmatpush1.bf16.msra.mxu0 %v20116_v4  ;;  %14229 = vmatpush1.bf16.msra.mxu1 %v20119_v3  ;;  %v20200_v4 = vld [vmem:[#allocation23 + $0x3e0] ss:$16 sps:$4 sm:$0xff]   ;;  %v20203_v3 = vld [vmem:[#allocation23 + $0x3e8] ss:$16 sps:$4 sm:$0xff]  }
 0xb05   :  { %14144 = vmatprep.subr.bf16.mxu0 %v20124_v52  ;;  %14230 = vmatprep.subr.bf16.mxu1 %v20127_v5  ;;  %v20208_v52 = vld [vmem:[#allocation26 + $0x4] ss:$28 sps:$4 sm:$0xff]   ;;  %v20211_v5 = vld [vmem:[#allocation26 + $0xc] ss:$28 sps:$4 sm:$0xff]  }
 0xb08   :  { %14145 = vmatpush1.bf16.msra.mxu0 %v20122_v22  ;;  %14231 = vmatpush1.bf16.msra.mxu1 %v20125_v9  ;;  %v20206_v22 = vld [vmem:[#allocation26] ss:$28 sps:$4 sm:$0xff]   ;;  %v20209_v9 = vld [vmem:[#allocation26 + $0x8] ss:$28 sps:$4 sm:$0xff]  }
 0xb09   :  { %14146 = vmatprep.subr.bf16.mxu0 %v20130_v16  ;;  %14232 = vmatprep.subr.bf16.mxu1 %v20133_v13  ;;  %v20214_v16 = vld [vmem:[#allocation26 + $0x3c] ss:$28 sps:$4 sm:$0xff]   ;;  %v20217_v13 = vld [vmem:[#allocation26 + $0x44] ss:$28 sps:$4 sm:$0xff]  }
 0xb0c   :  { %14147 = vmatpush1.bf16.msra.mxu0 %v20128_v10  ;;  %14233 = vmatpush1.bf16.msra.mxu1 %v20131_v12  ;;  %v20212_v10 = vld [vmem:[#allocation26 + $0x38] ss:$28 sps:$4 sm:$0xff]   ;;  %v20215_v12 = vld [vmem:[#allocation26 + $0x40] ss:$28 sps:$4 sm:$0xff]  }
 0xb0d   :  { %14148 = vmatprep.subr.bf16.mxu0 %v20136_v7  ;;  %14234 = vmatprep.subr.bf16.mxu1 %v20139_v37  ;;  %v20220_v7 = vld [vmem:[#allocation26 + $0x74] ss:$28 sps:$4 sm:$0xff]   ;;  %v20223_v37 = vld [vmem:[#allocation26 + $0x7c] ss:$28 sps:$4 sm:$0xff]  }
 0xb10   :  { %14149 = vmatpush1.bf16.msra.mxu0 %v20134_v8  ;;  %14235 = vmatpush1.bf16.msra.mxu1 %v20137_v24  ;;  %v20218_v8 = vld [vmem:[#allocation26 + $0x70] ss:$28 sps:$4 sm:$0xff]   ;;  %v20221_v24 = vld [vmem:[#allocation26 + $0x78] ss:$28 sps:$4 sm:$0xff]  }
 0xb11   :  { %14150 = vmatprep.subr.bf16.mxu0 %v20142_v25  ;;  %14236 = vmatprep.subr.bf16.mxu1 %v20145_v35  ;;  %v20226_v25 = vld [vmem:[#allocation26 + $0xac] ss:$28 sps:$4 sm:$0xff]   ;;  %v20229_v35 = vld [vmem:[#allocation26 + $0xb4] ss:$28 sps:$4 sm:$0xff]  }
 0xb14   :  { %14151 = vmatpush1.bf16.msra.mxu0 %v20140_v33  ;;  %14237 = vmatpush1.bf16.msra.mxu1 %v20143_v27  ;;  %v20224_v33 = vld [vmem:[#allocation26 + $0xa8] ss:$28 sps:$4 sm:$0xff]  }
 0xb15   :  { %14152 = vmatprep.subr.bf16.mxu0 %v20148_v30  ;;  %14238 = vmatprep.subr.bf16.mxu1 %v20151_v61  ;;  %v20232_v27 = vld [vmem:[#allocation26 + $0xe4] ss:$28 sps:$4 sm:$0xff]   ;;  %v20235_v30 = vld [vmem:[#allocation26 + $0xec] ss:$28 sps:$4 sm:$0xff]  }
 0xb16   :  { %v20230_v61 = vld [vmem:[#allocation26 + $0xe0] ss:$28 sps:$4 sm:$0xff]  }
 0xb18   :  { %14153 = vmatpush1.bf16.msra.mxu0 %v20146_v29  ;;  %14239 = vmatpush1.bf16.msra.mxu1 %v20149_v34  ;;  %v20233_v29 = vld [vmem:[#allocation26 + $0xe8] ss:$28 sps:$4 sm:$0xff]   ;;  %v20238_v34 = vld [vmem:[#allocation26 + $0x11c] ss:$28 sps:$4 sm:$0xff]  }
 0xb19   :  { %14154 = vmatprep.subr.bf16.mxu0 %v20154_v32  ;;  %14240 = vmatprep.subr.bf16.mxu1 %v20157_v36  ;;  %v20241_v32 = vld [vmem:[#allocation26 + $0x124] ss:$28 sps:$4 sm:$0xff]   ;;  %v20236_v36 = vld [vmem:[#allocation26 + $0x118] ss:$28 sps:$4 sm:$0xff]  }
 0xb1c   :  { %14155 = vmatpush1.bf16.msra.mxu0 %v20152_v23  ;;  %14241 = vmatpush1.bf16.msra.mxu1 %v20155_v63  ;;  %v20239_v23 = vld [vmem:[#allocation26 + $0x120] ss:$28 sps:$4 sm:$0xff]   ;;  %v20244_v63 = vld [vmem:[#allocation26 + $0x154] ss:$28 sps:$4 sm:$0xff]  }
 0xb1d   :  { %14156 = vmatprep.subr.bf16.mxu0 %v20160_v56  ;;  %14242 = vmatprep.subr.bf16.mxu1 %v20163_v62  ;;  %v20247_v56 = vld [vmem:[#allocation26 + $0x15c] ss:$28 sps:$4 sm:$0xff]   ;;  %v20242_v62 = vld [vmem:[#allocation26 + $0x150] ss:$28 sps:$4 sm:$0xff]  }
 0xb20   :  { %14157 = vmatpush1.bf16.msra.mxu0 %v20158_v38  ;;  %14243 = vmatpush1.bf16.msra.mxu1 %v20161_v41  ;;  %v20245_v38 = vld [vmem:[#allocation26 + $0x158] ss:$28 sps:$4 sm:$0xff]   ;;  %v20250_v41 = vld [vmem:[#allocation26 + $0x18c] ss:$28 sps:$4 sm:$0xff]  }
 0xb21   :  { %14158 = vmatprep.subr.bf16.mxu0 %v20166_v28  ;;  %14244 = vmatprep.subr.bf16.mxu1 %v20169_v0  ;;  %v20253_v28 = vld [vmem:[#allocation26 + $0x194] ss:$28 sps:$4 sm:$0xff]   ;;  %v20248_v0 = vld [vmem:[#allocation26 + $0x188] ss:$28 sps:$4 sm:$0xff]  }
 0xb24   :  { %14159 = vmatpush1.bf16.msra.mxu0 %v20164_v42  ;;  %14245 = vmatpush1.bf16.msra.mxu1 %v20167_v21  ;;  %v20251_v42 = vld [vmem:[#allocation26 + $0x190] ss:$28 sps:$4 sm:$0xff]   ;;  %v20256_v21 = vld [vmem:[#allocation26 + $0x1c4] ss:$28 sps:$4 sm:$0xff]  }
 0xb25   :  { %14160 = vmatprep.subr.bf16.mxu0 %v20172_v43  ;;  %14246 = vmatprep.subr.bf16.mxu1 %v20175_v44  ;;  %v20259_v43 = vld [vmem:[#allocation26 + $0x1cc] ss:$28 sps:$4 sm:$0xff]   ;;  %v20254_v44 = vld [vmem:[#allocation26 + $0x1c0] ss:$28 sps:$4 sm:$0xff]  }
 0xb28   :  { %14161 = vmatpush1.bf16.msra.mxu0 %v20170_v45  ;;  %14247 = vmatpush1.bf16.msra.mxu1 %v20173_v40  ;;  %v20257_v45 = vld [vmem:[#allocation26 + $0x1c8] ss:$28 sps:$4 sm:$0xff]   ;;  %v20262_v40 = vld [vmem:[#allocation26 + $0x1fc] ss:$28 sps:$4 sm:$0xff]  }
 0xb29   :  { %14162 = vmatprep.subr.bf16.mxu0 %v20178_v46  ;;  %14248 = vmatprep.subr.bf16.mxu1 %v20181_v47  ;;  %v20265_v46 = vld [vmem:[#allocation26 + $0x204] ss:$28 sps:$4 sm:$0xff]   ;;  %v20260_v47 = vld [vmem:[#allocation26 + $0x1f8] ss:$28 sps:$4 sm:$0xff]  }
 0xb2c   :  { %14163 = vmatpush1.bf16.msra.mxu0 %v20176_v48  ;;  %14249 = vmatpush1.bf16.msra.mxu1 %v20179_v49  ;;  %v20263_v48 = vld [vmem:[#allocation26 + $0x200] ss:$28 sps:$4 sm:$0xff]   ;;  %v20268_v49 = vld [vmem:[#allocation26 + $0x234] ss:$28 sps:$4 sm:$0xff]  }
 0xb2d   :  { %14164 = vmatprep.subr.bf16.mxu0 %v20184_v17  ;;  %14250 = vmatprep.subr.bf16.mxu1 %v20187_v50  ;;  %v20271_v17 = vld [vmem:[#allocation26 + $0x23c] ss:$28 sps:$4 sm:$0xff]   ;;  %v20266_v50 = vld [vmem:[#allocation26 + $0x230] ss:$28 sps:$4 sm:$0xff]  }
 0xb30   :  { %14165 = vmatpush1.bf16.msra.mxu0 %v20182_v51  ;;  %14251 = vmatpush1.bf16.msra.mxu1 %v20185_v57  ;;  %v20269_v51 = vld [vmem:[#allocation26 + $0x238] ss:$28 sps:$4 sm:$0xff]   ;;  %v20274_v57 = vld [vmem:[#allocation26 + $0x26c] ss:$28 sps:$4 sm:$0xff]  }
 0xb31   :  { %14166 = vmatprep.subr.bf16.mxu0 %v20190_v58  ;;  %14252 = vmatprep.subr.bf16.mxu1 %v20193_v59  ;;  %v20277_v58 = vld [vmem:[#allocation26 + $0x274] ss:$28 sps:$4 sm:$0xff]   ;;  %v20272_v59 = vld [vmem:[#allocation26 + $0x268] ss:$28 sps:$4 sm:$0xff]  }
 0xb34   :  { %14167 = vmatpush1.bf16.msra.mxu0 %v20188_v54  ;;  %14253 = vmatpush1.bf16.msra.mxu1 %v20191_v26  ;;  %v20275_v54 = vld [vmem:[#allocation26 + $0x270] ss:$28 sps:$4 sm:$0xff]   ;;  %v20280_v26 = vld [vmem:[#allocation26 + $0x2a4] ss:$28 sps:$4 sm:$0xff]  }
 0xb35   :  { %14168 = vmatprep.subr.bf16.mxu0 %v20196_v15  ;;  %14254 = vmatprep.subr.bf16.mxu1 %v20199_v60  ;;  %v20283_v15 = vld [vmem:[#allocation26 + $0x2ac] ss:$28 sps:$4 sm:$0xff]   ;;  %v20278_v60 = vld [vmem:[#allocation26 + $0x2a0] ss:$28 sps:$4 sm:$0xff]  }
 0xb38   :  { %14169 = vmatpush1.bf16.msra.mxu0 %v20194_v1  ;;  %14255 = vmatpush1.bf16.msra.mxu1 %v20197_v2  ;;  %v20281_v1 = vld [vmem:[#allocation26 + $0x2a8] ss:$28 sps:$4 sm:$0xff]   ;;  %v20286_v2 = vld [vmem:[#allocation26 + $0x2dc] ss:$28 sps:$4 sm:$0xff]  }
 0xb39   :  { %14170 = vmatprep.subr.bf16.mxu0 %v20202_v31  ;;  %14256 = vmatprep.subr.bf16.mxu1 %v20205_v20  ;;  %v20289_v31 = vld [vmem:[#allocation26 + $0x2e4] ss:$28 sps:$4 sm:$0xff]   ;;  %v20284_v20 = vld [vmem:[#allocation26 + $0x2d8] ss:$28 sps:$4 sm:$0xff]  }
 0xb3c   :  { %14171 = vmatpush1.bf16.msra.mxu0 %v20200_v4  ;;  %14257 = vmatpush1.bf16.msra.mxu1 %v20203_v3  ;;  %v20287_v4 = vld [vmem:[#allocation26 + $0x2e0] ss:$28 sps:$4 sm:$0xff]   ;;  %v20292_v3 = vld [vmem:[#allocation26 + $0x314] ss:$28 sps:$4 sm:$0xff]  }
 0xb3d   :  { %15726 = vmatprep.subr.bf16.mxu0 %v20208_v52  ;;  %15812 = vmatprep.subr.bf16.mxu1 %v20211_v5  ;;  %v20295_v52 = vld [vmem:[#allocation26 + $0x31c] ss:$28 sps:$4 sm:$0xff]   ;;  %v20290_v5 = vld [vmem:[#allocation26 + $0x310] ss:$28 sps:$4 sm:$0xff]  }
 0xb3f   :  { %14173 = vmatmul.mubr.bf16.vlgmr.msra.gmra.mrb[60].mxu0 %v21604_v39  ;;  %14259 = vmatmul.mubr.bf16.vlgmr.msra.gmra.mrb[64].mxu1 %v21604_v39  ;;  %v20227_v39 = vld [vmem:[#allocation26 + $0xb0] ss:$28 sps:$4 sm:$0xff]  }
 0xb40   :  { %15727 = vmatpush1.bf16.msra.mxu0 %v20206_v22  ;;  %15813 = vmatpush1.bf16.msra.mxu1 %v20209_v9  ;;  %v20293_v22 = vld [vmem:[#allocation26 + $0x318] ss:$28 sps:$4 sm:$0xff]   ;;  %v20298_v9 = vld [vmem:[#allocation26 + $0x34c] ss:$28 sps:$4 sm:$0xff]  }
 0xb41   :  { %15728 = vmatprep.subr.bf16.mxu0 %v20214_v16  ;;  %15814 = vmatprep.subr.bf16.mxu1 %v20217_v13  ;;  %v20301_v16 = vld [vmem:[#allocation26 + $0x354] ss:$28 sps:$4 sm:$0xff]   ;;  %v20296_v13 = vld [vmem:[#allocation26 + $0x348] ss:$28 sps:$4 sm:$0xff]  }
 0xb44   :  { %15729 = vmatpush1.bf16.msra.mxu0 %v20212_v10  ;;  %15815 = vmatpush1.bf16.msra.mxu1 %v20215_v12  ;;  %v20299_v10 = vld [vmem:[#allocation26 + $0x350] ss:$28 sps:$4 sm:$0xff]   ;;  %v20304_v12 = vld [vmem:[#allocation26 + $0x384] ss:$28 sps:$4 sm:$0xff]  }
 0xb45   :  { %15730 = vmatprep.subr.bf16.mxu0 %v20220_v7  ;;  %15816 = vmatprep.subr.bf16.mxu1 %v20223_v37  ;;  %v20307_v7 = vld [vmem:[#allocation26 + $0x38c] ss:$28 sps:$4 sm:$0xff]   ;;  %v13435_v37 = vld [vmem:[#allocation25] sm:$0xf] }
 0xb48   :  { %15731 = vmatpush1.bf16.msra.mxu0 %v20218_v8  ;;  %15817 = vmatpush1.bf16.msra.mxu1 %v20221_v24  ;;  %v13440_v8 = vrot.slane %v13435_v37, %v21353_v53  ;;  %v13448_v24 = vrot.slane %v13435_v37, %v21369_v6 }
 0xb49   :  { %15732 = vmatprep.subr.bf16.mxu0 %v20226_v25  ;;  %15818 = vmatprep.subr.bf16.mxu1 %v20229_v35  ;;  %v13444_v25 = vrot.slane %v13435_v37, %v21358_v55  ;;  %v13452_v35 = vrot.slane %v13435_v37, %v21372_v11  ;;  %v20338_v37 = vld [vmem:[#allocation26 + $0x4d0] ss:$28 sps:$4 sm:$0xff]  }
 0xb4c   :  { %15733 = vmatpush1.bf16.msra.mxu0 %v20224_v33  ;;  %15819 = vmatpush1.bf16.msra.mxu1 %v20227_v39 }
 0xb4d   :  { %15734 = vmatprep.subr.bf16.mxu0 %v20232_v27  ;;  %15820 = vmatprep.subr.bf16.mxu1 %v20235_v30 }
 0xb50   :  { %15735 = vmatpush1.bf16.msra.mxu0 %v20230_v61  ;;  %15821 = vmatpush1.bf16.msra.mxu1 %v20233_v29 }
 0xb51   :  { %15736 = vmatprep.subr.bf16.mxu0 %v20238_v34  ;;  %15822 = vmatprep.subr.bf16.mxu1 %v20241_v32 }
 0xb54   :  { %15737 = vmatpush1.bf16.msra.mxu0 %v20236_v36  ;;  %15823 = vmatpush1.bf16.msra.mxu1 %v20239_v23 }
 0xb55   :  { %15738 = vmatprep.subr.bf16.mxu0 %v20244_v63  ;;  %15824 = vmatprep.subr.bf16.mxu1 %v20247_v56 }
 0xb58   :  { %15739 = vmatpush1.bf16.msra.mxu0 %v20242_v62  ;;  %15825 = vmatpush1.bf16.msra.mxu1 %v20245_v38 }
 0xb59   :  { %15740 = vmatprep.subr.bf16.mxu0 %v20250_v41  ;;  %15826 = vmatprep.subr.bf16.mxu1 %v20253_v28 }
 0xb5c   :  { %15741 = vmatpush1.bf16.msra.mxu0 %v20248_v0  ;;  %15827 = vmatpush1.bf16.msra.mxu1 %v20251_v42 }
 0xb5d   :  { %15742 = vmatprep.subr.bf16.mxu0 %v20256_v21  ;;  %15828 = vmatprep.subr.bf16.mxu1 %v20259_v43 }
 0xb60   :  { %15743 = vmatpush1.bf16.msra.mxu0 %v20254_v44  ;;  %15829 = vmatpush1.bf16.msra.mxu1 %v20257_v45 }
 0xb61   :  { %15744 = vmatprep.subr.bf16.mxu0 %v20262_v40  ;;  %15830 = vmatprep.subr.bf16.mxu1 %v20265_v46 }
 0xb64   :  { %15745 = vmatpush1.bf16.msra.mxu0 %v20260_v47  ;;  %15831 = vmatpush1.bf16.msra.mxu1 %v20263_v48 }
 0xb65   :  { %15746 = vmatprep.subr.bf16.mxu0 %v20268_v49  ;;  %15832 = vmatprep.subr.bf16.mxu1 %v20271_v17 }
 0xb68   :  { %15747 = vmatpush1.bf16.msra.mxu0 %v20266_v50  ;;  %15833 = vmatpush1.bf16.msra.mxu1 %v20269_v51  ;;  %v20302_v50 = vld [vmem:[#allocation26 + $0x380] ss:$28 sps:$4 sm:$0xff]   ;;  %v20305_v51 = vld [vmem:[#allocation26 + $0x388] ss:$28 sps:$4 sm:$0xff]  }
 0xb69   :  { %15748 = vmatprep.subr.bf16.mxu0 %v20274_v57  ;;  %15834 = vmatprep.subr.bf16.mxu1 %v20277_v58  ;;  %v20310_v57 = vld [vmem:[#allocation26 + $0x3bc] ss:$28 sps:$4 sm:$0xff]   ;;  %v20313_v58 = vld [vmem:[#allocation26 + $0x3c4] ss:$28 sps:$4 sm:$0xff]  }
 0xb6c   :  { %15749 = vmatpush1.bf16.msra.mxu0 %v20272_v59  ;;  %15835 = vmatpush1.bf16.msra.mxu1 %v20275_v54  ;;  %v20308_v59 = vld [vmem:[#allocation26 + $0x3b8] ss:$28 sps:$4 sm:$0xff]   ;;  %v20311_v54 = vld [vmem:[#allocation26 + $0x3c0] ss:$28 sps:$4 sm:$0xff]  }
 0xb6d   :  { %15750 = vmatprep.subr.bf16.mxu0 %v20280_v26  ;;  %15836 = vmatprep.subr.bf16.mxu1 %v20283_v15  ;;  %v20316_v26 = vld [vmem:[#allocation26 + $0x3f4] ss:$28 sps:$4 sm:$0xff]   ;;  %v20319_v15 = vld [vmem:[#allocation26 + $0x3fc] ss:$28 sps:$4 sm:$0xff]  }
 0xb70   :  { %15751 = vmatpush1.bf16.msra.mxu0 %v20278_v60  ;;  %15837 = vmatpush1.bf16.msra.mxu1 %v20281_v1  ;;  %v20314_v60 = vld [vmem:[#allocation26 + $0x3f0] ss:$28 sps:$4 sm:$0xff]   ;;  %v20317_v1 = vld [vmem:[#allocation26 + $0x3f8] ss:$28 sps:$4 sm:$0xff]  }
 0xb71   :  { %15752 = vmatprep.subr.bf16.mxu0 %v20286_v2  ;;  %15838 = vmatprep.subr.bf16.mxu1 %v20289_v31  ;;  %v20322_v2 = vld [vmem:[#allocation26 + $0x42c] ss:$28 sps:$4 sm:$0xff]   ;;  %v20325_v31 = vld [vmem:[#allocation26 + $0x434] ss:$28 sps:$4 sm:$0xff]  }
 0xb74   :  { %15753 = vmatpush1.bf16.msra.mxu0 %v20284_v20  ;;  %15839 = vmatpush1.bf16.msra.mxu1 %v20287_v4  ;;  %v20320_v20 = vld [vmem:[#allocation26 + $0x428] ss:$28 sps:$4 sm:$0xff]   ;;  %v20323_v4 = vld [vmem:[#allocation26 + $0x430] ss:$28 sps:$4 sm:$0xff]  }
 0xb75   :  { %15754 = vmatprep.subr.bf16.mxu0 %v20292_v3  ;;  %15840 = vmatprep.subr.bf16.mxu1 %v20295_v52  ;;  %v20328_v3 = vld [vmem:[#allocation26 + $0x464] ss:$28 sps:$4 sm:$0xff]   ;;  %v20331_v52 = vld [vmem:[#allocation26 + $0x46c] ss:$28 sps:$4 sm:$0xff]  }
 0xb78   :  { %15755 = vmatpush1.bf16.msra.mxu0 %v20290_v5  ;;  %15841 = vmatpush1.bf16.msra.mxu1 %v20293_v22  ;;  %v20326_v5 = vld [vmem:[#allocation26 + $0x460] ss:$28 sps:$4 sm:$0xff]   ;;  %v20329_v22 = vld [vmem:[#allocation26 + $0x468] ss:$28 sps:$4 sm:$0xff]  }
 0xb79   :  { %15756 = vmatprep.subr.bf16.mxu0 %v20298_v9  ;;  %15842 = vmatprep.subr.bf16.mxu1 %v20301_v16  ;;  %v20334_v9 = vld [vmem:[#allocation26 + $0x49c] ss:$28 sps:$4 sm:$0xff]   ;;  %v20337_v16 = vld [vmem:[#allocation26 + $0x4a4] ss:$28 sps:$4 sm:$0xff]  }
 0xb7c   :  { %15757 = vmatpush1.bf16.msra.mxu0 %v20296_v13  ;;  %15843 = vmatpush1.bf16.msra.mxu1 %v20299_v10  ;;  %v20332_v13 = vld [vmem:[#allocation26 + $0x498] ss:$28 sps:$4 sm:$0xff]   ;;  %v20335_v10 = vld [vmem:[#allocation26 + $0x4a0] ss:$28 sps:$4 sm:$0xff]  }
 0xb7d   :  { %15769 = vmatprep.subr.bf16.mxu0 %v20304_v12  ;;  %15855 = vmatprep.subr.bf16.mxu1 %v20307_v7  ;;  %v20340_v12 = vld [vmem:[#allocation26 + $0x4d4] ss:$28 sps:$4 sm:$0xff]   ;;  %v20343_v7 = vld [vmem:[#allocation26 + $0x4dc] ss:$28 sps:$4 sm:$0xff]  }
 0xc12   :  { %v14174_v33 = vpop.f32.mrb[60].mxu0  ;;  %v14260_v39 = vpop.f32.mrb[64].mxu1 }
 0xc13   :  { %v18393_v27 = vadd.f32 %v14174_v33, %v13440_v8  ;;  %v18397_v30 = vadd.f32 %v14260_v39, %v13448_v24  ;;  %v14176_v61 = vpop.f32.mrb[61].mxu0  ;;  %v14262_v29 = vpop.f32.mrb[65].mxu1  ;;  %v20347_v33 = vld [vmem:[#allocation26 + $0x510] ss:$28 sps:$4 sm:$0xff]   ;;  %v20352_v39 = vld [vmem:[#allocation26 + $0x544] ss:$28 sps:$4 sm:$0xff]  }
 0xc14   :  { %v18394_v34 = vadd.f32 %v14176_v61, %v13444_v25  ;;  %v18398_v32 = vadd.f32 %v14262_v29, %v13452_v35  ;;  %v14178_v36 = vpop.f32.mrb[62].mxu0  ;;  %v14264_v23 = vpop.f32.mrb[66].mxu1  ;;  %v20353_v61 = vld [vmem:[#allocation26 + $0x548] ss:$28 sps:$4 sm:$0xff]   ;;  %v20358_v29 = vld [vmem:[#allocation26 + $0x57c] ss:$28 sps:$4 sm:$0xff]  }
 0xc15   :  { %v18395_v63 = vadd.f32 %v14178_v36, %v13440_v8  ;;  %v18399_v56 = vadd.f32 %v14264_v23, %v13448_v24  ;;  %v14180_v62 = vpop.f32.mrb[63].mxu0  ;;  %v14266_v38 = vpop.f32.mrb[67].mxu1  ;;  %v14269_v0 = vmax.f32 %v18393_v27, 0.0  ;;  %v14271_v42 = vmax.f32 %v18397_v30, 0.0  ;;  %v20341_v8 = vld [vmem:[#allocation26 + $0x4d8] ss:$28 sps:$4 sm:$0xff]  }
 0xc16   :  { %v18396_v41 = vadd.f32 %v14180_v62, %v13444_v25  ;;  %v18400_v28 = vadd.f32 %v14266_v38, %v13452_v35  ;;  %v14270_v44 = vmax.f32 %v18394_v34, 0.0  ;;  %v14272_v45 = vmax.f32 %v18398_v32, 0.0  ;;  %v20346_v24 = vld [vmem:[#allocation26 + $0x50c] ss:$28 sps:$4 sm:$0xff]   ;;  %v20349_v25 = vld [vmem:[#allocation26 + $0x514] ss:$28 sps:$4 sm:$0xff]  }
 0xc17   :  { %v14273_v21 = vmax.f32 %v18395_v63, 0.0  ;;  %v14275_v43 = vmax.f32 %v18399_v56, 0.0  ;;  %v20344_v35 = vld [vmem:[#allocation26 + $0x508] ss:$28 sps:$4 sm:$0xff]   ;;  %v20350_v30 = vld [vmem:[#allocation26 + $0x540] ss:$28 sps:$4 sm:$0xff]  }
 0xc18   :  { %v14274_v40 = vmax.f32 %v18396_v41, 0.0  ;;  %v14276_v46 = vmax.f32 %v18400_v28, 0.0  ;;  %v20355_v27 = vld [vmem:[#allocation26 + $0x54c] ss:$28 sps:$4 sm:$0xff]   ;;  %v20361_v34 = vld [vmem:[#allocation26 + $0x584] ss:$28 sps:$4 sm:$0xff]  }
 0xc19   :  { %v21612_v47 = vpack.c.bf16 %v14273_v21, %v14269_v0  ;;  %v21614_v48 = vpack.c.bf16 %v14275_v43, %v14271_v42  ;;  %v20356_v32 = vld [vmem:[#allocation26 + $0x578] ss:$28 sps:$4 sm:$0xff]   ;;  %v20359_v36 = vld [vmem:[#allocation26 + $0x580] ss:$28 sps:$4 sm:$0xff]   ;;  %v20362_v56 = vld [vmem:[#allocation26 + $0x5b0] ss:$28 sps:$4 sm:$0xff]  }
 0xc1a   :  { %v21616_v49 = vpack.c.bf16 %v14274_v40, %v14270_v44  ;;  %v21618_v17 = vpack.c.bf16 %v14276_v46, %v14272_v45  ;;  %v20364_v23 = vld [vmem:[#allocation26 + $0x5b4] ss:$28 sps:$4 sm:$0xff]   ;;  %v20367_v63 = vld [vmem:[#allocation26 + $0x5bc] ss:$28 sps:$4 sm:$0xff]   ;;  %v20370_v38 = vld [vmem:[#allocation26 + $0x5ec] ss:$28 sps:$4 sm:$0xff]  }
 0xc1b   :  { %v20365_v62 = vld [vmem:[#allocation26 + $0x5b8] ss:$28 sps:$4 sm:$0xff]   ;;  %v20368_v28 = vld [vmem:[#allocation26 + $0x5e8] ss:$28 sps:$4 sm:$0xff]   ;;  %v20371_v0 = vld [vmem:[#allocation26 + $0x5f0] ss:$28 sps:$4 sm:$0xff]  }
 0xc1c   :  { %15758 = vmatprep.mubr.bf16.mxu0 %v21616_v49  ;;  %15844 = vmatprep.mubr.bf16.mxu1 %v21616_v49  ;;  %v20373_v41 = vld [vmem:[#allocation26 + $0x5f4] ss:$28 sps:$4 sm:$0xff]   ;;  %v20376_v42 = vld [vmem:[#allocation26 + $0x624] ss:$28 sps:$4 sm:$0xff]   ;;  %v20379_v21 = vld [vmem:[#allocation26 + $0x62c] ss:$28 sps:$4 sm:$0xff]  }
 0xc1d   :  { %15759 = vmatmul.mubr.bf16.vlgmr.msra.gmra.mrb[64].mxu0 %v21612_v47  ;;  %15845 = vmatmul.mubr.bf16.vlgmr.msra.gmra.mrb[68].mxu1 %v21612_v47  ;;  %v20374_v43 = vld [vmem:[#allocation26 + $0x620] ss:$28 sps:$4 sm:$0xff]   ;;  %v20377_v44 = vld [vmem:[#allocation26 + $0x628] ss:$28 sps:$4 sm:$0xff]   ;;  %v20380_v46 = vld [vmem:[#allocation26 + $0x658] ss:$28 sps:$4 sm:$0xff]  }
 0xc1e   :  { %15770 = vmatpush1.bf16.msra.mxu0 %v20302_v50  ;;  %15856 = vmatpush1.bf16.msra.mxu1 %v20305_v51  ;;  %v20382_v45 = vld [vmem:[#allocation26 + $0x65c] ss:$28 sps:$4 sm:$0xff]   ;;  %v20385_v40 = vld [vmem:[#allocation26 + $0x664] ss:$28 sps:$4 sm:$0xff]   ;;  %v20388_v51 = vld [vmem:[#allocation26 + $0x694] ss:$28 sps:$4 sm:$0xff]  }
 0xc1f   :  { %15801 = vmatprep.mubr.bf16.mxu0 %v21618_v17  ;;  %15887 = vmatprep.mubr.bf16.mxu1 %v21618_v17  ;;  %v20383_v50 = vld [vmem:[#allocation26 + $0x660] ss:$28 sps:$4 sm:$0xff]  }
 0xc20   :  { %15771 = vmatprep.subr.bf16.mxu0 %v20310_v57  ;;  %15857 = vmatprep.subr.bf16.mxu1 %v20313_v58  ;;  %v20391_v57 = vld [vmem:[#allocation26 + $0x69c] ss:$28 sps:$4 sm:$0xff]   ;;  %v20386_v58 = vld [vmem:[#allocation26 + $0x690] ss:$28 sps:$4 sm:$0xff]  }
 0xc22   :  { %15772 = vmatpush1.bf16.msra.mxu0 %v20308_v59  ;;  %15858 = vmatpush1.bf16.msra.mxu1 %v20311_v54  ;;  %v20389_v59 = vld [vmem:[#allocation26 + $0x698] ss:$28 sps:$4 sm:$0xff]   ;;  %v20394_v54 = vld [vmem:[#allocation26 + $0x6cc] ss:$28 sps:$4 sm:$0xff]  }
 0xc23   :  { %15773 = vmatprep.subr.bf16.mxu0 %v20316_v26  ;;  %15859 = vmatprep.subr.bf16.mxu1 %v20319_v15  ;;  %v20397_v26 = vld [vmem:[#allocation26 + $0x6d4] ss:$28 sps:$4 sm:$0xff]   ;;  %v20392_v15 = vld [vmem:[#allocation26 + $0x6c8] ss:$28 sps:$4 sm:$0xff]  }
 0xc26   :  { %15774 = vmatpush1.bf16.msra.mxu0 %v20314_v60  ;;  %15860 = vmatpush1.bf16.msra.mxu1 %v20317_v1  ;;  %v20395_v60 = vld [vmem:[#allocation26 + $0x6d0] ss:$28 sps:$4 sm:$0xff]  }
 0xc27   :  { %15775 = vmatprep.subr.bf16.mxu0 %v20322_v2  ;;  %15861 = vmatprep.subr.bf16.mxu1 %v20325_v31  ;;  %v20400_v1 = vld [vmem:[#allocation26 + $0x14] ss:$28 sps:$4 sm:$0xff]  }
 0xc28   :  { %v20401_v2 = vld [vmem:[#allocation26 + $0x1d8] ss:$28 sps:$4 sm:$0xff]   ;;  %v20398_v31 = vld [vmem:[#allocation26 + $0x10] ss:$28 sps:$4 sm:$0xff]  }
 0xc2a   :  { %15776 = vmatpush1.bf16.msra.mxu0 %v20320_v20  ;;  %15862 = vmatpush1.bf16.msra.mxu1 %v20323_v4  ;;  %v20402_v20 = vld [vmem:[#allocation26 + $0x18] ss:$28 sps:$4 sm:$0xff]   ;;  %v20405_v4 = vld [vmem:[#allocation26 + $0x4c] ss:$28 sps:$4 sm:$0xff]  }
 0xc2b   :  { %15777 = vmatprep.subr.bf16.mxu0 %v20328_v3  ;;  %15863 = vmatprep.subr.bf16.mxu1 %v20331_v52  ;;  %v20406_v3 = vld [vmem:[#allocation26 + $0x210] ss:$28 sps:$4 sm:$0xff]   ;;  %v20403_v52 = vld [vmem:[#allocation26 + $0x48] ss:$28 sps:$4 sm:$0xff]  }
 0xc2e   :  { %15778 = vmatpush1.bf16.msra.mxu0 %v20326_v5  ;;  %15864 = vmatpush1.bf16.msra.mxu1 %v20329_v22  ;;  %v20407_v5 = vld [vmem:[#allocation26 + $0x50] ss:$28 sps:$4 sm:$0xff]   ;;  %v20410_v22 = vld [vmem:[#allocation26 + $0x84] ss:$28 sps:$4 sm:$0xff]  }
 0xc2f   :  { %15779 = vmatprep.subr.bf16.mxu0 %v20334_v9  ;;  %15865 = vmatprep.subr.bf16.mxu1 %v20337_v16  ;;  %v20411_v9 = vld [vmem:[#allocation26 + $0x248] ss:$28 sps:$4 sm:$0xff]   ;;  %v20408_v16 = vld [vmem:[#allocation26 + $0x80] ss:$28 sps:$4 sm:$0xff]  }
 0xc32   :  { %15780 = vmatpush1.bf16.msra.mxu0 %v20332_v13  ;;  %15866 = vmatpush1.bf16.msra.mxu1 %v20335_v10  ;;  %v20412_v13 = vld [vmem:[#allocation26 + $0x88] ss:$28 sps:$4 sm:$0xff]   ;;  %v20415_v10 = vld [vmem:[#allocation26 + $0xbc] ss:$28 sps:$4 sm:$0xff]  }
 0xc33   :  { %15781 = vmatprep.subr.bf16.mxu0 %v20340_v12  ;;  %15867 = vmatprep.subr.bf16.mxu1 %v20343_v7  ;;  %v20416_v12 = vld [vmem:[#allocation26 + $0x280] ss:$28 sps:$4 sm:$0xff]   ;;  %v20413_v7 = vld [vmem:[#allocation26 + $0xb8] ss:$28 sps:$4 sm:$0xff]  }
 0xc36   :  { %15782 = vmatpush1.bf16.msra.mxu0 %v20338_v37  ;;  %15868 = vmatpush1.bf16.msra.mxu1 %v20341_v8  ;;  %v20417_v37 = vld [vmem:[#allocation26 + $0xc0] ss:$28 sps:$4 sm:$0xff]   ;;  %v20420_v8 = vld [vmem:[#allocation26 + $0xf4] ss:$28 sps:$4 sm:$0xff]  }
 0xc37   :  { %15783 = vmatprep.subr.bf16.mxu0 %v20346_v24  ;;  %15869 = vmatprep.subr.bf16.mxu1 %v20349_v25  ;;  %v20418_v24 = vld [vmem:[#allocation26 + $0xf0] ss:$28 sps:$4 sm:$0xff]   ;;  %v20422_v25 = vld [vmem:[#allocation26 + $0xf8] ss:$28 sps:$4 sm:$0xff]  }
 0xc3a   :  { %15784 = vmatpush1.bf16.msra.mxu0 %v20344_v35  ;;  %15870 = vmatpush1.bf16.msra.mxu1 %v20347_v33  ;;  %v20425_v35 = vld [vmem:[#allocation26 + $0x12c] ss:$28 sps:$4 sm:$0xff]  }
 0xc3b   :  { %15785 = vmatprep.subr.bf16.mxu0 %v20352_v39  ;;  %15871 = vmatprep.subr.bf16.mxu1 %v20355_v27  ;;  %v20426_v33 = vld [vmem:[#allocation26 + $0x2f0] ss:$28 sps:$4 sm:$0xff]   ;;  %v20423_v39 = vld [vmem:[#allocation26 + $0x128] ss:$28 sps:$4 sm:$0xff]  }
 0xc3c   :  { %v20427_v27 = vld [vmem:[#allocation26 + $0x130] ss:$28 sps:$4 sm:$0xff]  }
 0xc3e   :  { %15786 = vmatpush1.bf16.msra.mxu0 %v20350_v30  ;;  %15872 = vmatpush1.bf16.msra.mxu1 %v20353_v61  ;;  %v20430_v30 = vld [vmem:[#allocation26 + $0x164] ss:$28 sps:$4 sm:$0xff]  }
 0xc3f   :  { %15787 = vmatprep.subr.bf16.mxu0 %v20358_v29  ;;  %15873 = vmatprep.subr.bf16.mxu1 %v20361_v34  ;;  %v20431_v61 = vld [vmem:[#allocation26 + $0x328] ss:$28 sps:$4 sm:$0xff]   ;;  %v20428_v29 = vld [vmem:[#allocation26 + $0x160] ss:$28 sps:$4 sm:$0xff]  }
 0xc40   :  { %v20432_v34 = vld [vmem:[#allocation26 + $0x168] ss:$28 sps:$4 sm:$0xff]  }
 0xc42   :  { %15788 = vmatpush1.bf16.msra.mxu0 %v20356_v32  ;;  %15874 = vmatpush1.bf16.msra.mxu1 %v20359_v36  ;;  %v20435_v32 = vld [vmem:[#allocation26 + $0x19c] ss:$28 sps:$4 sm:$0xff]  }
 0xc43   :  { %15789 = vmatprep.subr.bf16.mxu0 %v20364_v23  ;;  %15875 = vmatprep.subr.bf16.mxu1 %v20367_v63  ;;  %v20436_v36 = vld [vmem:[#allocation26 + $0x360] ss:$28 sps:$4 sm:$0xff]   ;;  %v20433_v23 = vld [vmem:[#allocation26 + $0x198] ss:$28 sps:$4 sm:$0xff]  }
 0xc44   :  { %v20437_v63 = vld [vmem:[#allocation26 + $0x1a0] ss:$28 sps:$4 sm:$0xff]  }
 0xc46   :  { %15790 = vmatpush1.bf16.msra.mxu0 %v20362_v56  ;;  %15876 = vmatpush1.bf16.msra.mxu1 %v20365_v62  ;;  %v20440_v56 = vld [vmem:[#allocation26 + $0x1d4] ss:$28 sps:$4 sm:$0xff]  }
 0xc47   :  { %15791 = vmatprep.subr.bf16.mxu0 %v20370_v38  ;;  %15877 = vmatprep.subr.bf16.mxu1 %v20373_v41  ;;  %v20441_v62 = vld [vmem:[#allocation26 + $0x558] ss:$28 sps:$4 sm:$0xff]   ;;  %v20438_v38 = vld [vmem:[#allocation26 + $0x1d0] ss:$28 sps:$4 sm:$0xff]  }
 0xc48   :  { %v20442_v41 = vld [vmem:[#allocation26 + $0x398] ss:$28 sps:$4 sm:$0xff]  }
 0xc4a   :  { %15792 = vmatpush1.bf16.msra.mxu0 %v20368_v28  ;;  %15878 = vmatpush1.bf16.msra.mxu1 %v20371_v0  ;;  %v20445_v28 = vld [vmem:[#allocation26 + $0x20c] ss:$28 sps:$4 sm:$0xff]  }
 0xc4b   :  { %15793 = vmatprep.subr.bf16.mxu0 %v20376_v42  ;;  %15879 = vmatprep.subr.bf16.mxu1 %v20379_v21  ;;  %v20446_v0 = vld [vmem:[#allocation26 + $0x590] ss:$28 sps:$4 sm:$0xff]   ;;  %v20443_v42 = vld [vmem:[#allocation26 + $0x208] ss:$28 sps:$4 sm:$0xff]  }
 0xc4c   :  { %v20447_v21 = vld [vmem:[#allocation26 + $0x3d0] ss:$28 sps:$4 sm:$0xff]  }
 0xc4e   :  { %15794 = vmatpush1.bf16.msra.mxu0 %v20374_v43  ;;  %15880 = vmatpush1.bf16.msra.mxu1 %v20377_v44  ;;  %v20450_v43 = vld [vmem:[#allocation26 + $0x244] ss:$28 sps:$4 sm:$0xff]  }
 0xc4f   :  { %15795 = vmatprep.subr.bf16.mxu0 %v20382_v45  ;;  %15881 = vmatprep.subr.bf16.mxu1 %v20385_v40  ;;  %v20451_v44 = vld [vmem:[#allocation26 + $0x5c8] ss:$28 sps:$4 sm:$0xff]   ;;  %v20448_v45 = vld [vmem:[#allocation26 + $0x240] ss:$28 sps:$4 sm:$0xff]  }
 0xc50   :  { %v20452_v40 = vld [vmem:[#allocation26 + $0x408] ss:$28 sps:$4 sm:$0xff]  }
 0xc52   :  { %15796 = vmatpush1.bf16.msra.mxu0 %v20380_v46  ;;  %15882 = vmatpush1.bf16.msra.mxu1 %v20383_v50  ;;  %v20455_v46 = vld [vmem:[#allocation26 + $0x27c] ss:$28 sps:$4 sm:$0xff]  }
 0xc53   :  { %15797 = vmatprep.subr.bf16.mxu0 %v20388_v51  ;;  %15883 = vmatprep.subr.bf16.mxu1 %v20391_v57  ;;  %v20456_v50 = vld [vmem:[#allocation26 + $0x600] ss:$28 sps:$4 sm:$0xff]   ;;  %v20453_v51 = vld [vmem:[#allocation26 + $0x278] ss:$28 sps:$4 sm:$0xff]  }
 0xc54   :  { %v20457_v57 = vld [vmem:[#allocation26 + $0x440] ss:$28 sps:$4 sm:$0xff]  }
 0xc56   :  { %15798 = vmatpush1.bf16.msra.mxu0 %v20386_v58  ;;  %15884 = vmatpush1.bf16.msra.mxu1 %v20389_v59  ;;  %v20460_v58 = vld [vmem:[#allocation26 + $0x2b4] ss:$28 sps:$4 sm:$0xff]  }
 0xc57   :  { %15799 = vmatprep.subr.bf16.mxu0 %v20394_v54  ;;  %15885 = vmatprep.subr.bf16.mxu1 %v20397_v26  ;;  %v20461_v59 = vld [vmem:[#allocation26 + $0x638] ss:$28 sps:$4 sm:$0xff]   ;;  %v20458_v54 = vld [vmem:[#allocation26 + $0x2b0] ss:$28 sps:$4 sm:$0xff]  }
 0xc58   :  { %v20462_v26 = vld [vmem:[#allocation26 + $0x478] ss:$28 sps:$4 sm:$0xff]  }
 0xc5a   :  { %15800 = vmatpush1.bf16.msra.mxu0 %v20392_v15  ;;  %15886 = vmatpush1.bf16.msra.mxu1 %v20395_v60  ;;  %v20465_v15 = vld [vmem:[#allocation26 + $0x2ec] ss:$28 sps:$4 sm:$0xff]  }
 0xc5b   :  { %15898 = vmatprep.subr.bf16.mxu0 %v20400_v1  ;;  %18289 = vmatprep.subr.bf16.mxu1 %v20401_v2  ;;  %v20466_v60 = vld [vmem:[#allocation26 + $0x670] ss:$28 sps:$4 sm:$0xff]   ;;  %v20463_v1 = vld [vmem:[#allocation26 + $0x2e8] ss:$28 sps:$4 sm:$0xff]  }
 0xc5c   :  { %v20467_v2 = vld [vmem:[#allocation26 + $0x4b0] ss:$28 sps:$4 sm:$0xff]  }
 0xc5d   :  { %15802 = vmatmul.mubr.bf16.vlgmr.msra.gmra.mrb[64].mxu0 %v21614_v48  ;;  %15888 = vmatmul.mubr.bf16.vlgmr.msra.gmra.mrb[68].mxu1 %v21614_v48 }
 0xc5e   :  { %15899 = vmatpush1.bf16.msra.mxu0 %v20398_v31  ;;  %15930 = vmatprep.mubr.bf16.mxu0 %v21616_v49  ;;  %v20470_v31 = vld [vmem:[#allocation26 + $0x324] ss:$28 sps:$4 sm:$0xff]  }
 0xc5f   :  { %18290 = vmatpush3.bf16.msra.mxu1 %v20402_v20  ;;  %16016 = vmatprep.mubr.bf16.mxu1 %v21616_v49  ;;  %v20421_v49 = vld [vmem:[#allocation26 + $0x2b8] ss:$28 sps:$4 sm:$0xff]   ;;  %v20471_v20 = vld [vmem:[#allocation26 + $0x6a8] ss:$28 sps:$4 sm:$0xff]  }
 0xc60   :  { %15900 = vmatprep.subr.bf16.mxu0 %v20405_v4  ;;  %18291 = vmatprep.subr.bf16.mxu1 %v20406_v3  ;;  %v20468_v4 = vld [vmem:[#allocation26 + $0x320] ss:$28 sps:$4 sm:$0xff]   ;;  %v20472_v3 = vld [vmem:[#allocation26 + $0x4e8] ss:$28 sps:$4 sm:$0xff]  }
 0xc62   :  { %15901 = vmatpush1.bf16.msra.mxu0 %v20403_v52  ;;  %v20475_v52 = vld [vmem:[#allocation26 + $0x35c] ss:$28 sps:$4 sm:$0xff]  }
 0xc63   :  { %18292 = vmatpush3.bf16.msra.mxu1 %v20407_v5  ;;  %15902 = vmatprep.subr.bf16.mxu0 %v20410_v22  ;;  %v20476_v5 = vld [vmem:[#allocation26 + $0x6e0] ss:$28 sps:$4 sm:$0xff]   ;;  %v20473_v22 = vld [vmem:[#allocation26 + $0x358] ss:$28 sps:$4 sm:$0xff]  }
 0xc64   :  { %18293 = vmatprep.subr.bf16.mxu1 %v20411_v9  ;;  %v20477_v9 = vld [vmem:[#allocation26 + $0x520] ss:$28 sps:$4 sm:$0xff]  }
 0xc66   :  { %15903 = vmatpush1.bf16.msra.mxu0 %v20408_v16  ;;  %v20480_v16 = vld [vmem:[#allocation26 + $0x394] ss:$28 sps:$4 sm:$0xff]  }
 0xc67   :  { %18294 = vmatpush3.bf16.msra.mxu1 %v20412_v13  ;;  %15904 = vmatprep.subr.bf16.mxu0 %v20415_v10  ;;  %v20478_v13 = vld [vmem:[#allocation26 + $0x390] ss:$28 sps:$4 sm:$0xff]  }
 0xc68   :  { %18295 = vmatprep.subr.bf16.mxu1 %v20416_v12  ;;  %v20483_v10 = vld [vmem:[#allocation26 + $0x3cc] ss:$28 sps:$4 sm:$0xff]  }
 0xc69   :  { %v20481_v12 = vld [vmem:[#allocation26 + $0x3c8] ss:$28 sps:$4 sm:$0xff]  }
 0xc6a   :  { %15905 = vmatpush1.bf16.msra.mxu0 %v20413_v7  ;;  %v20486_v7 = vld [vmem:[#allocation26 + $0x404] ss:$28 sps:$4 sm:$0xff]  }
 0xc6b   :  { %18296 = vmatpush3.bf16.msra.mxu1 %v20417_v37  ;;  %15906 = vmatprep.subr.bf16.mxu0 %v20420_v8  ;;  %v20484_v37 = vld [vmem:[#allocation26 + $0x400] ss:$28 sps:$4 sm:$0xff]  }
 0xc6c   :  { %18297 = vmatprep.subr.bf16.mxu1 %v20421_v49  ;;  %v20489_v8 = vld [vmem:[#allocation26 + $0x43c] ss:$28 sps:$4 sm:$0xff]  }
 0xc6d   :  { %v20487_v49 = vld [vmem:[#allocation26 + $0x438] ss:$28 sps:$4 sm:$0xff]  }
 0xc6e   :  { %15907 = vmatpush1.bf16.msra.mxu0 %v20418_v24  ;;  %v20492_v24 = vld [vmem:[#allocation26 + $0x474] ss:$28 sps:$4 sm:$0xff]  }
 0xc6f   :  { %18298 = vmatpush3.bf16.msra.mxu1 %v20422_v25  ;;  %15908 = vmatprep.subr.bf16.mxu0 %v20425_v35  ;;  %v20490_v25 = vld [vmem:[#allocation26 + $0x470] ss:$28 sps:$4 sm:$0xff]   ;;  %v20493_v35 = vld [vmem:[#allocation26 + $0x4a8] ss:$28 sps:$4 sm:$0xff]  }
 0xc70   :  { %18299 = vmatprep.subr.bf16.mxu1 %v20426_v33  ;;  %v20498_v33 = vld [vmem:[#allocation26 + $0x4e4] ss:$28 sps:$4 sm:$0xff]  }
 0xc72   :  { %15909 = vmatpush1.bf16.msra.mxu0 %v20423_v39  ;;  %v20501_v39 = vld [vmem:[#allocation26 + $0x51c] ss:$28 sps:$4 sm:$0xff]  }
 0xc73   :  { %18300 = vmatpush3.bf16.msra.mxu1 %v20427_v27  ;;  %15910 = vmatprep.subr.bf16.mxu0 %v20430_v30  ;;  %v20499_v27 = vld [vmem:[#allocation26 + $0x518] ss:$28 sps:$4 sm:$0xff]  }
 0xc74   :  { %18301 = vmatprep.subr.bf16.mxu1 %v20431_v61  ;;  %v20504_v30 = vld [vmem:[#allocation26 + $0x554] ss:$28 sps:$4 sm:$0xff]  }
 0xc75   :  { %v20502_v61 = vld [vmem:[#allocation26 + $0x550] ss:$28 sps:$4 sm:$0xff]  }
 0xc76   :  { %15911 = vmatpush1.bf16.msra.mxu0 %v20428_v29  ;;  %v20507_v29 = vld [vmem:[#allocation26 + $0x58c] ss:$28 sps:$4 sm:$0xff]  }
 0xc77   :  { %18302 = vmatpush3.bf16.msra.mxu1 %v20432_v34  ;;  %15912 = vmatprep.subr.bf16.mxu0 %v20435_v32  ;;  %v20505_v34 = vld [vmem:[#allocation26 + $0x588] ss:$28 sps:$4 sm:$0xff]  }
 0xc78   :  { %18303 = vmatprep.subr.bf16.mxu1 %v20436_v36  ;;  %v20510_v32 = vld [vmem:[#allocation26 + $0x5c4] ss:$28 sps:$4 sm:$0xff]  }
 0xc79   :  { %v20508_v36 = vld [vmem:[#allocation26 + $0x5c0] ss:$28 sps:$4 sm:$0xff]  }
 0xc7a   :  { %15913 = vmatpush1.bf16.msra.mxu0 %v20433_v23  ;;  %v20513_v23 = vld [vmem:[#allocation26 + $0x5fc] ss:$28 sps:$4 sm:$0xff]  }
 0xc7b   :  { %18304 = vmatpush3.bf16.msra.mxu1 %v20437_v63  ;;  %15914 = vmatprep.subr.bf16.mxu0 %v20440_v56  ;;  %v20511_v63 = vld [vmem:[#allocation26 + $0x5f8] ss:$28 sps:$4 sm:$0xff]  }
 0xc7c   :  { %18311 = vmatprep.subr.bf16.mxu1 %v20441_v62  ;;  %v20516_v56 = vld [vmem:[#allocation26 + $0x634] ss:$28 sps:$4 sm:$0xff]  }
 0xc7d   :  { %v20514_v62 = vld [vmem:[#allocation26 + $0x630] ss:$28 sps:$4 sm:$0xff]  }
 0xc7e   :  { %16017 = vmatmul.mubr.bf16.vlgmr.msra.gmra.mrb[72].mxu1 %v21612_v47  ;;  %15915 = vmatpush1.bf16.msra.mxu0 %v20438_v38  ;;  %v20519_v38 = vld [vmem:[#allocation26 + $0x66c] ss:$28 sps:$4 sm:$0xff]  }
 0xc7f   :  { %18312 = vmatpush3.bf16.msra.mxu1 %v20442_v41  ;;  %16057 = vmatprep.mubr.bf16.mxu1 %v21618_v17  ;;  %v20517_v41 = vld [vmem:[#allocation26 + $0x668] ss:$28 sps:$4 sm:$0xff]  }
 0xc80   :  { %15916 = vmatprep.subr.bf16.mxu0 %v20445_v28  ;;  %18313 = vmatprep.subr.bf16.mxu1 %v20446_v0  ;;  %v20522_v28 = vld [vmem:[#allocation26 + $0x6a4] ss:$28 sps:$4 sm:$0xff]  }
 0xc81   :  { %v20520_v0 = vld [vmem:[#allocation26 + $0x6a0] ss:$28 sps:$4 sm:$0xff]  }
 0xc82   :  { %15917 = vmatpush1.bf16.msra.mxu0 %v20443_v42  ;;  %v20525_v42 = vld [vmem:[#allocation26 + $0x6dc] ss:$28 sps:$4 sm:$0xff]  }
 0xc83   :  { %18314 = vmatpush3.bf16.msra.mxu1 %v20447_v21  ;;  %15918 = vmatprep.subr.bf16.mxu0 %v20450_v43  ;;  %v20523_v21 = vld [vmem:[#allocation26 + $0x6d8] ss:$28 sps:$4 sm:$0xff]   ;;  %v21636_v43 = vld [vmem:[#allocation28] sm:$0xff] }
 0xc84   :  { %18315 = vmatprep.subr.bf16.mxu1 %v20451_v44  ;;  %v14542_v44 = vrot.slane %v21636_v43, %v21353_v53 }
 0xc86   :  { %15919 = vmatpush1.bf16.msra.mxu0 %v20448_v45  ;;  %v14550_v45 = vrot.slane %v21636_v43, %v21369_v6 }
 0xc87   :  { %18316 = vmatpush3.bf16.msra.mxu1 %v20452_v40  ;;  %15920 = vmatprep.subr.bf16.mxu0 %v20455_v46  ;;  %v14546_v40 = vrot.slane %v21636_v43, %v21358_v55  ;;  %v14554_v46 = vrot.slane %v21636_v43, %v21372_v11 }
 0xc88   :  { %18317 = vmatprep.subr.bf16.mxu1 %v20456_v50 }
 0xc8a   :  { %15921 = vmatpush1.bf16.msra.mxu0 %v20453_v51 }
 0xc8b   :  { %18318 = vmatpush3.bf16.msra.mxu1 %v20457_v57  ;;  %15922 = vmatprep.subr.bf16.mxu0 %v20460_v58 }
 0xc8c   :  { %18319 = vmatprep.subr.bf16.mxu1 %v20461_v59 }
 0xc8e   :  { %15923 = vmatpush1.bf16.msra.mxu0 %v20458_v54 }
 0xc8f   :  { %18320 = vmatpush3.bf16.msra.mxu1 %v20462_v26  ;;  %15924 = vmatprep.subr.bf16.mxu0 %v20465_v15 }
 0xc90   :  { %18321 = vmatprep.subr.bf16.mxu1 %v20466_v60 }
 0xc92   :  { %15925 = vmatpush1.bf16.msra.mxu0 %v20463_v1 }
 0xc93   :  { %18322 = vmatpush3.bf16.msra.mxu1 %v20467_v2  ;;  %15926 = vmatprep.subr.bf16.mxu0 %v20470_v31 }
 0xc94   :  { %18323 = vmatprep.subr.bf16.mxu1 %v20471_v20 }
 0xc96   :  { %15927 = vmatpush1.bf16.msra.mxu0 %v20468_v4 }
 0xc97   :  { %18324 = vmatpush3.bf16.msra.mxu1 %v20472_v3  ;;  %15928 = vmatprep.subr.bf16.mxu0 %v20475_v52 }
 0xc98   :  { %18325 = vmatprep.subr.bf16.mxu1 %v20476_v5 }
 0xc9a   :  { %15929 = vmatpush1.bf16.msra.mxu0 %v20473_v22 }
 0xc9b   :  { %18326 = vmatpush3.bf16.msra.mxu1 %v20477_v9  ;;  %15941 = vmatprep.subr.bf16.mxu0 %v20480_v16 }
 0xc9d   :  { %15931 = vmatmul.mubr.bf16.vlgmr.msra.gmra.mrb[68].mxu0 %v21612_v47  ;;  %v20495_v47 = vld [vmem:[#allocation26 + $0x4ac] ss:$28 sps:$4 sm:$0xff]  }
 0xc9e   :  { %16058 = vmatmul.mubr.bf16.vlgmr.msra.gmra.mrb[76].mxu1 %v21614_v48  ;;  %15942 = vmatpush1.bf16.msra.mxu0 %v20478_v13 }
 0xc9f   :  { %15973 = vmatprep.mubr.bf16.mxu0 %v21618_v17  ;;  %15943 = vmatprep.subr.bf16.mxu0 %v20483_v10  ;;  %v20496_v17 = vld [vmem:[#allocation26 + $0x4e0] ss:$28 sps:$4 sm:$0xff]  }
 0xca2   :  { %15944 = vmatpush1.bf16.msra.mxu0 %v20481_v12 }
 0xca3   :  { %15945 = vmatprep.subr.bf16.mxu0 %v20486_v7 }
 0xca6   :  { %15946 = vmatpush1.bf16.msra.mxu0 %v20484_v37 }
 0xca7   :  { %15947 = vmatprep.subr.bf16.mxu0 %v20489_v8 }
 0xcaa   :  { %15948 = vmatpush1.bf16.msra.mxu0 %v20487_v49 }
 0xcab   :  { %15949 = vmatprep.subr.bf16.mxu0 %v20492_v24 }
 0xcae   :  { %15950 = vmatpush1.bf16.msra.mxu0 %v20490_v25 }
 0xcaf   :  { %15951 = vmatprep.subr.bf16.mxu0 %v20495_v47 }
 0xcb2   :  { %15952 = vmatpush1.bf16.msra.mxu0 %v20493_v35 }
 0xcb3   :  { %15953 = vmatprep.subr.bf16.mxu0 %v20498_v33 }
 0xcb6   :  { %15954 = vmatpush1.bf16.msra.mxu0 %v20496_v17 }
 0xcb7   :  { %15955 = vmatprep.subr.bf16.mxu0 %v20501_v39 }
 0xcba   :  { %15956 = vmatpush1.bf16.msra.mxu0 %v20499_v27 }
 0xcbb   :  { %15957 = vmatprep.subr.bf16.mxu0 %v20504_v30 }
 0xcbe   :  { %15958 = vmatpush1.bf16.msra.mxu0 %v20502_v61 }
 0xcbf   :  { %15959 = vmatprep.subr.bf16.mxu0 %v20507_v29 }
 0xcc2   :  { %15960 = vmatpush1.bf16.msra.mxu0 %v20505_v34 }
 0xcc3   :  { %15961 = vmatprep.subr.bf16.mxu0 %v20510_v32 }
 0xcc6   :  { %15962 = vmatpush1.bf16.msra.mxu0 %v20508_v36 }
 0xcc7   :  { %15963 = vmatprep.subr.bf16.mxu0 %v20513_v23 }
 0xcca   :  { %15964 = vmatpush1.bf16.msra.mxu0 %v20511_v63 }
 0xccb   :  { %15965 = vmatprep.subr.bf16.mxu0 %v20516_v56 }
 0xcce   :  { %15966 = vmatpush1.bf16.msra.mxu0 %v20514_v62 }
 0xccf   :  { %15967 = vmatprep.subr.bf16.mxu0 %v20519_v38 }
 0xcd2   :  { %15968 = vmatpush1.bf16.msra.mxu0 %v20517_v41 }
 0xcd3   :  { %15969 = vmatprep.subr.bf16.mxu0 %v20522_v28 }
 0xcd6   :  { %15970 = vmatpush1.bf16.msra.mxu0 %v20520_v0 }
 0xcd7   :  { %15971 = vmatprep.subr.bf16.mxu0 %v20525_v42 }
 0xcda   :  { %15972 = vmatpush1.bf16.msra.mxu0 %v20523_v21 }
 0xcdd   :  { %15974 = vmatmul.mubr.bf16.vlgmr.msra.gmra.mrb[68].mxu0 %v21614_v48 }
 0xd30   :  { %v15803_v50 = vpop.f32.mrb[64].mxu0  ;;  %v15889_v51 = vpop.f32.mrb[68].mxu1 }
 0xd31   :  { %v18401_v57 = vadd.f32 %v15803_v50, %v14542_v44  ;;  %v18405_v58 = vadd.f32 %v15889_v51, %v14550_v45  ;;  %v15805_v59 = vpop.f32.mrb[65].mxu0  ;;  %v15891_v48 = vpop.f32.mrb[69].mxu1 }
 0xd32   :  { %v18402_v54 = vadd.f32 %v15805_v59, %v14546_v40  ;;  %v18406_v26 = vadd.f32 %v15891_v48, %v14554_v46  ;;  %v15807_v15 = vpop.f32.mrb[66].mxu0  ;;  %v15893_v60 = vpop.f32.mrb[70].mxu1 }
 0xd33   :  { %16066 = vst [vmem:[#allocation30] sm:$0xff] %v18401_v57  ;;  %16068 = vst [vmem:[#allocation30 + $0x10] sm:$0xff] %v18405_v58  ;;  %v18403_v53 = vadd.f32 %v15807_v15, %v14542_v44  ;;  %v18407_v6 = vadd.f32 %v15893_v60, %v14550_v45  ;;  %v15809_v1 = vpop.f32.mrb[67].mxu0  ;;  %v15895_v2 = vpop.f32.mrb[71].mxu1 }
 0xd34   :  { %16067 = vst [vmem:[#allocation30 + $0x8] sm:$0xff] %v18402_v54  ;;  %16069 = vst [vmem:[#allocation30 + $0x18] sm:$0xff] %v18406_v26  ;;  %v18404_v55 = vadd.f32 %v15809_v1, %v14546_v40  ;;  %v18408_v11 = vadd.f32 %v15895_v2, %v14554_v46 }
 0xd35   :  { %16073 = vst [vmem:[#allocation30 + $0x38] sm:$0xff] %v18403_v53  ;;  %16075 = vst [vmem:[#allocation30 + $0x48] sm:$0xff] %v18407_v6 }
 0xd36   :  { %16074 = vst [vmem:[#allocation30 + $0x40] sm:$0xff] %v18404_v55  ;;  %16076 = vst [vmem:[#allocation30 + $0x50] sm:$0xff] %v18408_v11 }
 0xd37   :  { %20912 = shalt.err (!%p20909_p0)
}
 0xd38   :  { %s21708_s22 = sld [smem:[#allocation46_spill]] }
 0xd3e   :  { %s20913_s26 = scalar_lea.hbm %s21708_s22, 256 }
 0xd3f   :  { %p20914_p1 = scmp.ne.s32.totalorder %s21708_s22, %s20913_s26  ;;  %p20917_p2 = scmp.lt.u32.totalorder %s20913_s26, %s21708_s22 }
 0xd41   :  { %p20919_p3 = pnand %p20917_p2, %p20914_p1 }
 0xd43   :  { %20922 = shalt.err (!%p20919_p3)
}
 0xd44   :  { %s20993_s27 = smov 128   ;;  %s20994_s9 = smov 8   ;;  %v14566_v22 = vrot.slane %v21636_v43, %v21442_v18  ;;  %v14558_v25 = vrot.slane %v21636_v43, %v21439_v14  ;;  %v14562_v47 = vrot.slane %v21636_v43, %v21445_v19 }
 0xd45   :  { %16091 = dma.vmem_to_hbm [thread:$0]  %s16086_s21, 256, %s21708_s22, [#allocation4], %s20993_s27, %s20993_s27, %s20994_s9  }
 0xd46   :  { %s20995_s2 = smov [#allocation30]  }
 0xd47   :  { %s16097_s20 = sshll.u32 %s20995_s2, 4  ;;  %s16098_s20 = int_to_ptr.vmem [resolvable:$true] %s16097_s20 }
 0xd48   :  { %s20923_s12 = scalar_lea.vmem %s16098_s20, 1792  ;;  %p20928_p5 = scmp.lt.s32.totalorder %s16098_s20, %s16098_s20 }
 0xd49   :  { %p20924_p4 = scmp.ne.s32.totalorder %s16098_s20, %s20923_s12  ;;  %p20929_p6 = scmp.lt.s32.totalorder %s20923_s12, %s20923_s12 }
 0xd4b   :  { %p20930_p7 = por %p20929_p6, %p20928_p5 }
 0xd4d   :  { %p20931_p8 = pnand %p20930_p7, %p20924_p4 }
 0xd51   :  { %v18305_v31 = vpop.f32.mrb[72].mxu1 }
 0xd52   :  { %v18306_v20 = vpop.f32.mrb[73].mxu1 }
 0xd53   :  { %v18307_v4 = vadd.f32 %v18306_v20, %v18305_v31  ;;  %v18308_v3 = vpop.f32.mrb[74].mxu1 }
 0xd54   :  { %v18309_v52 = vpop.f32.mrb[75].mxu1 }
 0xd55   :  { %v18310_v5 = vadd.f32 %v18309_v52, %v18308_v3  ;;  %v16019_v13 = vadd.f32 %v18307_v4, %v14566_v22 }
 0xd57   :  { %v16022_v37 = vadd.f32 %v18310_v5, %v14566_v22 }
 0xd71   :  { %v18327_v9 = vpop.f32.mrb[76].mxu1 }
 0xd72   :  { %v18328_v16 = vpop.f32.mrb[77].mxu1 }
 0xd73   :  { %v18329_v10 = vadd.f32 %v18328_v16, %v18327_v9  ;;  %v18330_v12 = vpop.f32.mrb[78].mxu1 }
 0xd74   :  { %v18331_v7 = vpop.f32.mrb[79].mxu1 }
 0xd75   :  { %v16060_v8 = vadd.f32 %v18329_v10, %v16019_v13  ;;  %v18332_v49 = vadd.f32 %v18331_v7, %v18330_v12 }
 0xd77   :  { %16072 = vst [vmem:[#allocation30 + $0x30] sm:$0xff] %v16060_v8  ;;  %v16063_v24 = vadd.f32 %v18332_v49, %v16022_v37 }
 0xd79   :  { %16079 = vst [vmem:[#allocation30 + $0x68] sm:$0xff] %v16063_v24 }
 0xdb0   :  { %v15975_v35 = vpop.f32.mrb[68].mxu0 }
 0xdb1   :  { %v18409_v18 = vadd.f32 %v15975_v35, %v14558_v25  ;;  %v15977_v33 = vpop.f32.mrb[69].mxu0 }
 0xdb2   :  { %v18410_v17 = vadd.f32 %v15977_v33, %v14562_v47  ;;  %v15979_v39 = vpop.f32.mrb[70].mxu0 }
 0xdb3   :  { %16070 = vst [vmem:[#allocation30 + $0x20] sm:$0xff] %v18409_v18  ;;  %v18411_v27 = vadd.f32 %v15979_v39, %v14558_v25  ;;  %v15981_v30 = vpop.f32.mrb[71].mxu0 }
 0xdb4   :  { %16071 = vst [vmem:[#allocation30 + $0x28] sm:$0xff] %v18410_v17  ;;  %v18412_v61 = vadd.f32 %v15981_v30, %v14562_v47 }
 0xdb5   :  { %16077 = vst [vmem:[#allocation30 + $0x58] sm:$0xff] %v18411_v27 }
 0xdb6   :  { %16078 = vst [vmem:[#allocation30 + $0x60] sm:$0xff] %v18412_v61 }
 0xdb7   :  { %20934 = shalt.err (!%p20931_p8)
}
 0xdb8   :  { %s21709_s0 = sld [smem:[#allocation47_spill]] }
 0xdbe   :  { %s20935_s17 = scalar_lea.hbm %s21709_s0, 1792 }
 0xdbf   :  { %p20936_p9 = scmp.ne.s32.totalorder %s21709_s0, %s20935_s17  ;;  %p20939_p10 = scmp.lt.u32.totalorder %s20935_s17, %s21709_s0 }
 0xdc1   :  { %p20941_p11 = pnand %p20939_p10, %p20936_p9 }
 0xdc3   :  { %20944 = shalt.err (!%p20941_p11)
}
 0xdc4   :  { %s20996_s23 = smov 896   ;;  %s20997_s24 = smov 56  }
 0xdc5   :  { %16103 = dma.vmem_to_hbm [thread:$0]  %s16098_s20, 1792, %s21709_s0, [#allocation31], %s20996_s23, %s20996_s23, %s20997_s24  }
 0xdc6   :  { %20963 = dma.done.wait [#allocation4], 256  }
 0xdc7   :  { %20964 = vsyncadd [#allocation4], 4294967040 }
 0xdc8   :  { %20965 = dma.done.wait [#allocation31], 1792  }
 0xdc9   :  { %20966 = vsyncadd [#allocation31], 4294965504 }
 0xdca   :  { %16110 = vsyncpa [#allocation3], 1 }
 0xdcb   :  { %16111 = vsyncpa [#allocation6], 1 }
 0xdcc   :  { %16112 = vsyncpa [#allocation9], 1 }
 0xdcd   :  { %16113 = vsyncpa [#allocation12], 1 }
 0xdce   :  { %16114 = vsyncpa [#allocation15], 1 }
 0xdcf   :  { %16115 = vsyncpa [#allocation18], 1 }
 0xdd0   :  { %16116 = vsyncpa [#allocation21], 1 }
 0xdd1   :  { %16117 = vsyncpa [#allocation24], 1 }
 0xdd2   :  { %16118 = vsyncpa [#allocation27], 1 }
 0xdd3   :  { %16119 = vsyncpa [#allocation4], 1 }
 0xdd4   :  { %16120 = vsyncpa [#allocation31], 1 }

</bundles_post_ra>
